<compile_context>
chip_gen: v5e
topology: v5e:2x2
jax: 0.10.0
libtpu: 0.0.40
codegen_flags: <defaults>
</compile_context>

<pallas_src>
import functools

import jax
import jax.numpy as jnp
from jax.experimental import pallas as pl
from jax.experimental.pallas import tpu as pltpu


def _resblock_kernel(x_ref, ml_ref, mr_ref, w1_ref, b1_ref, w2_ref, b2_ref,
                     o_ref, tbuf_ref, *, H, W, margin):
    """One image per grid step.

    x_ref   : (1, 2*margin + (H+2)*W, Cp) f32  flattened, H-padded input rows
    ml_ref  : ((H+2)*W, Cp) bf16  0/1 mask, zero where column j == 0
    mr_ref  : ((H+2)*W, Cp) bf16  0/1 mask, zero where column j == W-1
    w1_ref  : (9, Cp, Cp) bf16    conv1 weights, tap index = kh*3 + kw
    b1_ref  : (1, Cp) f32
    w2_ref  : (9, Cp, Cp) bf16
    b2_ref  : (1, Cp) f32
    o_ref   : (1, H*W, Cp) f32
    tbuf_ref: (2*margin + (H+2)*W, Cp) bf16  scratch for the intermediate
    """
    HW = H * W
    R = (H + 2) * W               # rows of the H-padded, flattened feature map
    Cp = o_ref.shape[2]
    pad_lo = margin + W           # rows before the first "real" image row
    rows_total = 2 * margin + R

    def conv3x3(src_bf, w_ref):
        # src_bf: (rows_total, Cp) bf16; zero margin rows and zero H-pad rows.
        # Width (dw = -1, 0, +1) handled by one-row-shifted views + edge masks;
        # height (kh) handled by aligned row slices (W is a multiple of 8).
        s0 = src_bf[margin:margin + R]                              # dw =  0
        sm = src_bf[margin - 1:margin - 1 + R] * ml_ref[...]        # dw = -1
        sp = src_bf[margin + 1:margin + 1 + R] * mr_ref[...]        # dw = +1
        views = (sm, s0, sp)
        acc = jnp.zeros((HW, Cp), jnp.float32)
        for kh in range(3):
            for kw in range(3):
                patch = views[kw][kh * W:kh * W + HW]   # aligned row slice
                acc += jnp.dot(patch, w_ref[kh * 3 + kw],
                               preferred_element_type=jnp.float32)
        return acc

    x_f32 = x_ref[0]                                # (rows_total, Cp) f32
    x_bf = x_f32.astype(jnp.bfloat16)

    # ---- conv1 + bias + relu ----
    t = jnp.maximum(conv3x3(x_bf, w1_ref) + b1_ref[...], 0.0)   # (HW, Cp) f32

    # ---- stage intermediate in the same flat H-padded layout (aligned stores) ----
    tbuf_ref[0:pad_lo, :] = jnp.zeros((pad_lo, Cp), jnp.bfloat16)
    tbuf_ref[pad_lo:pad_lo + HW, :] = t.astype(jnp.bfloat16)
    tbuf_ref[pad_lo + HW:rows_total, :] = jnp.zeros((pad_lo, Cp), jnp.bfloat16)

    # ---- conv2 + bias + residual + relu ----
    acc2 = conv3x3(tbuf_ref[...], w2_ref)
    residual = x_f32[pad_lo:pad_lo + HW]            # original x rows, f32, aligned
    out = jnp.maximum(acc2 + b2_ref[...] + residual, 0.0)
    o_ref[...] = out.astype(o_ref.dtype).reshape(1, HW, Cp)


def residual_block(x_nchw, w1_oihw, b1, w2_oihw, b2):
    """x_nchw: (N, C, H, W) f32; conv weights in torch OIHW layout; biases (C,)."""
    N, Cin, H, W = x_nchw.shape
    Cout = w1_oihw.shape[0]
    assert Cin == Cout, "residual add requires in_channels == out_channels"

    LANE = 128
    Cp = ((max(Cin, Cout) + LANE - 1) // LANE) * LANE   # lane-dense channel pad
    MARGIN = 8                                          # keeps shifted reads in bounds
    R = (H + 2) * W
    RPAD = R + 2 * MARGIN

    # ---- activations: NCHW -> NHWC, channel pad, H pad, flatten rows, margins ----
    x_nhwc = jnp.transpose(x_nchw, (0, 2, 3, 1))
    x_nhwc = jnp.pad(x_nhwc, ((0, 0), (0, 0), (0, 0), (0, Cp - Cin)))
    x_hpad = jnp.pad(x_nhwc, ((0, 0), (1, 1), (0, 0), (0, 0)))       # (N, H+2, W, Cp)
    x_flat = x_hpad.reshape(N, R, Cp)
    x_flat = jnp.pad(x_flat, ((0, 0), (MARGIN, MARGIN), (0, 0)))     # (N, RPAD, Cp)

    # ---- boundary masks for the dw = -1 / +1 shifted views ----
    j = jnp.arange(R, dtype=jnp.int32) % W
    mask_l = jnp.broadcast_to((j >= 1)[:, None], (R, Cp)).astype(jnp.bfloat16)
    mask_r = jnp.broadcast_to((j <= W - 2)[:, None], (R, Cp)).astype(jnp.bfloat16)

    # ---- weights: OIHW -> (kh*3+kw, Cin_p, Cout_p) bf16; biases -> (1, Cp) f32 ----
    def prep_w(w):
        w_hwio = jnp.transpose(w, (2, 3, 1, 0))                       # (3,3,Cin,Cout)
        w_hwio = jnp.pad(w_hwio, ((0, 0), (0, 0), (0, Cp - Cin), (0, Cp - Cout)))
        return w_hwio.reshape(9, Cp, Cp).astype(jnp.bfloat16)

    def prep_b(b):
        return jnp.pad(b, (0, Cp - Cout)).reshape(1, Cp).astype(jnp.float32)

    w1p, w2p = prep_w(w1_oihw), prep_w(w2_oihw)
    b1p, b2p = prep_b(b1), prep_b(b2)

    out_flat = pl.pallas_call(
        functools.partial(_resblock_kernel, H=H, W=W, margin=MARGIN),
        out_shape=jax.ShapeDtypeStruct((N, H * W, Cp), x_nchw.dtype),
        grid=(N,),
        in_specs=[
            pl.BlockSpec((1, RPAD, Cp), lambda n: (n, 0, 0)),   # x
            pl.BlockSpec((R, Cp), lambda n: (0, 0)),            # mask_l
            pl.BlockSpec((R, Cp), lambda n: (0, 0)),            # mask_r
            pl.BlockSpec((9, Cp, Cp), lambda n: (0, 0, 0)),     # w1
            pl.BlockSpec((1, Cp), lambda n: (0, 0)),            # b1
            pl.BlockSpec((9, Cp, Cp), lambda n: (0, 0, 0)),     # w2
            pl.BlockSpec((1, Cp), lambda n: (0, 0)),            # b2
        ],
        out_specs=pl.BlockSpec((1, H * W, Cp), lambda n: (n, 0, 0)),
        scratch_shapes=[pltpu.VMEM((RPAD, Cp), jnp.bfloat16)],
        compiler_params=pltpu.CompilerParams(
            dimension_semantics=("parallel",)),
    )(x_flat, mask_l, mask_r, w1p, b1p, w2p, b2p)

    out = out_flat[:, :, :Cout].reshape(N, H, W, Cout)
    return jnp.transpose(out, (0, 3, 1, 2))          # back to NCHW


def _reference(x, w1, b1, w2, b2):
    dn = ("NCHW", "OIHW", "NCHW")
    hi = jax.lax.Precision.HIGHEST
    out = jax.lax.conv_general_dilated(
        x, w1, (1, 1), ((1, 1), (1, 1)), dimension_numbers=dn, precision=hi)
    out = out + b1[None, :, None, None]
    out = jnp.maximum(out, 0.0)
    out = jax.lax.conv_general_dilated(
        out, w2, (1, 1), ((1, 1), (1, 1)), dimension_numbers=dn, precision=hi)
    out = out + b2[None, :, None, None]
    out = jnp.maximum(out + x, 0.0)
    return out


if __name__ == "__main__":
    N, C, H, W = 2, 4, 16, 16  # in_channels == out_channels, stride=1
    key = jax.random.PRNGKey(0)
    kx, k1, kb1, k2, kb2 = jax.random.split(key, 5)

    x = jax.random.normal(kx, (N, C, H, W), jnp.float32)
    w1 = jax.random.normal(k1, (C, C, 3, 3), jnp.float32) * 0.1
    b1 = jax.random.normal(kb1, (C,), jnp.float32) * 0.1
    w2 = jax.random.normal(k2, (C, C, 3, 3), jnp.float32) * 0.1
    b2 = jax.random.normal(kb2, (C,), jnp.float32) * 0.1

    out = residual_block(x, w1, b1, w2, b2)
    out = jax.block_until_ready(out)

    ref = _reference(x, w1, b1, w2, b2)
    assert out.shape == (N, C, H, W)
    max_err = float(jnp.max(jnp.abs(out - ref)))
    # bf16 MXU operands (f32 accumulation) -> tolerance a bit above f32.
    assert max_err < 5e-2, f"mismatch vs reference: max abs err {max_err}"

    print("KERNEL_OK")
</pallas_src>

<mosaic_0001>
module attributes {stable_mosaic.version = 11 : i64} {
  func.func @_resblock_kernel(%arg0: i32, %arg1: memref<1x304x128xf32, #tpu.memory_space<vmem>>, %arg2: memref<288x128xbf16, #tpu.memory_space<vmem>>, %arg3: memref<288x128xbf16, #tpu.memory_space<vmem>>, %arg4: memref<9x128x128xbf16, #tpu.memory_space<vmem>>, %arg5: memref<1x128xf32, #tpu.memory_space<vmem>>, %arg6: memref<9x128x128xbf16, #tpu.memory_space<vmem>>, %arg7: memref<1x128xf32, #tpu.memory_space<vmem>>, %arg8: memref<1x256x128xf32, #tpu.memory_space<vmem>>, %arg9: memref<304x128xbf16, #tpu.memory_space<vmem>>) attributes {dimension_semantics = [#tpu.dimension_semantics<parallel>], iteration_bounds = array<i64: 2>, scalar_prefetch = 0 : i64, scratch_operands = 1 : i64, tpu.core_type = #tpu.core_type<tc>, window_params = [{transform_indices = @transform_0, window_bounds = array<i64: 1, 304, 128>}, {pipeline_mode = #tpu.pipeline_mode<synchronous>, transform_indices = @transform_1, window_bounds = array<i64: 288, 128>}, {pipeline_mode = #tpu.pipeline_mode<synchronous>, transform_indices = @transform_2, window_bounds = array<i64: 288, 128>}, {pipeline_mode = #tpu.pipeline_mode<synchronous>, transform_indices = @transform_3, window_bounds = array<i64: 9, 128, 128>}, {pipeline_mode = #tpu.pipeline_mode<synchronous>, transform_indices = @transform_4, window_bounds = array<i64: 1, 128>}, {pipeline_mode = #tpu.pipeline_mode<synchronous>, transform_indices = @transform_5, window_bounds = array<i64: 9, 128, 128>}, {pipeline_mode = #tpu.pipeline_mode<synchronous>, transform_indices = @transform_6, window_bounds = array<i64: 1, 128>}, {transform_indices = @transform_7, window_bounds = array<i64: 1, 256, 128>}]} {
    %c0 = arith.constant 0 : index
    %c0_0 = arith.constant 0 : index
    %c0_1 = arith.constant 0 : index
    %0 = vector.load %arg1[%c0, %c0_0, %c0_1] : memref<1x304x128xf32, #tpu.memory_space<vmem>>, vector<1x304x128xf32>
    %1 = vector.shape_cast %0 : vector<1x304x128xf32> to vector<304x128xf32>
    %2 = arith.truncf %1 : vector<304x128xf32> to vector<304x128xbf16>
    %3 = vector.extract_strided_slice %2 {offsets = [8, 0], sizes = [288, 128], strides = [1, 1]} : vector<304x128xbf16> to vector<288x128xbf16>
    %4 = vector.extract_strided_slice %2 {offsets = [7, 0], sizes = [288, 128], strides = [1, 1]} : vector<304x128xbf16> to vector<288x128xbf16>
    %c0_2 = arith.constant 0 : index
    %c0_3 = arith.constant 0 : index
    %5 = vector.load %arg2[%c0_2, %c0_3] : memref<288x128xbf16, #tpu.memory_space<vmem>>, vector<288x128xbf16>
    %6 = arith.mulf %4, %5 : vector<288x128xbf16>
    %7 = vector.extract_strided_slice %2 {offsets = [9, 0], sizes = [288, 128], strides = [1, 1]} : vector<304x128xbf16> to vector<288x128xbf16>
    %c0_4 = arith.constant 0 : index
    %c0_5 = arith.constant 0 : index
    %8 = vector.load %arg3[%c0_4, %c0_5] : memref<288x128xbf16, #tpu.memory_space<vmem>>, vector<288x128xbf16>
    %9 = arith.mulf %7, %8 : vector<288x128xbf16>
    %cst = arith.constant 0.000000e+00 : f32
    %10 = vector.broadcast %cst : f32 to vector<256x128xf32>
    %11 = vector.extract_strided_slice %6 {offsets = [0, 0], sizes = [256, 128], strides = [1, 1]} : vector<288x128xbf16> to vector<256x128xbf16>
    %c0_6 = arith.constant 0 : index
    %c0_7 = arith.constant 0 : index
    %c0_8 = arith.constant 0 : index
    %12 = vector.load %arg4[%c0_6, %c0_7, %c0_8] : memref<9x128x128xbf16, #tpu.memory_space<vmem>>, vector<1x128x128xbf16>
    %13 = vector.shape_cast %12 : vector<1x128x128xbf16> to vector<128x128xbf16>
    %cst_9 = arith.constant dense<0.000000e+00> : vector<256x128xf32>
    %14 = tpu.matmul %11, %13, %cst_9 {dimension_numbers = #tpu.dot_dimension_numbers<[1], [0], [0], [1], [0, 0, 1, 1], [], []>} : vector<256x128xbf16>, vector<128x128xbf16>, vector<256x128xf32> -> vector<256x128xf32>
    %15 = arith.addf %10, %14 : vector<256x128xf32>
    %16 = vector.extract_strided_slice %3 {offsets = [0, 0], sizes = [256, 128], strides = [1, 1]} : vector<288x128xbf16> to vector<256x128xbf16>
    %c1 = arith.constant 1 : index
    %c0_10 = arith.constant 0 : index
    %c0_11 = arith.constant 0 : index
    %17 = vector.load %arg4[%c1, %c0_10, %c0_11] : memref<9x128x128xbf16, #tpu.memory_space<vmem>>, vector<1x128x128xbf16>
    %18 = vector.shape_cast %17 : vector<1x128x128xbf16> to vector<128x128xbf16>
    %cst_12 = arith.constant dense<0.000000e+00> : vector<256x128xf32>
    %19 = tpu.matmul %16, %18, %cst_12 {dimension_numbers = #tpu.dot_dimension_numbers<[1], [0], [0], [1], [0, 0, 1, 1], [], []>} : vector<256x128xbf16>, vector<128x128xbf16>, vector<256x128xf32> -> vector<256x128xf32>
    %20 = arith.addf %15, %19 : vector<256x128xf32>
    %21 = vector.extract_strided_slice %9 {offsets = [0, 0], sizes = [256, 128], strides = [1, 1]} : vector<288x128xbf16> to vector<256x128xbf16>
    %c2 = arith.constant 2 : index
    %c0_13 = arith.constant 0 : index
    %c0_14 = arith.constant 0 : index
    %22 = vector.load %arg4[%c2, %c0_13, %c0_14] : memref<9x128x128xbf16, #tpu.memory_space<vmem>>, vector<1x128x128xbf16>
    %23 = vector.shape_cast %22 : vector<1x128x128xbf16> to vector<128x128xbf16>
    %cst_15 = arith.constant dense<0.000000e+00> : vector<256x128xf32>
    %24 = tpu.matmul %21, %23, %cst_15 {dimension_numbers = #tpu.dot_dimension_numbers<[1], [0], [0], [1], [0, 0, 1, 1], [], []>} : vector<256x128xbf16>, vector<128x128xbf16>, vector<256x128xf32> -> vector<256x128xf32>
    %25 = arith.addf %20, %24 : vector<256x128xf32>
    %26 = vector.extract_strided_slice %6 {offsets = [16, 0], sizes = [256, 128], strides = [1, 1]} : vector<288x128xbf16> to vector<256x128xbf16>
    %c3 = arith.constant 3 : index
    %c0_16 = arith.constant 0 : index
    %c0_17 = arith.constant 0 : index
    %27 = vector.load %arg4[%c3, %c0_16, %c0_17] : memref<9x128x128xbf16, #tpu.memory_space<vmem>>, vector<1x128x128xbf16>
    %28 = vector.shape_cast %27 : vector<1x128x128xbf16> to vector<128x128xbf16>
    %cst_18 = arith.constant dense<0.000000e+00> : vector<256x128xf32>
    %29 = tpu.matmul %26, %28, %cst_18 {dimension_numbers = #tpu.dot_dimension_numbers<[1], [0], [0], [1], [0, 0, 1, 1], [], []>} : vector<256x128xbf16>, vector<128x128xbf16>, vector<256x128xf32> -> vector<256x128xf32>
    %30 = arith.addf %25, %29 : vector<256x128xf32>
    %31 = vector.extract_strided_slice %3 {offsets = [16, 0], sizes = [256, 128], strides = [1, 1]} : vector<288x128xbf16> to vector<256x128xbf16>
    %c4 = arith.constant 4 : index
    %c0_19 = arith.constant 0 : index
    %c0_20 = arith.constant 0 : index
    %32 = vector.load %arg4[%c4, %c0_19, %c0_20] : memref<9x128x128xbf16, #tpu.memory_space<vmem>>, vector<1x128x128xbf16>
    %33 = vector.shape_cast %32 : vector<1x128x128xbf16> to vector<128x128xbf16>
    %cst_21 = arith.constant dense<0.000000e+00> : vector<256x128xf32>
    %34 = tpu.matmul %31, %33, %cst_21 {dimension_numbers = #tpu.dot_dimension_numbers<[1], [0], [0], [1], [0, 0, 1, 1], [], []>} : vector<256x128xbf16>, vector<128x128xbf16>, vector<256x128xf32> -> vector<256x128xf32>
    %35 = arith.addf %30, %34 : vector<256x128xf32>
    %36 = vector.extract_strided_slice %9 {offsets = [16, 0], sizes = [256, 128], strides = [1, 1]} : vector<288x128xbf16> to vector<256x128xbf16>
    %c5 = arith.constant 5 : index
    %c0_22 = arith.constant 0 : index
    %c0_23 = arith.constant 0 : index
    %37 = vector.load %arg4[%c5, %c0_22, %c0_23] : memref<9x128x128xbf16, #tpu.memory_space<vmem>>, vector<1x128x128xbf16>
    %38 = vector.shape_cast %37 : vector<1x128x128xbf16> to vector<128x128xbf16>
    %cst_24 = arith.constant dense<0.000000e+00> : vector<256x128xf32>
    %39 = tpu.matmul %36, %38, %cst_24 {dimension_numbers = #tpu.dot_dimension_numbers<[1], [0], [0], [1], [0, 0, 1, 1], [], []>} : vector<256x128xbf16>, vector<128x128xbf16>, vector<256x128xf32> -> vector<256x128xf32>
    %40 = arith.addf %35, %39 : vector<256x128xf32>
    %41 = vector.extract_strided_slice %6 {offsets = [32, 0], sizes = [256, 128], strides = [1, 1]} : vector<288x128xbf16> to vector<256x128xbf16>
    %c6 = arith.constant 6 : index
    %c0_25 = arith.constant 0 : index
    %c0_26 = arith.constant 0 : index
    %42 = vector.load %arg4[%c6, %c0_25, %c0_26] : memref<9x128x128xbf16, #tpu.memory_space<vmem>>, vector<1x128x128xbf16>
    %43 = vector.shape_cast %42 : vector<1x128x128xbf16> to vector<128x128xbf16>
    %cst_27 = arith.constant dense<0.000000e+00> : vector<256x128xf32>
    %44 = tpu.matmul %41, %43, %cst_27 {dimension_numbers = #tpu.dot_dimension_numbers<[1], [0], [0], [1], [0, 0, 1, 1], [], []>} : vector<256x128xbf16>, vector<128x128xbf16>, vector<256x128xf32> -> vector<256x128xf32>
    %45 = arith.addf %40, %44 : vector<256x128xf32>
    %46 = vector.extract_strided_slice %3 {offsets = [32, 0], sizes = [256, 128], strides = [1, 1]} : vector<288x128xbf16> to vector<256x128xbf16>
    %c7 = arith.constant 7 : index
    %c0_28 = arith.constant 0 : index
    %c0_29 = arith.constant 0 : index
    %47 = vector.load %arg4[%c7, %c0_28, %c0_29] : memref<9x128x128xbf16, #tpu.memory_space<vmem>>, vector<1x128x128xbf16>
    %48 = vector.shape_cast %47 : vector<1x128x128xbf16> to vector<128x128xbf16>
    %cst_30 = arith.constant dense<0.000000e+00> : vector<256x128xf32>
    %49 = tpu.matmul %46, %48, %cst_30 {dimension_numbers = #tpu.dot_dimension_numbers<[1], [0], [0], [1], [0, 0, 1, 1], [], []>} : vector<256x128xbf16>, vector<128x128xbf16>, vector<256x128xf32> -> vector<256x128xf32>
    %50 = arith.addf %45, %49 : vector<256x128xf32>
    %51 = vector.extract_strided_slice %9 {offsets = [32, 0], sizes = [256, 128], strides = [1, 1]} : vector<288x128xbf16> to vector<256x128xbf16>
    %c8 = arith.constant 8 : index
    %c0_31 = arith.constant 0 : index
    %c0_32 = arith.constant 0 : index
    %52 = vector.load %arg4[%c8, %c0_31, %c0_32] : memref<9x128x128xbf16, #tpu.memory_space<vmem>>, vector<1x128x128xbf16>
    %53 = vector.shape_cast %52 : vector<1x128x128xbf16> to vector<128x128xbf16>
    %cst_33 = arith.constant dense<0.000000e+00> : vector<256x128xf32>
    %54 = tpu.matmul %51, %53, %cst_33 {dimension_numbers = #tpu.dot_dimension_numbers<[1], [0], [0], [1], [0, 0, 1, 1], [], []>} : vector<256x128xbf16>, vector<128x128xbf16>, vector<256x128xf32> -> vector<256x128xf32>
    %55 = arith.addf %50, %54 : vector<256x128xf32>
    %c0_34 = arith.constant 0 : index
    %c0_35 = arith.constant 0 : index
    %56 = vector.load %arg5[%c0_34, %c0_35] : memref<1x128xf32, #tpu.memory_space<vmem>>, vector<1x128xf32>
    %57 = vector.broadcast %56 : vector<1x128xf32> to vector<256x128xf32>
    %58 = arith.addf %55, %57 : vector<256x128xf32>
    %cst_36 = arith.constant 0.000000e+00 : f32
    %59 = vector.broadcast %cst_36 : f32 to vector<256x128xf32>
    %60 = arith.maximumf %58, %59 : vector<256x128xf32>
    %cst_37 = arith.constant 0.000000e+00 : bf16
    %61 = vector.broadcast %cst_37 : bf16 to vector<24x128xbf16>
    %c0_38 = arith.constant 0 : index
    %c0_39 = arith.constant 0 : index
    %62 = vector.load %arg9[%c0_38, %c0_39] : memref<304x128xbf16, #tpu.memory_space<vmem>>, vector<24x128xbf16>
    tpu.vector_store %arg9[%c0_38, %c0_39], %61 {strides = array<i32>} : memref<304x128xbf16, #tpu.memory_space<vmem>>, vector<24x128xbf16>,
    %63 = arith.truncf %60 : vector<256x128xf32> to vector<256x128xbf16>
    %c24 = arith.constant 24 : index
    %c0_40 = arith.constant 0 : index
    %64 = vector.load %arg9[%c24, %c0_40] : memref<304x128xbf16, #tpu.memory_space<vmem>>, vector<256x128xbf16>
    tpu.vector_store %arg9[%c24, %c0_40], %63 {strides = array<i32>} : memref<304x128xbf16, #tpu.memory_space<vmem>>, vector<256x128xbf16>,
    %cst_41 = arith.constant 0.000000e+00 : bf16
    %65 = vector.broadcast %cst_41 : bf16 to vector<24x128xbf16>
    %c280 = arith.constant 280 : index
    %c0_42 = arith.constant 0 : index
    %66 = vector.load %arg9[%c280, %c0_42] : memref<304x128xbf16, #tpu.memory_space<vmem>>, vector<24x128xbf16>
    tpu.vector_store %arg9[%c280, %c0_42], %65 {strides = array<i32>} : memref<304x128xbf16, #tpu.memory_space<vmem>>, vector<24x128xbf16>,
    %c0_43 = arith.constant 0 : index
    %c0_44 = arith.constant 0 : index
    %67 = vector.load %arg9[%c0_43, %c0_44] : memref<304x128xbf16, #tpu.memory_space<vmem>>, vector<304x128xbf16>
    %68 = vector.extract_strided_slice %67 {offsets = [8, 0], sizes = [288, 128], strides = [1, 1]} : vector<304x128xbf16> to vector<288x128xbf16>
    %69 = vector.extract_strided_slice %67 {offsets = [7, 0], sizes = [288, 128], strides = [1, 1]} : vector<304x128xbf16> to vector<288x128xbf16>
    %c0_45 = arith.constant 0 : index
    %c0_46 = arith.constant 0 : index
    %70 = vector.load %arg2[%c0_45, %c0_46] : memref<288x128xbf16, #tpu.memory_space<vmem>>, vector<288x128xbf16>
    %71 = arith.mulf %69, %70 : vector<288x128xbf16>
    %72 = vector.extract_strided_slice %67 {offsets = [9, 0], sizes = [288, 128], strides = [1, 1]} : vector<304x128xbf16> to vector<288x128xbf16>
    %c0_47 = arith.constant 0 : index
    %c0_48 = arith.constant 0 : index
    %73 = vector.load %arg3[%c0_47, %c0_48] : memref<288x128xbf16, #tpu.memory_space<vmem>>, vector<288x128xbf16>
    %74 = arith.mulf %72, %73 : vector<288x128xbf16>
    %cst_49 = arith.constant 0.000000e+00 : f32
    %75 = vector.broadcast %cst_49 : f32 to vector<256x128xf32>
    %76 = vector.extract_strided_slice %71 {offsets = [0, 0], sizes = [256, 128], strides = [1, 1]} : vector<288x128xbf16> to vector<256x128xbf16>
    %c0_50 = arith.constant 0 : index
    %c0_51 = arith.constant 0 : index
    %c0_52 = arith.constant 0 : index
    %77 = vector.load %arg6[%c0_50, %c0_51, %c0_52] : memref<9x128x128xbf16, #tpu.memory_space<vmem>>, vector<1x128x128xbf16>
    %78 = vector.shape_cast %77 : vector<1x128x128xbf16> to vector<128x128xbf16>
    %cst_53 = arith.constant dense<0.000000e+00> : vector<256x128xf32>
    %79 = tpu.matmul %76, %78, %cst_53 {dimension_numbers = #tpu.dot_dimension_numbers<[1], [0], [0], [1], [0, 0, 1, 1], [], []>} : vector<256x128xbf16>, vector<128x128xbf16>, vector<256x128xf32> -> vector<256x128xf32>
    %80 = arith.addf %75, %79 : vector<256x128xf32>
    %81 = vector.extract_strided_slice %68 {offsets = [0, 0], sizes = [256, 128], strides = [1, 1]} : vector<288x128xbf16> to vector<256x128xbf16>
    %c1_54 = arith.constant 1 : index
    %c0_55 = arith.constant 0 : index
    %c0_56 = arith.constant 0 : index
    %82 = vector.load %arg6[%c1_54, %c0_55, %c0_56] : memref<9x128x128xbf16, #tpu.memory_space<vmem>>, vector<1x128x128xbf16>
    %83 = vector.shape_cast %82 : vector<1x128x128xbf16> to vector<128x128xbf16>
    %cst_57 = arith.constant dense<0.000000e+00> : vector<256x128xf32>
    %84 = tpu.matmul %81, %83, %cst_57 {dimension_numbers = #tpu.dot_dimension_numbers<[1], [0], [0], [1], [0, 0, 1, 1], [], []>} : vector<256x128xbf16>, vector<128x128xbf16>, vector<256x128xf32> -> vector<256x128xf32>
    %85 = arith.addf %80, %84 : vector<256x128xf32>
    %86 = vector.extract_strided_slice %74 {offsets = [0, 0], sizes = [256, 128], strides = [1, 1]} : vector<288x128xbf16> to vector<256x128xbf16>
    %c2_58 = arith.constant 2 : index
    %c0_59 = arith.constant 0 : index
    %c0_60 = arith.constant 0 : index
    %87 = vector.load %arg6[%c2_58, %c0_59, %c0_60] : memref<9x128x128xbf16, #tpu.memory_space<vmem>>, vector<1x128x128xbf16>
    %88 = vector.shape_cast %87 : vector<1x128x128xbf16> to vector<128x128xbf16>
    %cst_61 = arith.constant dense<0.000000e+00> : vector<256x128xf32>
    %89 = tpu.matmul %86, %88, %cst_61 {dimension_numbers = #tpu.dot_dimension_numbers<[1], [0], [0], [1], [0, 0, 1, 1], [], []>} : vector<256x128xbf16>, vector<128x128xbf16>, vector<256x128xf32> -> vector<256x128xf32>
    %90 = arith.addf %85, %89 : vector<256x128xf32>
    %91 = vector.extract_strided_slice %71 {offsets = [16, 0], sizes = [256, 128], strides = [1, 1]} : vector<288x128xbf16> to vector<256x128xbf16>
    %c3_62 = arith.constant 3 : index
    %c0_63 = arith.constant 0 : index
    %c0_64 = arith.constant 0 : index
    %92 = vector.load %arg6[%c3_62, %c0_63, %c0_64] : memref<9x128x128xbf16, #tpu.memory_space<vmem>>, vector<1x128x128xbf16>
    %93 = vector.shape_cast %92 : vector<1x128x128xbf16> to vector<128x128xbf16>
    %cst_65 = arith.constant dense<0.000000e+00> : vector<256x128xf32>
    %94 = tpu.matmul %91, %93, %cst_65 {dimension_numbers = #tpu.dot_dimension_numbers<[1], [0], [0], [1], [0, 0, 1, 1], [], []>} : vector<256x128xbf16>, vector<128x128xbf16>, vector<256x128xf32> -> vector<256x128xf32>
    %95 = arith.addf %90, %94 : vector<256x128xf32>
    %96 = vector.extract_strided_slice %68 {offsets = [16, 0], sizes = [256, 128], strides = [1, 1]} : vector<288x128xbf16> to vector<256x128xbf16>
    %c4_66 = arith.constant 4 : index
    %c0_67 = arith.constant 0 : index
    %c0_68 = arith.constant 0 : index
    %97 = vector.load %arg6[%c4_66, %c0_67, %c0_68] : memref<9x128x128xbf16, #tpu.memory_space<vmem>>, vector<1x128x128xbf16>
    %98 = vector.shape_cast %97 : vector<1x128x128xbf16> to vector<128x128xbf16>
    %cst_69 = arith.constant dense<0.000000e+00> : vector<256x128xf32>
    %99 = tpu.matmul %96, %98, %cst_69 {dimension_numbers = #tpu.dot_dimension_numbers<[1], [0], [0], [1], [0, 0, 1, 1], [], []>} : vector<256x128xbf16>, vector<128x128xbf16>, vector<256x128xf32> -> vector<256x128xf32>
    %100 = arith.addf %95, %99 : vector<256x128xf32>
    %101 = vector.extract_strided_slice %74 {offsets = [16, 0], sizes = [256, 128], strides = [1, 1]} : vector<288x128xbf16> to vector<256x128xbf16>
    %c5_70 = arith.constant 5 : index
    %c0_71 = arith.constant 0 : index
    %c0_72 = arith.constant 0 : index
    %102 = vector.load %arg6[%c5_70, %c0_71, %c0_72] : memref<9x128x128xbf16, #tpu.memory_space<vmem>>, vector<1x128x128xbf16>
    %103 = vector.shape_cast %102 : vector<1x128x128xbf16> to vector<128x128xbf16>
    %cst_73 = arith.constant dense<0.000000e+00> : vector<256x128xf32>
    %104 = tpu.matmul %101, %103, %cst_73 {dimension_numbers = #tpu.dot_dimension_numbers<[1], [0], [0], [1], [0, 0, 1, 1], [], []>} : vector<256x128xbf16>, vector<128x128xbf16>, vector<256x128xf32> -> vector<256x128xf32>
    %105 = arith.addf %100, %104 : vector<256x128xf32>
    %106 = vector.extract_strided_slice %71 {offsets = [32, 0], sizes = [256, 128], strides = [1, 1]} : vector<288x128xbf16> to vector<256x128xbf16>
    %c6_74 = arith.constant 6 : index
    %c0_75 = arith.constant 0 : index
    %c0_76 = arith.constant 0 : index
    %107 = vector.load %arg6[%c6_74, %c0_75, %c0_76] : memref<9x128x128xbf16, #tpu.memory_space<vmem>>, vector<1x128x128xbf16>
    %108 = vector.shape_cast %107 : vector<1x128x128xbf16> to vector<128x128xbf16>
    %cst_77 = arith.constant dense<0.000000e+00> : vector<256x128xf32>
    %109 = tpu.matmul %106, %108, %cst_77 {dimension_numbers = #tpu.dot_dimension_numbers<[1], [0], [0], [1], [0, 0, 1, 1], [], []>} : vector<256x128xbf16>, vector<128x128xbf16>, vector<256x128xf32> -> vector<256x128xf32>
    %110 = arith.addf %105, %109 : vector<256x128xf32>
    %111 = vector.extract_strided_slice %68 {offsets = [32, 0], sizes = [256, 128], strides = [1, 1]} : vector<288x128xbf16> to vector<256x128xbf16>
    %c7_78 = arith.constant 7 : index
    %c0_79 = arith.constant 0 : index
    %c0_80 = arith.constant 0 : index
    %112 = vector.load %arg6[%c7_78, %c0_79, %c0_80] : memref<9x128x128xbf16, #tpu.memory_space<vmem>>, vector<1x128x128xbf16>
    %113 = vector.shape_cast %112 : vector<1x128x128xbf16> to vector<128x128xbf16>
    %cst_81 = arith.constant dense<0.000000e+00> : vector<256x128xf32>
    %114 = tpu.matmul %111, %113, %cst_81 {dimension_numbers = #tpu.dot_dimension_numbers<[1], [0], [0], [1], [0, 0, 1, 1], [], []>} : vector<256x128xbf16>, vector<128x128xbf16>, vector<256x128xf32> -> vector<256x128xf32>
    %115 = arith.addf %110, %114 : vector<256x128xf32>
    %116 = vector.extract_strided_slice %74 {offsets = [32, 0], sizes = [256, 128], strides = [1, 1]} : vector<288x128xbf16> to vector<256x128xbf16>
    %c8_82 = arith.constant 8 : index
    %c0_83 = arith.constant 0 : index
    %c0_84 = arith.constant 0 : index
    %117 = vector.load %arg6[%c8_82, %c0_83, %c0_84] : memref<9x128x128xbf16, #tpu.memory_space<vmem>>, vector<1x128x128xbf16>
    %118 = vector.shape_cast %117 : vector<1x128x128xbf16> to vector<128x128xbf16>
    %cst_85 = arith.constant dense<0.000000e+00> : vector<256x128xf32>
    %119 = tpu.matmul %116, %118, %cst_85 {dimension_numbers = #tpu.dot_dimension_numbers<[1], [0], [0], [1], [0, 0, 1, 1], [], []>} : vector<256x128xbf16>, vector<128x128xbf16>, vector<256x128xf32> -> vector<256x128xf32>
    %120 = arith.addf %115, %119 : vector<256x128xf32>
    %121 = vector.extract_strided_slice %1 {offsets = [24, 0], sizes = [256, 128], strides = [1, 1]} : vector<304x128xf32> to vector<256x128xf32>
    %c0_86 = arith.constant 0 : index
    %c0_87 = arith.constant 0 : index
    %122 = vector.load %arg7[%c0_86, %c0_87] : memref<1x128xf32, #tpu.memory_space<vmem>>, vector<1x128xf32>
    %123 = vector.broadcast %122 : vector<1x128xf32> to vector<256x128xf32>
    %124 = arith.addf %120, %123 : vector<256x128xf32>
    %125 = arith.addf %124, %121 : vector<256x128xf32>
    %cst_88 = arith.constant 0.000000e+00 : f32
    %126 = vector.broadcast %cst_88 : f32 to vector<256x128xf32>
    %127 = arith.maximumf %125, %126 : vector<256x128xf32>
    %128 = vector.shape_cast %127 : vector<256x128xf32> to vector<1x256x128xf32>
    %c0_89 = arith.constant 0 : index
    %c0_90 = arith.constant 0 : index
    %c0_91 = arith.constant 0 : index
    %129 = vector.load %arg8[%c0_89, %c0_90, %c0_91] : memref<1x256x128xf32, #tpu.memory_space<vmem>>, vector<1x256x128xf32>
    tpu.vector_store %arg8[%c0_89, %c0_90, %c0_91], %128 {strides = array<i32>} : memref<1x256x128xf32, #tpu.memory_space<vmem>>, vector<1x256x128xf32>,
    return
  }
  func.func @transform_0(%arg0: i32) -> (i32, i32, i32) {
    %c0_i32 = arith.constant 0 : i32
    %c0_i32_0 = arith.constant 0 : i32
    %c0_i32_1 = arith.constant 0 : i32
    return %arg0, %c0_i32, %c0_i32_0 : i32, i32, i32
  }
  func.func @transform_1(%arg0: i32) -> (i32, i32) {
    %c0_i32 = arith.constant 0 : i32
    %c0_i32_0 = arith.constant 0 : i32
    %c0_i32_1 = arith.constant 0 : i32
    return %c0_i32, %c0_i32_0 : i32, i32
  }
  func.func @transform_2(%arg0: i32) -> (i32, i32) {
    %c0_i32 = arith.constant 0 : i32
    %c0_i32_0 = arith.constant 0 : i32
    %c0_i32_1 = arith.constant 0 : i32
    return %c0_i32, %c0_i32_0 : i32, i32
  }
  func.func @transform_3(%arg0: i32) -> (i32, i32, i32) {
    %c0_i32 = arith.constant 0 : i32
    %c0_i32_0 = arith.constant 0 : i32
    %c0_i32_1 = arith.constant 0 : i32
    %c0_i32_2 = arith.constant 0 : i32
    return %c0_i32, %c0_i32_0, %c0_i32_1 : i32, i32, i32
  }
  func.func @transform_4(%arg0: i32) -> (i32, i32) {
    %c0_i32 = arith.constant 0 : i32
    %c0_i32_0 = arith.constant 0 : i32
    %c0_i32_1 = arith.constant 0 : i32
    return %c0_i32, %c0_i32_0 : i32, i32
  }
  func.func @transform_5(%arg0: i32) -> (i32, i32, i32) {
    %c0_i32 = arith.constant 0 : i32
    %c0_i32_0 = arith.constant 0 : i32
    %c0_i32_1 = arith.constant 0 : i32
    %c0_i32_2 = arith.constant 0 : i32
    return %c0_i32, %c0_i32_0, %c0_i32_1 : i32, i32, i32
  }
  func.func @transform_6(%arg0: i32) -> (i32, i32) {
    %c0_i32 = arith.constant 0 : i32
    %c0_i32_0 = arith.constant 0 : i32
    %c0_i32_1 = arith.constant 0 : i32
    return %c0_i32, %c0_i32_0 : i32, i32
  }
  func.func @transform_7(%arg0: i32) -> (i32, i32, i32) {
    %c0_i32 = arith.constant 0 : i32
    %c0_i32_0 = arith.constant 0 : i32
    %c0_i32_1 = arith.constant 0 : i32
    return %arg0, %c0_i32, %c0_i32_0 : i32, i32, i32
  }
}

</mosaic_0001>

<bundles_post_ra>
// kernel: tpu_custom_call.1
= control target key start
LH: loop header
LB: loop body
LE: loop exit
PB: predicated region body
PF: predicated region fallthrough
CT: control target
= control target key end

     0   :  { %s11283_s0 = inlined_call_operand.hbm [shape: f32[2,304,128], index: 0, kind: input, shape index: {}]   ;;  %s11284_s1 = inlined_call_operand.hbm [shape: bf16[288,128], index: 1, kind: input, shape index: {}]   ;;  %s11285_s2 = inlined_call_operand.hbm [shape: bf16[288,128], index: 2, kind: input, shape index: {}]   ;;  %s11286_s3 = inlined_call_operand.hbm [shape: bf16[9,128,128], index: 3, kind: input, shape index: {}]   ;;  %s11287_s4 = inlined_call_operand.vmem [shape: f32[1,128], index: 4, kind: input, shape index: {}]   ;;  %s11288_s5 = inlined_call_operand.hbm [shape: bf16[9,128,128], index: 5, kind: input, shape index: {}]   ;;  %s11289_s6 = inlined_call_operand.vmem [shape: f32[1,128], index: 6, kind: input, shape index: {}]   ;;  %s11290_s7 = inlined_call_operand.hbm [shape: f32[2,256,128], index: 7, kind: output, shape index: {}]  }
   0x1   :  { %11406 = sst [smem:[#allocation68_spill]] %s11284_s1 }
   0x2   :  { %11407 = sst [smem:[#allocation69_spill]] %s11285_s2 }
   0x3   :  { %11408 = sst [smem:[#allocation70_spill]] %s11286_s3 }
   0x4   :  { %12 = vsyncpa [#allocation4], 0 }
   0x5   :  { %14 = vsyncpa [#allocation4 + $0x1], 0 }
   0x6   :  { %15 = vsyncpa [#allocation7], 0 }
   0x7   :  { %16 = vsyncpa [#allocation10], 0 }
   0x8   :  { %17 = vsyncpa [#allocation5], 0 }
   0x9   :  { %19 = vsyncpa [#allocation5 + $0x1], 0  ;;  %s8515_s24 = smov 0   ;;  %s8517_s25 = smov 0  }
   0xa   :  { %s8519_s26 = smov 0   ;;  %s8521_s27 = smov 0  }
   0xb LB: > { %s8536_s28 = sadd.s32 4294967295, %s8462_s27   ;;  %s6703_s29 = sadd.s32 4294967294, %s8462_s27   ;;  %s8462_s27 = sphi %s8521_s27, %s11728_s27   ;;  %s8458_s26 = sphi %s8519_s26, %s11727_s26   ;;  %s8454_s25 = sphi %s8517_s25, %s11726_s25   ;;  %s8450_s24 = sphi %s8515_s24, %s11725_s24  }
   0xc   : > { %p45_p0 = scmp.ne.s32.totalorder %s8454_s25, %s8450_s24  ;;  %p46_p1 = scmp.eq.s32.totalorder %s8536_s28, 0 }
   0xd   : > { %p195_p2 = scmp.eq.s32.totalorder %s8536_s28, 1  ;;  %p201_p3 = scmp.eq.s32.totalorder %s6703_s29, 1 }
   0xe   : > { %p8545_p4 = por %p46_p1, %p45_p0  ;;  %p6704_p5 = scmp.ge.s32.totalorder %s8462_s27, 1 }
   0xf   : > { %p8550_p6 = por %p201_p3, %p45_p0  ;;  %p208_p7 = scmp.lt.s32.totalorder %s8462_s27, 3 }
  0x10   : > { %s11411_s1 = sld [smem:[#allocation68_spill]]  ;;  %s8464_s13 = smov [#allocation6]  }
  0x11   : > { %p8558_p8 = pnand %p6704_p5, %p208_p7  ;;  %s221_s14 = sshll.u32 %s8464_s13, 4  ;;  %s222_s14 = int_to_ptr.vmem [resolvable:$true] %s221_s14 }
  0x12   : > { %s11414_s3 = sld [smem:[#allocation70_spill]]  ;;  %s8465_s19 = smov 64  }
  0x13   : > { %p8112_p9 = pneg %p8558_p8  ;;  %s8466_s20 = smov 4  }
  0x14   : > { %s8467_s21 = smov [#allocation9]   ;;  %s11415_s2 = sld [smem:[#allocation69_spill]] }
  0x15   : > { %p8566_p10 = pnand %p8112_p9, %p46_p1  ;;  %s249_s22 = sshll.u32 %s8467_s21, 4  ;;  %s250_s22 = int_to_ptr.vmem [resolvable:$true] %s249_s22 }
  0x16   : > { %s219_s11 = sshll.u32 %s11411_s1, 4  ;;  %s8469_s17 = smov [#allocation11]   ;;  %s220_s11 = int_to_ptr.hbm [resolvable:$true] %s219_s11 }
  0x17   : > { %8115 = dma.hbm_to_vmem [thread:$0]  (!%p8566_p10), %s220_s11, 2304, %s222_s14, [#allocation7], %s8465_s19, %s8465_s19, %s8466_s20  }
  0x18   : > { %s247_s18 = sshll.u32 %s11414_s3, 4  ;;  %s264_s11 = sshll.u32 %s11288_s5, 4  ;;  %s248_s18 = int_to_ptr.hbm [resolvable:$true] %s247_s18  ;;  %s265_s11 = int_to_ptr.hbm [resolvable:$true] %s264_s11 }
  0x19   : > { %8121 = dma.hbm_to_vmem [thread:$0]  (!%p8566_p10), %s248_s18, 9216, %s250_s22, [#allocation10], %s8465_s19, %s8465_s19, %s8466_s20  }
  0x1a   : > { %s233_s9 = sshll.u32 %s11415_s2, 4  ;;  %s8468_s14 = smov [#allocation8]   ;;  %s234_s9 = int_to_ptr.hbm [resolvable:$true] %s233_s9 }
  0x1b   : > { %s235_s16 = sshll.u32 %s8468_s14, 4  ;;  %s266_s21 = sshll.u32 %s8469_s17, 4  ;;  %s236_s16 = int_to_ptr.vmem [resolvable:$true] %s235_s16  ;;  %s267_s21 = int_to_ptr.vmem [resolvable:$true] %s266_s21 }
  0x1c   : > { %8118 = dma.hbm_to_vmem [thread:$0]  (!%p8566_p10), %s234_s9, 2304, %s236_s16, [#allocation7], %s8465_s19, %s8465_s19, %s8466_s20  }
  0x1d   : > { %8124 = dma.hbm_to_vmem [thread:$0]  (!%p8566_p10), %s265_s11, 9216, %s267_s21, [#allocation10], %s8465_s19, %s8465_s19, %s8466_s20  }
  0x1e   : > { %s8589_s18 = sadd.s32 1, %s8462_s27   ;;  %s32_s22 = sadd.s32 1, %s8458_s26 }
  0x1f   : > { %s29_s23 = ssub.s32 %s8462_s27, %s8589_s18  ;;  %p39_p12 = scmp.ne.s32.totalorder %s8458_s26, %s8454_s25 }
  0x20   : > { %p30_p13 = scmp.eq.s32.totalorder %s29_s23, 0  ;;  %p40_p0 = scmp.eq.s32.totalorder %s8462_s27, 0 }
  0x21   : > { %p8599_p3 = por %p195_p2, %p39_p12  ;;  %p8137_p5 = scmp.lt.s32.totalorder %s8462_s27, 2 }
  0x22   : > { %s8605_s9 = scalar_select %p30_p13, %s8458_s26, %s32_s22  }
  0x23   : > { %p41_p7 = por %p40_p0, %p39_p12  ;;  %s283_s10 = sand.u32 1, %s8458_s26  }
  0x24   : > { %s8089_s15 = smul.u32 304, %s283_s10  ;;  %s284_s22 = scalar_lea.sflag [#allocation4], %s283_s10 }
  0x25   : > { %s8090_s19 = smul.u32 304, %s8462_s27  ;;  %p8609_p9 = pnand %p8137_p5, %p41_p7 }
  0x26   : > { %s287_s16 = scalar_lea.vmem [#allocation3], %s8089_s15  ;;  %s8365_s13 = scalar_lea.hbm %s11283_s0, 608 }
  0x27   : > { %s292_s14 = scalar_lea.hbm %s11283_s0, %s8090_s19  ;;  %s295_s17 = sshll.u32 %s287_s16, 4  ;;  %s296_s17 = int_to_ptr.vmem [resolvable:$true] %s295_s17 }
  0x28   : > { %s293_s21 = sshll.u32 %s292_s14, 4  ;;  %p8362_p10 = pneg %p8609_p9  ;;  %s294_s21 = int_to_ptr.hbm [resolvable:$true] %s293_s21 }
  0x29   : > { %s8358_s23 = sshra.s32 %s294_s21, 4  ;;  %s8359_s23 = int_to_ptr.hbm [resolvable:$true] %s8358_s23 }
  0x2a   : > { %s8360_s1 = scalar_lea.hbm %s8359_s23, 304  ;;  %p8366_p0 = scmp.lt.s32.totalorder %s8359_s23, %s11283_s0 }
  0x2b   : > { %p8361_p2 = scmp.ne.s32.totalorder %s8359_s23, %s8360_s1  ;;  %p8367_p5 = scmp.lt.s32.totalorder %s8365_s13, %s8360_s1 }
  0x2d   : > { %p8363_p12 = pnand %p8362_p10, %p8361_p2  ;;  %p8368_p7 = por %p8367_p5, %p8366_p0 }
  0x2f   : > { %p8364_p13 = pneg %p8363_p12 }
  0x31   : > { %p8369_p11 = pnand %p8368_p7, %p8364_p13 }
  0x33   : > { %8372 = shalt.err (!%p8369_p11)
}
  0x34   : > { %s8470_s10 = smov 128   ;;  %s8471_s15 = smov 8  }
  0x35   : > { %8128 = dma.hbm_to_vmem [thread:$0]  (!%p8609_p9), %s294_s21, 4864, %s296_s17, %s284_s22, %s8470_s10, %s8470_s10, %s8471_s15  }
  0x36   : > { %307 = sbr.rel (%p8558_p8) target bundleno = 1540 (0x604), region = 48 }
  0x3b   : > { %s8629_s2 = sand.u32 1, %s8454_s25  }
  0x3c   : > { %s8091_s3 = smul.u32 304, %s8629_s2  ;;  %s310_s14 = scalar_lea.sflag [#allocation4], %s8629_s2 }
  0x3e   : > { %s8633_s1 = scalar_lea.vmem [#allocation3], %s8091_s3 }
  0x3f   : > { %8433 = dma.done.wait (%p8545_p4), %s310_s14, 4864  }
  0x40   : > { %8435 = vsyncadd (%p8545_p4), %s310_s14, 4294962432 }
  0x41   : > { %8437 = dma.done.wait (%p46_p1), [#allocation7], 4608  }
  0x42   : > { %8439 = vsyncadd (%p46_p1), [#allocation7], 4294962688 }
  0x43   : > { %8441 = dma.done.wait (%p46_p1), [#allocation10], 18432  }
  0x44   : > { %8443 = vsyncadd (%p46_p1), [#allocation10], 4294948864  ;;  %v7385_v0 = vld [vmem:[#allocation9 + $0x78] sm:$0xff]  ;;  %v7384_v2 = vld [vmem:[#allocation9 + $0x70] sm:$0xff]  ;;  %vm587_vm0 = vcmask 1046528   ;;  %vm879_vm2 = vcmask 1040384  }
  0x45   : > { %v7377_v1 = vld [vmem:[#allocation9 + $0x38] sm:$0xff]  ;;  %1239 = vmatpush.bf16.msra.mxu0 %v7385_v0  ;;  %8073 = vmatpush.bf16.msra.mxu2 %v7385_v0  ;;  %v7376_v3 = vld [vmem:[#allocation9 + $0x30] sm:$0xff]  ;;  %v7383_v6 = vld [vmem:[#allocation9 + $0x68] sm:$0xff]  ;;  %vm1411_vm1 = vsmask.f32 4352  ;;  %s6716_s13 = sshll.u32 %s8629_s2, 8 }
  0x46   : > { %8081 = vmatpush.bf16.msra.mxu3 %v7377_v1  ;;  %1628 = vmatpush.bf16.msra.mxu1 %v7377_v1  ;;  %v367_v4 = vld [vmem:[%s8633_s1 + $0x8] sm:$0xff]  ;;  %v368_v5 = vld [vmem:[%s8633_s1 + $0x10] sm:$0xff]  ;;  %v382_v41 = vld [vmem:[%s8633_s1 + $0x80] sm:$0xff]  ;;  %vm1817_vm3 = vsmask.f32 7424  ;;  %s11097_s11 = scalar_lea.vmem [#allocation12], %s6716_s13 }
  0x47   : > { %v8649_v7 = vpack.c.bf16 %v367_v4, %v367_v4  ;;  %v7534_v8 = vld [vmem:[#allocation6] sm:$0xff]   ;;  %v8651_v9 = vld [vmem:[#allocation6 + $0x8] sm:$0xff]   ;;  %v8653_v11 = vpack.c.bf16 %v368_v5, %v368_v5  ;;  %v7381_v34 = vld [vmem:[#allocation9 + $0x58] sm:$0xff]  ;;  %v8692_v54 = vpack.c.bf16 %v382_v41, %v382_v41  ;;  %s7532_s19 = sshll.u32 %s8536_s28, 8  ;;  %s6589_s14 = sshll.u32 %s11097_s11, 4  ;;  %s6590_s14 = int_to_ptr.vmem [resolvable:$true] %s6589_s14 }
  0x48   : > { %v7375_v10 = vld [vmem:[#allocation9 + $0x28] sm:$0xff]  ;;  %v7535_v12 = vunpack.c.l.bf16 %v7534_v8  ;;  %v7536_v13 = vunpack.c.h.bf16 %v7534_v8  ;;  %v7539_v14 = vunpack.c.l.bf16 %v8651_v9  ;;  %v384_v17 = vld [vmem:[%s8633_s1 + $0x90] sm:$0xff]  ;;  %v7373_v36 = vld [vmem:[#allocation9 + $0x18] sm:$0xff]  ;;  %v7540_v46 = vunpack.c.h.bf16 %v8651_v9  ;;  %s6588_s3 = scalar_lea.hbm %s11290_s7, %s7532_s19  ;;  %s6577_s28 = scalar_lea.sflag [#allocation5], %s8629_s2 }
  0x49   : > { %1240 = vmatpush.bf16.msra.mxu0 %v7384_v2  ;;  %8074 = vmatpush.bf16.msra.mxu2 %v7384_v2  ;;  %v383_v15 = vld [vmem:[%s8633_s1 + $0x88] sm:$0xff]  ;;  %v11309_v16 = vunpack.c.l.bf16 %v8649_v7  ;;  %v7979_v18 = vld [vmem:[#allocation6 + $0x40] sm:$0xff]   ;;  %v11308_v26 = vunpack.c.l.bf16 %v8653_v11  ;;  %v8668_v28 = vpack.c.bf16 %v384_v17, %v384_v17  ;;  %v385_v45 = vld [vmem:[%s8633_s1 + $0x98] sm:$0xff]  ;;  %v1127_v47 = vunpack.c.l.b16 %v8649_v7  ;;  %s6591_s30 = sshll.u32 %s6588_s3, 4  ;;  %s8408_s21 = scalar_lea.hbm %s11290_s7, 512  ;;  %s6592_s30 = int_to_ptr.hbm [resolvable:$true] %s6591_s30 }
  0x4a   : > { %8082 = vmatpush.bf16.msra.mxu3 %v7376_v3  ;;  %1629 = vmatpush.bf16.msra.mxu1 %v7376_v3  ;;  %v8659_v19 = vrot.slane %v7535_v12, 1  ;;  %v589_v20 = vrot.slane %v7536_v13, 1  ;;  %v8661_v21 = vrot.slane %v7539_v14, 1  ;;  %v7382_v22 = vld [vmem:[#allocation9 + $0x60] sm:$0xff]  ;;  %v8663_v23 = vpack.c.bf16 %v383_v15, %v383_v15  ;;  %v7980_v24 = vld [vmem:[#allocation6 + $0x48] sm:$0xff]   ;;  %v8681_v42 = vld [vmem:[#allocation6 + $0x38] sm:$0xff]  }
  0x4b   : > { %v7374_v25 = vld [vmem:[#allocation9 + $0x20] sm:$0xff]  ;;  %v7567_v29 = vunpack.c.l.bf16 %v7979_v18  ;;  %v7568_v32 = vunpack.c.h.bf16 %v7979_v18  ;;  %v7571_v33 = vunpack.c.l.bf16 %v7980_v24  ;;  %v11296_v38 = vunpack.c.l.bf16 %v8668_v28  ;;  %v7380_v51 = vld [vmem:[#allocation9 + $0x50] sm:$0xff]  ;;  %v369_v56 = vld [vmem:[%s8633_s1 + $0x18] sm:$0xff]  ;;  %s8402_s12 = sshra.s32 %s6592_s30, 4  ;;  %s8403_s12 = int_to_ptr.hbm [resolvable:$true] %s8402_s12 }
  0x4c   : > { %v590_v27 = vsel %vm587_vm0, %v8659_v19, %v589_v20  ;;  %v592_v30 = vsel %vm587_vm0, %v589_v20, %v8661_v21  ;;  %v11297_v35 = vunpack.c.l.bf16 %v8663_v23  ;;  %v1128_v48 = vunpack.c.l.b16 %v8653_v11  ;;  %v366_v50 = vld [vmem:[%s8633_s1] sm:$0xff]  ;;  %v7371_v14 = vld [vmem:[#allocation9 + $0x8] sm:$0xff]  ;;  %s8404_s20 = scalar_lea.hbm %s8403_s12, 256  ;;  %p8409_p11 = scmp.lt.s32.totalorder %s8403_s12, %s11290_s7 }
  0x4d   : > { %1241 = vmatpush.bf16.msra.mxu0 %v7383_v6  ;;  %8075 = vmatpush.bf16.msra.mxu2 %v7383_v6  ;;  %v697_v31 = vmul.f32 %v590_v27, %v11309_v16  ;;  %v8677_v37 = vmul.f32 %v592_v30, %v11308_v26  ;;  %v619_v39 = vrot.slane %v7567_v29, 1  ;;  %v621_v40 = vrot.slane %v7568_v32, 1  ;;  %v7372_v57 = vld [vmem:[#allocation9 + $0x10] sm:$0xff]  ;;  %v7379_v6 = vld [vmem:[#allocation9 + $0x48] sm:$0xff]  ;;  %p8405_p1 = scmp.ne.s32.totalorder %s8403_s12, %s8404_s20  ;;  %p8410_p9 = scmp.lt.s32.totalorder %s8408_s21, %s8404_s20 }
  0x4e   : > { %8083 = vmatpush.bf16.msra.mxu3 %v7375_v10  ;;  %1630 = vmatpush.bf16.msra.mxu1 %v7375_v10  ;;  %v623_v44 = vrot.slane %v7571_v33, 1  ;;  %v7564_v55 = vunpack.c.h.bf16 %v8681_v42  ;;  %v8700_v60 = vpack.c.bf16 %v385_v45, %v385_v45  ;;  %v7572_v61 = vunpack.c.h.bf16 %v7980_v24  ;;  %v8712_v13 = vld [vmem:[#allocation6 + $0x10] sm:$0xff]  }
  0x4f   : > { %v734_v43 = vpack.c.bf16 %v697_v31, %v697_v31  ;;  %v622_v49 = vsel %vm587_vm0, %v619_v39, %v621_v40  ;;  %v735_v58 = vpack.c.bf16 %v8677_v37, %v8677_v37  ;;  %v11298_v63 = vunpack.c.l.bf16 %v8692_v54  ;;  %p8406_p4 = pnand %p8405_p1, %p8599_p3  ;;  %p8411_p2 = por %p8410_p9, %p8409_p11 }
  0x50   : > { %v624_v52 = vsel %vm587_vm0, %v621_v40, %v623_v44  ;;  %v713_v53 = vmul.f32 %v622_v49, %v11297_v35  ;;  %11418 = vst [vmem:[#allocation17_spill] sm:$0xff] %v8700_v60  ;;  %v8703_v0 = vrot.slane %v7564_v55, 1  ;;  %v404_v1 = vpack.c.bf16 %v366_v50, %v366_v50  ;;  %v7401_v50 = vld [vmem:[#allocation9 + $0xf8] sm:$0xff] }
  0x51   : > { %1242 = vmatpush.bf16.msra.mxu0 %v7382_v22  ;;  %8076 = vmatpush.bf16.msra.mxu2 %v7382_v22  ;;  %v714_v59 = vmul.f32 %v624_v52, %v11296_v38  ;;  %v1362_v62 = vunpack.c.l.b16 %v734_v43  ;;  %v11295_v3 = vunpack.c.l.bf16 %v8700_v60  ;;  %v8706_v4 = vrot.slane %v7572_v61, 1  ;;  %v370_v22 = vld [vmem:[%s8633_s1 + $0x20] sm:$0xff]  ;;  %p8407_p8 = pneg %p8406_p4 }
  0x52   : > { %8084 = vmatpush.bf16.msra.mxu3 %v7374_v25  ;;  %1631 = vmatpush.bf16.msra.mxu1 %v7374_v25  ;;  %v750_v2 = vpack.c.bf16 %v713_v53, %v713_v53  ;;  %v8708_v5 = vpack.c.bf16 %v369_v56, %v369_v56  ;;  %v620_v9 = vsel %vm587_vm0, %v8703_v0, %v619_v39  ;;  %v478_v10 = vunpack.c.l.bf16 %v404_v1 }
  0x53   : > { %v751_v8 = vpack.c.bf16 %v714_v59, %v714_v59  ;;  %v593_v12 = vrot.slane %v7540_v46, 1  ;;  %v1143_v15 = vunpack.c.l.b16 %v8663_v23  ;;  %v626_v17 = vsel %vm587_vm0, %v623_v44, %v8706_v4  ;;  %v7393_v46 = vld [vmem:[#allocation9 + $0xb8] sm:$0xff]  ;;  %p8412_p10 = pnand %p8411_p2, %p8407_p8 }
  0x54   : > { %v712_v18 = vmul.f32 %v620_v9, %v11298_v63  ;;  %v11305_v20 = vunpack.c.l.bf16 %v8708_v5  ;;  %v1144_v24 = vunpack.c.l.b16 %v8668_v28  ;;  %v715_v25 = vmul.f32 %v626_v17, %v11295_v3 }
  0x55   : > { %1243 = vmatpush.bf16.msra.mxu0 %v7381_v34  ;;  %8077 = vmatpush.bf16.msra.mxu2 %v7381_v34  ;;  %v594_v27 = vsel %vm587_vm0, %v8661_v21, %v593_v12  ;;  %v696_v29 = vmul.f32 %v8659_v19, %v478_v10  ;;  %v1378_v31 = vunpack.c.l.b16 %v750_v2  ;;  %v7543_v33 = vunpack.c.l.bf16 %v8712_v13  ;;  %v7378_v34 = vld [vmem:[#allocation9 + $0x40] sm:$0xff]  ;;  %v7392_v10 = vld [vmem:[#allocation9 + $0xb0] sm:$0xff] }
  0x56   : > { %8085 = vmatpush.bf16.msra.mxu3 %v7373_v36  ;;  %1632 = vmatpush.bf16.msra.mxu1 %v7373_v36  ;;  %v749_v30 = vpack.c.bf16 %v712_v18, %v712_v18  ;;  %v699_v32 = vmul.f32 %v594_v27, %v11305_v20  ;;  %v752_v36 = vpack.c.bf16 %v715_v25, %v715_v25  ;;  %v1379_v37 = vunpack.c.l.b16 %v751_v8  ;;  %v7370_v21 = vld [vmem:[#allocation9] sm:$0xff] }
  0x57   : > { %v733_v39 = vpack.c.bf16 %v696_v29, %v696_v29  ;;  %v8730_v40 = vpack.c.bf16 %v370_v22, %v370_v22  ;;  %v1363_v41 = vunpack.c.l.b16 %v735_v58  ;;  %v8732_v44 = vrot.slane %v7543_v33, 1  ;;  %v7409_v58 = vld [vmem:[#allocation9 + $0x138] sm:$0xff]  ;;  %v386_v18 = vld [vmem:[%s8633_s1 + $0xa0] sm:$0xff] }
  0x58   : > { %v1377_v19 = vunpack.c.l.b16 %v749_v30  ;;  %v736_v43 = vpack.c.bf16 %v699_v32, %v699_v32  ;;  %v1380_v45 = vunpack.c.l.b16 %v752_v36  ;;  %v8738_v52 = vpack.c.b16 %v1144_v24, %v1143_v15  ;;  %v7400_v22 = vld [vmem:[#allocation9 + $0xf0] sm:$0xff]  ;;  %v387_v36 = vld [vmem:[%s8633_s1 + $0xa8] sm:$0xff] }
  0x59   : > { %1244 = vmatpush.bf16.msra.mxu0 %v7380_v51  ;;  %8078 = vmatpush.bf16.msra.mxu2 %v7380_v51  ;;  %v1361_v49 = vunpack.c.l.b16 %v733_v39  ;;  %v1159_v51 = vpack.c.b16 %v1128_v48, %v1127_v47  ;;  %v11307_v59 = vunpack.c.l.bf16 %v8730_v40  ;;  %v596_v47 = vsel %vm587_vm0, %v593_v12, %v8732_v44  ;;  %v7981_v29 = vld [vmem:[#allocation6 + $0x50] sm:$0xff]  }
  0x5a   : > { %8086 = vmatpush.bf16.msra.mxu3 %v7372_v57  ;;  %1633 = vmatpush.bf16.msra.mxu1 %v7372_v57  ;;  %11419 = vst [vmem:[#allocation18_spill] sm:$0xff] %v8738_v52  ;;  %v1402_v53 = vpack.c.b16 %v1378_v31, %v1377_v19  ;;  %v1364_v55 = vunpack.c.l.b16 %v736_v43  ;;  %v1403_v56 = vpack.c.b16 %v1380_v45, %v1379_v37  ;;  %v7408_v30 = vld [vmem:[#allocation9 + $0x130] sm:$0xff]  ;;  %v7575_v43 = vunpack.c.l.bf16 %v7981_v29  ;;  %v371_v45 = vld [vmem:[%s8633_s1 + $0x28] sm:$0xff] }
  0x5b   : > { %v1394_v57 = vpack.c.b16 %v1362_v62, %v1361_v49  ;;  %v8755_v19 = vpack.c.bf16 %v386_v18, %v386_v18  ;;  %v1129_v49 = vunpack.c.l.b16 %v8708_v5  ;;  %v7982_v18 = vld [vmem:[#allocation6 + $0x58] sm:$0xff]  }
  0x5c   : > { %v1484_v61 = vshrl.u32 %v1402_v53, 16  ;;  %v1487_v1 = vshll.u32 %v1402_v53, 16  ;;  %v1395_v2 = vpack.c.b16 %v1364_v55, %v1363_v41  ;;  %v1493_v48 = vshrl.u32 %v1403_v56, 16  ;;  %v372_v53 = vld [vmem:[%s8633_s1 + $0x30] sm:$0xff] }
  0x5d   : > { %1245 = vmatpush.bf16.msra.mxu0 %v7379_v6  ;;  %8079 = vmatpush.bf16.msra.mxu2 %v7379_v6  ;;  %v1496_v6 = vshll.u32 %v1403_v56, 16  ;;  %v1413_v8 = vshrl.u32 %v1394_v57, 16  ;;  %v1416_v9 = vshll.u32 %v1394_v57, 16  ;;  %v7544_v41 = vunpack.c.h.bf16 %v8712_v13  ;;  %11420 = vst [vmem:[#allocation19_spill] sm:$0xff] %v8755_v19 }
  0x5e   : > { %8087 = vmatpush.bf16.msra.mxu3 %v7371_v14  ;;  %1634 = vmatpush.bf16.msra.mxu1 %v7371_v14  ;;  %v1486_v62 = vrot.slane %v1484_v61, 3  ;;  %v1489_v14 = vrot.slane %v1487_v1, 4  ;;  %v1421_v15 = vshrl.u32 %v1395_v2, 16  ;;  %v1424_v17 = vshll.u32 %v1395_v2, 16 }
  0x5f   : > { %v1495_v24 = vrot.slane %v1493_v48, 3  ;;  %v1498_v25 = vrot.slane %v1496_v6, 4  ;;  %v1415_v12 = vrot.slane %v1413_v8, 3  ;;  %v1418_v27 = vrot.slane %v1416_v9, 4 }
  0x60   : > { %v8745_v31 = vor.u32 %v1489_v14, %v1486_v62  ;;  %v1423_v32 = vrot.slane %v1421_v15, 3  ;;  %v1426_v33 = vrot.slane %v1424_v17, 4  ;;  %v11294_v56 = vunpack.c.l.bf16 %v8755_v19  ;;  %v388_v17 = vld [vmem:[%s8633_s1 + $0xb0] sm:$0xff] }
  0x61   : > { %1246 = vmatpush.bf16.msra.mxu0 %v7378_v34  ;;  %8080 = vmatpush.bf16.msra.mxu2 %v7378_v34  ;;  %v700_v34 = vmul.f32 %v596_v47, %v11307_v59  ;;  %v8750_v37 = vor.u32 %v1498_v25, %v1495_v24  ;;  %v1419_v39 = vor.u32 %v1418_v27, %v1415_v12  ;;  %v627_v57 = vrot.slane %v7575_v43, 1 }
  0x62   : > { %8088 = vmatpush.bf16.msra.mxu3 %v7370_v21  ;;  %1635 = vmatpush.bf16.msra.mxu1 %v7370_v21  ;;  %v8752_v21 = vor.u32 %v1426_v33, %v1423_v32  ;;  %v1145_v61 = vunpack.c.l.b16 %v8700_v60  ;;  %v1146_v1 = vunpack.c.l.b16 %v8755_v19  ;;  %v7576_v2 = vunpack.c.h.bf16 %v7981_v29  ;;  %v7399_v32 = vld [vmem:[#allocation9 + $0xe8] sm:$0xff]  ;;  %v7417_v60 = vld [vmem:[#allocation9 + $0x178] sm:$0xff] }
  0x63   : > { %v737_v55 = vpack.c.bf16 %v700_v34, %v700_v34  ;;  %v8776_v47 = vpack.c.bf16 %v371_v45, %v371_v45  ;;  %v628_v48 = vsel %vm587_vm0, %v8706_v4, %v627_v57  ;;  %v597_v8 = vrot.slane %v7544_v41, 1  ;;  %v7407_v33 = vld [vmem:[#allocation9 + $0x128] sm:$0xff] }
  0x64   : > { %1247 = vmatmul.bf16.vlgmr.msra.gmra.mxu0 %v1159_v51  ;;  %1287 = vmatmul.bf16.vlgmr.msra.gmra.mxu2 %v8738_v52  ;;  %v8765_v51 = vpack.c.bf16 %v387_v36, %v387_v36  ;;  %v1428_v13 = vsel %vm1411_vm1, %v1419_v39, %v8752_v21  ;;  %v8781_v9 = vpack.c.bf16 %v372_v53, %v372_v53  ;;  %v629_v62 = vrot.slane %v7576_v2, 1  ;;  %v389_v41 = vld [vmem:[%s8633_s1 + $0xb8] sm:$0xff] }
  0x65   : > { %2014 = vmatpush.bf16.msrb.mxu2 %v7393_v46  ;;  %2418 = vmatpush.bf16.msrb.mxu0 %v7409_v58  ;;  %v8761_v46 = vsel %vm1411_vm1, %v8745_v31, %v8750_v37  ;;  %v8772_v58 = vld [vmem:[#allocation6 + $0x18] sm:$0xff]   ;;  %v11303_v14 = vunpack.c.l.bf16 %v8776_v47  ;;  %v598_v4 = vsel %vm587_vm0, %v8732_v44, %v597_v8  ;;  %v8796_v34 = vpack.c.b16 %v1146_v1, %v1145_v61 }
  0x66   : > { %2226 = vmatpush.bf16.msrb.mxu3 %v7401_v50  ;;  %11421 = vst [vmem:[#allocation20_spill] sm:$0xff] %v8761_v46  ;;  %v1130_v50 = vunpack.c.l.b16 %v8730_v40  ;;  %1636 = vmatmul.bf16.vlgmr.msra.gmra.mxu1 %v1428_v13  ;;  %v11292_v6 = vunpack.c.l.bf16 %v8765_v51  ;;  %v7547_v15 = vunpack.c.l.bf16 %v8772_v58  ;;  %v11302_v24 = vunpack.c.l.bf16 %v8781_v9  ;;  %v373_v53 = vld [vmem:[%s8633_s1 + $0x38] sm:$0xff] }
  0x67   : > { %11422 = vst [vmem:[#allocation21_spill] sm:$0xff] %v8765_v51  ;;  %1676 = vmatmul.bf16.vlgmr.msra.gmra.mxu3 %v8761_v46  ;;  %v630_v12 = vsel %vm587_vm0, %v627_v57, %v629_v62  ;;  %v701_v27 = vmul.f32 %v598_v4, %v11303_v14  ;;  %v8800_v39 = vpack.c.bf16 %v388_v17, %v388_v17  ;;  %v7579_v44 = vunpack.c.l.bf16 %v7982_v18 }
  0x68   : > { %v599_v29 = vrot.slane %v7547_v15, 1  ;;  %11423 = vst [vmem:[#allocation22_spill] sm:$0xff] %v8796_v34  ;;  %v717_v36 = vmul.f32 %v630_v12, %v11292_v6  ;;  %v1365_v43 = vunpack.c.l.b16 %v737_v55  ;;  %v8814_v17 = vpack.c.bf16 %v373_v53, %v373_v53  ;;  %2625 = vmatpush.bf16.msrb.mxu1 %v7417_v60 }
  0x69   : > { %2015 = vmatpush.bf16.msrb.mxu2 %v7392_v10  ;;  %2419 = vmatpush.bf16.msrb.mxu0 %v7408_v30  ;;  %v716_v10 = vmul.f32 %v628_v48, %v11294_v56  ;;  %v7391_v30 = vld [vmem:[#allocation9 + $0xa8] sm:$0xff]  ;;  %11424 = vst [vmem:[#allocation23_spill] sm:$0xff] %v8800_v39  ;;  %v11291_v61 = vunpack.c.l.bf16 %v8800_v39  ;;  %v631_v1 = vrot.slane %v7579_v44, 1  ;;  %v8808_v48 = vpack.c.bf16 %v389_v41, %v389_v41 }
  0x6a   : > { %2227 = vmatpush.bf16.msrb.mxu3 %v7400_v22  ;;  %v8788_v22 = vpack.c.b16 %v1130_v50, %v1129_v49  ;;  %v738_v49 = vpack.c.bf16 %v701_v27, %v701_v27  ;;  %v600_v50 = vsel %vm587_vm0, %v597_v8, %v599_v29  ;;  %v754_v13 = vpack.c.bf16 %v717_v36, %v717_v36 }
  0x6b   : > { %v753_v25 = vpack.c.bf16 %v716_v10, %v716_v10  ;;  %v702_v57 = vmul.f32 %v600_v50, %v11302_v24  ;;  %11425 = vst [vmem:[#allocation24_spill] sm:$0xff] %v8808_v48  ;;  %v7580_v10 = vunpack.c.h.bf16 %v7982_v18  ;;  %v1131_v8 = vunpack.c.l.b16 %v8776_v47 }
  0x6c   : > { %v1366_v2 = vunpack.c.l.b16 %v738_v49  ;;  %v1382_v55 = vunpack.c.l.b16 %v754_v13  ;;  %v632_v15 = vsel %vm587_vm0, %v629_v62, %v631_v1  ;;  %v11293_v18 = vunpack.c.l.bf16 %v8808_v48  ;;  %v374_v49 = vld [vmem:[%s8633_s1 + $0x40] sm:$0xff] }
  0x6d   : > { %v1381_v45 = vunpack.c.l.b16 %v753_v25  ;;  %2016 = vmatpush.bf16.msrb.mxu2 %v7391_v30  ;;  %2420 = vmatpush.bf16.msrb.mxu0 %v7407_v33  ;;  %v1132_v25 = vunpack.c.l.b16 %v8781_v9  ;;  %v718_v12 = vmul.f32 %v632_v15, %v11291_v61  ;;  %v739_v30 = vpack.c.bf16 %v702_v57, %v702_v57 }
  0x6e   : > { %2228 = vmatpush.bf16.msrb.mxu3 %v7399_v32  ;;  %v1396_v4 = vpack.c.b16 %v1366_v2, %v1365_v43  ;;  %v633_v32 = vrot.slane %v7580_v10, 1  ;;  %v7548_v33 = vunpack.c.h.bf16 %v8772_v58  ;;  %v11299_v62 = vunpack.c.l.bf16 %v8814_v17  ;;  %v8824_v2 = vld [vmem:[#allocation6 + $0x20] sm:$0xff]  }
  0x6f   : > { %v1404_v27 = vpack.c.b16 %v1382_v55, %v1381_v45  ;;  %v755_v41 = vpack.c.bf16 %v718_v12, %v718_v12  ;;  %v8829_v12 = vpack.c.bf16 %v374_v49, %v374_v49 }
  0x70   : > { %v1430_v36 = vshrl.u32 %v1396_v4, 16  ;;  %v1433_v44 = vshll.u32 %v1396_v4, 16  ;;  %v634_v53 = vsel %vm587_vm0, %v631_v1, %v633_v32  ;;  %v601_v13 = vrot.slane %v7548_v33, 1 }
  0x71   : > { %v1502_v50 = vshrl.u32 %v1404_v27, 16  ;;  %v1505_v43 = vshll.u32 %v1404_v27, 16  ;;  %v719_v57 = vmul.f32 %v634_v53, %v11293_v18  ;;  %v1383_v58 = vunpack.c.l.b16 %v755_v41  ;;  %v7406_v18 = vld [vmem:[#allocation9 + $0x120] sm:$0xff] }
  0x72   : > { %v1432_v15 = vrot.slane %v1430_v36, 3  ;;  %v1435_v45 = vrot.slane %v1433_v44, 4  ;;  %v602_v4 = vsel %vm587_vm0, %v599_v29, %v601_v13  ;;  %v7551_v33 = vunpack.c.l.bf16 %v8824_v2  ;;  %v390_v36 = vld [vmem:[%s8633_s1 + $0xc0] sm:$0xff]  ;;  %2421 = vmatpush.bf16.msrb.mxu0 %v7406_v18  ;;  %v8879_v18 = vld [vmem:[#allocation6 + $0x28] sm:$0xff]  }
  0x73   : > { %v1504_v10 = vrot.slane %v1502_v50, 3  ;;  %v1507_v55 = vrot.slane %v1505_v43, 4  ;;  %v756_v27 = vpack.c.bf16 %v719_v57, %v719_v57  ;;  %v703_v1 = vmul.f32 %v602_v4, %v11299_v62  ;;  %v7983_v44 = vld [vmem:[#allocation6 + $0x60] sm:$0xff]  }
  0x74   : > { %1252 = vmatmul.bf16.gmra.mxu0 %v8788_v22  ;;  %1292 = vmatmul.bf16.gmra.mxu2 %v8796_v34  ;;  %v8831_v61 = vor.u32 %v1435_v45, %v1432_v15  ;;  %v1147_v41 = vunpack.c.l.b16 %v8765_v51  ;;  %v1148_v50 = vunpack.c.l.b16 %v8800_v39  ;;  %v1367_v29 = vunpack.c.l.b16 %v739_v30  ;;  %v7403_v39 = vld [vmem:[#allocation9 + $0x108] sm:$0xff] }
  0x75   : > { %v8837_v6 = vor.u32 %v1507_v55, %v1504_v10  ;;  %v1384_v43 = vunpack.c.l.b16 %v756_v27  ;;  %v740_v53 = vpack.c.bf16 %v703_v1, %v703_v1  ;;  %v603_v15 = vrot.slane %v7551_v33, 1  ;;  %v391_v55 = vld [vmem:[%s8633_s1 + $0xc8] sm:$0xff]  ;;  %v7390_v1 = vld [vmem:[#allocation9 + $0xa0] sm:$0xff] }
  0x76   : > { %v8844_v49 = vsel %vm1411_vm1, %v8752_v21, %v8831_v61  ;;  %v11301_v57 = vunpack.c.l.bf16 %v8829_v12  ;;  %v8853_v10 = vpack.c.bf16 %v390_v36, %v390_v36  ;;  %v7583_v30 = vunpack.c.l.bf16 %v7983_v44  ;;  %v7398_v33 = vld [vmem:[#allocation9 + $0xe0] sm:$0xff]  ;;  %2017 = vmatpush.bf16.msrb.mxu2 %v7390_v1 }
  0x77   : > { %v8849_v45 = vsel %vm1411_vm1, %v8750_v37, %v8837_v6  ;;  %1641 = vmatmul.bf16.gmra.mxu1 %v8844_v49  ;;  %v1405_v21 = vpack.c.b16 %v1384_v43, %v1383_v58  ;;  %v1368_v4 = vunpack.c.l.b16 %v740_v53  ;;  %v604_v27 = vsel %vm587_vm0, %v601_v13, %v603_v15  ;;  %v375_v58 = vld [vmem:[%s8633_s1 + $0x48] sm:$0xff]  ;;  %2229 = vmatpush.bf16.msrb.mxu3 %v7398_v33 }
  0x78   : > { %11426 = vst [vmem:[#allocation25_spill] sm:$0xff] %v8849_v45  ;;  %1681 = vmatmul.bf16.gmra.mxu3 %v8849_v45  ;;  %v8858_v37 = vpack.c.b16 %v1132_v25, %v1131_v8  ;;  %v8860_v56 = vpack.c.b16 %v1148_v50, %v1147_v41  ;;  %v11300_v3 = vunpack.c.l.bf16 %v8853_v10  ;;  %v635_v36 = vrot.slane %v7583_v30, 1 }
  0x79   : > { %11427 = vst [vmem:[#allocation26_spill] sm:$0xff] %v8853_v10  ;;  %v1511_v38 = vshrl.u32 %v1405_v21, 16  ;;  %v1514_v35 = vshll.u32 %v1405_v21, 16  ;;  %v1397_v63 = vpack.c.b16 %v1368_v4, %v1367_v29  ;;  %v8863_v62 = vpack.c.bf16 %v391_v55, %v391_v55 }
  0x7a   : > { %11428 = vst [vmem:[#allocation27_spill] sm:$0xff] %v8860_v56  ;;  %v704_v13 = vmul.f32 %v604_v27, %v11301_v57  ;;  %v636_v43 = vsel %vm587_vm0, %v633_v32, %v635_v36  ;;  %v7584_v8 = vunpack.c.h.bf16 %v7983_v44  ;;  %v8874_v21 = vpack.c.bf16 %v375_v58, %v375_v58 }
  0x7b   : > { %11429 = vst [vmem:[#allocation28_spill] sm:$0xff] %v8863_v62  ;;  %v1513_v25 = vrot.slane %v1511_v38, 3  ;;  %v1516_v41 = vrot.slane %v1514_v35, 4  ;;  %v1439_v50 = vshrl.u32 %v1397_v63, 16  ;;  %v1442_v53 = vshll.u32 %v1397_v63, 16  ;;  %v376_v63 = vld [vmem:[%s8633_s1 + $0x50] sm:$0xff] }
  0x7c   : > { %v720_v29 = vmul.f32 %v636_v43, %v11300_v3  ;;  %v11304_v30 = vunpack.c.l.bf16 %v8863_v62  ;;  %v637_v55 = vrot.slane %v7584_v8, 1  ;;  %v1133_v38 = vunpack.c.l.b16 %v8814_v17  ;;  %v392_v43 = vld [vmem:[%s8633_s1 + $0xd0] sm:$0xff] }
  0x7d   : > { %v1441_v32 = vrot.slane %v1439_v50, 3  ;;  %v1444_v44 = vrot.slane %v1442_v53, 4  ;;  %v7552_v35 = vunpack.c.h.bf16 %v8824_v2  ;;  %v741_v4 = vpack.c.bf16 %v704_v13, %v704_v13 }
  0x7e   : > { %v757_v27 = vpack.c.bf16 %v720_v29, %v720_v29  ;;  %v638_v1 = vsel %vm587_vm0, %v635_v36, %v637_v55  ;;  %v11306_v33 = vunpack.c.l.bf16 %v8874_v21  ;;  %v1134_v58 = vunpack.c.l.b16 %v8829_v12  ;;  %v7984_v29 = vld [vmem:[#allocation6 + $0x68] sm:$0xff]  }
  0x7f   : > { %v8884_v3 = vor.u32 %v1444_v44, %v1441_v32  ;;  %v721_v8 = vmul.f32 %v638_v1, %v11304_v30  ;;  %v605_v50 = vrot.slane %v7552_v35, 1  ;;  %v8889_v2 = vor.u32 %v1516_v41, %v1513_v25  ;;  %v393_v1 = vld [vmem:[%s8633_s1 + $0xd8] sm:$0xff] }
  0x80   : > { %v1149_v53 = vunpack.c.l.b16 %v8808_v48  ;;  %v8892_v13 = vpack.c.bf16 %v376_v63, %v376_v63  ;;  %v7555_v36 = vunpack.c.l.bf16 %v8879_v18  ;;  %v1385_v32 = vunpack.c.l.b16 %v757_v27 }
  0x81   : > { %v758_v57 = vpack.c.bf16 %v721_v8, %v721_v8  ;;  %v606_v44 = vsel %vm587_vm0, %v603_v15, %v605_v50  ;;  %v8896_v24 = vpack.c.bf16 %v392_v43, %v392_v43  ;;  %v1150_v14 = vunpack.c.l.b16 %v8853_v10  ;;  %v377_v15 = vld [vmem:[%s8633_s1 + $0x58] sm:$0xff] }
  0x82   : > { %v705_v25 = vmul.f32 %v606_v44, %v11306_v33  ;;  %v1369_v41 = vunpack.c.l.b16 %v741_v4  ;;  %v607_v35 = vrot.slane %v7555_v36, 1  ;;  %v8905_v63 = vsel %vm1411_vm1, %v8831_v61, %v8884_v3 }
  0x83   : > { %11430 = vst [vmem:[#allocation29_spill] sm:$0xff] %v8896_v24  ;;  %v1386_v30 = vunpack.c.l.b16 %v758_v57  ;;  %v7587_v8 = vunpack.c.l.bf16 %v7984_v29  ;;  %v8912_v43 = vsel %vm1411_vm1, %v8837_v6, %v8889_v2  ;;  %v11312_v36 = vunpack.c.l.bf16 %v8896_v24 }
  0x84   : > { %1257 = vmatmul.bf16.gmra.mxu0 %v8858_v37  ;;  %1297 = vmatmul.bf16.gmra.mxu2 %v8860_v56  ;;  %11431 = vst [vmem:[#allocation30_spill] sm:$0xff] %v8912_v43  ;;  %v742_v20 = vpack.c.bf16 %v705_v25, %v705_v25  ;;  %v608_v4 = vsel %vm587_vm0, %v605_v50, %v607_v35  ;;  %v7588_v16 = vunpack.c.h.bf16 %v7984_v29  ;;  %v11435_v25 = vunpack.c.l.bf16 %v8892_v13 }
  0x85   : > { %v8916_v44 = vpack.c.b16 %v1134_v58, %v1133_v38  ;;  %v1406_v33 = vpack.c.b16 %v1386_v30, %v1385_v32  ;;  %v639_v61 = vrot.slane %v7587_v8, 1  ;;  %v8918_v59 = vpack.c.bf16 %v393_v1, %v393_v1  ;;  %v7389_v58 = vld [vmem:[#allocation9 + $0x98] sm:$0xff] }
  0x86   : > { %v8921_v57 = vpack.c.b16 %v1150_v14, %v1149_v53  ;;  %v1370_v26 = vunpack.c.l.b16 %v742_v20  ;;  %v8923_v27 = vpack.c.bf16 %v377_v15, %v377_v15  ;;  %v706_v38 = vmul.f32 %v608_v4, %v11435_v25  ;;  %v7397_v32 = vld [vmem:[#allocation9 + $0xd8] sm:$0xff]  ;;  %2018 = vmatpush.bf16.msrb.mxu2 %v7389_v58 }
  0x87   : > { %11432 = vst [vmem:[#allocation31_spill] sm:$0xff] %v8916_v44  ;;  %1646 = vmatmul.bf16.gmra.mxu1 %v8905_v63  ;;  %v1520_v6 = vshrl.u32 %v1406_v33, 16  ;;  %v1523_v50 = vshll.u32 %v1406_v33, 16  ;;  %v640_v30 = vsel %vm587_vm0, %v637_v55, %v639_v61  ;;  %v7405_v1 = vld [vmem:[#allocation9 + $0x118] sm:$0xff]  ;;  %v11313_v14 = vunpack.c.l.bf16 %v8918_v59  ;;  %2230 = vmatpush.bf16.msrb.mxu3 %v7397_v32  ;;  %v7985_v33 = vld [vmem:[#allocation6 + $0x70] sm:$0xff]  }
  0x88   : > { %11433 = vst [vmem:[#allocation32_spill] sm:$0xff] %v8918_v59  ;;  %1686 = vmatmul.bf16.gmra.mxu3 %v8912_v43  ;;  %v1398_v8 = vpack.c.b16 %v1370_v26, %v1369_v41  ;;  %v722_v20 = vmul.f32 %v640_v30, %v11312_v36  ;;  %v641_v53 = vrot.slane %v7588_v16, 1  ;;  %v7556_v29 = vunpack.c.h.bf16 %v8879_v18  ;;  %2422 = vmatpush.bf16.msrb.mxu0 %v7405_v1  ;;  %v378_v43 = vld [vmem:[%s8633_s1 + $0x60] sm:$0xff] }
  0x89   : > { %11434 = vst [vmem:[#allocation33_spill] sm:$0xff] %v8921_v57  ;;  %v8936_v26 = vld [vmem:[#allocation6 + $0x30] sm:$0xff]   ;;  %v1522_v41 = vrot.slane %v1520_v6, 3  ;;  %v1525_v30 = vrot.slane %v1523_v50, 4  ;;  %v8943_v36 = vpack.c.bf16 %v378_v43, %v378_v43  ;;  %v395_v43 = vld [vmem:[%s8633_s1 + $0xe8] sm:$0xff]  ;;  %v1135_v56 = vunpack.c.l.b16 %v8874_v21 }
  0x8a   : > { %v1448_v15 = vshrl.u32 %v1398_v8, 16  ;;  %v1451_v4 = vshll.u32 %v1398_v8, 16  ;;  %v759_v55 = vpack.c.bf16 %v722_v20, %v722_v20  ;;  %v642_v25 = vsel %vm587_vm0, %v639_v61, %v641_v53  ;;  %v394_v50 = vld [vmem:[%s8633_s1 + $0xe0] sm:$0xff] }
  0x8b   : > { %v723_v16 = vmul.f32 %v642_v25, %v11313_v14  ;;  %v609_v58 = vrot.slane %v7556_v29, 1  ;;  %v743_v8 = vpack.c.bf16 %v706_v38, %v706_v38  ;;  %v7559_v6 = vunpack.c.l.bf16 %v8936_v26 }
  0x8c   : > { %v1450_v18 = vrot.slane %v1448_v15, 3  ;;  %v1453_v32 = vrot.slane %v1451_v4, 4  ;;  %v1387_v20 = vunpack.c.l.b16 %v759_v55  ;;  %v11436_v29 = vunpack.c.l.bf16 %v8923_v27 }
  0x8d   : > { %v760_v61 = vpack.c.bf16 %v723_v16, %v723_v16  ;;  %v610_v1 = vsel %vm587_vm0, %v607_v35, %v609_v58  ;;  %v8949_v14 = vor.u32 %v1525_v30, %v1522_v41  ;;  %v611_v38 = vrot.slane %v7559_v6, 1 }
  0x8e   : > { %v707_v25 = vmul.f32 %v610_v1, %v11436_v29  ;;  %v1371_v55 = vunpack.c.l.b16 %v743_v8  ;;  %v8953_v16 = vpack.c.bf16 %v394_v50, %v394_v50  ;;  %v7591_v35 = vunpack.c.l.bf16 %v7985_v33  ;;  %v379_v50 = vld [vmem:[%s8633_s1 + $0x68] sm:$0xff] }
  0x8f   : > { %v1388_v15 = vunpack.c.l.b16 %v760_v61  ;;  %v11324_v34 = vunpack.c.l.bf16 %v8943_v36  ;;  %v1136_v1 = vunpack.c.l.b16 %v8892_v13  ;;  %v612_v30 = vsel %vm587_vm0, %v609_v58, %v611_v38 }
  0x90   : > { %v744_v4 = vpack.c.bf16 %v707_v25, %v707_v25  ;;  %11437 = vst [vmem:[#allocation34_spill] sm:$0xff] %v8953_v16  ;;  %v1151_v8 = vunpack.c.l.b16 %v8863_v62  ;;  %v8966_v61 = vpack.c.bf16 %v395_v43, %v395_v43  ;;  %v7592_v6 = vunpack.c.h.bf16 %v7985_v33  ;;  %v7388_v25 = vld [vmem:[#allocation9 + $0x90] sm:$0xff] }
  0x91   : > { %v1407_v45 = vpack.c.b16 %v1388_v15, %v1387_v20  ;;  %v8972_v20 = vsel %vm1411_vm1, %v8889_v2, %v8949_v14  ;;  %v1152_v29 = vunpack.c.l.b16 %v8896_v24  ;;  %v8981_v2 = vpack.c.bf16 %v379_v50, %v379_v50  ;;  %2019 = vmatpush.bf16.msrb.mxu2 %v7388_v25  ;;  %v396_v50 = vld [vmem:[%s8633_s1 + $0xf0] sm:$0xff] }
  0x92   : > { %v1372_v41 = vunpack.c.l.b16 %v744_v4  ;;  %11438 = vst [vmem:[#allocation35_spill] sm:$0xff] %v8972_v20  ;;  %v645_v62 = vrot.slane %v7592_v6, 1  ;;  %v7560_v24 = vunpack.c.h.bf16 %v8936_v26 }
  0x93   : > { %v1529_v15 = vshrl.u32 %v1407_v45, 16 }
  0x94   : > { %1262 = vmatmul.bf16.gmra.mxu0 %v8916_v44  ;;  %1302 = vmatmul.bf16.gmra.mxu2 %v8921_v57  ;;  %v8951_v57 = vor.u32 %v1453_v32, %v1450_v18  ;;  %v643_v18 = vrot.slane %v7591_v35, 1  ;;  %v1399_v58 = vpack.c.b16 %v1372_v41, %v1371_v55  ;;  %v8984_v55 = vpack.c.b16 %v1136_v1, %v1135_v56 }
  0x95   : > { %v1532_v41 = vshll.u32 %v1407_v45, 16  ;;  %v11441_v35 = vunpack.c.l.bf16 %v8953_v16  ;;  %v11442_v45 = vunpack.c.l.bf16 %v8966_v61  ;;  %v613_v26 = vrot.slane %v7560_v24, 1 }
  0x96   : > { %v8963_v32 = vsel %vm1411_vm1, %v8884_v3, %v8951_v57  ;;  %v708_v3 = vmul.f32 %v612_v30, %v11324_v34  ;;  %v644_v4 = vsel %vm587_vm0, %v641_v53, %v643_v18  ;;  %v1457_v33 = vshrl.u32 %v1399_v58, 16  ;;  %11439 = vst [vmem:[#allocation36_spill] sm:$0xff] %v8984_v55  ;;  %v7396_v30 = vld [vmem:[#allocation9 + $0xd0] sm:$0xff] }
  0x97   : > { %1651 = vmatmul.bf16.gmra.mxu1 %v8963_v32  ;;  %v1460_v43 = vshll.u32 %v1399_v58, 16  ;;  %v7404_v34 = vld [vmem:[#allocation9 + $0x110] sm:$0xff]  ;;  %v8987_v53 = vpack.c.b16 %v1152_v29, %v1151_v8  ;;  %v724_v10 = vmul.f32 %v644_v4, %v11441_v35  ;;  %v646_v6 = vsel %vm587_vm0, %v643_v18, %v645_v62  ;;  %v7986_v58 = vld [vmem:[#allocation6 + $0x78] sm:$0xff]   ;;  %2231 = vmatpush.bf16.msrb.mxu3 %v7396_v30 }
  0x98   : > { %1691 = vmatmul.bf16.gmra.mxu3 %v8972_v20  ;;  %v1459_v56 = vrot.slane %v1457_v33, 3  ;;  %v725_v20 = vmul.f32 %v646_v6, %v11442_v45  ;;  %v1531_v8 = vrot.slane %v1529_v15, 3  ;;  %v745_v29 = vpack.c.bf16 %v708_v3, %v708_v3  ;;  %2423 = vmatpush.bf16.msrb.mxu0 %v7404_v34  ;;  %v380_v18 = vld [vmem:[%s8633_s1 + $0x70] sm:$0xff] }
  0x99   : > { %11440 = vst [vmem:[#allocation37_spill] sm:$0xff] %v8987_v53  ;;  %v1462_v1 = vrot.slane %v1460_v43, 4  ;;  %v1534_v48 = vrot.slane %v1532_v41, 4  ;;  %v614_v4 = vsel %vm587_vm0, %v611_v38, %v613_v26  ;;  %v7563_v35 = vunpack.c.l.bf16 %v8681_v42  ;;  %v397_v38 = vld [vmem:[%s8633_s1 + $0xf8] sm:$0xff] }
  0x9a   : > { %v7595_v46 = vunpack.c.l.bf16 %v7986_v58  ;;  %v761_v25 = vpack.c.bf16 %v724_v10, %v724_v10  ;;  %v762_v24 = vpack.c.bf16 %v725_v20, %v725_v20  ;;  %v11443_v15 = vunpack.c.l.bf16 %v8981_v2 }
  0x9b   : > { %v9003_v3 = vor.u32 %v1462_v1, %v1459_v56  ;;  %v1137_v34 = vunpack.c.l.b16 %v8923_v27  ;;  %v1373_v41 = vunpack.c.l.b16 %v745_v29  ;;  %v9007_v42 = vpack.c.bf16 %v380_v18, %v380_v18  ;;  %v7606_v18 = vld [vmem:[#allocation8] sm:$0xff]  }
  0x9c   : > { %v709_v33 = vmul.f32 %v614_v4, %v11443_v15  ;;  %v9009_v30 = vpack.c.bf16 %v396_v50, %v396_v50  ;;  %v9011_v6 = vor.u32 %v1534_v48, %v1531_v8  ;;  %v1138_v45 = vunpack.c.l.b16 %v8943_v36  ;;  %v7989_v15 = vld [vmem:[#allocation8 + $0x8] sm:$0xff]   ;;  %2424 = vmatpush.bf16.msrb.mxu0 %v7403_v39 }
  0x9d   : > { %v615_v10 = vrot.slane %v7563_v35, 1  ;;  %v647_v20 = vrot.slane %v7595_v46, 1  ;;  %v1389_v52 = vunpack.c.l.b16 %v761_v25  ;;  %v1390_v4 = vunpack.c.l.b16 %v762_v24 }
  0x9e   : > { %v746_v43 = vpack.c.bf16 %v709_v33, %v709_v33  ;;  %v9015_v1 = vpack.c.bf16 %v397_v38, %v397_v38  ;;  %v9020_v29 = vsel %vm1411_vm1, %v8951_v57, %v9003_v3  ;;  %v1153_v50 = vunpack.c.l.b16 %v8918_v59 }
  0x9f   : > { %11444 = vst [vmem:[#allocation38_spill] sm:$0xff] %v9020_v29  ;;  %v1154_v48 = vunpack.c.l.b16 %v8953_v16  ;;  %v7596_v8 = vunpack.c.h.bf16 %v7986_v58  ;;  %v616_v33 = vsel %vm587_vm0, %v613_v26, %v615_v10  ;;  %v648_v38 = vsel %vm587_vm0, %v645_v62, %v647_v20 }
  0xa0   : > { %v1374_v56 = vunpack.c.l.b16 %v746_v43  ;;  %v9036_v58 = vsel %vm1411_vm1, %v8949_v14, %v9011_v6  ;;  %v7607_v25 = vunpack.c.l.bf16 %v7606_v18  ;;  %v7608_v46 = vunpack.c.h.bf16 %v7606_v18  ;;  %v7387_v18 = vld [vmem:[#allocation9 + $0x88] sm:$0xff] }
  0xa1   : > { %v9031_v43 = vrot.slane %v7596_v8, 1  ;;  %11445 = vst [vmem:[#allocation39_spill] sm:$0xff] %v9036_v58  ;;  %v7611_v26 = vunpack.c.l.bf16 %v7989_v15  ;;  %v7612_v57 = vunpack.c.h.bf16 %v7989_v15  ;;  %v11446_v16 = vunpack.c.l.bf16 %v9007_v42  ;;  %v7395_v15 = vld [vmem:[#allocation9 + $0xc8] sm:$0xff]  ;;  %2020 = vmatpush.bf16.msrb.mxu2 %v7387_v18 }
  0xa2   : > { %v1400_v35 = vpack.c.b16 %v1374_v56, %v1373_v41  ;;  %v1408_v41 = vpack.c.b16 %v1390_v4, %v1389_v52  ;;  %v11447_v52 = vunpack.c.l.bf16 %v9009_v30  ;;  %v9053_v51 = vpack.c.b16 %v1138_v45, %v1137_v34  ;;  %2232 = vmatpush.bf16.msrb.mxu3 %v7395_v15 }
  0xa3   : > { %v650_v62 = vsel %vm587_vm0, %v647_v20, %v9031_v43  ;;  %v710_v14 = vmul.f32 %v616_v33, %v11446_v16  ;;  %v9055_v19 = vpack.c.b16 %v1154_v48, %v1153_v50 }
  0xa4   : > { %1267 = vmatmul.bf16.gmra.mxu0 %v8984_v55  ;;  %1307 = vmatmul.bf16.gmra.mxu2 %v8987_v53  ;;  %v381_v53 = vld [vmem:[%s8633_s1 + $0x78] sm:$0xff]  ;;  %v1466_v8 = vshrl.u32 %v1400_v35, 16  ;;  %v726_v4 = vmul.f32 %v648_v38, %v11447_v52  ;;  %v1469_v56 = vshll.u32 %v1400_v35, 16  ;;  %11450 = vst [vmem:[#allocation40_spill] sm:$0xff] %v9053_v51  ;;  %v1538_v16 = vshrl.u32 %v1408_v41, 16  ;;  %v7987_v38 = vld [vmem:[#allocation6 + $0x80] sm:$0xff]  }
  0xa5   : > { %v9026_v24 = vpack.c.bf16 %v381_v53, %v381_v53  ;;  %v618_v53 = vsel %vm587_vm0, %v615_v10, %v8703_v0  ;;  %v11448_v0 = vunpack.c.l.bf16 %v9015_v1  ;;  %11451 = vst [vmem:[#allocation41_spill] sm:$0xff] %v9055_v19  ;;  %v1541_v33 = vshll.u32 %v1408_v41, 16  ;;  %v398_v41 = vld [vmem:[%s8633_s1 + $0x100] sm:$0xff] }
  0xa6   : > { %v880_v35 = vrot.slane %v7607_v25, 7  ;;  %v9057_v52 = vrot.slane %v7608_v46, 7  ;;  %v763_v34 = vpack.c.bf16 %v726_v4, %v726_v4  ;;  %v1471_v45 = vrot.slane %v1469_v56, 4 }
  0xa7   : > { %1656 = vmatmul.bf16.gmra.mxu1 %v9020_v29  ;;  %v727_v10 = vmul.f32 %v650_v62, %v11448_v0  ;;  %v11449_v59 = vunpack.c.l.bf16 %v9026_v24  ;;  %v883_v62 = vrot.slane %v7611_v26, 7  ;;  %v9059_v0 = vrot.slane %v7612_v57, 7 }
  0xa8   : > { %1696 = vmatmul.bf16.gmra.mxu3 %v9036_v58  ;;  %v7599_v58 = vunpack.c.l.bf16 %v7987_v38  ;;  %v1540_v46 = vrot.slane %v1538_v16, 3  ;;  %v1543_v25 = vrot.slane %v1541_v33, 4  ;;  %v882_v57 = vsel %vm879_vm2, %v880_v35, %v9057_v52 }
  0xa9   : > { %v711_v20 = vmul.f32 %v618_v53, %v11449_v59  ;;  %v1468_v59 = vrot.slane %v1466_v8, 3  ;;  %v747_v53 = vpack.c.bf16 %v710_v14, %v710_v14  ;;  %v764_v50 = vpack.c.bf16 %v727_v10, %v727_v10 }
  0xaa   : > { %v886_v26 = vsel %vm879_vm2, %v883_v62, %v9059_v0  ;;  %v1391_v8 = vunpack.c.l.b16 %v763_v34  ;;  %v9068_v60 = vpack.c.bf16 %v398_v41, %v398_v41  ;;  %v9072_v10 = vrot.slane %v7599_v58, 1 }
  0xab   : > { %v748_v48 = vpack.c.bf16 %v711_v20, %v711_v20  ;;  %v1375_v39 = vunpack.c.l.b16 %v747_v53  ;;  %v9070_v56 = vor.u32 %v1471_v45, %v1468_v59  ;;  %v1392_v14 = vunpack.c.l.b16 %v764_v50 }
  0xac   : > { %v9074_v18 = vor.u32 %v1543_v25, %v1540_v46  ;;  %v11452_v20 = vunpack.c.l.bf16 %v8649_v7  ;;  %v11453_v16 = vunpack.c.l.bf16 %v8653_v11  ;;  %v11454_v38 = vunpack.c.l.bf16 %v8730_v40  ;;  %v7416_v25 = vld [vmem:[#allocation9 + $0x170] sm:$0xff] }
  0xad   : > { %v1376_v4 = vunpack.c.l.b16 %v748_v48  ;;  %v1139_v53 = vunpack.c.l.b16 %v8981_v2  ;;  %v11343_v59 = vunpack.c.l.bf16 %v9068_v60  ;;  %v9087_v58 = vsel %vm1411_vm1, %v9003_v3, %v9070_v56  ;;  %2626 = vmatpush.bf16.msrb.mxu1 %v7416_v25 }
  0xae   : > { %v988_v15 = vmul.f32 %v880_v35, %v11452_v20  ;;  %v989_v33 = vmul.f32 %v882_v57, %v11453_v16  ;;  %v991_v34 = vmul.f32 %v886_v26, %v11454_v38  ;;  %11455 = vst [vmem:[#allocation42_spill] sm:$0xff] %v9087_v58  ;;  %v1409_v45 = vpack.c.b16 %v1392_v14, %v1391_v8  ;;  %v7386_v8 = vld [vmem:[#allocation9 + $0x80] sm:$0xff]  ;;  %v7415_v16 = vld [vmem:[#allocation9 + $0x168] sm:$0xff] }
  0xaf   : > { %v1401_v50 = vpack.c.b16 %v1376_v4, %v1375_v39  ;;  %v652_v7 = vsel %vm587_vm0, %v9031_v43, %v9072_v10  ;;  %v9095_v11 = vsel %vm1411_vm1, %v9011_v6, %v9074_v18  ;;  %v1140_v40 = vunpack.c.l.b16 %v9007_v42  ;;  %v7394_v39 = vld [vmem:[#allocation9 + $0xc0] sm:$0xff]  ;;  %2021 = vmatpush.bf16.msrb.mxu2 %v7386_v8 }
  0xb0   : > { %v1155_v35 = vunpack.c.l.b16 %v8966_v61  ;;  %v1156_v48 = vunpack.c.l.b16 %v9009_v30  ;;  %v1025_v41 = vpack.c.bf16 %v988_v15, %v988_v15  ;;  %v1026_v3 = vpack.c.bf16 %v989_v33, %v989_v33  ;;  %v7402_v15 = vld [vmem:[#allocation9 + $0x100] sm:$0xff]  ;;  %2233 = vmatpush.bf16.msrb.mxu3 %v7394_v39  ;;  %v7413_v39 = vld [vmem:[#allocation9 + $0x158] sm:$0xff] }
  0xb1   : > { %v728_v46 = vmul.f32 %v652_v7, %v11343_v59  ;;  %v1547_v43 = vshrl.u32 %v1409_v45, 16  ;;  %v1550_v57 = vshll.u32 %v1409_v45, 16  ;;  %v1475_v6 = vshrl.u32 %v1401_v50, 16  ;;  %2425 = vmatpush.bf16.msrb.mxu0 %v7402_v15  ;;  %2627 = vmatpush.bf16.msrb.mxu1 %v7415_v16  ;;  %v7414_v8 = vld [vmem:[#allocation9 + $0x160] sm:$0xff] }
  0xb2   : > { %v1478_v26 = vshll.u32 %v1401_v50, 16  ;;  %v1028_v14 = vpack.c.bf16 %v991_v34, %v991_v34  ;;  %v9104_v4 = vpack.c.b16 %v1140_v40, %v1139_v53  ;;  %v9106_v20 = vpack.c.b16 %v1156_v48, %v1155_v35 }
  0xb3   : > { %v884_v33 = vsel %vm879_vm2, %v9057_v52, %v883_v62  ;;  %v1767_v38 = vunpack.c.l.b16 %v1025_v41  ;;  %v1768_v7 = vunpack.c.l.b16 %v1026_v3  ;;  %v765_v45 = vpack.c.bf16 %v728_v46, %v728_v46 }
  0xb4   : > { %1272 = vmatmul.bf16.gmra.mxu0 %v9053_v51  ;;  %1312 = vmatmul.bf16.gmra.mxu2 %v9055_v19  ;;  %11456 = vst [vmem:[#allocation43_spill] sm:$0xff] %v9104_v4  ;;  %v11458_v50 = vunpack.c.l.bf16 %v8708_v5  ;;  %v1549_v34 = vrot.slane %v1547_v43, 3  ;;  %v1552_v53 = vrot.slane %v1550_v57, 4  ;;  %v1477_v40 = vrot.slane %v1475_v6, 3  ;;  %v7990_v6 = vld [vmem:[#allocation8 + $0x10] sm:$0xff]  }
  0xb5   : > { %11457 = vst [vmem:[#allocation44_spill] sm:$0xff] %v9106_v20  ;;  %v1480_v35 = vrot.slane %v1478_v26, 4  ;;  %v1770_v48 = vunpack.c.l.b16 %v1028_v14  ;;  %v1800_v62 = vpack.c.b16 %v1768_v7, %v1767_v38  ;;  %v9116_v46 = vunpack.c.l.b16 %v765_v45  ;;  %2628 = vmatpush.bf16.msrb.mxu1 %v7414_v8  ;;  %v7412_v8 = vld [vmem:[#allocation9 + $0x150] sm:$0xff] }
  0xb6   : > { %v990_v59 = vmul.f32 %v884_v33, %v11458_v50  ;;  %v9114_v41 = vor.u32 %v1552_v53, %v1549_v34  ;;  %v1141_v5 = vunpack.c.l.b16 %v9026_v24  ;;  %v1142_v26 = vunpack.c.l.b16 %v8692_v54 }
  0xb7   : > { %1661 = vmatmul.bf16.gmra.mxu1 %v9087_v58  ;;  %v1481_v3 = vor.u32 %v1480_v35, %v1477_v40  ;;  %v1821_v57 = vshll.u32 %v1800_v62, 16  ;;  %v7615_v14 = vunpack.c.l.bf16 %v7990_v6  ;;  %v7616_v15 = vunpack.c.h.bf16 %v7990_v6 }
  0xb8   : > { %1701 = vmatmul.bf16.gmra.mxu3 %v9095_v11  ;;  %v1027_v25 = vpack.c.bf16 %v990_v59, %v990_v59  ;;  %v1819_v59 = vshrl.u32 %v1800_v62, 16  ;;  %v1157_v16 = vunpack.c.l.b16 %v9015_v1  ;;  %v1158_v33 = vunpack.c.l.b16 %v9068_v60  ;;  %v7433_v62 = vld [vmem:[#allocation9 + $0x1f8] sm:$0xff] }
  0xb9   : > { %v1823_v38 = vrot.slane %v1821_v57, 1  ;;  %v9128_v45 = vsel %vm1411_vm1, %v9074_v18, %v9114_v41  ;;  %v9132_v50 = vsel %vm1411_vm1, %v9070_v56, %v1481_v3  ;;  %v1410_v34 = vpack.c.b16 %v9116_v46, %v9116_v46  ;;  %2629 = vmatpush.bf16.msrb.mxu1 %v7413_v39  ;;  %3029 = vmatpush.bf16.msra.mxu3 %v7433_v62 }
  0xba   : > { %v1769_v52 = vunpack.c.l.b16 %v1027_v25  ;;  %11459 = vst [vmem:[#allocation45_spill] sm:$0xff] %v9128_v45  ;;  %v887_v35 = vrot.slane %v7615_v14, 7  ;;  %v9139_v18 = vpack.c.b16 %v1142_v26, %v1141_v5  ;;  %v9141_v56 = vpack.c.b16 %v1158_v33, %v1157_v16  ;;  %v7411_v14 = vld [vmem:[#allocation9 + $0x148] sm:$0xff] }
  0xbb   : > { %11460 = vst [vmem:[#allocation46_spill] sm:$0xff] %v9132_v50  ;;  %v1824_v53 = vor.u32 %v1823_v38, %v1819_v59  ;;  %v1556_v57 = vshrl.u32 %v1410_v34, 16  ;;  %v1559_v6 = vshll.u32 %v1410_v34, 16  ;;  %v11463_v5 = vunpack.c.l.bf16 %v8776_v47 }
  0xbc   : > { %v9119_v43 = vpack.c.b16 %v1770_v48, %v1769_v52  ;;  %v889_v48 = vrot.slane %v7616_v15, 7  ;;  %11461 = vst [vmem:[#allocation47_spill] sm:$0xff] %v9139_v18  ;;  %v7425_v52 = vld [vmem:[#allocation9 + $0x1b8] sm:$0xff]  ;;  %v888_v59 = vsel %vm879_vm2, %v9059_v0, %v887_v35  ;;  %v11464_v16 = vunpack.c.l.bf16 %v8781_v9 }
  0xbd   : > { %11462 = vst [vmem:[#allocation48_spill] sm:$0xff] %v9141_v56  ;;  %2837 = vmatpush.bf16.msra.mxu2 %v7425_v52  ;;  %2630 = vmatpush.bf16.msrb.mxu1 %v7412_v8  ;;  %v7441_v15 = vld [vmem:[#allocation9 + $0x238] sm:$0xff]  ;;  %v992_v26 = vmul.f32 %v888_v59, %v11463_v5  ;;  %v1558_v38 = vrot.slane %v1556_v57, 3  ;;  %v1561_v0 = vrot.slane %v1559_v6, 4  ;;  %v7991_v8 = vld [vmem:[#allocation8 + $0x18] sm:$0xff]   ;;  %v9154_v47 = vsel %vm1411_vm1, %v1481_v3, %v8745_v31 }
  0xbe   : > { %v1826_v7 = vshll.u32 %v9119_v43, 16  ;;  %v890_v39 = vsel %vm879_vm2, %v887_v35, %v889_v48  ;;  %3236 = vmatpush.bf16.msra.mxu0 %v7441_v15  ;;  %v7619_v52 = vunpack.c.l.bf16 %v7991_v8  ;;  %v7620_v62 = vunpack.c.h.bf16 %v7991_v8  ;;  %11465 = vst [vmem:[#allocation49_spill] sm:$0xff] %v9154_v47 }
  0xbf   : > { %v993_v33 = vmul.f32 %v890_v39, %v11464_v16  ;;  %v1029_v34 = vpack.c.bf16 %v992_v26, %v992_v26  ;;  %v1562_v35 = vor.u32 %v1561_v0, %v1558_v38  ;;  %v11466_v16 = vunpack.c.l.bf16 %v8814_v17 }
  0xc0   : > { %v1828_v40 = vrot.slane %v1826_v7, 1  ;;  %v7410_v7 = vld [vmem:[#allocation9 + $0x140] sm:$0xff]  ;;  %v891_v39 = vrot.slane %v7619_v52, 7  ;;  %v893_v15 = vrot.slane %v7620_v62, 7  ;;  %v11467_v3 = vunpack.c.l.bf16 %v8829_v12  ;;  %v7992_v52 = vld [vmem:[#allocation8 + $0x20] sm:$0xff]  }
  0xc1   : > { %2631 = vmatpush.bf16.msrb.mxu1 %v7411_v14  ;;  %v1771_v9 = vunpack.c.l.b16 %v1029_v34  ;;  %v1563_v57 = vsel %vm1411_vm1, %v9114_v41, %v1562_v35  ;;  %v1830_v38 = vshrl.u32 %v9119_v43, 16 }
  0xc2   : > { %v1829_v25 = vsel %vm1817_vm3, %v1824_v53, %v1828_v40  ;;  %v1030_v53 = vpack.c.bf16 %v993_v33, %v993_v33  ;;  %v892_v14 = vsel %vm879_vm2, %v889_v48, %v891_v39  ;;  %v894_v5 = vsel %vm879_vm2, %v891_v39, %v893_v15 }
  0xc3   : > { %v994_v31 = vmul.f32 %v892_v14, %v11466_v16  ;;  %v995_v33 = vmul.f32 %v894_v5, %v11467_v3  ;;  %v1832_v35 = vor.u32 %v1830_v38, %v1828_v40  ;;  %v7424_v16 = vld [vmem:[#allocation9 + $0x1b0] sm:$0xff] }
  0xc4   : > { %1277 = vmatmul.bf16.gmra.mxu0 %v9104_v4  ;;  %1317 = vmatmul.bf16.gmra.mxu2 %v9106_v20  ;;  %v1772_v59 = vunpack.c.l.b16 %v1030_v53 }
  0xc5   : > { %2632 = vmatpush.bf16.msrb.mxu1 %v7410_v7  ;;  %v1031_v7 = vpack.c.bf16 %v994_v31, %v994_v31  ;;  %v1032_v34 = vpack.c.bf16 %v995_v33, %v995_v33  ;;  %2838 = vmatpush.bf16.msra.mxu2 %v7424_v16 }
  0xc6   : > { %v1802_v6 = vpack.c.b16 %v1772_v59, %v1771_v9  ;;  %v7623_v9 = vunpack.c.l.bf16 %v7992_v52  ;;  %v7624_v59 = vunpack.c.h.bf16 %v7992_v52  ;;  %v7440_v52 = vld [vmem:[#allocation9 + $0x230] sm:$0xff] }
  0xc7   : > { %1666 = vmatmul.bf16.gmra.mxu1 %v9132_v50  ;;  %v1773_v12 = vunpack.c.l.b16 %v1031_v7  ;;  %v1774_v39 = vunpack.c.l.b16 %v1032_v34  ;;  %3237 = vmatpush.bf16.msra.mxu0 %v7440_v52 }
  0xc8   : > { %1706 = vmatmul.bf16.gmra.mxu3 %v9128_v45  ;;  %v1834_v0 = vshll.u32 %v1802_v6, 16  ;;  %v1838_v7 = vshrl.u32 %v1802_v6, 16 }
  0xc9   : > { %v1803_v5 = vpack.c.b16 %v1774_v39, %v1773_v12 }
  0xca   : > { %v1836_v48 = vrot.slane %v1834_v0, 1 }
  0xcb   : > { %v1842_v34 = vshll.u32 %v1803_v5, 16 }
  0xcc   : > { %v1837_v43 = vsel %vm1817_vm3, %v1832_v35, %v1836_v48 }
  0xd4   : > { %1282 = vmatmul.bf16.gmra.mxu0 %v9139_v18  ;;  %1322 = vmatmul.bf16.gmra.mxu2 %v9141_v56 }
  0xd7   : > { %1671 = vmatmul.bf16.gmra.mxu1 %v9154_v47 }
  0xd8   : > { %1711 = vmatmul.bf16.gmra.mxu3 %v1563_v57  ;;  %v895_v57 = vrot.slane %v7623_v9, 7 }
  0xda   : > { %v896_v3 = vsel %vm879_vm2, %v893_v15, %v895_v57 }
  0xe1   : > { %v1248_v26 = vpop.f32.mrf.mxu0 }
  0xe3   : > { %v1637_v8 = vpop.f32.mrf.mxu1 }
  0xe4   : > { %2022 = vmatmul.bf16.vlgmr.msrb.gmra.mxu2 %v1829_v25  ;;  %2426 = vmatmul.bf16.vlgmr.msrb.gmra.mxu0 %v8788_v22  ;;  %v9167_v62 = vadd.f32 %v1637_v8, %v1248_v26  ;;  %v897_v25 = vrot.slane %v7624_v59, 7  ;;  %v7432_v26 = vld [vmem:[#allocation9 + $0x1f0] sm:$0xff]  ;;  %v1844_v59 = vrot.slane %v1842_v34, 1 }
  0xe5   : > { %3030 = vmatpush.bf16.msra.mxu3 %v7432_v26 }
  0xe6   : > { %v898_v33 = vsel %vm879_vm2, %v895_v57, %v897_v25  ;;  %v7993_v57 = vld [vmem:[#allocation8 + $0x28] sm:$0xff]  }
  0xe7   : > { %v1288_v53 = vpop.f32.mrf.mxu2  ;;  %2633 = vmatmul.bf16.vlgmr.msrb.gmra.mxu1 %v1837_v43  ;;  %v7628_v16 = vunpack.c.h.bf16 %v7993_v57 }
  0xe8   : > { %2234 = vmatmul.bf16.vlgmr.msrb.gmra.mxu3 %v8844_v49  ;;  %v11469_v49 = vunpack.c.l.bf16 %v8892_v13 }
  0xe9   : > { %v1250_v17 = vpop.f32.mrf.mxu0 }
  0xea   : > { %v1677_v14 = vpop.f32.mrf.mxu3  ;;  %v997_v8 = vmul.f32 %v898_v33, %v11469_v49  ;;  %v901_v33 = vrot.slane %v7628_v16, 7 }
  0xeb   : > { %v9170_v22 = vadd.f32 %v1677_v14, %v1288_v53  ;;  %v1639_v31 = vpop.f32.mrf.mxu1  ;;  %v11468_v53 = vunpack.c.l.bf16 %v8874_v21  ;;  %v7627_v21 = vunpack.c.l.bf16 %v7993_v57 }
  0xec   : > { %v9175_v38 = vadd.f32 %v1639_v31, %v1250_v17  ;;  %v1840_v17 = vor.u32 %v1838_v7, %v1836_v48  ;;  %v1034_v6 = vpack.c.bf16 %v997_v8, %v997_v8  ;;  %v11470_v8 = vunpack.c.l.bf16 %v8923_v27 }
  0xed   : > { %v996_v35 = vmul.f32 %v896_v3, %v11468_v53  ;;  %v899_v3 = vrot.slane %v7627_v21, 7 }
  0xee   : > { %v9185_v13 = vsel %vm1817_vm3, %v1840_v17, %v1844_v59  ;;  %v1776_v31 = vunpack.c.l.b16 %v1034_v6  ;;  %v1846_v6 = vshrl.u32 %v1803_v5, 16 }
  0xef   : > { %v1290_v40 = vpop.f32.mrf.mxu2  ;;  %v1033_v39 = vpack.c.bf16 %v996_v35, %v996_v35  ;;  %v900_v34 = vsel %vm879_vm2, %v897_v25, %v899_v3  ;;  %v902_v53 = vsel %vm879_vm2, %v899_v3, %v901_v33 }
  0xf0   : > { %v998_v52 = vmul.f32 %v900_v34, %v11470_v8 }
  0xf1   : > { %v1253_v0 = vpop.f32.mrf.mxu0  ;;  %v1775_v26 = vunpack.c.l.b16 %v1033_v39 }
  0xf2   : > { %v1679_v15 = vpop.f32.mrf.mxu3  ;;  %v1035_v25 = vpack.c.bf16 %v998_v52, %v998_v52 }
  0xf3   : > { %v9182_v9 = vadd.f32 %v1679_v15, %v1290_v40  ;;  %v1804_v7 = vpack.c.b16 %v1776_v31, %v1775_v26  ;;  %v11471_v15 = vunpack.c.l.bf16 %v8943_v36  ;;  %v1848_v26 = vor.u32 %v1846_v6, %v1844_v59  ;;  %v7994_v31 = vld [vmem:[#allocation8 + $0x30] sm:$0xff]   ;;  %v7423_v6 = vld [vmem:[#allocation9 + $0x1a8] sm:$0xff] }
  0xf4   : > { %2027 = vmatmul.bf16.gmra.mxu2 %v1837_v43  ;;  %2431 = vmatmul.bf16.gmra.mxu0 %v8858_v37  ;;  %v1642_v43 = vpop.f32.mrf.mxu1  ;;  %v7631_v36 = vunpack.c.l.bf16 %v7994_v31  ;;  %v7632_v34 = vunpack.c.h.bf16 %v7994_v31 }
  0xf5   : > { %v9187_v40 = vadd.f32 %v1642_v43, %v1253_v0  ;;  %v999_v17 = vmul.f32 %v902_v53, %v11471_v15  ;;  %v1850_v57 = vshll.u32 %v1804_v7, 16  ;;  %v1777_v53 = vunpack.c.l.b16 %v1035_v25  ;;  %2839 = vmatpush.bf16.msra.mxu2 %v7423_v6 }
  0xf6   : > { %v903_v15 = vrot.slane %v7631_v36, 7  ;;  %v905_v52 = vrot.slane %v7632_v34, 7  ;;  %v1854_v31 = vshrl.u32 %v1804_v7, 16  ;;  %v11475_v36 = vunpack.c.l.bf16 %v8981_v2 }
  0xf7   : > { %v1293_v12 = vpop.f32.mrf.mxu2  ;;  %2638 = vmatmul.bf16.gmra.mxu1 %v9185_v13  ;;  %v1036_v16 = vpack.c.bf16 %v999_v17, %v999_v17  ;;  %v1852_v27 = vrot.slane %v1850_v57, 1  ;;  %v7431_v57 = vld [vmem:[#allocation9 + $0x1e8] sm:$0xff] }
  0xf8   : > { %2239 = vmatmul.bf16.gmra.mxu3 %v8905_v63  ;;  %v904_v25 = vsel %vm879_vm2, %v901_v33, %v903_v15  ;;  %v7439_v33 = vld [vmem:[#allocation9 + $0x228] sm:$0xff] }
  0xf9   : > { %v1255_v14 = vpop.f32.mrf.mxu0  ;;  %v9206_v8 = vsel %vm1817_vm3, %v1848_v26, %v1852_v27  ;;  %3031 = vmatpush.bf16.msra.mxu3 %v7431_v57  ;;  %v1000_v34 = vmul.f32 %v904_v25, %v11475_v36  ;;  %3238 = vmatpush.bf16.msra.mxu0 %v7439_v33  ;;  %v7995_v25 = vld [vmem:[#allocation8 + $0x38] sm:$0xff]  }
  0xfa   : > { %11474 = vst [vmem:[#allocation52_spill] sm:$0xff] %v9206_v8  ;;  %v7636_v36 = vunpack.c.h.bf16 %v7995_v25 }
  0xfb   : > { %v1682_v49 = vpop.f32.mrf.mxu3  ;;  %v1037_v7 = vpack.c.bf16 %v1000_v34, %v1000_v34 }
  0xfc   : > { %v9197_v0 = vadd.f32 %v1682_v49, %v1293_v12  ;;  %v1644_v39 = vpop.f32.mrf.mxu1  ;;  %v1778_v49 = vunpack.c.l.b16 %v1036_v16 }
  0xfd   : > { %v9199_v21 = vadd.f32 %v1644_v39, %v1255_v14 }
  0xfe   : > { %11472 = vst [vmem:[#allocation50_spill] sm:$0xff] %v9197_v0  ;;  %v1805_v59 = vpack.c.b16 %v1778_v49, %v1777_v53  ;;  %v11477_v49 = vunpack.c.l.bf16 %v9007_v42  ;;  %v7436_v0 = vld [vmem:[#allocation9 + $0x210] sm:$0xff] }
  0xff   : > { %v1295_v48 = vpop.f32.mrf.mxu2 }
 0x101   : > { %v1258_v35 = vpop.f32.mrf.mxu0 }
 0x103   : > { %v1684_v12 = vpop.f32.mrf.mxu3 }
 0x104   : > { %2032 = vmatmul.bf16.gmra.mxu2 %v9185_v13  ;;  %2436 = vmatmul.bf16.gmra.mxu0 %v8916_v44  ;;  %v9203_v5 = vadd.f32 %v1684_v12, %v1295_v48  ;;  %v1647_v14 = vpop.f32.mrf.mxu1  ;;  %v906_v48 = vsel %vm879_vm2, %v903_v15, %v905_v52  ;;  %v1856_v15 = vor.u32 %v1854_v31, %v1852_v27  ;;  %v909_v27 = vrot.slane %v7636_v36, 7 }
 0x105   : > { %v9208_v39 = vadd.f32 %v1647_v14, %v1258_v35  ;;  %v1858_v35 = vshll.u32 %v1805_v59, 16  ;;  %v1001_v14 = vmul.f32 %v906_v48, %v11477_v49  ;;  %v1862_v36 = vshrl.u32 %v1805_v59, 16 }
 0x106   : > { %11473 = vst [vmem:[#allocation51_spill] sm:$0xff] %v9203_v5 }
 0x107   : > { %v1298_v43 = vpop.f32.mrf.mxu2  ;;  %2643 = vmatmul.bf16.gmra.mxu1 %v9206_v8  ;;  %v1860_v6 = vrot.slane %v1858_v35, 1  ;;  %v1038_v2 = vpack.c.bf16 %v1001_v14, %v1001_v14 }
 0x108   : > { %2244 = vmatmul.bf16.gmra.mxu3 %v8963_v32 }
 0x109   : > { %v1260_v3 = vpop.f32.mrf.mxu0  ;;  %v9225_v42 = vsel %vm1817_vm3, %v1856_v15, %v1860_v6  ;;  %v1780_v49 = vunpack.c.l.b16 %v1038_v2  ;;  %v11481_v2 = vunpack.c.l.bf16 %v8692_v54 }
 0x10a   : > { %11478 = vst [vmem:[#allocation54_spill] sm:$0xff] %v9225_v42 }
 0x10b   : > { %v1687_v26 = vpop.f32.mrf.mxu3 }
 0x10c   : > { %v9216_v12 = vadd.f32 %v1687_v26, %v1298_v43  ;;  %v1649_v53 = vpop.f32.mrf.mxu1  ;;  %v7635_v26 = vunpack.c.l.bf16 %v7995_v25 }
 0x10d   : > { %v9220_v5 = vadd.f32 %v1649_v53, %v1260_v3  ;;  %v1779_v3 = vunpack.c.l.b16 %v1037_v7 }
 0x10e   : > { %11476 = vst [vmem:[#allocation53_spill] sm:$0xff] %v9216_v12 }
 0x10f   : > { %v1300_v17 = vpop.f32.mrf.mxu2  ;;  %v1806_v34 = vpack.c.b16 %v1780_v49, %v1779_v3  ;;  %v1864_v49 = vor.u32 %v1862_v36, %v1860_v6  ;;  %v7422_v36 = vld [vmem:[#allocation9 + $0x1a0] sm:$0xff] }
 0x110   : > { %2840 = vmatpush.bf16.msra.mxu2 %v7422_v36 }
 0x111   : > { %v1263_v16 = vpop.f32.mrf.mxu0 }
 0x113   : > { %v1689_v12 = vpop.f32.mrf.mxu3 }
 0x114   : > { %2037 = vmatmul.bf16.gmra.mxu2 %v9206_v8  ;;  %2441 = vmatmul.bf16.gmra.mxu0 %v8984_v55  ;;  %v9227_v48 = vadd.f32 %v1689_v12, %v1300_v17  ;;  %v1652_v53 = vpop.f32.mrf.mxu1  ;;  %v907_v55 = vrot.slane %v7635_v26, 7  ;;  %v11480_v17 = vunpack.c.l.bf16 %v9026_v24 }
 0x115   : > { %v9229_v31 = vadd.f32 %v1652_v53, %v1263_v16  ;;  %v1866_v53 = vshll.u32 %v1806_v34, 16 }
 0x116   : > { %11479 = vst [vmem:[#allocation55_spill] sm:$0xff] %v9227_v48  ;;  %v908_v14 = vsel %vm879_vm2, %v905_v52, %v907_v55  ;;  %v910_v33 = vsel %vm879_vm2, %v907_v55, %v909_v27 }
 0x117   : > { %v1303_v57 = vpop.f32.mrf.mxu2  ;;  %2648 = vmatmul.bf16.gmra.mxu1 %v9225_v42  ;;  %v1002_v12 = vmul.f32 %v908_v14, %v11480_v17  ;;  %v1003_v25 = vmul.f32 %v910_v33, %v11481_v2  ;;  %v1868_v24 = vrot.slane %v1866_v53, 1  ;;  %v7996_v14 = vld [vmem:[#allocation8 + $0x40] sm:$0xff]   ;;  %v7430_v53 = vld [vmem:[#allocation9 + $0x1e0] sm:$0xff] }
 0x118   : > { %2249 = vmatmul.bf16.gmra.mxu3 %v9020_v29  ;;  %v7639_v54 = vunpack.c.l.bf16 %v7996_v14  ;;  %v7640_v33 = vunpack.c.h.bf16 %v7996_v14  ;;  %v1870_v14 = vshrl.u32 %v1806_v34, 16 }
 0x119   : > { %v1265_v43 = vpop.f32.mrf.mxu0  ;;  %v1039_v55 = vpack.c.bf16 %v1002_v12, %v1002_v12  ;;  %v1040_v52 = vpack.c.bf16 %v1003_v25, %v1003_v25  ;;  %3032 = vmatpush.bf16.msra.mxu3 %v7430_v53 }
 0x11a   : > { %v913_v12 = vrot.slane %v7640_v33, 7 }
 0x11b   : > { %v1692_v7 = vpop.f32.mrf.mxu3  ;;  %v1782_v2 = vunpack.c.l.b16 %v1040_v52 }
 0x11c   : > { %v9239_v16 = vadd.f32 %v1692_v7, %v1303_v57  ;;  %v1654_v26 = vpop.f32.mrf.mxu1  ;;  %v1781_v7 = vunpack.c.l.b16 %v1039_v55 }
 0x11d   : > { %v9241_v48 = vadd.f32 %v1654_v26, %v1265_v43  ;;  %v9248_v26 = vsel %vm1817_vm3, %v1864_v49, %v1868_v24 }
 0x11e   : > { %11482 = vst [vmem:[#allocation56_spill] sm:$0xff] %v9239_v16  ;;  %v911_v16 = vrot.slane %v7639_v54, 7  ;;  %v1807_v6 = vpack.c.b16 %v1782_v2, %v1781_v7  ;;  %v11485_v54 = vunpack.c.l.bf16 %v8663_v23  ;;  %v11487_v2 = vunpack.c.l.bf16 %v8668_v28 }
 0x11f   : > { %v1305_v35 = vpop.f32.mrf.mxu2  ;;  %11484 = vst [vmem:[#allocation58_spill] sm:$0xff] %v9248_v26 }
 0x120   : > { %v912_v55 = vsel %vm879_vm2, %v909_v27, %v911_v16  ;;  %v7438_v27 = vld [vmem:[#allocation9 + $0x220] sm:$0xff] }
 0x121   : > { %v1268_v15 = vpop.f32.mrf.mxu0  ;;  %v1004_v33 = vmul.f32 %v912_v55, %v11485_v54  ;;  %3239 = vmatpush.bf16.msra.mxu0 %v7438_v27  ;;  %v7997_v55 = vld [vmem:[#allocation8 + $0x48] sm:$0xff]  }
 0x122   : > { %v7644_v54 = vunpack.c.h.bf16 %v7997_v55 }
 0x123   : > { %v1694_v57 = vpop.f32.mrf.mxu3  ;;  %v1041_v34 = vpack.c.bf16 %v1004_v33, %v1004_v33 }
 0x124   : > { %2042 = vmatmul.bf16.gmra.mxu2 %v9225_v42  ;;  %2446 = vmatmul.bf16.gmra.mxu0 %v9053_v51  ;;  %v9245_v59 = vadd.f32 %v1694_v57, %v1305_v35  ;;  %v1657_v43 = vpop.f32.mrf.mxu1  ;;  %v914_v35 = vsel %vm879_vm2, %v911_v16, %v913_v12  ;;  %v1872_v16 = vor.u32 %v1870_v14, %v1868_v24  ;;  %v917_v24 = vrot.slane %v7644_v54, 7 }
 0x125   : > { %v9250_v51 = vadd.f32 %v1657_v43, %v1268_v15  ;;  %v1874_v15 = vshll.u32 %v1807_v6, 16  ;;  %v1005_v43 = vmul.f32 %v914_v35, %v11487_v2 }
 0x126   : > { %11483 = vst [vmem:[#allocation57_spill] sm:$0xff] %v9245_v59 }
 0x127   : > { %v1308_v3 = vpop.f32.mrf.mxu2  ;;  %2653 = vmatmul.bf16.gmra.mxu1 %v9248_v26  ;;  %v1876_v36 = vrot.slane %v1874_v15, 1  ;;  %v1042_v23 = vpack.c.bf16 %v1005_v43, %v1005_v43 }
 0x128   : > { %2254 = vmatmul.bf16.gmra.mxu3 %v9087_v58  ;;  %v7437_v58 = vld [vmem:[#allocation9 + $0x218] sm:$0xff] }
 0x129   : > { %v1270_v17 = vpop.f32.mrf.mxu0  ;;  %v9267_v28 = vsel %vm1817_vm3, %v1872_v16, %v1876_v36  ;;  %v1784_v2 = vunpack.c.l.b16 %v1042_v23  ;;  %v11492_v23 = vld [vmem:[#allocation19_spill] sm:$0xff]  ;;  %3240 = vmatpush.bf16.msra.mxu0 %v7437_v58 }
 0x12a   : > { %11488 = vst [vmem:[#allocation60_spill] sm:$0xff] %v9267_v28 }
 0x12b   : > { %v1697_v49 = vpop.f32.mrf.mxu3 }
 0x12c   : > { %v9258_v57 = vadd.f32 %v1697_v49, %v1308_v3  ;;  %v1659_v7 = vpop.f32.mrf.mxu1  ;;  %v7643_v49 = vunpack.c.l.bf16 %v7997_v55 }
 0x12d   : > { %v9262_v59 = vadd.f32 %v1659_v7, %v1270_v17  ;;  %v1783_v17 = vunpack.c.l.b16 %v1041_v34  ;;  %3241 = vmatpush.bf16.msra.mxu0 %v7436_v0 }
 0x12e   : > { %11486 = vst [vmem:[#allocation59_spill] sm:$0xff] %v9258_v57 }
 0x12f   : > { %v1310_v25 = vpop.f32.mrf.mxu2  ;;  %v1808_v33 = vpack.c.b16 %v1784_v2, %v1783_v17 }
 0x131   : > { %v1273_v52 = vpop.f32.mrf.mxu0 }
 0x133   : > { %v1699_v57 = vpop.f32.mrf.mxu3 }
 0x134   : > { %2047 = vmatmul.bf16.gmra.mxu2 %v9248_v26  ;;  %2451 = vmatmul.bf16.gmra.mxu0 %v9104_v4  ;;  %v9269_v35 = vadd.f32 %v1699_v57, %v1310_v25  ;;  %v1662_v7 = vpop.f32.mrf.mxu1  ;;  %v915_v4 = vrot.slane %v7643_v49, 7  ;;  %v11490_v25 = vld [vmem:[#allocation17_spill] sm:$0xff]  ;;  %v11493_v49 = vunpack.c.l.bf16 %v11492_v23  ;;  %v1882_v26 = vshll.u32 %v1808_v33, 16 }
 0x135   : > { %v9271_v14 = vadd.f32 %v1662_v7, %v1273_v52  ;;  %v11491_v57 = vunpack.c.l.bf16 %v11490_v25 }
 0x136   : > { %11489 = vst [vmem:[#allocation61_spill] sm:$0xff] %v9269_v35  ;;  %v916_v43 = vsel %vm879_vm2, %v913_v12, %v915_v4  ;;  %v918_v27 = vsel %vm879_vm2, %v915_v4, %v917_v24  ;;  %v1878_v35 = vshrl.u32 %v1807_v6, 16  ;;  %v1884_v25 = vrot.slane %v1882_v26, 1 }
 0x137   : > { %v1313_v53 = vpop.f32.mrf.mxu2  ;;  %2658 = vmatmul.bf16.gmra.mxu1 %v9267_v28  ;;  %v1006_v55 = vmul.f32 %v916_v43, %v11491_v57  ;;  %v1007_v54 = vmul.f32 %v918_v27, %v11493_v49  ;;  %v7998_v43 = vld [vmem:[#allocation8 + $0x50] sm:$0xff]  }
 0x138   : > { %2259 = vmatmul.bf16.gmra.mxu3 %v9132_v50  ;;  %v1880_v2 = vor.u32 %v1878_v35, %v1876_v36  ;;  %v7647_v23 = vunpack.c.l.bf16 %v7998_v43  ;;  %v7648_v27 = vunpack.c.h.bf16 %v7998_v43  ;;  %v7421_v35 = vld [vmem:[#allocation9 + $0x198] sm:$0xff]  ;;  %v1886_v43 = vshrl.u32 %v1808_v33, 16 }
 0x139   : > { %v1275_v3 = vpop.f32.mrf.mxu0  ;;  %v1043_v4 = vpack.c.bf16 %v1006_v55, %v1006_v55  ;;  %v1044_v12 = vpack.c.bf16 %v1007_v54, %v1007_v54  ;;  %v7429_v54 = vld [vmem:[#allocation9 + $0x1d8] sm:$0xff]  ;;  %2841 = vmatpush.bf16.msra.mxu2 %v7421_v35 }
 0x13a   : > { %v921_v55 = vrot.slane %v7648_v27, 7  ;;  %3033 = vmatpush.bf16.msra.mxu3 %v7429_v54 }
 0x13b   : > { %v1702_v34 = vpop.f32.mrf.mxu3  ;;  %v1786_v49 = vunpack.c.l.b16 %v1044_v12 }
 0x13c   : > { %v9281_v52 = vadd.f32 %v1702_v34, %v1313_v53  ;;  %v1664_v7 = vpop.f32.mrf.mxu1  ;;  %v1785_v34 = vunpack.c.l.b16 %v1043_v4 }
 0x13d   : > { %v9283_v50 = vadd.f32 %v1664_v7, %v1275_v3  ;;  %v9290_v7 = vsel %vm1817_vm3, %v1880_v2, %v1884_v25 }
 0x13e   : > { %11494 = vst [vmem:[#allocation17_spill] sm:$0xff] %v9281_v52  ;;  %v919_v52 = vrot.slane %v7647_v23, 7  ;;  %v1809_v26 = vpack.c.b16 %v1786_v49, %v1785_v34  ;;  %v11497_v23 = vld [vmem:[#allocation21_spill] sm:$0xff]  ;;  %v11500_v49 = vld [vmem:[#allocation23_spill] sm:$0xff] }
 0x13f   : > { %v1315_v15 = vpop.f32.mrf.mxu2  ;;  %11496 = vst [vmem:[#allocation62_spill] sm:$0xff] %v9290_v7  ;;  %v11498_v27 = vunpack.c.l.bf16 %v11497_v23  ;;  %v7999_v23 = vld [vmem:[#allocation8 + $0x58] sm:$0xff]  }
 0x140   : > { %v920_v4 = vsel %vm879_vm2, %v917_v24, %v919_v52  ;;  %v11502_v24 = vld [vmem:[#allocation18_spill] sm:$0xff] }
 0x141   : > { %v1278_v16 = vpop.f32.mrf.mxu0 }
 0x143   : > { %v1704_v53 = vpop.f32.mrf.mxu3 }
 0x144   : > { %2052 = vmatmul.bf16.gmra.mxu2 %v9267_v28  ;;  %2456 = vmatmul.bf16.gmra.mxu0 %v9139_v18  ;;  %v9287_v6 = vadd.f32 %v1704_v53, %v1315_v15  ;;  %v1667_v3 = vpop.f32.mrf.mxu1  ;;  %v922_v15 = vsel %vm879_vm2, %v919_v52, %v921_v55  ;;  %v1008_v53 = vmul.f32 %v920_v4, %v11498_v27 }
 0x145   : > { %v9292_v18 = vadd.f32 %v1667_v3, %v1278_v16  ;;  %v1890_v16 = vshll.u32 %v1809_v26, 16  ;;  %v1888_v52 = vor.u32 %v1886_v43, %v1884_v25 }
 0x146   : > { %11495 = vst [vmem:[#allocation19_spill] sm:$0xff] %v9287_v6  ;;  %v11501_v6 = vunpack.c.l.bf16 %v11500_v49  ;;  %v1045_v54 = vpack.c.bf16 %v1008_v53, %v1008_v53 }
 0x147   : > { %v1318_v17 = vpop.f32.mrf.mxu2  ;;  %2663 = vmatmul.bf16.gmra.mxu1 %v9290_v7  ;;  %v1892_v35 = vrot.slane %v1890_v16, 1 }
 0x148   : > { %2264 = vmatmul.bf16.gmra.mxu3 %v9154_v47  ;;  %v1009_v47 = vmul.f32 %v922_v15, %v11501_v6 }
 0x149   : > { %v1280_v57 = vpop.f32.mrf.mxu0  ;;  %v9309_v6 = vsel %vm1817_vm3, %v1888_v52, %v1892_v35 }
 0x14a   : > { %v1046_v42 = vpack.c.bf16 %v1009_v47, %v1009_v47  ;;  %11503 = vst [vmem:[#allocation23_spill] sm:$0xff] %v9309_v6  ;;  %v11505_v47 = vld [vmem:[#allocation20_spill] sm:$0xff] }
 0x14b   : > { %v1707_v2 = vpop.f32.mrf.mxu3 }
 0x14c   : > { %v9300_v3 = vadd.f32 %v1707_v2, %v1318_v17  ;;  %v1669_v34 = vpop.f32.mrf.mxu1  ;;  %v7651_v17 = vunpack.c.l.bf16 %v7999_v23  ;;  %v7652_v2 = vunpack.c.h.bf16 %v7999_v23  ;;  %v1788_v49 = vunpack.c.l.b16 %v1046_v42  ;;  %v11508_v42 = vld [vmem:[#allocation26_spill] sm:$0xff] }
 0x14d   : > { %v9304_v28 = vadd.f32 %v1669_v34, %v1280_v57  ;;  %v1787_v57 = vunpack.c.l.b16 %v1045_v54 }
 0x14e   : > { %11499 = vst [vmem:[#allocation21_spill] sm:$0xff] %v9300_v3  ;;  %v923_v25 = vrot.slane %v7651_v17, 7  ;;  %v925_v43 = vrot.slane %v7652_v2, 7  ;;  %v11509_v17 = vunpack.c.l.bf16 %v11508_v42  ;;  %v1894_v3 = vshrl.u32 %v1809_v26, 16 }
 0x14f   : > { %v1320_v36 = vpop.f32.mrf.mxu2  ;;  %v1810_v53 = vpack.c.b16 %v1788_v49, %v1787_v57 }
 0x150   : > { %v924_v23 = vsel %vm879_vm2, %v921_v55, %v923_v25  ;;  %v926_v52 = vsel %vm879_vm2, %v923_v25, %v925_v43  ;;  %v11511_v55 = vld [vmem:[#allocation22_spill] sm:$0xff]  ;;  %v1896_v29 = vor.u32 %v1894_v3, %v1892_v35 }
 0x151   : > { %v1283_v12 = vpop.f32.mrf.mxu0  ;;  %v1011_v2 = vmul.f32 %v926_v52, %v11509_v17  ;;  %v8000_v52 = vld [vmem:[#allocation8 + $0x60] sm:$0xff]  }
 0x152   : > { %v7656_v26 = vunpack.c.h.bf16 %v8000_v52 }
 0x153   : > { %v1709_v27 = vpop.f32.mrf.mxu3  ;;  %v1048_v49 = vpack.c.bf16 %v1011_v2, %v1011_v2 }
 0x154   : > { %2057 = vmatmul.bf16.gmra.mxu2 %v9290_v7  ;;  %2461 = vmatmul.bf16.gmra.mxu0 %v11502_v24  ;;  %v9311_v15 = vadd.f32 %v1709_v27, %v1320_v36  ;;  %v1672_v34 = vpop.f32.mrf.mxu1  ;;  %v11506_v36 = vld [vmem:[#allocation24_spill] sm:$0xff]  ;;  %v1898_v7 = vshll.u32 %v1810_v53, 16  ;;  %v929_v3 = vrot.slane %v7656_v26, 7 }
 0x155   : > { %v9313_v16 = vadd.f32 %v1672_v34, %v1283_v12  ;;  %v11507_v27 = vunpack.c.l.bf16 %v11506_v36  ;;  %v1790_v17 = vunpack.c.l.b16 %v1048_v49 }
 0x156   : > { %11504 = vst [vmem:[#allocation63_spill] sm:$0xff] %v9311_v15  ;;  %v1900_v36 = vrot.slane %v1898_v7, 1 }
 0x157   : > { %v1323_v33 = vpop.f32.mrf.mxu2  ;;  %2668 = vmatmul.bf16.gmra.mxu1 %v9309_v6  ;;  %v1010_v15 = vmul.f32 %v924_v23, %v11507_v27  ;;  %v7475_v23 = vld [vmem:[#allocation11 + $0x78] sm:$0xff] }
 0x158   : > { %2269 = vmatmul.bf16.gmra.mxu3 %v11505_v47  ;;  %4328 = vmatpush.bf16.msra.mxu1 %v7475_v23  ;;  %v7428_v23 = vld [vmem:[#allocation9 + $0x1d0] sm:$0xff] }
 0x159   : > { %v1285_v4 = vpop.f32.mrf.mxu0  ;;  %v1047_v57 = vpack.c.bf16 %v1010_v15, %v1010_v15  ;;  %v9333_v15 = vsel %vm1817_vm3, %v1896_v29, %v1900_v36  ;;  %3034 = vmatpush.bf16.msra.mxu3 %v7428_v23 }
 0x15b   : > { %v1712_v54 = vpop.f32.mrf.mxu3 }
 0x15c   : > { %v9323_v12 = vadd.f32 %v1712_v54, %v1323_v33  ;;  %v1674_v34 = vpop.f32.mrf.mxu1  ;;  %v7655_v54 = vunpack.c.l.bf16 %v8000_v52 }
 0x15d   : > { %v9325_v47 = vadd.f32 %v1674_v34, %v1285_v4  ;;  %v1789_v4 = vunpack.c.l.b16 %v1047_v57 }
 0x15e   : > { %11510 = vst [vmem:[#allocation24_spill] sm:$0xff] %v9323_v12  ;;  %v927_v2 = vrot.slane %v7655_v54, 7  ;;  %v1902_v54 = vshrl.u32 %v1810_v53, 16 }
 0x15f   : > { %v1325_v58 = vpop.f32.mrf.mxu2  ;;  %v9336_v7 = vpack.c.b16 %v1790_v17, %v1789_v4 }
 0x160   : > { %v928_v57 = vsel %vm879_vm2, %v925_v43, %v927_v2  ;;  %v930_v49 = vsel %vm879_vm2, %v927_v2, %v929_v3  ;;  %v1904_v2 = vor.u32 %v1902_v54, %v1900_v36 }
 0x161   : > { %v2427_v24 = vpop.f32.mrf.mxu0  ;;  %v1906_v26 = vshll.u32 %v9336_v7, 16 }
 0x163   : > { %v1714_v42 = vpop.f32.mrf.mxu3 }
 0x164   : > { %2062 = vmatmul.bf16.gmra.mxu2 %v9309_v6  ;;  %2466 = vmatmul.bf16.gmra.mxu0 %v11511_v55  ;;  %v9330_v34 = vadd.f32 %v1714_v42, %v1325_v58  ;;  %v2634_v12 = vpop.f32.mrf.mxu1  ;;  %v11514_v42 = vld [vmem:[#allocation28_spill] sm:$0xff] }
 0x165   : > { %v11515_v4 = vunpack.c.l.bf16 %v11514_v42 }
 0x166   : > { %11512 = vst [vmem:[#allocation26_spill] sm:$0xff] %v9330_v34 }
 0x167   : > { %v2023_v25 = vpop.f32.mrf.mxu2  ;;  %2673 = vmatmul.bf16.gmra.mxu1 %v9333_v15  ;;  %v1012_v17 = vmul.f32 %v928_v57, %v11515_v4 }
 0x168   : > { %v2103_v27 = vadd.f32 %v2023_v25, %v9167_v62  ;;  %v11513_v62 = vld [vmem:[#allocation25_spill] sm:$0xff]  ;;  %v7420_v25 = vld [vmem:[#allocation9 + $0x190] sm:$0xff] }
 0x169   : > { %v2429_v33 = vpop.f32.mrf.mxu0  ;;  %2274 = vmatmul.bf16.gmra.mxu3 %v11513_v62  ;;  %2842 = vmatpush.bf16.msra.mxu2 %v7420_v25  ;;  %v11516_v62 = vld [vmem:[#allocation29_spill] sm:$0xff]  ;;  %v1049_v25 = vpack.c.bf16 %v1012_v17, %v1012_v17 }
 0x16a   : > { %v11517_v6 = vunpack.c.l.bf16 %v11516_v62 }
 0x16b   : > { %v2235_v29 = vpop.f32.mrf.mxu3 }
 0x16c   : > { %v2315_v34 = vadd.f32 %v2235_v29, %v2103_v27  ;;  %v2636_v55 = vpop.f32.mrf.mxu1  ;;  %v1013_v44 = vmul.f32 %v930_v49, %v11517_v6  ;;  %v8001_v27 = vld [vmem:[#allocation8 + $0x68] sm:$0xff]  }
 0x16d   : > { %v7659_v62 = vunpack.c.l.bf16 %v8001_v27  ;;  %v7660_v6 = vunpack.c.h.bf16 %v8001_v27 }
 0x16e   : > { %v2507_v43 = vadd.f32 %v2427_v24, %v2315_v34  ;;  %v1050_v8 = vpack.c.bf16 %v1013_v44, %v1013_v44  ;;  %v1791_v24 = vunpack.c.l.b16 %v1049_v25  ;;  %v11520_v44 = vld [vmem:[#allocation30_spill] sm:$0xff] }
 0x16f   : > { %v2025_v35 = vpop.f32.mrf.mxu2 }
 0x170   : > { %v2104_v58 = vadd.f32 %v2025_v35, %v9175_v38  ;;  %v11518_v38 = vld [vmem:[#allocation27_spill] sm:$0xff]  ;;  %v1908_v35 = vrot.slane %v1906_v26, 1  ;;  %v9349_v23 = vadd.f32 %v2634_v12, %v2507_v43  ;;  %v1792_v54 = vunpack.c.l.b16 %v1050_v8  ;;  %v11522_v8 = vld [vmem:[#allocation32_spill] sm:$0xff] }
 0x171   : > { %v2432_v52 = vpop.f32.mrf.mxu0  ;;  %v931_v12 = vrot.slane %v7659_v62, 7  ;;  %v933_v26 = vrot.slane %v7660_v6, 7  ;;  %v11523_v27 = vunpack.c.l.bf16 %v11522_v8 }
 0x172   : > { %11519 = vst [vmem:[#allocation28_spill] sm:$0xff] %v9349_v23  ;;  %v9353_v42 = vsel %vm1817_vm3, %v1904_v2, %v1908_v35  ;;  %v1812_v17 = vpack.c.b16 %v1792_v54, %v1791_v24 }
 0x173   : > { %v2237_v49 = vpop.f32.mrf.mxu3  ;;  %v932_v43 = vsel %vm879_vm2, %v929_v3, %v931_v12  ;;  %v934_v2 = vsel %vm879_vm2, %v931_v12, %v933_v26  ;;  %v11526_v3 = vld [vmem:[#allocation33_spill] sm:$0xff] }
 0x174   : > { %2067 = vmatmul.bf16.gmra.mxu2 %v9333_v15  ;;  %2471 = vmatmul.bf16.gmra.mxu0 %v11518_v38  ;;  %v2316_v36 = vadd.f32 %v2237_v49, %v2104_v58  ;;  %v2639_v34 = vpop.f32.mrf.mxu1  ;;  %v1014_v62 = vmul.f32 %v932_v43, %v11523_v27  ;;  %v7474_v27 = vld [vmem:[#allocation11 + $0x70] sm:$0xff] }
 0x175   : > { %4329 = vmatpush.bf16.msra.mxu1 %v7474_v27 }
 0x176   : > { %v2508_v4 = vadd.f32 %v2429_v33, %v2316_v36  ;;  %v11524_v33 = vld [vmem:[#allocation34_spill] sm:$0xff]  ;;  %v1051_v54 = vpack.c.bf16 %v1014_v62, %v1014_v62 }
 0x177   : > { %v2028_v53 = vpop.f32.mrf.mxu2  ;;  %2678 = vmatmul.bf16.gmra.mxu1 %v9353_v42  ;;  %v11525_v6 = vunpack.c.l.bf16 %v11524_v33 }
 0x178   : > { %v2105_v57 = vadd.f32 %v2028_v53, %v9187_v40  ;;  %v9357_v40 = vadd.f32 %v2636_v55, %v2508_v4  ;;  %v1910_v55 = vshrl.u32 %v9336_v7, 16  ;;  %v1914_v4 = vshll.u32 %v1812_v17, 16 }
 0x179   : > { %v2434_v29 = vpop.f32.mrf.mxu0  ;;  %2279 = vmatmul.bf16.gmra.mxu3 %v11520_v44  ;;  %v1015_v49 = vmul.f32 %v934_v2, %v11525_v6 }
 0x17a   : > { %11521 = vst [vmem:[#allocation29_spill] sm:$0xff] %v9357_v40  ;;  %v1912_v8 = vor.u32 %v1910_v55, %v1908_v35  ;;  %v1916_v43 = vrot.slane %v1914_v4, 1  ;;  %v1793_v40 = vunpack.c.l.b16 %v1051_v54  ;;  %v7427_v54 = vld [vmem:[#allocation9 + $0x1c8] sm:$0xff] }
 0x17b   : > { %v2240_v53 = vpop.f32.mrf.mxu3  ;;  %3035 = vmatpush.bf16.msra.mxu3 %v7427_v54 }
 0x17c   : > { %v2317_v36 = vadd.f32 %v2240_v53, %v2105_v57  ;;  %v2641_v23 = vpop.f32.mrf.mxu1  ;;  %v8002_v57 = vld [vmem:[#allocation8 + $0x70] sm:$0xff]   ;;  %v9373_v62 = vsel %vm1817_vm3, %v1912_v8, %v1916_v43 }
 0x17d   : > { %v7663_v7 = vunpack.c.l.bf16 %v8002_v57  ;;  %v7664_v33 = vunpack.c.h.bf16 %v8002_v57 }
 0x17e   : > { %v2509_v24 = vadd.f32 %v2432_v52, %v2317_v36 }
 0x17f   : > { %v2030_v0 = vpop.f32.mrf.mxu2 }
 0x180   : > { %v2106_v25 = vadd.f32 %v2030_v0, %v9199_v21  ;;  %v1052_v21 = vpack.c.bf16 %v1015_v49, %v1015_v49  ;;  %v9369_v12 = vadd.f32 %v2639_v34, %v2509_v24  ;;  %v935_v34 = vrot.slane %v7663_v7, 7  ;;  %v7419_v24 = vld [vmem:[#allocation9 + $0x188] sm:$0xff] }
 0x181   : > { %v2437_v58 = vpop.f32.mrf.mxu0  ;;  %v937_v49 = vrot.slane %v7664_v33, 7  ;;  %2843 = vmatpush.bf16.msra.mxu2 %v7419_v24  ;;  %v11529_v7 = vunpack.c.l.bf16 %v9009_v30  ;;  %v7435_v24 = vld [vmem:[#allocation9 + $0x208] sm:$0xff] }
 0x182   : > { %v1794_v38 = vunpack.c.l.b16 %v1052_v21  ;;  %3242 = vmatpush.bf16.msra.mxu0 %v7435_v24  ;;  %v11532_v24 = vunpack.c.l.bf16 %v9015_v1 }
 0x183   : > { %v2242_v6 = vpop.f32.mrf.mxu3 }
 0x184   : > { %2072 = vmatmul.bf16.gmra.mxu2 %v9353_v42  ;;  %2476 = vmatmul.bf16.gmra.mxu0 %v11526_v3  ;;  %v2318_v3 = vadd.f32 %v2242_v6, %v2106_v25  ;;  %v2644_v52 = vpop.f32.mrf.mxu1  ;;  %v9376_v36 = vpack.c.b16 %v1794_v38, %v1793_v40  ;;  %v936_v25 = vsel %vm879_vm2, %v933_v26, %v935_v34  ;;  %v11528_v40 = vunpack.c.l.bf16 %v8966_v61 }
 0x186   : > { %v2510_v35 = vadd.f32 %v2434_v29, %v2318_v3  ;;  %v1918_v3 = vshrl.u32 %v1812_v17, 16  ;;  %v1922_v38 = vshll.u32 %v9376_v36, 16 }
 0x187   : > { %v2033_v0 = vpop.f32.mrf.mxu2  ;;  %2683 = vmatmul.bf16.gmra.mxu1 %v9373_v62 }
 0x188   : > { %v2107_v2 = vadd.f32 %v2033_v0, %v9208_v39  ;;  %v11527_v39 = vld [vmem:[#allocation35_spill] sm:$0xff]  ;;  %v9379_v55 = vadd.f32 %v2641_v23, %v2510_v35  ;;  %v938_v0 = vsel %vm879_vm2, %v935_v34, %v937_v49  ;;  %v1016_v23 = vmul.f32 %v936_v25, %v11528_v40 }
 0x189   : > { %v2439_v53 = vpop.f32.mrf.mxu0  ;;  %2284 = vmatmul.bf16.gmra.mxu3 %v11527_v39  ;;  %v1017_v33 = vmul.f32 %v938_v0, %v11529_v7  ;;  %v1920_v6 = vor.u32 %v1918_v3, %v1916_v43  ;;  %v1924_v34 = vrot.slane %v1922_v38, 1 }
 0x18a   : > { %v1053_v35 = vpack.c.bf16 %v1016_v23, %v1016_v23 }
 0x18b   : > { %v2245_v29 = vpop.f32.mrf.mxu3  ;;  %v1054_v54 = vpack.c.bf16 %v1017_v33, %v1017_v33  ;;  %v9395_v40 = vsel %vm1817_vm3, %v1920_v6, %v1924_v34 }
 0x18c   : > { %v2319_v27 = vadd.f32 %v2245_v29, %v2107_v2  ;;  %v2646_v57 = vpop.f32.mrf.mxu1  ;;  %v8003_v2 = vld [vmem:[#allocation8 + $0x78] sm:$0xff]  }
 0x18d   : > { %v7667_v30 = vunpack.c.l.bf16 %v8003_v2  ;;  %v7668_v0 = vunpack.c.h.bf16 %v8003_v2  ;;  %v1796_v38 = vunpack.c.l.b16 %v1054_v54  ;;  %v11533_v2 = vunpack.c.l.bf16 %v9068_v60 }
 0x18e   : > { %v2511_v26 = vadd.f32 %v2437_v58, %v2319_v27  ;;  %v1795_v58 = vunpack.c.l.b16 %v1053_v35 }
 0x18f   : > { %v2035_v4 = vpop.f32.mrf.mxu2  ;;  %v9397_v23 = vrot.slane %v7668_v0, 7 }
 0x190   : > { %v2108_v21 = vadd.f32 %v2035_v4, %v9220_v5  ;;  %v11530_v5 = vld [vmem:[#allocation37_spill] sm:$0xff]  ;;  %v9391_v4 = vadd.f32 %v2644_v52, %v2511_v26  ;;  %v939_v52 = vrot.slane %v7667_v30, 7  ;;  %v9403_v26 = vpack.c.b16 %v1796_v38, %v1795_v58  ;;  %v399_v58 = vld [vmem:[%s8633_s1 + $0x108] sm:$0xff] }
 0x191   : > { %v2442_v8 = vpop.f32.mrf.mxu0 }
 0x192   : > { %v940_v6 = vsel %vm879_vm2, %v937_v49, %v939_v52  ;;  %v1930_v49 = vshll.u32 %v9403_v26, 16 }
 0x193   : > { %v2247_v29 = vpop.f32.mrf.mxu3  ;;  %v1018_v54 = vmul.f32 %v940_v6, %v11532_v24  ;;  %v7473_v6 = vld [vmem:[#allocation11 + $0x68] sm:$0xff]  ;;  %v8004_v24 = vld [vmem:[#allocation8 + $0x80] sm:$0xff]  }
 0x194   : > { %2077 = vmatmul.bf16.gmra.mxu2 %v9373_v62  ;;  %2481 = vmatmul.bf16.gmra.mxu0 %v11530_v5  ;;  %v2320_v43 = vadd.f32 %v2247_v29, %v2108_v21  ;;  %v2649_v3 = vpop.f32.mrf.mxu1  ;;  %v942_v21 = vsel %vm879_vm2, %v939_v52, %v9397_v23  ;;  %v1926_v29 = vshrl.u32 %v9376_v36, 16  ;;  %v1932_v36 = vrot.slane %v1930_v49, 1 }
 0x195   : > { %v1055_v1 = vpack.c.bf16 %v1018_v54, %v1018_v54  ;;  %4330 = vmatpush.bf16.msra.mxu1 %v7473_v6  ;;  %v7672_v54 = vunpack.c.h.bf16 %v8004_v24 }
 0x196   : > { %v2512_v27 = vadd.f32 %v2439_v53, %v2320_v43  ;;  %v8188_v43 = vld [vmem:[#allocation6 + $0x80] sm:$0xff]  }
 0x197   : > { %v2038_v17 = vpop.f32.mrf.mxu2  ;;  %2688 = vmatmul.bf16.gmra.mxu1 %v9395_v40  ;;  %v7600_v38 = vunpack.c.h.bf16 %v8188_v43  ;;  %v400_v43 = vld [vmem:[%s8633_s1 + $0x110] sm:$0xff] }
 0x198   : > { %v2109_v61 = vadd.f32 %v2038_v17, %v9229_v31  ;;  %v11531_v31 = vld [vmem:[#allocation39_spill] sm:$0xff]  ;;  %v9401_v7 = vadd.f32 %v2646_v57, %v2512_v27  ;;  %v1019_v57 = vmul.f32 %v942_v21, %v11533_v2  ;;  %v9420_v27 = vpack.c.bf16 %v399_v58, %v399_v58 }
 0x199   : > { %v2444_v25 = vpop.f32.mrf.mxu0  ;;  %2289 = vmatmul.bf16.gmra.mxu3 %v11531_v31  ;;  %v9424_v21 = vrot.slane %v7600_v38, 1  ;;  %v9437_v49 = vpack.c.bf16 %v400_v43, %v400_v43 }
 0x19a   : > { %v1056_v52 = vpack.c.bf16 %v1019_v57, %v1019_v57 }
 0x19b   : > { %v2250_v53 = vpop.f32.mrf.mxu3 }
 0x19c   : > { %v2321_v30 = vadd.f32 %v2250_v53, %v2109_v61  ;;  %v2651_v0 = vpop.f32.mrf.mxu1  ;;  %v1798_v58 = vunpack.c.l.b16 %v1056_v52 }
 0x19f   : > { %v2040_v33 = vpop.f32.mrf.mxu2 }
 0x1a0   : > { %v2110_v35 = vadd.f32 %v2040_v33, %v9241_v48  ;;  %v2513_v48 = vadd.f32 %v2442_v8, %v2321_v30  ;;  %v1928_v33 = vor.u32 %v1926_v29, %v1924_v34  ;;  %v7671_v8 = vunpack.c.l.bf16 %v8004_v24  ;;  %v7418_v24 = vld [vmem:[#allocation9 + $0x180] sm:$0xff] }
 0x1a1   : > { %v9409_v17 = vpop.f32.mrf.mxu0  ;;  %v1797_v30 = vunpack.c.l.b16 %v1055_v1  ;;  %2844 = vmatpush.bf16.msra.mxu2 %v7418_v24 }
 0x1a2   : > { %v9422_v60 = vadd.f32 %v2649_v3, %v2513_v48  ;;  %v511_v3 = vunpack.c.l.bf16 %v9420_v27  ;;  %v9432_v29 = vsel %vm1817_vm3, %v1928_v33, %v1932_v36  ;;  %v943_v38 = vrot.slane %v7671_v8, 7 }
 0x1a3   : > { %v2252_v57 = vpop.f32.mrf.mxu3  ;;  %v9442_v1 = vpack.c.b16 %v1798_v58, %v1797_v30 }
 0x1a4   : > { %2082 = vmatmul.bf16.gmra.mxu2 %v9395_v40  ;;  %2486 = vmatmul.bf16.gmra.mxu0 %v9055_v19  ;;  %11534 = vst [vmem:[#allocation30_spill] sm:$0xff] %v9422_v60  ;;  %v2322_v48 = vadd.f32 %v2252_v57, %v2110_v35  ;;  %v2654_v34 = vpop.f32.mrf.mxu1  ;;  %v7426_v57 = vld [vmem:[#allocation9 + $0x1c0] sm:$0xff]  ;;  %v944_v8 = vsel %vm879_vm2, %v9397_v23, %v943_v38 }
 0x1a5   : > { %3036 = vmatpush.bf16.msra.mxu3 %v7426_v57  ;;  %v1938_v58 = vshll.u32 %v9442_v1, 16 }
 0x1a6   : > { %v2514_v6 = vadd.f32 %v2444_v25, %v2322_v48 }
 0x1a7   : > { %v2043_v61 = vpop.f32.mrf.mxu2  ;;  %2693 = vmatmul.bf16.gmra.mxu1 %v9432_v29  ;;  %v1940_v57 = vrot.slane %v1938_v58, 1 }
 0x1a8   : > { %v2111_v53 = vadd.f32 %v2043_v61, %v9250_v51  ;;  %v654_v51 = vsel %vm587_vm0, %v9072_v10, %v9424_v21  ;;  %v9439_v61 = vrot.slane %v7672_v54, 7  ;;  %v9445_v35 = vadd.f32 %v2651_v0, %v2514_v6 }
 0x1a9   : > { %v9427_v2 = vpop.f32.mrf.mxu0  ;;  %v729_v52 = vmul.f32 %v654_v51, %v511_v3  ;;  %2294 = vmatmul.bf16.gmra.mxu3 %v9095_v11  ;;  %v512_v10 = vunpack.c.l.bf16 %v9437_v49  ;;  %v1934_v0 = vshrl.u32 %v9403_v26, 16  ;;  %v9457_v51 = vld [vmem:[#allocation6 + $0x88] sm:$0xff]  }
 0x1aa   : > { %11535 = vst [vmem:[#allocation32_spill] sm:$0xff] %v9445_v35  ;;  %v946_v25 = vsel %vm879_vm2, %v943_v38, %v9439_v61  ;;  %v7603_v24 = vunpack.c.l.bf16 %v9457_v51 }
 0x1ab   : > { %v2255_v30 = vpop.f32.mrf.mxu3  ;;  %v766_v48 = vpack.c.bf16 %v729_v52, %v729_v52  ;;  %v1021_v23 = vmul.f32 %v946_v25, %v512_v10  ;;  %v1936_v26 = vor.u32 %v1934_v0, %v1932_v36 }
 0x1ac   : > { %v2323_v6 = vadd.f32 %v2255_v30, %v2111_v53  ;;  %v7434_v53 = vld [vmem:[#allocation9 + $0x200] sm:$0xff] }
 0x1ad   : > { %v2154_v35 = vunpack.c.l.b16 %v766_v48  ;;  %v1058_v19 = vpack.c.bf16 %v1021_v23, %v1021_v23  ;;  %3243 = vmatpush.bf16.msra.mxu0 %v7434_v53  ;;  %v9475_v0 = vsel %vm1817_vm3, %v1936_v26, %v1940_v57 }
 0x1ae   : > { %v2515_v38 = vadd.f32 %v9409_v17, %v2323_v6  ;;  %v401_v17 = vld [vmem:[%s8633_s1 + $0x118] sm:$0xff] }
 0x1af   : > { %v2045_v33 = vpop.f32.mrf.mxu2  ;;  %v2558_v23 = vunpack.c.l.b16 %v1058_v19 }
 0x1b0   : > { %v2112_v43 = vadd.f32 %v2045_v33, %v9262_v59  ;;  %v9459_v59 = vpop.f32.mrf.mxu1  ;;  %v1020_v33 = vmul.f32 %v944_v8, %v511_v3  ;;  %v9465_v52 = vadd.f32 %v2654_v34, %v2515_v38  ;;  %v9468_v8 = vld [vmem:[#allocation8 + $0x88] sm:$0xff]   ;;  %v2156_v34 = vpack.c.b16 %v2154_v35, %v9116_v46 }
 0x1b1   : > { %v9453_v54 = vpop.f32.mrf.mxu0  ;;  %v7675_v6 = vunpack.c.l.bf16 %v9468_v8 }
 0x1b2   : > { %11536 = vst [vmem:[#allocation34_spill] sm:$0xff] %v9465_v52  ;;  %v1057_v30 = vpack.c.bf16 %v1020_v33, %v1020_v33  ;;  %v2159_v35 = vshrl.u32 %v2156_v34, 16  ;;  %v2162_v53 = vshll.u32 %v2156_v34, 16 }
 0x1b3   : > { %v2257_v36 = vpop.f32.mrf.mxu3 }
 0x1b4   : > { %2087 = vmatmul.bf16.gmra.mxu2 %v9432_v29  ;;  %2491 = vmatmul.bf16.gmra.mxu0 %v9106_v20  ;;  %v9470_v20 = vrot.slane %v7603_v24, 1  ;;  %v2324_v58 = vadd.f32 %v2257_v36, %v2112_v43  ;;  %v1799_v33 = vunpack.c.l.b16 %v1057_v30 }
 0x1b6   : > { %11537 = vst [vmem:[#allocation35_spill] sm:$0xff] %v9470_v20  ;;  %v9483_v38 = vadd.f32 %v9427_v2, %v2324_v58  ;;  %v656_v24 = vsel %vm587_vm0, %v9424_v21, %v9470_v20  ;;  %v9490_v43 = vpack.c.b16 %v2558_v23, %v1799_v33  ;;  %v1942_v58 = vshrl.u32 %v9442_v1, 16 }
 0x1b7   : > { %v2048_v60 = vpop.f32.mrf.mxu2  ;;  %2698 = vmatmul.bf16.gmra.mxu1 %v9475_v0  ;;  %v730_v30 = vmul.f32 %v656_v24, %v512_v10  ;;  %v2164_v10 = vrot.slane %v2162_v53, 4  ;;  %v1816_v24 = vpack.c.b16 %v1799_v33, %v1799_v33 }
 0x1b8   : > { %v2113_v3 = vadd.f32 %v2048_v60, %v9271_v14  ;;  %v2659_v48 = vpop.f32.mrf.mxu1  ;;  %v9478_v14 = vpack.c.bf16 %v401_v17, %v401_v17  ;;  %v9480_v60 = vrot.slane %v7675_v6, 7  ;;  %v2563_v23 = vshll.u32 %v9490_v43, 16 }
 0x1b9   : > { %v2454_v25 = vpop.f32.mrf.mxu0  ;;  %2299 = vmatmul.bf16.gmra.mxu3 %v9128_v45  ;;  %v767_v34 = vpack.c.bf16 %v730_v30, %v730_v30  ;;  %v1946_v53 = vshll.u32 %v1816_v24, 16 }
 0x1ba   : > { %11538 = vst [vmem:[#allocation37_spill] sm:$0xff] %v9478_v14  ;;  %v11364_v19 = vunpack.c.l.bf16 %v9478_v14  ;;  %v948_v2 = vsel %vm879_vm2, %v9439_v61, %v9480_v60  ;;  %v2565_v1 = vrot.slane %v2563_v23, 1 }
 0x1bb   : > { %11539 = vst [vmem:[#allocation39_spill] sm:$0xff] %v9480_v60  ;;  %v2260_v21 = vpop.f32.mrf.mxu3  ;;  %v7472_v60 = vld [vmem:[#allocation11 + $0x60] sm:$0xff] }
 0x1bc   : > { %v2325_v6 = vadd.f32 %v2260_v21, %v2113_v3  ;;  %v1022_v52 = vmul.f32 %v948_v2, %v11364_v19  ;;  %v1944_v21 = vor.u32 %v1942_v58, %v1940_v57  ;;  %v9511_v19 = vunpack.c.l.b16 %v767_v34  ;;  %4331 = vmatpush.bf16.msra.mxu1 %v7472_v60 }
 0x1bd   : > { %v2367_v60 = vunpack.c.l.b16 %v9437_v49 }
 0x1be   : > { %v2517_v61 = vadd.f32 %v9453_v54, %v2325_v6  ;;  %v1059_v45 = vpack.c.bf16 %v1022_v52, %v1022_v52  ;;  %v2366_v52 = vunpack.c.l.b16 %v9420_v27 }
 0x1bf   : > { %v2050_v46 = vpop.f32.mrf.mxu2 }
 0x1c0   : > { %v2114_v26 = vadd.f32 %v2050_v46, %v9283_v50  ;;  %v9497_v36 = vpop.f32.mrf.mxu1  ;;  %v2161_v50 = vrot.slane %v2159_v35, 3  ;;  %v9506_v3 = vadd.f32 %v2659_v48, %v2517_v61  ;;  %v9514_v48 = vsel %vm1817_vm3, %v1944_v21, %v2565_v1 }
 0x1c1   : > { %v2457_v17 = vpop.f32.mrf.mxu0  ;;  %v9516_v33 = vunpack.c.l.b16 %v1059_v45  ;;  %v2567_v61 = vshrl.u32 %v9490_v43, 16 }
 0x1c2   : > { %v9508_v20 = vor.u32 %v2164_v10, %v2161_v50  ;;  %v9534_v10 = vpack.c.b16 %v2367_v60, %v2366_v52 }
 0x1c3   : > { %v2262_v30 = vpop.f32.mrf.mxu3  ;;  %v2561_v58 = vpack.c.b16 %v9516_v33, %v9516_v33  ;;  %v9543_v52 = vor.u32 %v2567_v61, %v2565_v1 }
 0x1c4   : > { %2092 = vmatmul.bf16.gmra.mxu2 %v9475_v0  ;;  %2496 = vmatmul.bf16.gmra.mxu0 %v9141_v56  ;;  %v2326_v56 = vadd.f32 %v2262_v30, %v2114_v26  ;;  %v9521_v57 = vsel %vm1411_vm1, %v9114_v41, %v9508_v20  ;;  %v1948_v26 = vrot.slane %v1946_v53, 1 }
 0x1c5   : > { %v2571_v24 = vshll.u32 %v2561_v58, 16 }
 0x1c6   : > { %v9527_v6 = vadd.f32 %v2454_v25, %v2326_v56  ;;  %v1949_v49 = vsel %vm1817_vm3, %v1944_v21, %v1948_v26 }
 0x1c7   : > { %v2053_v46 = vpop.f32.mrf.mxu2  ;;  %2703 = vmatmul.bf16.gmra.mxu1 %v9514_v48  ;;  %v2573_v60 = vrot.slane %v2571_v24, 1 }
 0x1c8   : > { %v2115_v2 = vadd.f32 %v2053_v46, %v9292_v18  ;;  %v2664_v54 = vpop.f32.mrf.mxu1  ;;  %v2157_v18 = vpack.c.b16 %v9511_v19, %v9511_v19 }
 0x1c9   : > { %v2459_v35 = vpop.f32.mrf.mxu0  ;;  %2304 = vmatmul.bf16.gmra.mxu3 %v9521_v57  ;;  %v2574_v58 = vsel %vm1817_vm3, %v9543_v52, %v2573_v60 }
 0x1ca   : > { %v2168_v23 = vshrl.u32 %v2157_v18, 16  ;;  %v2171_v50 = vshll.u32 %v2157_v18, 16 }
 0x1cb   : > { %v2265_v56 = vpop.f32.mrf.mxu3 }
 0x1cc   : > { %v2327_v25 = vadd.f32 %v2265_v56, %v2115_v2  ;;  %v2170_v46 = vrot.slane %v2168_v23, 3  ;;  %v2173_v53 = vrot.slane %v2171_v50, 4 }
 0x1ce   : > { %v2174_v21 = vor.u32 %v2173_v53, %v2170_v46 }
 0x1cf   : > { %v2055_v45 = vpop.f32.mrf.mxu2 }
 0x1d0   : > { %v2116_v41 = vadd.f32 %v2055_v45, %v9304_v28  ;;  %v9537_v34 = vpop.f32.mrf.mxu1  ;;  %v2519_v28 = vadd.f32 %v2457_v17, %v2327_v25  ;;  %v2175_v23 = vsel %vm1411_vm1, %v9508_v20, %v2174_v21 }
 0x1d1   : > { %v2462_v27 = vpop.f32.mrf.mxu0 }
 0x1d2   : > { %v9541_v30 = vadd.f32 %v2664_v54, %v2519_v28 }
 0x1d3   : > { %v2267_v45 = vpop.f32.mrf.mxu3 }
 0x1d4   : > { %2097 = vmatmul.bf16.gmra.mxu2 %v1949_v49  ;;  %2501 = vmatmul.bf16.gmra.mxu0 %v9534_v10  ;;  %v2328_v56 = vadd.f32 %v2267_v45, %v2116_v41 }
 0x1d6   : > { %v9550_v17 = vadd.f32 %v2459_v35, %v2328_v56  ;;  %v7471_v35 = vld [vmem:[#allocation11 + $0x58] sm:$0xff] }
 0x1d7   : > { %v2058_v18 = vpop.f32.mrf.mxu2  ;;  %2708 = vmatmul.bf16.gmra.mxu1 %v2574_v58 }
 0x1d8   : > { %v2117_v2 = vadd.f32 %v2058_v18, %v9313_v16  ;;  %v2669_v43 = vpop.f32.mrf.mxu1  ;;  %4332 = vmatpush.bf16.msra.mxu1 %v7471_v35 }
 0x1d9   : > { %v2464_v26 = vpop.f32.mrf.mxu0  ;;  %2309 = vmatmul.bf16.gmra.mxu3 %v2175_v23 }
 0x1db   : > { %v2270_v49 = vpop.f32.mrf.mxu3 }
 0x1dc   : > { %v2329_v16 = vadd.f32 %v2270_v49, %v2117_v2 }
 0x1de   : > { %v2521_v41 = vadd.f32 %v2462_v27, %v2329_v16  ;;  %v11548_v16 = vld [vmem:[#allocation31_spill] sm:$0xff] }
 0x1df   : > { %v2060_v1 = vpop.f32.mrf.mxu2 }
 0x1e0   : > { %v2118_v54 = vadd.f32 %v2060_v1, %v9325_v47  ;;  %v9553_v25 = vpop.f32.mrf.mxu1  ;;  %v9557_v61 = vadd.f32 %v2669_v43, %v2521_v41 }
 0x1e1   : > { %v2467_v50 = vpop.f32.mrf.mxu0  ;;  %11540 = vst [vmem:[#allocation64_spill] sm:$0xff] %v9553_v25 }
 0x1e2   : > { %11541 = vst [vmem:[#allocation65_spill] sm:$0xff] %v9557_v61 }
 0x1e3   : > { %v2272_v28 = vpop.f32.mrf.mxu3 }
 0x1e4   : > { %2845 = vmatmul.bf16.vlgmr.msra.gmra.mxu2 %v8905_v63  ;;  %3244 = vmatmul.bf16.vlgmr.msra.gmra.mxu0 %v9185_v13  ;;  %v2330_v47 = vadd.f32 %v2272_v28, %v2118_v54 }
 0x1e6   : > { %v9560_v60 = vadd.f32 %v2464_v26, %v2330_v47  ;;  %v11546_v26 = vld [vmem:[#allocation50_spill] sm:$0xff] }
 0x1e7   : > { %v2063_v24 = vpop.f32.mrf.mxu2  ;;  %v11551_v47 = vld [vmem:[#allocation38_spill] sm:$0xff] }
 0x1e8   : > { %v2119_v46 = vadd.f32 %v2063_v24, %v9170_v22  ;;  %v2674_v18 = vpop.f32.mrf.mxu1  ;;  %11542 = vst [vmem:[#allocation66_spill] sm:$0xff] %v9560_v60  ;;  %v11544_v22 = vld [vmem:[#allocation52_spill] sm:$0xff]  ;;  %v11549_v24 = vld [vmem:[#allocation51_spill] sm:$0xff] }
 0x1e9   : > { %v2469_v53 = vpop.f32.mrf.mxu0  ;;  %3037 = vmatmul.bf16.vlgmr.msra.gmra.mxu3 %v8858_v37 }
 0x1ec   : > { %v2275_v27 = vpop.f32.mrf.mxu3 }
 0x1ed   : > { %v2331_v2 = vadd.f32 %v2275_v27, %v2119_v46 }
 0x1ef   : > { %v2065_v21 = vpop.f32.mrf.mxu2  ;;  %v2523_v56 = vadd.f32 %v2467_v50, %v2331_v2  ;;  %v11554_v2 = vld [vmem:[#allocation53_spill] sm:$0xff] }
 0x1f0   : > { %v2120_v63 = vadd.f32 %v2065_v21, %v9182_v9  ;;  %v9564_v45 = vpop.f32.mrf.mxu1 }
 0x1f1   : > { %v2472_v13 = vpop.f32.mrf.mxu0  ;;  %11543 = vst [vmem:[#allocation67_spill] sm:$0xff] %v9564_v45  ;;  %v9568_v43 = vadd.f32 %v2674_v18, %v2523_v56  ;;  %v11552_v18 = vld [vmem:[#allocation54_spill] sm:$0xff] }
 0x1f3   : > { %11545 = vst [vmem:[#allocation52_spill] sm:$0xff] %v9568_v43 }
 0x1f4   : > { %2850 = vmatmul.bf16.gmra.mxu2 %v8963_v32  ;;  %3249 = vmatmul.bf16.gmra.mxu0 %v11544_v22  ;;  %v2277_v37 = vpop.f32.mrf.mxu3 }
 0x1f5   : > { %v2332_v54 = vadd.f32 %v2277_v37, %v2120_v63 }
 0x1f7   : > { %v2068_v58 = vpop.f32.mrf.mxu2  ;;  %v9571_v9 = vadd.f32 %v2469_v53, %v2332_v54  ;;  %v7470_v53 = vld [vmem:[#allocation11 + $0x50] sm:$0xff] }
 0x1f8   : > { %v2121_v23 = vadd.f32 %v2068_v58, %v11546_v26  ;;  %v2679_v49 = vpop.f32.mrf.mxu1  ;;  %4333 = vmatpush.bf16.msra.mxu1 %v7470_v53 }
 0x1f9   : > { %v2474_v1 = vpop.f32.mrf.mxu0  ;;  %11547 = vst [vmem:[#allocation50_spill] sm:$0xff] %v9571_v9  ;;  %3042 = vmatmul.bf16.gmra.mxu3 %v11548_v16 }
 0x1fc   : > { %v2280_v46 = vpop.f32.mrf.mxu3 }
 0x1fd   : > { %v2333_v28 = vadd.f32 %v2280_v46, %v2121_v23  ;;  %v11556_v23 = vld [vmem:[#allocation36_spill] sm:$0xff] }
 0x1ff   : > { %v2070_v41 = vpop.f32.mrf.mxu2  ;;  %v2525_v21 = vadd.f32 %v2472_v13, %v2333_v28 }
 0x200   : > { %v2122_v35 = vadd.f32 %v2070_v41, %v11549_v24  ;;  %v9575_v50 = vpop.f32.mrf.mxu1  ;;  %v11557_v41 = vld [vmem:[#allocation55_spill] sm:$0xff] }
 0x201   : > { %v2477_v32 = vpop.f32.mrf.mxu0  ;;  %11550 = vst [vmem:[#allocation31_spill] sm:$0xff] %v9575_v50  ;;  %v9579_v27 = vadd.f32 %v2679_v49, %v2525_v21 }
 0x203   : > { %11553 = vst [vmem:[#allocation51_spill] sm:$0xff] %v9579_v27 }
 0x204   : > { %2855 = vmatmul.bf16.gmra.mxu2 %v11551_v47  ;;  %3254 = vmatmul.bf16.gmra.mxu0 %v11552_v18  ;;  %v2282_v58 = vpop.f32.mrf.mxu3  ;;  %v11559_v47 = vld [vmem:[#allocation42_spill] sm:$0xff] }
 0x205   : > { %v2334_v26 = vadd.f32 %v2282_v58, %v2122_v35  ;;  %v11560_v18 = vld [vmem:[#allocation58_spill] sm:$0xff] }
 0x207   : > { %v2073_v63 = vpop.f32.mrf.mxu2  ;;  %v9582_v54 = vadd.f32 %v2474_v1, %v2334_v26  ;;  %v11562_v1 = vld [vmem:[#allocation56_spill] sm:$0xff] }
 0x208   : > { %v2123_v22 = vadd.f32 %v2073_v63, %v11554_v2  ;;  %v2684_v37 = vpop.f32.mrf.mxu1 }
 0x209   : > { %v2479_v56 = vpop.f32.mrf.mxu0  ;;  %11555 = vst [vmem:[#allocation38_spill] sm:$0xff] %v9582_v54  ;;  %3047 = vmatmul.bf16.gmra.mxu3 %v11556_v23 }
 0x20c   : > { %v2285_v13 = vpop.f32.mrf.mxu3 }
 0x20d   : > { %v2335_v49 = vadd.f32 %v2285_v13, %v2123_v22  ;;  %v11565_v13 = vld [vmem:[#allocation57_spill] sm:$0xff] }
 0x20f   : > { %v2075_v16 = vpop.f32.mrf.mxu2  ;;  %v2527_v21 = vadd.f32 %v2477_v32, %v2335_v49  ;;  %v11568_v49 = vld [vmem:[#allocation60_spill] sm:$0xff] }
 0x210   : > { %v2124_v24 = vadd.f32 %v2075_v16, %v11557_v41  ;;  %v9586_v28 = vpop.f32.mrf.mxu1  ;;  %v11564_v41 = vld [vmem:[#allocation40_spill] sm:$0xff] }
 0x211   : > { %v2482_v46 = vpop.f32.mrf.mxu0  ;;  %11558 = vst [vmem:[#allocation54_spill] sm:$0xff] %v9586_v28  ;;  %v9590_v63 = vadd.f32 %v2684_v37, %v2527_v21  ;;  %v11567_v37 = vld [vmem:[#allocation46_spill] sm:$0xff] }
 0x213   : > { %11561 = vst [vmem:[#allocation53_spill] sm:$0xff] %v9590_v63 }
 0x214   : > { %2860 = vmatmul.bf16.gmra.mxu2 %v11559_v47  ;;  %3259 = vmatmul.bf16.gmra.mxu0 %v11560_v18  ;;  %v2287_v58 = vpop.f32.mrf.mxu3 }
 0x215   : > { %v2336_v26 = vadd.f32 %v2287_v58, %v2124_v24 }
 0x217   : > { %v2078_v35 = vpop.f32.mrf.mxu2  ;;  %v9593_v16 = vadd.f32 %v2479_v56, %v2336_v26  ;;  %v7469_v56 = vld [vmem:[#allocation11 + $0x48] sm:$0xff] }
 0x218   : > { %v2125_v53 = vadd.f32 %v2078_v35, %v11562_v1  ;;  %v2689_v23 = vpop.f32.mrf.mxu1  ;;  %v11570_v1 = vld [vmem:[#allocation59_spill] sm:$0xff]  ;;  %4334 = vmatpush.bf16.msra.mxu1 %v7469_v56 }
 0x219   : > { %v2484_v2 = vpop.f32.mrf.mxu0  ;;  %11563 = vst [vmem:[#allocation36_spill] sm:$0xff] %v9593_v16  ;;  %3052 = vmatmul.bf16.gmra.mxu3 %v11564_v41 }
 0x21c   : > { %v2290_v28 = vpop.f32.mrf.mxu3 }
 0x21d   : > { %v2337_v18 = vadd.f32 %v2290_v28, %v2125_v53  ;;  %v11572_v28 = vld [vmem:[#allocation43_spill] sm:$0xff] }
 0x21f   : > { %v2080_v22 = vpop.f32.mrf.mxu2  ;;  %v2529_v21 = vadd.f32 %v2482_v46, %v2337_v18 }
 0x220   : > { %v2126_v27 = vadd.f32 %v2080_v22, %v11565_v13  ;;  %v9597_v32 = vpop.f32.mrf.mxu1 }
 0x221   : > { %v2487_v47 = vpop.f32.mrf.mxu0  ;;  %11566 = vst [vmem:[#allocation55_spill] sm:$0xff] %v9597_v32  ;;  %v9601_v35 = vadd.f32 %v2689_v23, %v2529_v21  ;;  %v11575_v21 = vld [vmem:[#allocation49_spill] sm:$0xff] }
 0x223   : > { %11569 = vst [vmem:[#allocation42_spill] sm:$0xff] %v9601_v35 }
 0x224   : > { %2865 = vmatmul.bf16.gmra.mxu2 %v11567_v37  ;;  %3264 = vmatmul.bf16.gmra.mxu0 %v11568_v49  ;;  %v2292_v41 = vpop.f32.mrf.mxu3  ;;  %v11573_v37 = vld [vmem:[#allocation61_spill] sm:$0xff] }
 0x225   : > { %v2338_v22 = vadd.f32 %v2292_v41, %v2126_v27 }
 0x227   : > { %v2083_v24 = vpop.f32.mrf.mxu2  ;;  %v9604_v63 = vadd.f32 %v2484_v2, %v2338_v22  ;;  %v11578_v2 = vld [vmem:[#allocation17_spill] sm:$0xff] }
 0x228   : > { %v2127_v58 = vadd.f32 %v2083_v24, %v11570_v1  ;;  %v2694_v13 = vpop.f32.mrf.mxu1  ;;  %v11576_v24 = vld [vmem:[#allocation62_spill] sm:$0xff] }
 0x229   : > { %v2489_v26 = vpop.f32.mrf.mxu0  ;;  %11571 = vst [vmem:[#allocation58_spill] sm:$0xff] %v9604_v63  ;;  %3057 = vmatmul.bf16.gmra.mxu3 %v11572_v28 }
 0x22c   : > { %v2295_v46 = vpop.f32.mrf.mxu3 }
 0x22d   : > { %v2339_v23 = vadd.f32 %v2295_v46, %v2127_v58  ;;  %v11581_v46 = vld [vmem:[#allocation19_spill] sm:$0xff] }
 0x22f   : > { %v2085_v53 = vpop.f32.mrf.mxu2  ;;  %v2531_v56 = vadd.f32 %v2487_v47, %v2339_v23  ;;  %v11582_v47 = vld [vmem:[#allocation20_spill] sm:$0xff] }
 0x230   : > { %v2128_v32 = vadd.f32 %v2085_v53, %v11573_v37  ;;  %v9608_v18 = vpop.f32.mrf.mxu1  ;;  %v11580_v37 = vld [vmem:[#allocation47_spill] sm:$0xff] }
 0x231   : > { %v2492_v49 = vpop.f32.mrf.mxu0  ;;  %11574 = vst [vmem:[#allocation56_spill] sm:$0xff] %v9608_v18  ;;  %v9612_v1 = vadd.f32 %v2694_v13, %v2531_v56  ;;  %v11583_v13 = vld [vmem:[#allocation23_spill] sm:$0xff] }
 0x233   : > { %11577 = vst [vmem:[#allocation40_spill] sm:$0xff] %v9612_v1  ;;  %v7498_v1 = vld [vmem:[#allocation11 + $0x130] sm:$0xff] }
 0x234   : > { %2870 = vmatmul.bf16.gmra.mxu2 %v11575_v21  ;;  %3269 = vmatmul.bf16.gmra.mxu0 %v11576_v24  ;;  %v2297_v28 = vpop.f32.mrf.mxu3 }
 0x235   : > { %v2340_v35 = vadd.f32 %v2297_v28, %v2128_v32 }
 0x237   : > { %v2088_v27 = vpop.f32.mrf.mxu2  ;;  %v9615_v53 = vadd.f32 %v2489_v26, %v2340_v35  ;;  %v7468_v35 = vld [vmem:[#allocation11 + $0x40] sm:$0xff] }
 0x238   : > { %v2129_v41 = vadd.f32 %v2088_v27, %v11578_v2  ;;  %v2699_v63 = vpop.f32.mrf.mxu1  ;;  %v11586_v26 = vld [vmem:[#allocation21_spill] sm:$0xff]  ;;  %4335 = vmatpush.bf16.msra.mxu1 %v7468_v35 }
 0x239   : > { %v2494_v22 = vpop.f32.mrf.mxu0  ;;  %11579 = vst [vmem:[#allocation57_spill] sm:$0xff] %v9615_v53  ;;  %3062 = vmatmul.bf16.gmra.mxu3 %v11580_v37 }
 0x23c   : > { %v2300_v16 = vpop.f32.mrf.mxu3 }
 0x23d   : > { %v2341_v24 = vadd.f32 %v2300_v16, %v2129_v41  ;;  %v11588_v16 = vld [vmem:[#allocation18_spill] sm:$0xff] }
 0x23f   : > { %v2090_v58 = vpop.f32.mrf.mxu2  ;;  %v2533_v23 = vadd.f32 %v2492_v49, %v2341_v24 }
 0x240   : > { %v2130_v18 = vadd.f32 %v2090_v58, %v11581_v46  ;;  %v9621_v56 = vpop.f32.mrf.mxu1 }
 0x241   : > { %v2497_v21 = vpop.f32.mrf.mxu0  ;;  %11584 = vst [vmem:[#allocation46_spill] sm:$0xff] %v9621_v56  ;;  %v9623_v27 = vadd.f32 %v2699_v63, %v2533_v23  ;;  %v11590_v23 = vld [vmem:[#allocation25_spill] sm:$0xff] }
 0x243   : > { %11585 = vst [vmem:[#allocation60_spill] sm:$0xff] %v9623_v27 }
 0x244   : > { %2875 = vmatmul.bf16.gmra.mxu2 %v11582_v47  ;;  %3274 = vmatmul.bf16.gmra.mxu0 %v11583_v13  ;;  %v2302_v37 = vpop.f32.mrf.mxu3  ;;  %v11589_v13 = vld [vmem:[#allocation63_spill] sm:$0xff] }
 0x245   : > { %v2342_v58 = vadd.f32 %v2302_v37, %v2130_v18  ;;  %v8472_v18 = vmov 0  }
 0x246   : > { %3426 = vst [vmem:[#allocation2 + $0x4] sm:$0xf] %v8472_v18 }
 0x247   : > { %v2093_v32 = vpop.f32.mrf.mxu2  ;;  %v9626_v46 = vadd.f32 %v2494_v22, %v2342_v58  ;;  %v11592_v22 = vld [vmem:[#allocation24_spill] sm:$0xff]  ;;  %3427 = vst [vmem:[#allocation2 + $0x8] sm:$0xf] %v8472_v18 }
 0x248   : > { %v2131_v2 = vadd.f32 %v2093_v32, %v11586_v26  ;;  %v2704_v47 = vpop.f32.mrf.mxu1  ;;  %3425 = vst [vmem:[#allocation2] sm:$0xf] %v8472_v18 }
 0x249   : > { %v2499_v28 = vpop.f32.mrf.mxu0  ;;  %11587 = vst [vmem:[#allocation59_spill] sm:$0xff] %v9626_v46  ;;  %3067 = vmatmul.bf16.gmra.mxu3 %v11588_v16 }
 0x24a   : > { %3492 = vst [vmem:[#allocation2 + $0x8c] sm:$0xf] %v8472_v18 }
 0x24b   : > { %3493 = vst [vmem:[#allocation2 + $0x90] sm:$0xf] %v8472_v18 }
 0x24c   : > { %v2305_v56 = vpop.f32.mrf.mxu3  ;;  %3494 = vst [vmem:[#allocation2 + $0x94] sm:$0xf] %v8472_v18 }
 0x24d   : > { %v2343_v63 = vadd.f32 %v2305_v56, %v2131_v2 }
 0x24f   : > { %v2095_v41 = vpop.f32.mrf.mxu2  ;;  %v2535_v32 = vadd.f32 %v2497_v21, %v2343_v63 }
 0x250   : > { %v2132_v49 = vadd.f32 %v2095_v41, %v11589_v13  ;;  %v9635_v41 = vpop.f32.mrf.mxu1  ;;  %v11596_v13 = vld [vmem:[#allocation26_spill] sm:$0xff] }
 0x251   : > { %v2502_v24 = vpop.f32.mrf.mxu0  ;;  %v9632_v26 = vadd.f32 %v2704_v47, %v2535_v32  ;;  %11593 = vst [vmem:[#allocation61_spill] sm:$0xff] %v9635_v41  ;;  %v7442_v47 = vld [vmem:[#allocation2 + $0x4] sm:$0xff]  ;;  %v7467_v32 = vld [vmem:[#allocation11 + $0x38] sm:$0xff] }
 0x252   : > { %4336 = vmatmul.bf16.vlgmr.msra.gmra.mxu1 %v7442_v47  ;;  %4716 = vmatpush.bf16.msrb.mxu2 %v7467_v32  ;;  %v7499_v47 = vld [vmem:[#allocation11 + $0x138] sm:$0xff] }
 0x253   : > { %11591 = vst [vmem:[#allocation43_spill] sm:$0xff] %v9632_v26  ;;  %5505 = vmatpush.bf16.msrb.mxu1 %v7499_v47  ;;  %v11602_v47 = vld [vmem:[#allocation33_spill] sm:$0xff] }
 0x254   : > { %2880 = vmatmul.bf16.gmra.mxu2 %v11590_v23  ;;  %3279 = vmatmul.bf16.gmra.mxu0 %v9333_v15  ;;  %v2307_v16 = vpop.f32.mrf.mxu3  ;;  %v11595_v15 = vld [vmem:[#allocation22_spill] sm:$0xff] }
 0x255   : > { %v2344_v56 = vadd.f32 %v2307_v16, %v2132_v49 }
 0x257   : > { %v2098_v35 = vpop.f32.mrf.mxu2  ;;  %v9637_v2 = vadd.f32 %v2499_v28, %v2344_v56  ;;  %5506 = vmatpush.bf16.msrb.mxu1 %v7498_v1 }
 0x258   : > { %v2133_v37 = vadd.f32 %v2098_v35, %v11592_v22  ;;  %v7483_v35 = vld [vmem:[#allocation11 + $0xb8] sm:$0xff]  ;;  %v2709_v41 = vpop.f32.mrf.mxu1 }
 0x259   : > { %v2504_v58 = vpop.f32.mrf.mxu0  ;;  %11594 = vst [vmem:[#allocation49_spill] sm:$0xff] %v9637_v2  ;;  %3072 = vmatmul.bf16.gmra.mxu3 %v11595_v15  ;;  %v11599_v2 = vld [vmem:[#allocation27_spill] sm:$0xff] }
 0x25a   : > { %5101 = vmatpush.bf16.msrb.mxu3 %v7483_v35 }
 0x25c   : > { %v2310_v22 = vpop.f32.mrf.mxu3 }
 0x25d   : > { %v2345_v26 = vadd.f32 %v2310_v22, %v2133_v37  ;;  %v11600_v37 = vld [vmem:[#allocation28_spill] sm:$0xff]  ;;  %v11601_v22 = vld [vmem:[#allocation29_spill] sm:$0xff] }
 0x25f   : > { %v2100_v21 = vpop.f32.mrf.mxu2  ;;  %v2537_v28 = vadd.f32 %v2502_v24, %v2345_v26  ;;  %v9652_v26 = vld [vmem:[%s11287_s4] ss:$0 sm:$0xff] }
 0x260   : > { %v2134_v63 = vadd.f32 %v2100_v21, %v11596_v13  ;;  %v7491_v13 = vld [vmem:[#allocation11 + $0xf8] sm:$0xff] }
 0x261   : > { %v3245_v23 = vpop.f32.mrf.mxu0  ;;  %v9643_v49 = vadd.f32 %v2709_v41, %v2537_v28  ;;  %5313 = vmatpush.bf16.msrb.mxu0 %v7491_v13 }
 0x263   : > { %11597 = vst [vmem:[#allocation62_spill] sm:$0xff] %v9643_v49 }
 0x264   : > { %2885 = vmatmul.bf16.gmra.mxu2 %v11520_v44  ;;  %3284 = vmatmul.bf16.gmra.mxu0 %v9353_v42  ;;  %v2312_v56 = vpop.f32.mrf.mxu3 }
 0x265   : > { %v2346_v15 = vadd.f32 %v2312_v56, %v2134_v63 }
 0x267   : > { %v2846_v18 = vpop.f32.mrf.mxu2  ;;  %v9645_v21 = vadd.f32 %v2504_v58, %v2346_v15 }
 0x268   : > { %v2926_v32 = vadd.f32 %v2846_v18, %v11600_v37 }
 0x269   : > { %v3247_v16 = vpop.f32.mrf.mxu0  ;;  %11598 = vst [vmem:[#allocation17_spill] sm:$0xff] %v9645_v21  ;;  %3077 = vmatmul.bf16.gmra.mxu3 %v11599_v2 }
 0x26c   : > { %v3038_v42 = vpop.f32.mrf.mxu3 }
 0x26d   : > { %v3118_v24 = vadd.f32 %v3038_v42, %v2926_v32  ;;  %v7482_v42 = vld [vmem:[#allocation11 + $0xb0] sm:$0xff] }
 0x26e   : > { %5102 = vmatpush.bf16.msrb.mxu3 %v7482_v42 }
 0x26f   : > { %v2848_v35 = vpop.f32.mrf.mxu2  ;;  %v3325_v58 = vadd.f32 %v3245_v23, %v3118_v24  ;;  %v7466_v23 = vld [vmem:[#allocation11 + $0x30] sm:$0xff] }
 0x270   : > { %v2927_v28 = vadd.f32 %v2848_v35, %v11601_v22  ;;  %4717 = vmatpush.bf16.msrb.mxu2 %v7466_v23  ;;  %v9664_v35 = vld [vmem:[#allocation8] sm:$0xff]  }
 0x271   : > { %v3250_v44 = vpop.f32.mrf.mxu0  ;;  %v3361_v41 = vadd.f32 %v9652_v26, %v3325_v58 }
 0x273   : > { %v3393_v63 = vmax.f32 %v3361_v41, 0.0  ;;  %v8056_v41 = vld [vmem:[#allocation8 + $0x8] sm:$0xff]  }
 0x274   : > { %2890 = vmatmul.bf16.gmra.mxu2 %v11527_v39  ;;  %3289 = vmatmul.bf16.gmra.mxu0 %v9373_v62  ;;  %v3040_v56 = vpop.f32.mrf.mxu3  ;;  %v7906_v22 = vunpack.c.l.bf16 %v8056_v41 }
 0x275   : > { %v3428_v15 = vpack.c.bf16 %v3393_v63, %v3393_v63  ;;  %v3119_v13 = vadd.f32 %v3040_v56, %v2927_v28  ;;  %v7907_v63 = vunpack.c.h.bf16 %v8056_v41 }
 0x276   : > { %v3972_v41 = vrot.slane %v7906_v22, 7  ;;  %v7490_v22 = vld [vmem:[#allocation11 + $0xf0] sm:$0xff] }
 0x277   : > { %v2851_v2 = vpop.f32.mrf.mxu2  ;;  %3460 = vst [vmem:[#allocation2 + $0xc] sm:$0xf] %v3428_v15  ;;  %v3326_v32 = vadd.f32 %v3247_v16, %v3119_v13  ;;  %v7903_v16 = vunpack.c.h.bf16 %v9664_v35  ;;  %v8040_v15 = vld [vmem:[#allocation6 + $0x10] sm:$0xff]   ;;  %v7829_v13 = vld [vmem:[#allocation6] sm:$0xff]   ;;  %5314 = vmatpush.bf16.msrb.mxu0 %v7490_v22  ;;  %v9711_v22 = vld [vmem:[#allocation8 + $0x18] sm:$0xff]  }
 0x278   : > { %v2928_v37 = vadd.f32 %v2851_v2, %v9369_v12  ;;  %v7839_v49 = vunpack.c.h.bf16 %v8040_v15 }
 0x279   : > { %v9658_v18 = vpop.f32.mrf.mxu0  ;;  %3082 = vmatmul.bf16.gmra.mxu3 %v11602_v47  ;;  %v3362_v12 = vadd.f32 %v9652_v26, %v3326_v32  ;;  %v3974_v47 = vrot.slane %v7907_v63, 7  ;;  %v7830_v63 = vunpack.c.l.bf16 %v7829_v13 }
 0x27a   : > { %v9696_v50 = vrot.slane %v7839_v49, 1 }
 0x27b   : > { %v3394_v23 = vmax.f32 %v3362_v12, 0.0  ;;  %v7831_v12 = vunpack.c.h.bf16 %v7829_v13  ;;  %v7902_v13 = vunpack.c.l.bf16 %v9664_v35  ;;  %v3678_v35 = vrot.slane %v7830_v63, 1 }
 0x27c   : > { %v3043_v24 = vpop.f32.mrf.mxu3 }
 0x27d   : > { %v3120_v58 = vadd.f32 %v3043_v24, %v2928_v37  ;;  %v9671_v37 = vld [vmem:[#allocation8 + $0x10] sm:$0xff]   ;;  %v8039_v24 = vld [vmem:[#allocation6 + $0x8] sm:$0xff]   ;;  %v3679_v54 = vrot.slane %v7831_v12, 1  ;;  %v9713_v1 = vrot.slane %v7902_v13, 7 }
 0x27e   : > { %v7910_v46 = vunpack.c.l.bf16 %v9671_v37  ;;  %v7835_v27 = vunpack.c.h.bf16 %v8039_v24 }
 0x27f   : > { %v2853_v39 = vpop.f32.mrf.mxu2  ;;  %v3327_v2 = vadd.f32 %v3250_v44, %v3120_v58  ;;  %v9676_v44 = vld [vmem:[#allocation2 + $0x8] sm:$0xff]   ;;  %v9678_v58 = vrot.slane %v7903_v16, 7  ;;  %v3680_v13 = vsel %vm587_vm0, %v3678_v35, %v3679_v54 }
 0x281   : > { %v9662_v62 = vpop.f32.mrf.mxu0  ;;  %v3363_v28 = vadd.f32 %v9652_v26, %v3327_v2  ;;  %v7838_v2 = vunpack.c.l.bf16 %v8040_v15  ;;  %v3976_v15 = vrot.slane %v7910_v46, 7 }
 0x283   : > { %v3395_v42 = vmax.f32 %v3363_v28, 0.0  ;;  %v7834_v28 = vunpack.c.l.bf16 %v8039_v24  ;;  %v3973_v24 = vsel %vm879_vm2, %v9678_v58, %v3972_v41  ;;  %v3685_v53 = vrot.slane %v7838_v2, 1 }
 0x284   : > { %2895 = vmatmul.bf16.gmra.mxu2 %v11531_v31  ;;  %3294 = vmatmul.bf16.gmra.mxu0 %v9395_v40  ;;  %v2929_v31 = vadd.f32 %v2853_v39, %v9379_v55  ;;  %v3045_v32 = vpop.f32.mrf.mxu3  ;;  %v3975_v55 = vsel %vm879_vm2, %v3972_v41, %v3974_v47  ;;  %v9686_v39 = vadd.f32 %v9459_v59, %v9483_v38  ;;  %v3683_v41 = vrot.slane %v7835_v27, 1 }
 0x285   : > { %v9680_v21 = vpack.c.bf16 %v3395_v42, %v3394_v23  ;;  %v9691_v42 = vld [vmem:[#allocation2] sm:$0xff]   ;;  %v9700_v59 = vadd.f32 %v9497_v36, %v9527_v6  ;;  %v3681_v45 = vrot.slane %v7834_v28, 1  ;;  %v7914_v6 = vunpack.c.l.bf16 %v9711_v22 }
 0x286   : > { %v3121_v16 = vadd.f32 %v3045_v32, %v2929_v31  ;;  %11603 = vst [vmem:[#allocation47_spill] sm:$0xff] %v9691_v42  ;;  %v7754_v36 = vunpack.c.l.bf16 %v9691_v42  ;;  %v3686_v27 = vsel %vm587_vm0, %v3683_v41, %v3685_v53 }
 0x287   : > { %v2856_v56 = vpop.f32.mrf.mxu2  ;;  %8006 = vst [vmem:[#allocation2 + $0x10] sm:$0xff] %v9680_v21   ;;  %v7762_v23 = vunpack.c.l.bf16 %v9680_v21  ;;  %v7763_v63 = vunpack.c.h.bf16 %v9680_v21 }
 0x288   : > { %v2930_v38 = vadd.f32 %v2856_v56, %v9391_v4  ;;  %v3328_v49 = vadd.f32 %v9658_v18, %v3121_v16  ;;  %v8041_v56 = vld [vmem:[#allocation6 + $0x18] sm:$0xff]   ;;  %v3688_v18 = vsel %vm587_vm0, %v3685_v53, %v9696_v50  ;;  %v3977_v16 = vsel %vm879_vm2, %v3974_v47, %v3976_v15 }
 0x289   : > { %v9674_v40 = vpop.f32.mrf.mxu0  ;;  %3087 = vmatmul.bf16.gmra.mxu3 %v11530_v5  ;;  %v4080_v32 = vmul.f32 %v7762_v23, %v3975_v55  ;;  %v11604_v5 = vunpack.c.h.bf16 %v9676_v44  ;;  %v7911_v55 = vunpack.c.h.bf16 %v9671_v37  ;;  %v7843_v21 = vunpack.c.h.bf16 %v8041_v56 }
 0x28a   : > { %v3364_v9 = vadd.f32 %v9652_v26, %v3328_v49  ;;  %v9728_v47 = vsel %vm587_vm0, %v3679_v54, %v3681_v45  ;;  %v4081_v37 = vmul.f32 %v7763_v63, %v3977_v16  ;;  %v9734_v43 = vmul.f32 %v7754_v36, %v3678_v35 }
 0x28b   : > { %v4079_v4 = vmul.f32 %v11604_v5, %v3973_v24  ;;  %v4117_v28 = vpack.c.bf16 %v4080_v32, %v4080_v32  ;;  %v7842_v5 = vunpack.c.l.bf16 %v8041_v56  ;;  %v3790_v32 = vmul.f32 %v7762_v23, %v3686_v27 }
 0x28c   : > { %v3048_v46 = vpop.f32.mrf.mxu3  ;;  %v3978_v49 = vrot.slane %v7911_v55, 7  ;;  %v9737_v23 = vrot.slane %v7843_v21, 1  ;;  %v3980_v27 = vrot.slane %v7914_v6, 7  ;;  %v3396_v54 = vmax.f32 %v3364_v9, 0.0 }
 0x28d   : > { %v3122_v12 = vadd.f32 %v3048_v46, %v2930_v38  ;;  %v4116_v38 = vpack.c.bf16 %v4079_v4, %v4079_v4  ;;  %v4858_v25 = vunpack.c.l.b16 %v4117_v28  ;;  %v3689_v4 = vrot.slane %v7842_v5, 1 }
 0x28e   : > { %v7443_v24 = vld [vmem:[#allocation2 + $0xc] sm:$0xff]  ;;  %v4118_v28 = vpack.c.bf16 %v4081_v37, %v4081_v37  ;;  %v7604_v6 = vunpack.c.h.bf16 %v9457_v51  ;;  %v3979_v55 = vsel %vm879_vm2, %v3976_v15, %v3978_v49  ;;  %v9757_v21 = vsel %vm879_vm2, %v3978_v49, %v3980_v27  ;;  %v11607_v49 = vld [vmem:[#allocation30_spill] sm:$0xff] }
 0x28f   : > { %v2858_v31 = vpop.f32.mrf.mxu2  ;;  %v3329_v53 = vadd.f32 %v9662_v62, %v3122_v12  ;;  %4341 = vmatmul.bf16.gmra.mxu1 %v7443_v24  ;;  %v3690_v5 = vsel %vm587_vm0, %v9696_v50, %v3689_v4  ;;  %v7676_v51 = vunpack.c.h.bf16 %v9468_v8 }
 0x290   : > { %v2931_v62 = vadd.f32 %v2858_v31, %v9401_v7  ;;  %v7915_v7 = vunpack.c.h.bf16 %v9711_v22  ;;  %v9760_v22 = vrot.slane %v7604_v6, 1 }
 0x291   : > { %v9705_v2 = vpop.f32.mrf.mxu0  ;;  %v3365_v46 = vadd.f32 %v9652_v26, %v3329_v53  ;;  %v402_v53 = vld [vmem:[%s8633_s1 + $0x120] sm:$0xff]  ;;  %v9779_v6 = vrot.slane %v7676_v51, 7 }
 0x292   : > { %v9766_v37 = vrot.slane %v7915_v7, 7  ;;  %v7465_v7 = vld [vmem:[#allocation11 + $0x28] sm:$0xff] }
 0x293   : > { %v3397_v12 = vmax.f32 %v3365_v46, 0.0  ;;  %v11606_v46 = vld [vmem:[#allocation41_spill] sm:$0xff]  ;;  %4718 = vmatpush.bf16.msrb.mxu2 %v7465_v7 }
 0x294   : > { %2900 = vmatmul.bf16.gmra.mxu2 %v9095_v11  ;;  %3299 = vmatmul.bf16.gmra.mxu0 %v9432_v29  ;;  %v9731_v11 = vsel %vm587_vm0, %v3681_v45, %v3683_v41  ;;  %v3791_v29 = vmul.f32 %v7763_v63, %v3688_v18  ;;  %v4857_v45 = vunpack.c.l.b16 %v4116_v38  ;;  %v3827_v41 = vpack.c.bf16 %v3790_v32, %v3790_v32  ;;  %v3050_v63 = vpop.f32.mrf.mxu3  ;;  %v8042_v38 = vld [vmem:[#allocation6 + $0x20] sm:$0xff]  }
 0x295   : > { %v11605_v18 = vunpack.c.h.bf16 %v9691_v42  ;;  %v9746_v31 = vpack.c.bf16 %v3397_v12, %v3396_v54  ;;  %v3123_v16 = vadd.f32 %v3050_v63, %v2931_v62  ;;  %v11608_v54 = vld [vmem:[#allocation35_spill] sm:$0xff]  ;;  %v9775_v63 = vpack.c.bf16 %v402_v53, %v402_v53  ;;  %v11610_v42 = vld [vmem:[#allocation45_spill] sm:$0xff] }
 0x296   : > { %v3828_v36 = vpack.c.bf16 %v3791_v29, %v3791_v29  ;;  %v9749_v9 = vpack.c.b16 %v4858_v25, %v4857_v45  ;;  %v4454_v25 = vunpack.c.l.b16 %v3827_v41  ;;  %v4859_v29 = vunpack.c.l.b16 %v4118_v28 }
 0x297   : > { %v2861_v56 = vpop.f32.mrf.mxu2  ;;  %v9743_v35 = vmul.f32 %v11605_v18, %v3680_v13  ;;  %v3692_v13 = vsel %vm587_vm0, %v3689_v4, %v9737_v23  ;;  %8007 = vst [vmem:[#allocation2 + $0x18] sm:$0xff] %v9746_v31   ;;  %v7766_v15 = vunpack.c.l.bf16 %v9746_v31  ;;  %v7767_v50 = vunpack.c.h.bf16 %v9746_v31  ;;  %v7481_v31 = vld [vmem:[#allocation11 + $0xa8] sm:$0xff] }
 0x298   : > { %v4455_v32 = vunpack.c.l.b16 %v3828_v36  ;;  %v2932_v62 = vadd.f32 %v2861_v56, %v11607_v49  ;;  %v658_v12 = vsel %vm587_vm0, %v11608_v54, %v9760_v22  ;;  %v4913_v8 = vshll.u32 %v9749_v9, 16  ;;  %v9782_v54 = vld [vmem:[#allocation8 + $0x20] sm:$0xff]   ;;  %5103 = vmatpush.bf16.msrb.mxu3 %v7481_v31 }
 0x299   : > { %v9739_v24 = vpop.f32.mrf.mxu0  ;;  %3092 = vmatmul.bf16.gmra.mxu3 %v11606_v46  ;;  %v4082_v45 = vmul.f32 %v7766_v15, %v3979_v55  ;;  %v3330_v41 = vadd.f32 %v9674_v40, %v3123_v16  ;;  %v7846_v18 = vunpack.c.l.bf16 %v8042_v38  ;;  %v7847_v36 = vunpack.c.h.bf16 %v8042_v38 }
 0x29a   : > { %v4917_v46 = vshrl.u32 %v9749_v9, 16  ;;  %v3792_v49 = vmul.f32 %v7766_v15, %v3690_v5  ;;  %v11609_v55 = vunpack.c.l.bf16 %v9478_v14  ;;  %v4485_v16 = vpack.c.b16 %v4455_v32, %v4454_v25  ;;  %v11611_v32 = vld [vmem:[#allocation39_spill] sm:$0xff] }
 0x29b   : > { %v4119_v56 = vpack.c.bf16 %v4082_v45, %v4082_v45  ;;  %v3793_v53 = vmul.f32 %v7767_v50, %v3692_v13  ;;  %v9788_v38 = vsel %vm879_vm2, %v3980_v27, %v9766_v37  ;;  %v9790_v51 = vrot.slane %v4913_v8, 1 }
 0x29c   : > { %v3053_v60 = vpop.f32.mrf.mxu3  ;;  %v731_v40 = vmul.f32 %v658_v12, %v11609_v55  ;;  %v3829_v9 = vpack.c.bf16 %v3792_v49, %v3792_v49  ;;  %v3366_v5 = vadd.f32 %v9652_v26, %v3330_v41  ;;  %v7918_v27 = vunpack.c.l.bf16 %v9782_v54 }
 0x29d   : > { %v3124_v61 = vadd.f32 %v3053_v60, %v2932_v62  ;;  %v4860_v45 = vunpack.c.l.b16 %v4119_v56  ;;  %v3830_v25 = vpack.c.bf16 %v3793_v53, %v3793_v53  ;;  %v950_v62 = vsel %vm879_vm2, %v11611_v32, %v9779_v6 }
 0x29e   : > { %v7444_v15 = vld [vmem:[#allocation2 + $0x14] sm:$0xff]  ;;  %v4456_v8 = vunpack.c.l.b16 %v3829_v9  ;;  %v768_v41 = vpack.c.bf16 %v731_v40, %v731_v40  ;;  %v4518_v7 = vshrl.u32 %v4485_v16, 16  ;;  %v3693_v55 = vrot.slane %v7846_v18, 1 }
 0x29f   : > { %v2863_v4 = vpop.f32.mrf.mxu2  ;;  %v3331_v60 = vadd.f32 %v9705_v2, %v3124_v61  ;;  %v9801_v12 = vpack.c.b16 %v4860_v45, %v4859_v29  ;;  %4346 = vmatmul.bf16.gmra.mxu1 %v7444_v15  ;;  %v4457_v31 = vunpack.c.l.b16 %v3830_v25  ;;  %v9805_v53 = vrot.slane %v7847_v36, 1  ;;  %v11612_v2 = vld [vmem:[#allocation32_spill] sm:$0xff] }
 0x2a0   : > { %v3398_v61 = vmax.f32 %v3366_v5, 0.0  ;;  %v2933_v13 = vadd.f32 %v2863_v4, %v11612_v2  ;;  %v11613_v29 = vunpack.c.l.bf16 %v9775_v63  ;;  %v4919_v9 = vor.u32 %v4917_v46, %v9790_v51 }
 0x2a1   : > { %v9777_v28 = vpop.f32.mrf.mxu0  ;;  %v4921_v49 = vshll.u32 %v9801_v12, 16  ;;  %v4486_v25 = vpack.c.b16 %v4457_v31, %v4456_v8  ;;  %v2765_v18 = vunpack.c.l.b16 %v768_v41  ;;  %v4520_v36 = vrot.slane %v4518_v7, 3  ;;  %v7497_v41 = vld [vmem:[#allocation11 + $0x128] sm:$0xff] }
 0x2a2   : > { %v1023_v45 = vmul.f32 %v950_v62, %v11613_v29  ;;  %v9816_v14 = vrot.slane %v7918_v27, 7  ;;  %v7489_v27 = vld [vmem:[#allocation11 + $0xe8] sm:$0xff]  ;;  %5507 = vmatpush.bf16.msrb.mxu1 %v7497_v41 }
 0x2a3   : > { %v4527_v62 = vshrl.u32 %v4486_v25, 16  ;;  %v403_v7 = vld [vmem:[%s8633_s1 + $0x128] sm:$0xff]  ;;  %v2767_v29 = vpack.c.b16 %v2765_v18, %v9511_v19  ;;  %5315 = vmatpush.bf16.msrb.mxu0 %v7489_v27 }
 0x2a4   : > { %2905 = vmatmul.bf16.gmra.mxu2 %v11610_v42  ;;  %3304 = vmatmul.bf16.gmra.mxu0 %v9475_v0  ;;  %v4521_v42 = vshll.u32 %v4485_v16, 16  ;;  %v3367_v0 = vadd.f32 %v9652_v26, %v3331_v60  ;;  %v9813_v16 = vrot.slane %v4921_v49, 1  ;;  %v4083_v60 = vmul.f32 %v7767_v50, %v9757_v21  ;;  %v3055_v32 = vpop.f32.mrf.mxu3 }
 0x2a5   : > { %v3125_v8 = vadd.f32 %v3055_v32, %v2933_v13  ;;  %v1060_v31 = vpack.c.bf16 %v1023_v45, %v1023_v45  ;;  %v4530_v21 = vshll.u32 %v4486_v25, 16  ;;  %v3696_v50 = vsel %vm587_vm0, %v3693_v55, %v9805_v53  ;;  %v11615_v45 = vld [vmem:[#allocation44_spill] sm:$0xff] }
 0x2a6   : > { %v3399_v40 = vmax.f32 %v3367_v0, 0.0  ;;  %v4523_v5 = vrot.slane %v4521_v42, 4  ;;  %v9822_v46 = vsel %vm1817_vm3, %v4919_v9, %v9813_v16  ;;  %v3694_v0 = vsel %vm587_vm0, %v9737_v23, %v3693_v55  ;;  %v11616_v9 = vld [vmem:[#allocation34_spill] sm:$0xff] }
 0x2a7   : > { %v2866_v56 = vpop.f32.mrf.mxu2  ;;  %11614 = vst [vmem:[#allocation19_spill] sm:$0xff] %v9822_v46  ;;  %v4529_v42 = vrot.slane %v4527_v62, 3  ;;  %v4532_v13 = vrot.slane %v4530_v21, 4  ;;  %v9838_v55 = vsel %vm879_vm2, %v9766_v37, %v9816_v14  ;;  %v7919_v62 = vunpack.c.h.bf16 %v9782_v54 }
 0x2a8   : > { %v9818_v4 = vpack.c.bf16 %v3399_v40, %v3398_v61  ;;  %v4120_v61 = vpack.c.bf16 %v4083_v60, %v4083_v60  ;;  %v9833_v23 = vor.u32 %v4523_v5, %v4520_v36  ;;  %v2934_v40 = vadd.f32 %v2866_v56, %v11616_v9 }
 0x2a9   : > { %v9811_v15 = vpop.f32.mrf.mxu0  ;;  %3097 = vmatmul.bf16.gmra.mxu3 %v11615_v45  ;;  %v3332_v19 = vadd.f32 %v9739_v24, %v3125_v8  ;;  %v3169_v18 = vunpack.c.l.b16 %v1060_v31  ;;  %v441_v36 = vpack.c.bf16 %v403_v7, %v403_v7  ;;  %v9845_v5 = vor.u32 %v4532_v13, %v4529_v42 }
 0x2aa   : > { %8008 = vst [vmem:[#allocation2 + $0x20] sm:$0xff] %v9818_v4   ;;  %v7770_v49 = vunpack.c.l.bf16 %v9818_v4  ;;  %v7771_v2 = vunpack.c.h.bf16 %v9818_v4  ;;  %v4861_v45 = vunpack.c.l.b16 %v4120_v61  ;;  %v11617_v54 = vunpack.c.l.bf16 %v9775_v63 }
 0x2ab   : > { %v9857_v8 = vsel %vm1411_vm1, %v9833_v23, %v9845_v5  ;;  %v9865_v13 = vrot.slane %v7919_v62, 7 }
 0x2ac   : > { %v4084_v60 = vmul.f32 %v7770_v49, %v9788_v38  ;;  %v3794_v32 = vmul.f32 %v7770_v49, %v3694_v0  ;;  %v3795_v56 = vmul.f32 %v7771_v2, %v3696_v50  ;;  %v3058_v9 = vpop.f32.mrf.mxu3  ;;  %v2770_v38 = vshrl.u32 %v2767_v29, 16  ;;  %11618 = vst [vmem:[#allocation20_spill] sm:$0xff] %v9857_v8  ;;  %v8043_v49 = vld [vmem:[#allocation6 + $0x28] sm:$0xff]  }
 0x2ad   : > { %v2773_v0 = vshll.u32 %v2767_v29, 16  ;;  %v732_v24 = vmul.f32 %v9760_v22, %v11617_v54  ;;  %v3126_v31 = vadd.f32 %v3058_v9, %v2934_v40  ;;  %v3368_v50 = vadd.f32 %v9652_v26, %v3332_v19 }
 0x2ae   : > { %v4121_v21 = vpack.c.bf16 %v4084_v60, %v4084_v60  ;;  %v3831_v27 = vpack.c.bf16 %v3794_v32, %v3794_v32  ;;  %v3832_v7 = vpack.c.bf16 %v3795_v56, %v3795_v56  ;;  %v9863_v29 = vpack.c.b16 %v3169_v18, %v9516_v33 }
 0x2af   : > { %v2868_v25 = vpop.f32.mrf.mxu2  ;;  %v806_v22 = vunpack.c.l.bf16 %v441_v36  ;;  %v3333_v60 = vadd.f32 %v9777_v28, %v3126_v31  ;;  %v4925_v32 = vshrl.u32 %v9801_v12, 16  ;;  %v2772_v19 = vrot.slane %v2770_v38, 3 }
 0x2b0   : > { %v4862_v41 = vunpack.c.l.b16 %v4121_v21  ;;  %v4458_v42 = vunpack.c.l.b16 %v3831_v27  ;;  %v4459_v21 = vunpack.c.l.b16 %v3832_v7  ;;  %v769_v56 = vpack.c.bf16 %v732_v24, %v732_v24 }
 0x2b1   : > { %v9847_v37 = vpop.f32.mrf.mxu0  ;;  %v7445_v61 = vld [vmem:[#allocation2 + $0x1c] sm:$0xff]  ;;  %v7850_v27 = vunpack.c.l.bf16 %v8043_v49  ;;  %v2775_v33 = vrot.slane %v2773_v0, 4  ;;  %v3400_v36 = vmax.f32 %v3368_v50, 0.0  ;;  %v2935_v28 = vadd.f32 %v2868_v25, %v9686_v39 }
 0x2b2   : > { %v9868_v40 = vpack.c.b16 %v4862_v41, %v4861_v45  ;;  %4351 = vmatmul.bf16.gmra.mxu1 %v7445_v61  ;;  %v4487_v62 = vpack.c.b16 %v4459_v21, %v4458_v42  ;;  %v3174_v45 = vshll.u32 %v9863_v29, 16  ;;  %v1024_v12 = vmul.f32 %v9779_v6, %v806_v22  ;;  %v7480_v0 = vld [vmem:[#allocation11 + $0xa0] sm:$0xff] }
 0x2b3   : > { %v7488_v61 = vld [vmem:[#allocation11 + $0xe0] sm:$0xff]  ;;  %v4927_v42 = vor.u32 %v4925_v32, %v9813_v16  ;;  %v3697_v50 = vrot.slane %v7850_v27, 1  ;;  %v9885_v6 = vor.u32 %v2775_v33, %v2772_v19  ;;  %v7758_v22 = vunpack.c.l.bf16 %v9676_v44  ;;  %5104 = vmatpush.bf16.msrb.mxu3 %v7480_v0  ;;  %v7463_v33 = vld [vmem:[#allocation11 + $0x18] sm:$0xff] }
 0x2b4   : > { %2910 = vmatmul.bf16.gmra.mxu2 %v9521_v57  ;;  %3309 = vmatmul.bf16.gmra.mxu0 %v9514_v48  ;;  %v7851_v57 = vunpack.c.h.bf16 %v8043_v49  ;;  %v3369_v48 = vadd.f32 %v9652_v26, %v3333_v60  ;;  %v4929_v18 = vshll.u32 %v9868_v40, 16  ;;  %v4536_v24 = vshrl.u32 %v4487_v62, 16  ;;  %v3060_v7 = vpop.f32.mrf.mxu3  ;;  %v7464_v49 = vld [vmem:[#allocation11 + $0x20] sm:$0xff] }
 0x2b5   : > { %v4539_v41 = vshll.u32 %v4487_v62, 16  ;;  %v2766_v60 = vunpack.c.l.b16 %v769_v56  ;;  %v3823_v21 = vpack.c.bf16 %v9734_v43, %v9734_v43  ;;  %4719 = vmatpush.bf16.msrb.mxu2 %v7464_v49  ;;  %v4085_v32 = vmul.f32 %v7771_v2, %v9838_v55  ;;  %5316 = vmatpush.bf16.msrb.mxu0 %v7488_v61  ;;  %v7479_v62 = vld [vmem:[#allocation11 + $0x98] sm:$0xff] }
 0x2b6   : > { %v3401_v54 = vmax.f32 %v3369_v48, 0.0  ;;  %v9878_v38 = vrot.slane %v4929_v18, 1  ;;  %v9881_v39 = vrot.slane %v7851_v57, 1  ;;  %v9890_v48 = vrot.slane %v3174_v45, 1  ;;  %v11620_v55 = vld [vmem:[#allocation48_spill] sm:$0xff] }
 0x2b7   : > { %v2871_v9 = vpop.f32.mrf.mxu2  ;;  %v1061_v18 = vpack.c.bf16 %v1024_v12, %v1024_v12  ;;  %v3127_v19 = vadd.f32 %v3060_v7, %v2935_v28  ;;  %v4538_v56 = vrot.slane %v4536_v24, 3  ;;  %v4541_v27 = vrot.slane %v4539_v41, 4  ;;  %5105 = vmatpush.bf16.msrb.mxu3 %v7479_v62 }
 0x2b8   : > { %v9883_v25 = vpack.c.bf16 %v3401_v54, %v3400_v36  ;;  %v9894_v16 = vsel %vm1817_vm3, %v4927_v42, %v9878_v38  ;;  %v3987_v43 = vsel %vm879_vm2, %v9816_v14, %v9865_v13  ;;  %v9903_v57 = vpack.c.b16 %v2766_v60, %v2766_v60  ;;  %v7487_v36 = vld [vmem:[#allocation11 + $0xd8] sm:$0xff]  ;;  %v7462_v42 = vld [vmem:[#allocation11 + $0x10] sm:$0xff] }
 0x2b9   : > { %v9876_v31 = vpop.f32.mrf.mxu0  ;;  %11619 = vst [vmem:[#allocation23_spill] sm:$0xff] %v9894_v16  ;;  %v3698_v4 = vsel %vm587_vm0, %v9805_v53, %v3697_v50  ;;  %v3700_v2 = vsel %vm587_vm0, %v3697_v50, %v9881_v39  ;;  %3102 = vmatmul.bf16.gmra.mxu3 %v11620_v55  ;;  %v2936_v28 = vadd.f32 %v2871_v9, %v9506_v3  ;;  %v3170_v41 = vunpack.c.l.b16 %v1061_v18  ;;  %v7478_v50 = vld [vmem:[#allocation11 + $0x90] sm:$0xff] }
 0x2ba   : > { %8009 = vst [vmem:[#allocation2 + $0x28] sm:$0xff] %v9883_v25   ;;  %v7774_v45 = vunpack.c.l.bf16 %v9883_v25  ;;  %v2777_v14 = vsel %vm1411_vm1, %v9508_v20, %v9885_v6  ;;  %v9915_v54 = vor.u32 %v4541_v27, %v4538_v56  ;;  %v7775_v24 = vunpack.c.h.bf16 %v9883_v25  ;;  %4720 = vmatpush.bf16.msrb.mxu2 %v7463_v33  ;;  %5317 = vmatpush.bf16.msrb.mxu0 %v7487_v36  ;;  %v7486_v18 = vld [vmem:[#allocation11 + $0xd0] sm:$0xff]  ;;  %v9937_v33 = vld [vmem:[#allocation8 + $0x28] sm:$0xff]  }
 0x2bb   : > { %v3177_v53 = vsel %vm1817_vm3, %v9543_v52, %v9890_v48  ;;  %v4122_v49 = vpack.c.bf16 %v4085_v32, %v4085_v32  ;;  %v3334_v3 = vadd.f32 %v9811_v15, %v3127_v19  ;;  %v2779_v60 = vshrl.u32 %v9903_v57, 16  ;;  %5106 = vmatpush.bf16.msrb.mxu3 %v7478_v50 }
 0x2bc   : > { %v4086_v7 = vmul.f32 %v7774_v45, %v3987_v43  ;;  %v9927_v20 = vsel %vm1411_vm1, %v9845_v5, %v9915_v54  ;;  %v3796_v0 = vmul.f32 %v7774_v45, %v3698_v4  ;;  %v3797_v61 = vmul.f32 %v7775_v24, %v3700_v2  ;;  %v3063_v52 = vpop.f32.mrf.mxu3 }
 0x2bd   : > { %11621 = vst [vmem:[#allocation21_spill] sm:$0xff] %v9927_v20  ;;  %v3824_v15 = vpack.c.bf16 %v9743_v35, %v9743_v35  ;;  %v9934_v32 = vunpack.c.l.b16 %v3823_v21  ;;  %v3128_v56 = vadd.f32 %v3063_v52, %v2936_v28  ;;  %v2782_v5 = vshll.u32 %v9903_v57, 16 }
 0x2be   : > { %v4123_v19 = vpack.c.bf16 %v4086_v7, %v4086_v7  ;;  %v3833_v27 = vpack.c.bf16 %v3796_v0, %v3796_v0  ;;  %v3834_v43 = vpack.c.bf16 %v3797_v61, %v3797_v61  ;;  %v3172_v36 = vpack.c.b16 %v3170_v41, %v3170_v41  ;;  %4721 = vmatpush.bf16.msrb.mxu2 %v7462_v42  ;;  %v7461_v7 = vld [vmem:[#allocation11 + $0x8] sm:$0xff] }
 0x2bf   : > { %v2873_v12 = vpop.f32.mrf.mxu2  ;;  %v3788_v45 = vmul.f32 %v7758_v22, %v9728_v47  ;;  %v4863_v4 = vunpack.c.l.b16 %v4122_v49  ;;  %v3370_v21 = vadd.f32 %v9652_v26, %v3334_v3  ;;  %v3335_v55 = vadd.f32 %v9847_v37, %v3128_v56  ;;  %5318 = vmatpush.bf16.msrb.mxu0 %v7486_v18 }
 0x2c0   : > { %v4864_v2 = vunpack.c.l.b16 %v4123_v19  ;;  %v4460_v57 = vunpack.c.l.b16 %v3833_v27  ;;  %v4461_v28 = vunpack.c.l.b16 %v3834_v43  ;;  %v11622_v41 = vunpack.c.h.bf16 %v9676_v44 }
 0x2c1   : > { %v9922_v9 = vpop.f32.mrf.mxu0  ;;  %v7446_v62 = vld [vmem:[#allocation2 + $0x24] sm:$0xff]  ;;  %v4933_v49 = vshrl.u32 %v9868_v40, 16  ;;  %v7922_v3 = vunpack.c.l.bf16 %v9937_v33  ;;  %v3371_v37 = vadd.f32 %v9652_v26, %v3335_v55  ;;  %v2781_v52 = vrot.slane %v2779_v60, 3  ;;  %v7460_v60 = vld [vmem:[#allocation11] sm:$0xff] }
 0x2c2   : > { %4356 = vmatmul.bf16.gmra.mxu1 %v7446_v62  ;;  %v3789_v0 = vmul.f32 %v11622_v41, %v9731_v11  ;;  %v9947_v47 = vpack.c.b16 %v4864_v2, %v4863_v4  ;;  %v2784_v42 = vrot.slane %v2782_v5, 4  ;;  %v4488_v50 = vpack.c.b16 %v4461_v28, %v4460_v57  ;;  %4722 = vmatpush.bf16.msrb.mxu2 %v7461_v7  ;;  %v7476_v5 = vld [vmem:[#allocation11 + $0x80] sm:$0xff] }
 0x2c3   : > { %v2937_v18 = vadd.f32 %v2873_v12, %v9700_v59  ;;  %v3178_v19 = vshrl.u32 %v9863_v29, 16  ;;  %v3182_v56 = vshll.u32 %v3172_v36, 16  ;;  %v3402_v11 = vmax.f32 %v3370_v21, 0.0  ;;  %v7484_v55 = vld [vmem:[#allocation11 + $0xc0] sm:$0xff] }
 0x2c4   : > { %2915 = vmatmul.bf16.gmra.mxu2 %v2777_v14  ;;  %3314 = vmatmul.bf16.gmra.mxu0 %v3177_v53  ;;  %v7477_v14 = vld [vmem:[#allocation11 + $0x88] sm:$0xff]  ;;  %v4937_v27 = vshll.u32 %v9947_v47, 16  ;;  %v3403_v43 = vmax.f32 %v3371_v37, 0.0  ;;  %v4545_v40 = vshrl.u32 %v4488_v50, 16  ;;  %v4548_v4 = vshll.u32 %v4488_v50, 16  ;;  %v3065_v2 = vpop.f32.mrf.mxu3  ;;  %v7496_v50 = vld [vmem:[#allocation11 + $0x120] sm:$0xff] }
 0x2c5   : > { %v7485_v53 = vld [vmem:[#allocation11 + $0xc8] sm:$0xff]  ;;  %5107 = vmatpush.bf16.msrb.mxu3 %v7477_v14  ;;  %v3825_v57 = vpack.c.bf16 %v3788_v45, %v3788_v45  ;;  %v3826_v59 = vpack.c.bf16 %v3789_v0, %v3789_v0  ;;  %v4935_v29 = vor.u32 %v4933_v49, %v9878_v38  ;;  %v2785_v21 = vor.u32 %v2784_v42, %v2781_v52 }
 0x2c6   : > { %5319 = vmatpush.bf16.msrb.mxu0 %v7485_v53  ;;  %v9958_v12 = vrot.slane %v4937_v27, 1  ;;  %v7700_v36 = vpack.c.bf16 %v3403_v43, %v3402_v11  ;;  %v4547_v28 = vrot.slane %v4545_v40, 3  ;;  %v4550_v41 = vrot.slane %v4548_v4, 4  ;;  %4723 = vmatpush.bf16.msrb.mxu2 %v7460_v60  ;;  %v11627_v60 = vld [vmem:[#allocation37_spill] sm:$0xff] }
 0x2c7   : > { %v2876_v61 = vpop.f32.mrf.mxu2  ;;  %v3180_v7 = vor.u32 %v3178_v19, %v9890_v48  ;;  %v7923_v53 = vunpack.c.h.bf16 %v9937_v33  ;;  %v3988_v37 = vrot.slane %v7922_v3, 7  ;;  %v3129_v45 = vadd.f32 %v3065_v2, %v2937_v18  ;;  %5508 = vmatpush.bf16.msrb.mxu1 %v7496_v50 }
 0x2c8   : > { %v9963_v14 = vsel %vm1817_vm3, %v4935_v29, %v9958_v12  ;;  %8010 = vst [vmem:[#allocation2 + $0x30] sm:$0xff] %v7700_v36   ;;  %v3184_v0 = vrot.slane %v3182_v56, 1  ;;  %v4451_v38 = vunpack.c.l.b16 %v3824_v15  ;;  %v9969_v49 = vor.u32 %v4550_v41, %v4547_v28 }
 0x2c9   : > { %v9955_v62 = vpop.f32.mrf.mxu0  ;;  %11623 = vst [vmem:[#allocation18_spill] sm:$0xff] %v9963_v14  ;;  %5108 = vmatpush.bf16.msrb.mxu3 %v7476_v5  ;;  %v4452_v48 = vunpack.c.l.b16 %v3825_v57  ;;  %v4453_v52 = vunpack.c.l.b16 %v3826_v59  ;;  %v2938_v33 = vadd.f32 %v2876_v61, %v9541_v30  ;;  %v3971_v35 = vsel %vm879_vm2, %v9713_v1, %v9678_v58 }
 0x2ca   : > { %5320 = vmatpush.bf16.msrb.mxu0 %v7484_v55  ;;  %3107 = vmatmul.bf16.gmra.mxu3 %v9534_v10  ;;  %v9976_v42 = vsel %vm1411_vm1, %v9915_v54, %v9969_v49  ;;  %v3989_v15 = vsel %vm879_vm2, %v9865_v13, %v3988_v37  ;;  %v9983_v18 = vrot.slane %v7923_v53, 7  ;;  %v3336_v10 = vadd.f32 %v9876_v31, %v3129_v45  ;;  %v11625_v31 = vld [vmem:[#allocation47_spill] sm:$0xff] }
 0x2cb   : > { %11624 = vst [vmem:[#allocation63_spill] sm:$0xff] %v9976_v42  ;;  %v2786_v30 = vsel %vm1411_vm1, %v9885_v6, %v2785_v21  ;;  %v3185_v61 = vsel %vm1817_vm3, %v3180_v7, %v3184_v0  ;;  %v4483_v54 = vpack.c.b16 %v4451_v38, %v9934_v32  ;;  %v4484_v27 = vpack.c.b16 %v4453_v52, %v4452_v48 }
 0x2cc   : > { %v3068_v56 = vpop.f32.mrf.mxu3  ;;  %v2727_v58 = vadd.f32 %v9537_v34, %v9550_v17  ;;  %v4087_v13 = vmul.f32 %v7775_v24, %v3989_v15  ;;  %v11626_v40 = vunpack.c.h.bf16 %v11625_v31  ;;  %v4078_v4 = vmul.f32 %v7758_v22, %v3971_v35 }
 0x2cd   : > { %v3130_v11 = vadd.f32 %v3068_v56, %v2938_v33  ;;  %v3991_v2 = vsel %vm879_vm2, %v3988_v37, %v9983_v18  ;;  %v3372_v34 = vadd.f32 %v9652_v26, %v3336_v10  ;;  %v4501_v25 = vshrl.u32 %v4483_v54, 16 }
 0x2ce   : > { %v4077_v6 = vmul.f32 %v11626_v40, %v9713_v1  ;;  %v2977_v5 = vunpack.c.l.b16 %v11627_v60  ;;  %v4504_v55 = vshll.u32 %v4483_v54, 16  ;;  %v4509_v1 = vshrl.u32 %v4484_v27, 16 }
 0x2cf   : > { %v2878_v3 = vpop.f32.mrf.mxu2  ;;  %v7447_v43 = vld [vmem:[#allocation2 + $0x2c] sm:$0xff]  ;;  %v3337_v17 = vadd.f32 %v9922_v9, %v3130_v11  ;;  %v4512_v57 = vshll.u32 %v4484_v27, 16  ;;  %v2978_v22 = vunpack.c.l.b16 %v9775_v63  ;;  %v4124_v36 = vpack.c.bf16 %v4087_v13, %v4087_v13 }
 0x2d0   : > { %v10001_v32 = vld [vmem:[#allocation2 + $0x30] sm:$0xff]   ;;  %v4114_v21 = vpack.c.bf16 %v4077_v6, %v4077_v6  ;;  %v4115_v9 = vpack.c.bf16 %v4078_v4, %v4078_v4  ;;  %v3404_v28 = vmax.f32 %v3372_v34, 0.0  ;;  %v2939_v7 = vadd.f32 %v2878_v3, %v2727_v58  ;;  %v11628_v3 = vld [vmem:[#allocation65_spill] sm:$0xff] }
 0x2d1   : > { %v9986_v19 = vpop.f32.mrf.mxu0  ;;  %v7778_v24 = vunpack.c.l.bf16 %v10001_v32  ;;  %v3373_v44 = vadd.f32 %v9652_v26, %v3337_v17  ;;  %v4503_v0 = vrot.slane %v4501_v25, 3  ;;  %v4506_v50 = vrot.slane %v4504_v55, 4  ;;  %v8044_v55 = vld [vmem:[#allocation6 + $0x30] sm:$0xff]  }
 0x2d2   : > { %4361 = vmatmul.bf16.gmra.mxu1 %v7447_v43  ;;  %v4511_v38 = vrot.slane %v4509_v1, 3  ;;  %v4514_v48 = vrot.slane %v4512_v57, 4  ;;  %v2979_v63 = vpack.c.b16 %v2978_v22, %v2977_v5  ;;  %v4865_v33 = vunpack.c.l.b16 %v4124_v36  ;;  %v11630_v1 = vld [vmem:[#allocation66_spill] sm:$0xff]  ;;  %v11631_v57 = vld [vmem:[#allocation64_spill] sm:$0xff] }
 0x2d3   : > { %v4088_v29 = vmul.f32 %v7778_v24, %v3991_v2  ;;  %v3405_v41 = vmax.f32 %v3373_v44, 0.0  ;;  %v4855_v15 = vunpack.c.l.b16 %v4114_v21  ;;  %v4856_v10 = vunpack.c.l.b16 %v4115_v9 }
 0x2d4   : > { %2920 = vmatmul.bf16.gmra.mxu2 %v2786_v30  ;;  %3319 = vmatmul.bf16.gmra.mxu0 %v3185_v61  ;;  %v3070_v45 = vpop.f32.mrf.mxu3  ;;  %v4507_v54 = vor.u32 %v4506_v50, %v4503_v0  ;;  %v4515_v58 = vor.u32 %v4514_v48, %v4511_v38  ;;  %v4941_v11 = vshrl.u32 %v9947_v47, 16  ;;  %v2729_v44 = vadd.f32 %v11631_v57, %v11630_v1  ;;  %v8045_v0 = vld [vmem:[#allocation6 + $0x38] sm:$0xff]  }
 0x2d5   : > { %v4125_v37 = vpack.c.bf16 %v4088_v29, %v4088_v29  ;;  %v7705_v52 = vpack.c.bf16 %v3405_v41, %v3404_v28  ;;  %v3131_v30 = vadd.f32 %v3070_v45, %v2939_v7  ;;  %v4888_v43 = vpack.c.b16 %v4856_v10, %v4855_v15  ;;  %v8061_v7 = vld [vmem:[#allocation8 + $0x30] sm:$0xff]  }
 0x2d6   : > { %v4943_v6 = vor.u32 %v4941_v11, %v9958_v12  ;;  %v4516_v17 = vsel %vm1411_vm1, %v4507_v54, %v4515_v58  ;;  %v4525_v25 = vsel %vm1411_vm1, %v4515_v58, %v9833_v23  ;;  %v7854_v29 = vunpack.c.l.bf16 %v8044_v55 }
 0x2d7   : > { %v2881_v59 = vpop.f32.mrf.mxu2  ;;  %v4866_v35 = vunpack.c.l.b16 %v4125_v37  ;;  %8011 = vst [vmem:[#allocation2 + $0x38] sm:$0xff] %v7705_v52   ;;  %v3338_v31 = vadd.f32 %v9955_v62, %v3131_v30  ;;  %v4908_v62 = vshll.u32 %v4888_v43, 16  ;;  %v7855_v41 = vunpack.c.h.bf16 %v8044_v55  ;;  %v11632_v30 = vld [vmem:[#allocation52_spill] sm:$0xff]  ;;  %v11638_v55 = vld [vmem:[#allocation54_spill] sm:$0xff] }
 0x2d8   : > { %v2940_v56 = vadd.f32 %v2881_v59, %v11628_v3  ;;  %v4906_v45 = vshrl.u32 %v4888_v43, 16  ;;  %v3701_v38 = vrot.slane %v7854_v29, 1  ;;  %v7926_v48 = vunpack.c.l.bf16 %v8061_v7 }
 0x2d9   : > { %v10013_v53 = vpop.f32.mrf.mxu0  ;;  %v10015_v61 = vpack.c.b16 %v4866_v35, %v4865_v33  ;;  %v3374_v5 = vadd.f32 %v9652_v26, %v3338_v31  ;;  %v4910_v59 = vrot.slane %v4908_v62, 1  ;;  %v7927_v33 = vunpack.c.h.bf16 %v8061_v7  ;;  %v11633_v31 = vld [vmem:[#allocation50_spill] sm:$0xff] }
 0x2da   : > { %3112 = vmatmul.bf16.gmra.mxu3 %v2979_v63  ;;  %v3703_v63 = vrot.slane %v7855_v41, 1  ;;  %v7858_v15 = vunpack.c.l.bf16 %v8045_v0  ;;  %v7859_v10 = vunpack.c.h.bf16 %v8045_v0  ;;  %v3992_v58 = vrot.slane %v7926_v48, 7  ;;  %v11635_v62 = vld [vmem:[#allocation38_spill] sm:$0xff]  ;;  %v11642_v41 = vld [vmem:[#allocation56_spill] sm:$0xff] }
 0x2db   : > { %v4945_v13 = vshll.u32 %v10015_v61, 16  ;;  %v3406_v36 = vmax.f32 %v3374_v5, 0.0  ;;  %v4911_v50 = vor.u32 %v4910_v59, %v4906_v45  ;;  %v11636_v5 = vld [vmem:[#allocation31_spill] sm:$0xff] }
 0x2dc   : > { %v3073_v2 = vpop.f32.mrf.mxu3  ;;  %v3704_v43 = vsel %vm587_vm0, %v3701_v38, %v3703_v63  ;;  %v8063_v45 = vld [vmem:[#allocation8 + $0x40] sm:$0xff]  }
 0x2dd   : > { %v10024_v4 = vrot.slane %v4945_v13, 1  ;;  %v3132_v34 = vadd.f32 %v3073_v2, %v2940_v56  ;;  %v4916_v35 = vsel %vm1817_vm3, %v4911_v50, %v9790_v51  ;;  %v7779_v56 = vunpack.c.h.bf16 %v10001_v32  ;;  %v10080_v32 = vld [vmem:[%s11287_s4] ss:$0 sm:$0xff] }
 0x2de   : > { %v7448_v60 = vld [vmem:[#allocation2 + $0x34] sm:$0xff]  ;;  %v10050_v51 = vrot.slane %v7927_v33, 7  ;;  %v7935_v48 = vunpack.c.h.bf16 %v8063_v45 }
 0x2df   : > { %v2883_v27 = vpop.f32.mrf.mxu2  ;;  %v10031_v47 = vsel %vm1817_vm3, %v4943_v6, %v10024_v4  ;;  %v3339_v12 = vadd.f32 %v9986_v19, %v3132_v34  ;;  %v11634_v6 = vld [vmem:[#allocation67_spill] sm:$0xff] }
 0x2e0   : > { %11629 = vst [vmem:[#allocation25_spill] sm:$0xff] %v10031_v47  ;;  %v2941_v9 = vadd.f32 %v2883_v27, %v2729_v44  ;;  %v3702_v27 = vsel %vm587_vm0, %v9881_v39, %v3701_v38  ;;  %v2731_v2 = vadd.f32 %v11634_v6, %v11633_v31  ;;  %v11637_v39 = vld [vmem:[#allocation36_spill] sm:$0xff]  ;;  %v8062_v44 = vld [vmem:[#allocation8 + $0x38] sm:$0xff]   ;;  %v8046_v38 = vld [vmem:[#allocation6 + $0x40] sm:$0xff]  }
 0x2e1   : > { %v10021_v40 = vpop.f32.mrf.mxu0  ;;  %v3375_v22 = vadd.f32 %v9652_v26, %v3339_v12  ;;  %v7495_v26 = vld [vmem:[#allocation11 + $0x118] sm:$0xff]  ;;  %v10058_v12 = vadd.f32 %v11636_v5, %v11635_v62  ;;  %v3798_v57 = vmul.f32 %v7778_v24, %v3702_v27  ;;  %v7930_v50 = vunpack.c.l.bf16 %v8062_v44 }
 0x2e2   : > { %4366 = vmatmul.bf16.gmra.mxu1 %v7448_v60  ;;  %v10054_v60 = vrot.slane %v7859_v10, 1  ;;  %v7863_v6 = vunpack.c.h.bf16 %v8046_v38 }
 0x2e3   : > { %v3407_v21 = vmax.f32 %v3375_v22, 0.0  ;;  %5509 = vmatpush.bf16.msrb.mxu1 %v7495_v26  ;;  %v11639_v22 = vld [vmem:[#allocation58_spill] sm:$0xff]  ;;  %v3835_v33 = vpack.c.bf16 %v3798_v57, %v3798_v57  ;;  %v3996_v5 = vrot.slane %v7930_v50, 7  ;;  %v7862_v57 = vunpack.c.l.bf16 %v8046_v38  ;;  %v11643_v50 = vld [vmem:[#allocation51_spill] sm:$0xff] }
 0x2e4   : > { %4724 = vmatmul.bf16.vlgmr.msrb.gmra.mxu2 %v4516_v17  ;;  %5321 = vmatmul.bf16.vlgmr.msrb.gmra.mxu0 %v4525_v25  ;;  %v3075_v37 = vpop.f32.mrf.mxu3  ;;  %v3705_v17 = vrot.slane %v7858_v15, 1  ;;  %v7931_v15 = vunpack.c.h.bf16 %v8062_v44  ;;  %v10102_v44 = vld [vmem:[#allocation8 + $0x48] sm:$0xff]  }
 0x2e5   : > { %v7710_v19 = vpack.c.bf16 %v3407_v21, %v3406_v36  ;;  %v3133_v52 = vadd.f32 %v3075_v37, %v2941_v9  ;;  %v3799_v36 = vmul.f32 %v7779_v56, %v3704_v43  ;;  %v3993_v21 = vsel %vm879_vm2, %v9983_v18, %v3992_v58  ;;  %v11641_v9 = vld [vmem:[#allocation57_spill] sm:$0xff] }
 0x2e6   : > { %v10075_v7 = vadd.f32 %v11642_v41, %v11641_v9  ;;  %v3706_v18 = vsel %vm587_vm0, %v3703_v63, %v3705_v17  ;;  %v3708_v0 = vsel %vm587_vm0, %v3705_v17, %v10054_v60  ;;  %v3711_v9 = vrot.slane %v7863_v6, 1 }
 0x2e7   : > { %v2886_v23 = vpop.f32.mrf.mxu2  ;;  %8012 = vst [vmem:[#allocation2 + $0x40] sm:$0xff] %v7710_v19   ;;  %v3340_v11 = vadd.f32 %v10013_v53, %v3133_v52  ;;  %v10062_v53 = vadd.f32 %v11638_v55, %v11637_v39  ;;  %v8047_v19 = vld [vmem:[#allocation6 + $0x48] sm:$0xff]   ;;  %v3836_v10 = vpack.c.bf16 %v3799_v36, %v3799_v36 }
 0x2e8   : > { %v2942_v54 = vadd.f32 %v2886_v23, %v11632_v30  ;;  %v11640_v23 = vld [vmem:[#allocation55_spill] sm:$0xff]  ;;  %v7934_v30 = vunpack.c.l.bf16 %v8063_v45  ;;  %v7867_v27 = vunpack.c.h.bf16 %v8047_v19 }
 0x2e9   : > { %v10038_v28 = vpop.f32.mrf.mxu0  ;;  %v10068_v59 = vadd.f32 %v11640_v23, %v11639_v22  ;;  %v3376_v24 = vadd.f32 %v10080_v32, %v3340_v11  ;;  %v4462_v22 = vunpack.c.l.b16 %v3835_v33 }
 0x2ea   : > { %5109 = vmatmul.bf16.vlgmr.msrb.gmra.mxu3 %v4916_v35  ;;  %v4089_v35 = vmul.f32 %v7779_v56, %v3993_v21  ;;  %v4002_v56 = vrot.slane %v7935_v48, 7  ;;  %v4463_v21 = vunpack.c.l.b16 %v3836_v10 }
 0x2eb   : > { %v3408_v63 = vmax.f32 %v3376_v24, 0.0 }
 0x2ec   : > { %v3078_v34 = vpop.f32.mrf.mxu3  ;;  %v4126_v55 = vpack.c.bf16 %v4089_v35, %v4089_v35  ;;  %v3709_v35 = vrot.slane %v7862_v57, 1 }
 0x2ed   : > { %v3134_v1 = vadd.f32 %v3078_v34, %v2942_v54  ;;  %v7866_v54 = vunpack.c.l.bf16 %v8047_v19  ;;  %v7938_v19 = vunpack.c.l.bf16 %v10102_v44 }
 0x2ee   : > { %v7449_v29 = vld [vmem:[#allocation2 + $0x3c] sm:$0xff] }
 0x2ef   : > { %v2888_v3 = vpop.f32.mrf.mxu2  ;;  %v3341_v37 = vadd.f32 %v10021_v40, %v3134_v1  ;;  %v10092_v40 = vld [vmem:[#allocation2 + $0x38] sm:$0xff]   ;;  %v3998_v1 = vrot.slane %v7931_v15, 7  ;;  %v10104_v23 = vld [vmem:[#allocation2 + $0x40] sm:$0xff]   ;;  %v4004_v57 = vrot.slane %v7938_v19, 7 }
 0x2f0   : > { %v2943_v43 = vadd.f32 %v2888_v3, %v2731_v2  ;;  %v7782_v17 = vunpack.c.l.bf16 %v10092_v40  ;;  %v11368_v62 = vunpack.c.h.bf16 %v10092_v40  ;;  %v4000_v3 = vrot.slane %v7934_v30, 7 }
 0x2f1   : > { %v10047_v13 = vpop.f32.mrf.mxu0  ;;  %v3377_v52 = vadd.f32 %v10080_v32, %v3341_v37  ;;  %v3713_v2 = vrot.slane %v7866_v54, 1  ;;  %v11369_v33 = vunpack.c.h.bf16 %v10104_v23 }
 0x2f2   : > { %4371 = vmatmul.bf16.gmra.mxu1 %v7449_v29  ;;  %v10106_v29 = vrot.slane %v7867_v27, 1  ;;  %v3800_v24 = vmul.f32 %v7782_v17, %v3706_v18  ;;  %v3801_v37 = vmul.f32 %v11368_v62, %v3708_v0  ;;  %v4003_v45 = vsel %vm879_vm2, %v4000_v3, %v4002_v56 }
 0x2f3   : > { %v3409_v11 = vmax.f32 %v3377_v52, 0.0  ;;  %v10120_v52 = vsel %vm879_vm2, %v10050_v51, %v3996_v5  ;;  %v4001_v0 = vsel %vm879_vm2, %v3998_v1, %v4000_v3  ;;  %v3714_v15 = vsel %vm587_vm0, %v3711_v9, %v3713_v2 }
 0x2f4   : > { %4729 = vmatmul.bf16.gmra.mxu2 %v4525_v25  ;;  %5326 = vmatmul.bf16.gmra.mxu0 %v9857_v8  ;;  %v10086_v25 = vsel %vm879_vm2, %v3992_v58, %v10050_v51  ;;  %v10094_v58 = vpop.f32.mrf.mxu1  ;;  %v3080_v34 = vpop.f32.mrf.mxu3  ;;  %v3716_v10 = vsel %vm587_vm0, %v3713_v2, %v10106_v29  ;;  %v4489_v51 = vpack.c.b16 %v4463_v21, %v4462_v22  ;;  %v10133_v27 = vunpack.c.l.b16 %v4126_v55 }
 0x2f5   : > { %v10100_v39 = vpack.c.bf16 %v3409_v11, %v3408_v63  ;;  %v3135_v36 = vadd.f32 %v3080_v34, %v2943_v43  ;;  %v8048_v11 = vld [vmem:[#allocation6 + $0x50] sm:$0xff]   ;;  %v3837_v6 = vpack.c.bf16 %v3800_v24, %v3800_v24  ;;  %v3838_v34 = vpack.c.bf16 %v3801_v37, %v3801_v37 }
 0x2f6   : > { %v10144_v55 = vsel %vm587_vm0, %v10054_v60, %v3709_v35  ;;  %v7939_v22 = vunpack.c.h.bf16 %v10102_v44  ;;  %v4554_v37 = vshrl.u32 %v4489_v51, 16 }
 0x2f7   : > { %v2891_v26 = vpop.f32.mrf.mxu2  ;;  %8013 = vst [vmem:[#allocation2 + $0x48] sm:$0xff] %v10100_v39   ;;  %v7790_v41 = vunpack.c.l.bf16 %v10100_v39  ;;  %v7791_v18 = vunpack.c.h.bf16 %v10100_v39  ;;  %v3342_v30 = vadd.f32 %v10038_v28, %v3135_v36  ;;  %v10136_v39 = vsel %vm879_vm2, %v3996_v5, %v3998_v1 }
 0x2f8   : > { %v2944_v38 = vadd.f32 %v2891_v26, %v11643_v50  ;;  %v4093_v28 = vmul.f32 %v11369_v33, %v4001_v0  ;;  %v7870_v5 = vunpack.c.l.bf16 %v8048_v11  ;;  %v7871_v1 = vunpack.c.h.bf16 %v8048_v11 }
 0x2f9   : > { %v10096_v31 = vpop.f32.mrf.mxu0  ;;  %v4094_v63 = vmul.f32 %v7790_v41, %v4003_v45  ;;  %v3804_v2 = vmul.f32 %v7790_v41, %v3714_v15  ;;  %v3805_v36 = vmul.f32 %v7791_v18, %v3716_v10  ;;  %v3378_v21 = vadd.f32 %v10080_v32, %v3342_v30 }
 0x2fa   : > { %5114 = vmatmul.bf16.gmra.mxu3 %v9822_v46  ;;  %v4557_v45 = vshll.u32 %v4489_v51, 16  ;;  %v4464_v19 = vunpack.c.l.b16 %v3837_v6  ;;  %v4005_v0 = vsel %vm879_vm2, %v4002_v56, %v4004_v57  ;;  %v4130_v10 = vpack.c.bf16 %v4093_v28, %v4093_v28 }
 0x2fb   : > { %v4131_v41 = vpack.c.bf16 %v4094_v63, %v4094_v63  ;;  %v3842_v44 = vpack.c.bf16 %v3805_v36, %v3805_v36  ;;  %v10152_v11 = vsel %vm587_vm0, %v3709_v35, %v3711_v9  ;;  %v10154_v30 = vrot.slane %v7939_v22, 7 }
 0x2fc   : > { %v10129_v26 = vpop.f32.mrf.mxu1  ;;  %v3083_v43 = vpop.f32.mrf.mxu3  ;;  %v3410_v63 = vmax.f32 %v3378_v21, 0.0  ;;  %v4559_v36 = vrot.slane %v4557_v45, 4  ;;  %v4095_v9 = vmul.f32 %v7791_v18, %v4005_v0  ;;  %v7494_v45 = vld [vmem:[#allocation11 + $0x110] sm:$0xff] }
 0x2fd   : > { %v3136_v3 = vadd.f32 %v3083_v43, %v2944_v38  ;;  %v4465_v38 = vunpack.c.l.b16 %v3838_v34  ;;  %v3841_v43 = vpack.c.bf16 %v3804_v2, %v3804_v2  ;;  %v4872_v56 = vunpack.c.l.b16 %v4131_v41  ;;  %5510 = vmatpush.bf16.msrb.mxu1 %v7494_v45 }
 0x2fe   : > { %v7450_v50 = vld [vmem:[#allocation2 + $0x44] sm:$0xff]  ;;  %v4556_v2 = vrot.slane %v4554_v37, 3  ;;  %v4469_v21 = vunpack.c.l.b16 %v3842_v44 }
 0x2ff   : > { %v2893_v48 = vpop.f32.mrf.mxu2  ;;  %v3343_v24 = vadd.f32 %v10047_v13, %v3136_v3  ;;  %v3717_v13 = vrot.slane %v7870_v5, 1  ;;  %v10156_v3 = vrot.slane %v7871_v1, 1  ;;  %v4871_v5 = vunpack.c.l.b16 %v4130_v10 }
 0x300   : > { %v2945_v6 = vadd.f32 %v2893_v48, %v10058_v12  ;;  %v4468_v1 = vunpack.c.l.b16 %v3841_v43  ;;  %v4007_v12 = vsel %vm879_vm2, %v4004_v57, %v10154_v30  ;;  %v10182_v10 = vor.u32 %v4559_v36, %v4556_v2 }
 0x301   : > { %v10131_v54 = vpop.f32.mrf.mxu0  ;;  %v3379_v15 = vadd.f32 %v10080_v32, %v3343_v24  ;;  %v10163_v24 = vpack.c.b16 %v4465_v38, %v4464_v19  ;;  %v3718_v48 = vsel %vm587_vm0, %v10106_v29, %v3717_v13  ;;  %v3720_v37 = vsel %vm587_vm0, %v3717_v13, %v10156_v3 }
 0x302   : > { %4376 = vmatmul.bf16.gmra.mxu1 %v7450_v50  ;;  %v10161_v50 = vld [vmem:[#allocation8 + $0x50] sm:$0xff]   ;;  %v10177_v19 = vpack.c.b16 %v4872_v56, %v4871_v5  ;;  %v10187_v29 = vmul.f32 %v7782_v17, %v10086_v25  ;;  %v4132_v43 = vpack.c.bf16 %v4095_v9, %v4095_v9  ;;  %v8049_v56 = vld [vmem:[#allocation6 + $0x58] sm:$0xff]  }
 0x303   : > { %v3411_v51 = vmax.f32 %v3379_v15, 0.0  ;;  %v7942_v41 = vunpack.c.l.bf16 %v10161_v50  ;;  %v11644_v15 = vld [vmem:[#allocation53_spill] sm:$0xff]  ;;  %v7943_v2 = vunpack.c.h.bf16 %v10161_v50 }
 0x304   : > { %4734 = vmatmul.bf16.gmra.mxu2 %v9857_v8  ;;  %5331 = vmatmul.bf16.gmra.mxu0 %v9927_v20  ;;  %v3085_v28 = vpop.f32.mrf.mxu3  ;;  %v10167_v22 = vpop.f32.mrf.mxu1  ;;  %v4969_v9 = vshll.u32 %v10177_v19, 16 }
 0x305   : > { %v10165_v35 = vpack.c.bf16 %v3411_v51, %v3410_v63  ;;  %v3137_v18 = vadd.f32 %v3085_v28, %v2945_v6  ;;  %v4492_v63 = vpack.c.b16 %v4469_v21, %v4468_v1  ;;  %v4008_v25 = vrot.slane %v7942_v41, 7 }
 0x306   : > { %v4873_v21 = vunpack.c.l.b16 %v4132_v43 }
 0x307   : > { %v2896_v60 = vpop.f32.mrf.mxu2  ;;  %8014 = vst [vmem:[#allocation2 + $0x50] sm:$0xff] %v10165_v35   ;;  %v7794_v38 = vunpack.c.l.bf16 %v10165_v35  ;;  %v7795_v0 = vunpack.c.h.bf16 %v10165_v35  ;;  %v3344_v17 = vadd.f32 %v10096_v31, %v3137_v18  ;;  %v11370_v31 = vunpack.c.l.bf16 %v10104_v23 }
 0x308   : > { %v2946_v57 = vadd.f32 %v2896_v60, %v11644_v15  ;;  %v4584_v18 = vshll.u32 %v4492_v63, 16  ;;  %v4009_v43 = vsel %vm879_vm2, %v10154_v30, %v4008_v25 }
 0x309   : > { %v10159_v34 = vpop.f32.mrf.mxu0  ;;  %v4096_v51 = vmul.f32 %v7794_v38, %v4007_v12  ;;  %v3806_v6 = vmul.f32 %v7794_v38, %v3718_v48  ;;  %v3807_v28 = vmul.f32 %v7795_v0, %v3720_v37  ;;  %v7874_v48 = vunpack.c.l.bf16 %v8049_v56 }
 0x30a   : > { %5119 = vmatmul.bf16.gmra.mxu3 %v9894_v16  ;;  %v7875_v38 = vunpack.c.h.bf16 %v8049_v56  ;;  %v4581_v37 = vshrl.u32 %v4492_v63, 16  ;;  %v10208_v56 = vrot.slane %v4969_v9, 1  ;;  %v4586_v9 = vrot.slane %v4584_v18, 4 }
 0x30b   : > { %v4133_v5 = vpack.c.bf16 %v4096_v51, %v4096_v51  ;;  %v3843_v45 = vpack.c.bf16 %v3806_v6, %v3806_v6  ;;  %v3844_v12 = vpack.c.bf16 %v3807_v28, %v3807_v28  ;;  %v3380_v6 = vadd.f32 %v10080_v32, %v3344_v17 }
 0x30c   : > { %v3088_v1 = vpop.f32.mrf.mxu3  ;;  %v10199_v62 = vpop.f32.mrf.mxu1  ;;  %v3721_v60 = vrot.slane %v7874_v48, 1  ;;  %v4583_v33 = vrot.slane %v4581_v37, 3  ;;  %v10217_v17 = vrot.slane %v7875_v38, 1  ;;  %v3802_v37 = vmul.f32 %v11370_v31, %v10144_v55  ;;  %v8066_v55 = vld [vmem:[#allocation8 + $0x58] sm:$0xff]  }
 0x30d   : > { %v3138_v15 = vadd.f32 %v3088_v1, %v2946_v57  ;;  %v4874_v13 = vunpack.c.l.b16 %v4133_v5  ;;  %v4470_v50 = vunpack.c.l.b16 %v3843_v45  ;;  %v4471_v51 = vunpack.c.l.b16 %v3844_v12 }
 0x30e   : > { %v7451_v41 = vld [vmem:[#allocation2 + $0x4c] sm:$0xff]  ;;  %v4973_v5 = vshrl.u32 %v10177_v19, 16  ;;  %v10213_v1 = vrot.slane %v7943_v2, 7 }
 0x30f   : > { %v2898_v44 = vpop.f32.mrf.mxu2  ;;  %v3345_v57 = vadd.f32 %v10131_v54, %v3138_v15  ;;  %v10210_v28 = vpack.c.b16 %v4874_v13, %v4873_v21  ;;  %v4493_v45 = vpack.c.b16 %v4471_v51, %v4470_v50  ;;  %v3412_v15 = vmax.f32 %v3380_v6, 0.0 }
 0x310   : > { %v2947_v54 = vadd.f32 %v2898_v44, %v10062_v53  ;;  %v4975_v2 = vor.u32 %v4973_v5, %v10208_v56  ;;  %v4097_v53 = vmul.f32 %v7795_v0, %v4009_v43  ;;  %v3722_v5 = vsel %vm587_vm0, %v10156_v3, %v3721_v60 }
 0x311   : > { %v10196_v36 = vpop.f32.mrf.mxu0  ;;  %v3381_v63 = vadd.f32 %v10080_v32, %v3345_v57  ;;  %v4977_v30 = vshll.u32 %v10210_v28, 16  ;;  %v4590_v13 = vshrl.u32 %v4493_v45, 16  ;;  %v4593_v21 = vshll.u32 %v4493_v45, 16 }
 0x312   : > { %4381 = vmatmul.bf16.gmra.mxu1 %v7451_v41  ;;  %v4011_v57 = vsel %vm879_vm2, %v4008_v25, %v10213_v1  ;;  %v3724_v0 = vsel %vm587_vm0, %v3721_v60, %v10217_v17  ;;  %v10252_v43 = vsel %vm1411_vm1, %v9969_v49, %v10182_v10  ;;  %v11647_v25 = vunpack.c.h.bf16 %v10104_v23  ;;  %v11648_v49 = vld [vmem:[#allocation42_spill] sm:$0xff] }
 0x313   : > { %v3413_v41 = vmax.f32 %v3381_v63, 0.0  ;;  %v10223_v48 = vrot.slane %v4977_v30, 1  ;;  %v4592_v38 = vrot.slane %v4590_v13, 3  ;;  %v4595_v51 = vrot.slane %v4593_v21, 4  ;;  %11646 = vst [vmem:[#allocation22_spill] sm:$0xff] %v10252_v43 }
 0x314   : > { %4739 = vmatmul.bf16.gmra.mxu2 %v9927_v20  ;;  %5336 = vmatmul.bf16.gmra.mxu0 %v9976_v42  ;;  %v3090_v50 = vpop.f32.mrf.mxu3  ;;  %v10232_v18 = vpop.f32.mrf.mxu1  ;;  %v10242_v63 = vor.u32 %v4586_v9, %v4583_v33  ;;  %v3803_v3 = vmul.f32 %v11647_v25, %v10152_v11  ;;  %v4134_v9 = vpack.c.bf16 %v4097_v53, %v4097_v53  ;;  %v7946_v13 = vunpack.c.l.bf16 %v8066_v55 }
 0x315   : > { %v10230_v44 = vpack.c.bf16 %v3413_v41, %v3412_v15  ;;  %v10236_v6 = vsel %vm1817_vm3, %v4975_v2, %v10223_v48  ;;  %v3139_v45 = vadd.f32 %v3090_v50, %v2947_v54  ;;  %v10244_v35 = vor.u32 %v4595_v51, %v4592_v38  ;;  %v8050_v50 = vld [vmem:[#allocation6 + $0x60] sm:$0xff]  }
 0x316   : > { %11645 = vst [vmem:[#allocation24_spill] sm:$0xff] %v10236_v6  ;;  %v4127_v54 = vpack.c.bf16 %v10187_v29, %v10187_v29  ;;  %v11649_v38 = vshrl.u32 %v10163_v24, 16  ;;  %v4566_v25 = vshll.u32 %v10163_v24, 16  ;;  %v3839_v53 = vpack.c.bf16 %v3802_v37, %v3802_v37 }
 0x317   : > { %v2901_v12 = vpop.f32.mrf.mxu2  ;;  %8015 = vst [vmem:[#allocation2 + $0x58] sm:$0xff] %v10230_v44   ;;  %v7798_v30 = vunpack.c.l.bf16 %v10230_v44  ;;  %v11376_v33 = vunpack.c.h.bf16 %v10230_v44  ;;  %v10264_v60 = vsel %vm1411_vm1, %v10242_v63, %v10244_v35  ;;  %v3346_v29 = vadd.f32 %v10159_v34, %v3139_v45 }
 0x318   : > { %v2948_v21 = vadd.f32 %v2901_v12, %v11648_v49  ;;  %v4565_v51 = vrot.slane %v11649_v38, 3  ;;  %v4012_v16 = vrot.slane %v7946_v13, 7 }
 0x319   : > { %v10220_v19 = vpop.f32.mrf.mxu0  ;;  %v4098_v11 = vmul.f32 %v7798_v30, %v4011_v57  ;;  %v3808_v41 = vmul.f32 %v7798_v30, %v3722_v5  ;;  %v3809_v2 = vmul.f32 %v11376_v33, %v3724_v0  ;;  %v4875_v5 = vunpack.c.l.b16 %v4134_v9 }
 0x31a   : > { %5124 = vmatmul.bf16.gmra.mxu3 %v9963_v14  ;;  %v3840_v14 = vpack.c.bf16 %v3803_v3, %v3803_v3  ;;  %v7947_v30 = vunpack.c.h.bf16 %v8066_v55  ;;  %v7878_v0 = vunpack.c.l.bf16 %v8050_v50  ;;  %v3382_v24 = vadd.f32 %v10080_v32, %v3346_v29 }
 0x31b   : > { %v4135_v20 = vpack.c.bf16 %v4098_v11, %v4098_v11  ;;  %v3845_v12 = vpack.c.bf16 %v3808_v41, %v3808_v41  ;;  %v3846_v49 = vpack.c.bf16 %v3809_v2, %v3809_v2  ;;  %v4568_v3 = vrot.slane %v4566_v25, 4 }
 0x31c   : > { %v3093_v57 = vpop.f32.mrf.mxu3  ;;  %v10276_v8 = vpop.f32.mrf.mxu1  ;;  %v4466_v11 = vunpack.c.l.b16 %v3839_v53  ;;  %v7879_v41 = vunpack.c.h.bf16 %v8050_v50  ;;  %v4467_v9 = vunpack.c.l.b16 %v3840_v14  ;;  %v4013_v2 = vsel %vm879_vm2, %v10213_v1, %v4012_v16 }
 0x31d   : > { %v3140_v33 = vadd.f32 %v3093_v57, %v2948_v21  ;;  %v4876_v34 = vunpack.c.l.b16 %v4135_v20  ;;  %v4472_v45 = vunpack.c.l.b16 %v3845_v12  ;;  %v4473_v38 = vunpack.c.l.b16 %v3846_v49 }
 0x31e   : > { %v7452_v37 = vld [vmem:[#allocation2 + $0x54] sm:$0xff]  ;;  %v4981_v20 = vshrl.u32 %v10210_v28, 16  ;;  %v10287_v29 = vrot.slane %v7947_v30, 7  ;;  %v3725_v12 = vrot.slane %v7878_v0, 1  ;;  %v3414_v14 = vmax.f32 %v3382_v24, 0.0 }
 0x31f   : > { %v2903_v15 = vpop.f32.mrf.mxu2  ;;  %v3347_v55 = vadd.f32 %v10196_v36, %v3140_v33  ;;  %v10282_v13 = vpack.c.b16 %v4876_v34, %v4875_v5  ;;  %v4494_v21 = vpack.c.b16 %v4473_v38, %v4472_v45  ;;  %v10293_v5 = vrot.slane %v7879_v41, 1 }
 0x320   : > { %v2949_v33 = vadd.f32 %v2903_v15, %v10068_v59  ;;  %v4983_v57 = vor.u32 %v4981_v20, %v10223_v48  ;;  %v4868_v38 = vunpack.c.l.b16 %v4127_v54  ;;  %v11651_v59 = vunpack.c.h.bf16 %v10092_v40 }
 0x321   : > { %v10274_v31 = vpop.f32.mrf.mxu0  ;;  %v3383_v49 = vadd.f32 %v10080_v32, %v3347_v55  ;;  %v4985_v50 = vshll.u32 %v10282_v13, 16  ;;  %v4599_v53 = vshrl.u32 %v4494_v21, 16  ;;  %v4602_v36 = vshll.u32 %v4494_v21, 16 }
 0x322   : > { %4386 = vmatmul.bf16.gmra.mxu1 %v7452_v37  ;;  %v11650_v37 = vshrl.u32 %v10015_v61, 16  ;;  %v10307_v48 = vmul.f32 %v11651_v59, %v10120_v52  ;;  %v11652_v15 = vunpack.c.h.bf16 %v10230_v44  ;;  %v10315_v20 = vor.u32 %v4568_v3, %v4565_v51  ;;  %v7493_v3 = vld [vmem:[#allocation11 + $0x108] sm:$0xff] }
 0x323   : > { %v3415_v28 = vmax.f32 %v3383_v49, 0.0  ;;  %v10297_v1 = vrot.slane %v4985_v50, 1  ;;  %v4601_v30 = vrot.slane %v4599_v53, 3  ;;  %v4604_v0 = vrot.slane %v4602_v36, 4  ;;  %v11653_v53 = vld [vmem:[#allocation40_spill] sm:$0xff]  ;;  %5511 = vmatpush.bf16.msrb.mxu1 %v7493_v3 }
 0x324   : > { %4744 = vmatmul.bf16.gmra.mxu2 %v9976_v42  ;;  %5341 = vmatmul.bf16.gmra.mxu0 %v10252_v43  ;;  %v3095_v45 = vpop.f32.mrf.mxu3  ;;  %v10302_v55 = vor.u32 %v11650_v37, %v10024_v4  ;;  %v4099_v24 = vmul.f32 %v11652_v15, %v4013_v2  ;;  %v10313_v21 = vpop.f32.mrf.mxu1  ;;  %v8067_v4 = vld [vmem:[#allocation8 + $0x60] sm:$0xff]   ;;  %v4491_v49 = vpack.c.b16 %v4467_v9, %v4466_v11  ;;  %v7523_v42 = vld [vmem:[#allocation11 + $0x1f8] sm:$0xff] }
 0x325   : > { %v10311_v41 = vpack.c.bf16 %v3415_v28, %v3414_v14  ;;  %v10319_v54 = vsel %vm1817_vm3, %v4983_v57, %v10297_v1  ;;  %v10321_v61 = vor.u32 %v4604_v0, %v4601_v30  ;;  %v4015_v40 = vsel %vm879_vm2, %v4012_v16, %v10287_v29  ;;  %v8051_v57 = vld [vmem:[#allocation6 + $0x68] sm:$0xff]   ;;  %6116 = vmatpush.bf16.msra.mxu0 %v7523_v42 }
 0x326   : > { %v3726_v52 = vsel %vm587_vm0, %v10217_v17, %v3725_v12  ;;  %v3728_v44 = vsel %vm587_vm0, %v3725_v12, %v10293_v5  ;;  %v3141_v51 = vadd.f32 %v3095_v45, %v2949_v33  ;;  %v10338_v16 = vpack.c.b16 %v4868_v38, %v10133_v27 }
 0x327   : > { %v2906_v25 = vpop.f32.mrf.mxu2  ;;  %8016 = vst [vmem:[#allocation2 + $0x60] sm:$0xff] %v10311_v41   ;;  %v10333_v2 = vsel %vm1411_vm1, %v10244_v35, %v10321_v61  ;;  %v7802_v11 = vunpack.c.l.bf16 %v10311_v41  ;;  %v7803_v9 = vunpack.c.h.bf16 %v10311_v41  ;;  %v4136_v12 = vpack.c.bf16 %v4099_v24, %v4099_v24 }
 0x328   : > { %v7950_v50 = vunpack.c.l.bf16 %v8067_v4  ;;  %v2950_v36 = vadd.f32 %v2906_v25, %v11653_v53  ;;  %v10347_v28 = vsel %vm1411_vm1, %v10182_v10, %v10315_v20  ;;  %v11655_v27 = vunpack.c.l.bf16 %v10104_v23 }
 0x329   : > { %v10295_v34 = vpop.f32.mrf.mxu0  ;;  %v4100_v35 = vmul.f32 %v7802_v11, %v4015_v40  ;;  %v3810_v33 = vmul.f32 %v7802_v11, %v3726_v52  ;;  %11654 = vst [vmem:[#allocation26_spill] sm:$0xff] %v10347_v28  ;;  %v4572_v0 = vshrl.u32 %v4491_v49, 16  ;;  %v3811_v45 = vmul.f32 %v7803_v9, %v3728_v44 }
 0x32a   : > { %5129 = vmatmul.bf16.gmra.mxu3 %v10031_v47  ;;  %v4092_v30 = vmul.f32 %v11655_v27, %v10136_v39  ;;  %v3348_v25 = vadd.f32 %v10220_v19, %v3141_v51  ;;  %v4575_v37 = vshll.u32 %v4491_v49, 16  ;;  %v7951_v52 = vunpack.c.h.bf16 %v8067_v4 }
 0x32b   : > { %v4137_v59 = vpack.c.bf16 %v4100_v35, %v4100_v35  ;;  %v3847_v15 = vpack.c.bf16 %v3810_v33, %v3810_v33  ;;  %v3848_v40 = vpack.c.bf16 %v3811_v45, %v3811_v45  ;;  %v4016_v10 = vrot.slane %v7950_v50, 7 }
 0x32c   : > { %v3098_v24 = vpop.f32.mrf.mxu3  ;;  %v7882_v3 = vunpack.c.l.bf16 %v8051_v57  ;;  %v4877_v23 = vunpack.c.l.b16 %v4136_v12  ;;  %v4953_v19 = vshll.u32 %v10338_v16, 16  ;;  %v4129_v49 = vpack.c.bf16 %v4092_v30, %v4092_v30 }
 0x32d   : > { %v3142_v11 = vadd.f32 %v3098_v24, %v2950_v36  ;;  %v4878_v39 = vunpack.c.l.b16 %v4137_v59  ;;  %v4474_v27 = vunpack.c.l.b16 %v3847_v15  ;;  %v4475_v44 = vunpack.c.l.b16 %v3848_v40 }
 0x32e   : > { %v7453_v17 = vld [vmem:[#allocation2 + $0x5c] sm:$0xff]  ;;  %v7883_v51 = vunpack.c.h.bf16 %v8051_v57  ;;  %v3384_v4 = vadd.f32 %v10080_v32, %v3348_v25  ;;  %v4574_v36 = vrot.slane %v4572_v0, 3  ;;  %v4577_v12 = vrot.slane %v4575_v37, 4 }
 0x32f   : > { %v2908_v14 = vpop.f32.mrf.mxu2  ;;  %v10357_v53 = vpop.f32.mrf.mxu1  ;;  %v3349_v50 = vadd.f32 %v10274_v31, %v3142_v11  ;;  %v10364_v35 = vpack.c.b16 %v4878_v39, %v4877_v23  ;;  %v4495_v33 = vpack.c.b16 %v4475_v44, %v4474_v27  ;;  %v4017_v45 = vsel %vm879_vm2, %v10287_v29, %v4016_v10 }
 0x330   : > { %v10368_v59 = vrot.slane %v7951_v52, 7  ;;  %v4989_v57 = vshrl.u32 %v10282_v13, 16  ;;  %v3729_v24 = vrot.slane %v7882_v3, 1  ;;  %v2951_v31 = vadd.f32 %v2908_v14, %v10075_v7 }
 0x331   : > { %v10355_v38 = vpop.f32.mrf.mxu0  ;;  %v3385_v15 = vadd.f32 %v10080_v32, %v3349_v50  ;;  %v4993_v25 = vshll.u32 %v10364_v35, 16  ;;  %v4608_v0 = vshrl.u32 %v4495_v33, 16  ;;  %v4611_v40 = vshll.u32 %v4495_v33, 16  ;;  %v8068_v50 = vld [vmem:[#allocation8 + $0x68] sm:$0xff]  }
 0x332   : > { %4391 = vmatmul.bf16.gmra.mxu1 %v7453_v17  ;;  %v10374_v17 = vrot.slane %v7883_v51, 1  ;;  %v3416_v37 = vmax.f32 %v3384_v4, 0.0  ;;  %v4991_v29 = vor.u32 %v4989_v57, %v10297_v1  ;;  %v10381_v27 = vrot.slane %v4953_v19, 1 }
 0x333   : > { %v3417_v11 = vmax.f32 %v3385_v15, 0.0  ;;  %v10379_v52 = vrot.slane %v4993_v25, 1  ;;  %v4610_v13 = vrot.slane %v4608_v0, 3  ;;  %v4613_v44 = vrot.slane %v4611_v40, 4 }
 0x334   : > { %4749 = vmatmul.bf16.gmra.mxu2 %v10252_v43  ;;  %5346 = vmatmul.bf16.gmra.mxu0 %v10347_v28  ;;  %v3100_v39 = vpop.f32.mrf.mxu3  ;;  %v4101_v7 = vmul.f32 %v7803_v9, %v4017_v45  ;;  %v4870_v51 = vunpack.c.l.b16 %v4129_v49  ;;  %v4019_v1 = vsel %vm879_vm2, %v4016_v10, %v10368_v59  ;;  %v3730_v41 = vsel %vm587_vm0, %v10293_v5, %v3729_v24 }
 0x335   : > { %v10385_v14 = vpack.c.bf16 %v3417_v11, %v3416_v37  ;;  %v10391_v4 = vsel %vm1817_vm3, %v4991_v29, %v10379_v52  ;;  %v3143_v19 = vadd.f32 %v3100_v39, %v2951_v31  ;;  %v10395_v33 = vor.u32 %v4613_v44, %v4610_v13  ;;  %v8052_v11 = vld [vmem:[#allocation6 + $0x70] sm:$0xff]  }
 0x336   : > { %v3732_v9 = vsel %vm587_vm0, %v3729_v24, %v10374_v17  ;;  %v11656_v49 = vpack.c.bf16 %v10307_v48, %v10307_v48  ;;  %v10405_v15 = vor.u32 %v4577_v12, %v4574_v36  ;;  %v10412_v25 = vsel %vm1817_vm3, %v10302_v55, %v10381_v27  ;;  %v11658_v48 = vld [vmem:[#allocation60_spill] sm:$0xff] }
 0x337   : > { %v2911_v30 = vpop.f32.mrf.mxu2  ;;  %v10387_v3 = vpop.f32.mrf.mxu1  ;;  %8017 = vst [vmem:[#allocation2 + $0x68] sm:$0xff] %v10385_v14   ;;  %v7806_v10 = vunpack.c.l.bf16 %v10385_v14  ;;  %v7807_v57 = vunpack.c.h.bf16 %v10385_v14  ;;  %v10417_v5 = vsel %vm1411_vm1, %v10321_v61, %v10395_v33  ;;  %v4138_v24 = vpack.c.bf16 %v4101_v7, %v4101_v7 }
 0x338   : > { %v4869_v45 = vunpack.c.l.b16 %v11656_v49  ;;  %11657 = vst [vmem:[#allocation27_spill] sm:$0xff] %v10412_v25  ;;  %v7954_v31 = vunpack.c.l.bf16 %v8068_v50  ;;  %v2952_v36 = vadd.f32 %v2911_v30, %v11658_v48  ;;  %v3350_v29 = vadd.f32 %v10295_v34, %v3143_v19  ;;  %v11661_v48 = vld [vmem:[#allocation46_spill] sm:$0xff] }
 0x339   : > { %v10376_v23 = vpop.f32.mrf.mxu0  ;;  %v4102_v0 = vmul.f32 %v7806_v10, %v4019_v1  ;;  %v3812_v40 = vmul.f32 %v7806_v10, %v3730_v41  ;;  %v3813_v37 = vmul.f32 %v7807_v57, %v3732_v9  ;;  %v10429_v61 = vsel %vm1411_vm1, %v10315_v20, %v10405_v15 }
 0x33a   : > { %5134 = vmatmul.bf16.gmra.mxu3 %v10412_v25  ;;  %v10422_v55 = vpack.c.b16 %v4870_v51, %v4869_v45  ;;  %11659 = vst [vmem:[#allocation28_spill] sm:$0xff] %v10429_v61  ;;  %v4879_v14 = vunpack.c.l.b16 %v4138_v24  ;;  %v7955_v1 = vunpack.c.h.bf16 %v8068_v50  ;;  %v4020_v41 = vrot.slane %v7954_v31, 7  ;;  %v11660_v45 = vld [vmem:[#allocation59_spill] sm:$0xff] }
 0x33b   : > { %v4139_v13 = vpack.c.bf16 %v4102_v0, %v4102_v0  ;;  %v3849_v44 = vpack.c.bf16 %v3812_v40, %v3812_v40  ;;  %v3850_v7 = vpack.c.bf16 %v3813_v37, %v3813_v37  ;;  %v7886_v9 = vunpack.c.l.bf16 %v8052_v11 }
 0x33c   : > { %v3103_v30 = vpop.f32.mrf.mxu3  ;;  %v2741_v25 = vadd.f32 %v11661_v48, %v11660_v45  ;;  %v3386_v20 = vadd.f32 %v10080_v32, %v3350_v29  ;;  %v4957_v0 = vshrl.u32 %v10338_v16, 16  ;;  %v7887_v50 = vunpack.c.h.bf16 %v8052_v11 }
 0x33d   : > { %v3144_v49 = vadd.f32 %v3103_v30, %v2952_v36  ;;  %v4880_v34 = vunpack.c.l.b16 %v4139_v13  ;;  %v4476_v51 = vunpack.c.l.b16 %v3849_v44  ;;  %v4477_v19 = vunpack.c.l.b16 %v3850_v7 }
 0x33e   : > { %v7454_v43 = vld [vmem:[#allocation2 + $0x64] sm:$0xff]  ;;  %v4961_v31 = vshll.u32 %v10422_v55, 16  ;;  %v4997_v37 = vshrl.u32 %v10364_v35, 16  ;;  %v4021_v29 = vsel %vm879_vm2, %v10368_v59, %v4020_v41  ;;  %v10446_v13 = vrot.slane %v7955_v1, 7 }
 0x33f   : > { %v2913_v12 = vpop.f32.mrf.mxu2  ;;  %v10431_v10 = vpop.f32.mrf.mxu1  ;;  %v3351_v24 = vadd.f32 %v10355_v38, %v3144_v49  ;;  %v10441_v36 = vpack.c.b16 %v4880_v34, %v4879_v14  ;;  %v4496_v40 = vpack.c.b16 %v4477_v19, %v4476_v51  ;;  %v3733_v44 = vrot.slane %v7886_v9, 1  ;;  %v8069_v19 = vld [vmem:[#allocation8 + $0x70] sm:$0xff]  }
 0x340   : > { %v3418_v49 = vmax.f32 %v3386_v20, 0.0  ;;  %v2953_v14 = vadd.f32 %v2913_v12, %v2741_v25  ;;  %v4999_v34 = vor.u32 %v4997_v37, %v10379_v52  ;;  %v4963_v48 = vrot.slane %v4961_v31, 1 }
 0x341   : > { %v10424_v39 = vpop.f32.mrf.mxu0  ;;  %v3387_v16 = vadd.f32 %v10080_v32, %v3351_v24  ;;  %v5001_v11 = vshll.u32 %v10441_v36, 16  ;;  %v4617_v38 = vshrl.u32 %v4496_v40, 16  ;;  %v4620_v30 = vshll.u32 %v4496_v40, 16 }
 0x342   : > { %4396 = vmatmul.bf16.gmra.mxu1 %v7454_v43  ;;  %v10451_v43 = vrot.slane %v7887_v50, 1  ;;  %v4103_v24 = vmul.f32 %v7807_v57, %v4021_v29  ;;  %v4959_v25 = vor.u32 %v4957_v0, %v10381_v27  ;;  %v4023_v20 = vsel %vm879_vm2, %v4020_v41, %v10446_v13  ;;  %v7492_v27 = vld [vmem:[#allocation11 + $0x100] sm:$0xff] }
 0x343   : > { %v3419_v35 = vmax.f32 %v3387_v16, 0.0  ;;  %v10455_v59 = vrot.slane %v5001_v11, 1  ;;  %v4619_v1 = vrot.slane %v4617_v38, 3  ;;  %v4622_v9 = vrot.slane %v4620_v30, 4  ;;  %v11662_v16 = vld [vmem:[#allocation49_spill] sm:$0xff]  ;;  %v11665_v30 = vld [vmem:[#allocation43_spill] sm:$0xff]  ;;  %5512 = vmatpush.bf16.msrb.mxu1 %v7492_v27 }
 0x344   : > { %4754 = vmatmul.bf16.gmra.mxu2 %v10347_v28  ;;  %5351 = vmatmul.bf16.gmra.mxu0 %v10429_v61  ;;  %v3105_v45 = vpop.f32.mrf.mxu3  ;;  %v3734_v50 = vsel %vm587_vm0, %v10374_v17, %v3733_v44  ;;  %v3736_v57 = vsel %vm587_vm0, %v3733_v44, %v10451_v43  ;;  %v7958_v31 = vunpack.c.l.bf16 %v8069_v19  ;;  %v11663_v11 = vld [vmem:[#allocation61_spill] sm:$0xff]  ;;  %v10485_v38 = vsel %vm1817_vm3, %v4959_v25, %v4963_v48  ;;  %v10495_v25 = vld [vmem:[#allocation8 + $0x78] sm:$0xff]  }
 0x345   : > { %v10457_v28 = vpack.c.bf16 %v3419_v35, %v3418_v49  ;;  %v10464_v52 = vsel %vm1817_vm3, %v4999_v34, %v10455_v59  ;;  %v10466_v12 = vor.u32 %v4622_v9, %v4619_v1  ;;  %v3145_v37 = vadd.f32 %v3105_v45, %v2953_v14  ;;  %11664 = vst [vmem:[#allocation29_spill] sm:$0xff] %v10485_v38  ;;  %v8053_v35 = vld [vmem:[#allocation6 + $0x78] sm:$0xff]  }
 0x346   : > { %v2743_v17 = vadd.f32 %v11663_v11, %v11662_v16  ;;  %v4140_v44 = vpack.c.bf16 %v4103_v24, %v4103_v24  ;;  %v4965_v1 = vshrl.u32 %v10422_v55, 16  ;;  %v4024_v45 = vrot.slane %v7958_v31, 7  ;;  %v11668_v31 = vld [vmem:[#allocation17_spill] sm:$0xff] }
 0x347   : > { %v2916_v7 = vpop.f32.mrf.mxu2  ;;  %v10459_v40 = vpop.f32.mrf.mxu1  ;;  %8018 = vst [vmem:[#allocation2 + $0x70] sm:$0xff] %v10457_v28   ;;  %v10478_v0 = vsel %vm1411_vm1, %v10395_v33, %v10466_v12  ;;  %v7810_v29 = vunpack.c.l.bf16 %v10457_v28  ;;  %v7811_v41 = vunpack.c.h.bf16 %v10457_v28  ;;  %v10493_v28 = vsel %vm1411_vm1, %v10405_v15, %v10242_v63 }
 0x348   : > { %v2954_v49 = vadd.f32 %v2916_v7, %v11665_v30  ;;  %11666 = vst [vmem:[#allocation33_spill] sm:$0xff] %v10493_v28  ;;  %v3352_v24 = vadd.f32 %v10376_v23, %v3145_v37  ;;  %v7890_v55 = vunpack.c.l.bf16 %v8053_v35  ;;  %v7891_v30 = vunpack.c.h.bf16 %v8053_v35 }
 0x349   : > { %v10453_v51 = vpop.f32.mrf.mxu0  ;;  %v4104_v34 = vmul.f32 %v7810_v29, %v4023_v20  ;;  %v3814_v33 = vmul.f32 %v7810_v29, %v3734_v50  ;;  %v3815_v9 = vmul.f32 %v7811_v41, %v3736_v57  ;;  %v7959_v20 = vunpack.c.h.bf16 %v8069_v19 }
 0x34a   : > { %5139 = vmatmul.bf16.gmra.mxu3 %v10485_v38  ;;  %v4881_v29 = vunpack.c.l.b16 %v4140_v44  ;;  %v7962_v57 = vunpack.c.l.bf16 %v10495_v25  ;;  %v10505_v23 = vadd.f32 %v10094_v58, %v11668_v31  ;;  %v4967_v19 = vor.u32 %v4965_v1, %v4963_v48  ;;  %v10521_v31 = vld [vmem:[#allocation6 + $0x80] sm:$0xff]  }
 0x34b   : > { %v4141_v7 = vpack.c.bf16 %v4104_v34, %v4104_v34  ;;  %v3851_v27 = vpack.c.bf16 %v3814_v33, %v3814_v33  ;;  %v3852_v11 = vpack.c.bf16 %v3815_v9, %v3815_v9  ;;  %v3388_v34 = vadd.f32 %v10080_v32, %v3352_v24 }
 0x34c   : > { %v5005_v9 = vshrl.u32 %v10441_v36, 16  ;;  %v4028_v24 = vrot.slane %v7962_v57, 7  ;;  %v7963_v36 = vunpack.c.h.bf16 %v10495_v25  ;;  %v7507_v25 = vld [vmem:[#allocation11 + $0x178] sm:$0xff] }
 0x34d   : > { %v3108_v50 = vpop.f32.mrf.mxu3  ;;  %v4882_v63 = vunpack.c.l.b16 %v4141_v7  ;;  %v4478_v15 = vunpack.c.l.b16 %v3851_v27  ;;  %v4479_v44 = vunpack.c.l.b16 %v3852_v11  ;;  %v4026_v7 = vrot.slane %v7959_v20, 7  ;;  %5712 = vmatpush.bf16.msra.mxu2 %v7507_v25 }
 0x34e   : > { %v3146_v38 = vadd.f32 %v3108_v50, %v2954_v49  ;;  %v7455_v37 = vld [vmem:[#allocation2 + $0x6c] sm:$0xff]  ;;  %v4025_v49 = vsel %vm879_vm2, %v10446_v13, %v4024_v45  ;;  %v3737_v27 = vrot.slane %v7890_v55, 1  ;;  %v10516_v50 = vrot.slane %v7891_v30, 1 }
 0x34f   : > { %v2918_v14 = vpop.f32.mrf.mxu2  ;;  %v10500_v47 = vpop.f32.mrf.mxu1  ;;  %v10513_v35 = vpack.c.b16 %v4882_v63, %v4881_v29  ;;  %v4497_v58 = vpack.c.b16 %v4479_v44, %v4478_v15  ;;  %v5007_v11 = vor.u32 %v5005_v9, %v10455_v59  ;;  %v3420_v63 = vmax.f32 %v3388_v34, 0.0 }
 0x350   : > { %11667 = vst [vmem:[#allocation41_spill] sm:$0xff] %v10500_v47  ;;  %v3353_v33 = vadd.f32 %v10424_v39, %v3146_v38  ;;  %v2955_v39 = vadd.f32 %v2918_v14, %v2743_v17  ;;  %v10530_v59 = vsel %vm1817_vm3, %v4967_v19, %v10208_v56  ;;  %v7894_v17 = vunpack.c.l.bf16 %v10521_v31  ;;  %v8071_v56 = vld [vmem:[#allocation8 + $0x80] sm:$0xff]  }
 0x351   : > { %v10498_v16 = vpop.f32.mrf.mxu0  ;;  %v5009_v13 = vshll.u32 %v10513_v35, 16  ;;  %v4626_v38 = vshrl.u32 %v4497_v58, 16  ;;  %v4629_v29 = vshll.u32 %v4497_v58, 16  ;;  %11669 = vst [vmem:[#allocation30_spill] sm:$0xff] %v10530_v59  ;;  %v3740_v9 = vsel %vm587_vm0, %v3737_v27, %v10516_v50 }
 0x352   : > { %4401 = vmatmul.bf16.gmra.mxu1 %v7455_v37  ;;  %v3389_v48 = vadd.f32 %v10080_v32, %v3353_v33  ;;  %v4105_v32 = vmul.f32 %v7811_v41, %v4025_v49  ;;  %v4027_v41 = vsel %vm879_vm2, %v4024_v45, %v4026_v7  ;;  %v3738_v49 = vsel %vm587_vm0, %v10451_v43, %v3737_v27 }
 0x353   : > { %v10526_v30 = vrot.slane %v5009_v13, 1  ;;  %v4628_v57 = vrot.slane %v4626_v38, 3  ;;  %v4631_v37 = vrot.slane %v4629_v29, 4  ;;  %v10548_v58 = vrot.slane %v7963_v36, 7  ;;  %v8055_v29 = vld [vmem:[#allocation6 + $0x88] sm:$0xff]  }
 0x354   : > { %4759 = vmatmul.bf16.gmra.mxu2 %v10429_v61  ;;  %5356 = vmatmul.bf16.gmra.mxu0 %v10493_v28  ;;  %v3421_v20 = vmax.f32 %v3389_v48, 0.0  ;;  %v10554_v13 = vsel %vm879_vm2, %v4026_v7, %v4028_v24  ;;  %v7895_v27 = vunpack.c.h.bf16 %v10521_v31  ;;  %v7966_v38 = vunpack.c.l.bf16 %v8071_v56  ;;  %v11673_v36 = vld [vmem:[#allocation62_spill] sm:$0xff] }
 0x355   : > { %v3110_v15 = vpop.f32.mrf.mxu3  ;;  %v10539_v34 = vsel %vm1817_vm3, %v5007_v11, %v10526_v30  ;;  %v10544_v33 = vor.u32 %v4631_v37, %v4628_v57  ;;  %v4142_v11 = vpack.c.bf16 %v4105_v32, %v4105_v32  ;;  %v7515_v32 = vld [vmem:[#allocation11 + $0x1b8] sm:$0xff]  ;;  %v10571_v31 = vsel %vm879_vm2, %v4028_v24, %v10548_v58 }
 0x356   : > { %v10533_v14 = vpack.c.bf16 %v3421_v20, %v3420_v63  ;;  %11671 = vst [vmem:[#allocation45_spill] sm:$0xff] %v10539_v34  ;;  %v3147_v19 = vadd.f32 %v3110_v15, %v2955_v39  ;;  %v10562_v39 = vrot.slane %v7894_v17, 1  ;;  %v7898_v37 = vunpack.c.l.bf16 %v8055_v29  ;;  %5924 = vmatpush.bf16.msra.mxu3 %v7515_v32 }
 0x357   : > { %v2921_v1 = vpop.f32.mrf.mxu2  ;;  %v10535_v44 = vpop.f32.mrf.mxu1  ;;  %v10559_v43 = vsel %vm1411_vm1, %v10466_v12, %v10544_v33  ;;  %v7967_v17 = vunpack.c.h.bf16 %v8071_v56 }
 0x358   : > { %11670 = vst [vmem:[#allocation35_spill] sm:$0xff] %v10535_v44  ;;  %v7814_v48 = vunpack.c.l.bf16 %v10533_v14  ;;  %v11389_v45 = vunpack.c.h.bf16 %v10533_v14  ;;  %v2956_v63 = vadd.f32 %v2921_v1, %v11673_v36  ;;  %v3354_v12 = vadd.f32 %v10453_v51, %v3147_v19  ;;  %v8072_v19 = vld [vmem:[#allocation8 + $0x88] sm:$0xff]  }
 0x359   : > { %v10524_v55 = vpop.f32.mrf.mxu0  ;;  %8019 = vst [vmem:[#allocation2 + $0x78] sm:$0xff] %v10533_v14   ;;  %v4883_v1 = vunpack.c.l.b16 %v4142_v11  ;;  %v7899_v51 = vunpack.c.h.bf16 %v8055_v29  ;;  %v8190_v11 = vld [vmem:[%s11287_s4] ss:$0 sm:$0xff] }
 0x35a   : > { %11672 = vst [vmem:[#allocation39_spill] sm:$0xff] %v10559_v43  ;;  %5144 = vmatmul.bf16.gmra.mxu3 %v10530_v59  ;;  %v4106_v15 = vmul.f32 %v7814_v48, %v4027_v41  ;;  %v3816_v7 = vmul.f32 %v7814_v48, %v3738_v49  ;;  %v3817_v57 = vmul.f32 %v11389_v45, %v3740_v9  ;;  %v4032_v49 = vrot.slane %v7966_v38, 7 }
 0x35b   : > { %v10575_v48 = vrot.slane %v7898_v37, 1  ;;  %v10577_v9 = vrot.slane %v7967_v17, 7  ;;  %v3390_v32 = vadd.f32 %v8190_v11, %v3354_v12  ;;  %v10588_v38 = vrot.slane %v7895_v27, 1  ;;  %v7531_v37 = vld [vmem:[#allocation11 + $0x238] sm:$0xff] }
 0x35c   : > { %v4143_v59 = vpack.c.bf16 %v4106_v15, %v4106_v15  ;;  %v3853_v36 = vpack.c.bf16 %v3816_v7, %v3816_v7  ;;  %v3854_v61 = vpack.c.bf16 %v3817_v57, %v3817_v57  ;;  %v7970_v57 = vunpack.c.l.bf16 %v8072_v19  ;;  %6323 = vmatpush.bf16.msra.mxu1 %v7531_v37 }
 0x35d   : > { %v3113_v41 = vpop.f32.mrf.mxu3  ;;  %v10592_v29 = vsel %vm879_vm2, %v4032_v49, %v10577_v9  ;;  %v5013_v27 = vshrl.u32 %v10513_v35, 16 }
 0x35e   : > { %v3148_v45 = vadd.f32 %v3113_v41, %v2956_v63  ;;  %v4884_v56 = vunpack.c.l.b16 %v4143_v59  ;;  %v4480_v46 = vunpack.c.l.b16 %v3853_v36  ;;  %v4481_v44 = vunpack.c.l.b16 %v3854_v61 }
 0x35f   : > { %v2923_v20 = vpop.f32.mrf.mxu2  ;;  %v10579_v24 = vpop.f32.mrf.mxu1  ;;  %v3747_v59 = vrot.slane %v7899_v51, 1  ;;  %v7971_v36 = vunpack.c.h.bf16 %v8072_v19 }
 0x360   : > { %11674 = vst [vmem:[#allocation32_spill] sm:$0xff] %v10579_v24  ;;  %v10584_v15 = vld [vmem:[#allocation2 + $0x74] sm:$0xff]  ;;  %v3355_v61 = vadd.f32 %v10498_v16, %v3148_v45  ;;  %v10595_v63 = vpack.c.b16 %v4884_v56, %v4883_v1  ;;  %v4498_v7 = vpack.c.b16 %v4481_v44, %v4480_v46  ;;  %v2957_v12 = vadd.f32 %v2923_v20, %v10505_v23 }
 0x361   : > { %v10573_v25 = vpop.f32.mrf.mxu0  ;;  %11675 = vst [vmem:[#allocation44_spill] sm:$0xff] %v10584_v15  ;;  %v10602_v17 = vsel %vm587_vm0, %v10575_v48, %v3747_v59  ;;  %v8038_v46 = vld [vmem:[#allocation2 + $0x90] sm:$0xff]   ;;  %v3422_v44 = vmax.f32 %v3390_v32, 0.0  ;;  %v5015_v1 = vor.u32 %v5013_v27, %v10526_v30  ;;  %v10606_v23 = vrot.slane %v7970_v57, 7 }
 0x362   : > { %4406 = vmatmul.bf16.gmra.mxu1 %v10584_v15  ;;  %v3391_v41 = vadd.f32 %v8190_v11, %v3355_v61  ;;  %v5017_v42 = vshll.u32 %v10595_v63, 16  ;;  %v4635_v16 = vshrl.u32 %v4498_v7, 16  ;;  %v4638_v45 = vshll.u32 %v4498_v7, 16 }
 0x363   : > { %v7827_v20 = vunpack.c.h.bf16 %v8038_v46  ;;  %v11676_v24 = vunpack.c.h.bf16 %v10533_v14  ;;  %v3742_v32 = vsel %vm587_vm0, %v10516_v50, %v10562_v39  ;;  %v7826_v7 = vunpack.c.l.bf16 %v8038_v46 }
 0x364   : > { %4764 = vmatmul.bf16.gmra.mxu2 %v10493_v28  ;;  %5361 = vmatmul.bf16.gmra.mxu0 %v10264_v60  ;;  %v3423_v35 = vmax.f32 %v3391_v41, 0.0  ;;  %v5019_v15 = vrot.slane %v5017_v42, 1  ;;  %v4637_v28 = vrot.slane %v4635_v16, 3  ;;  %v4640_v19 = vrot.slane %v4638_v45, 4 }
 0x365   : > { %v3115_v61 = vpop.f32.mrf.mxu3  ;;  %v4107_v47 = vmul.f32 %v11676_v24, %v10554_v13  ;;  %v4038_v30 = vrot.slane %v7971_v36, 7  ;;  %v3744_v14 = vsel %vm587_vm0, %v10562_v39, %v10588_v38  ;;  %v4033_v13 = vsel %vm879_vm2, %v10548_v58, %v4032_v49 }
 0x366   : > { %v7750_v57 = vpack.c.bf16 %v3423_v35, %v3422_v44  ;;  %v3149_v37 = vadd.f32 %v3115_v61, %v2957_v12  ;;  %v10619_v41 = vsel %vm1817_vm3, %v5015_v1, %v5019_v15  ;;  %v10621_v42 = vor.u32 %v4640_v19, %v4637_v28 }
 0x367   : > { %v4725_v51 = vpop.f32.mrf.mxu2  ;;  %v10616_v27 = vpop.f32.mrf.mxu1  ;;  %11677 = vst [vmem:[#allocation34_spill] sm:$0xff] %v10619_v41  ;;  %v4039_v50 = vsel %vm879_vm2, %v10606_v23, %v4038_v30  ;;  %v10630_v24 = vmul.f32 %v7827_v20, %v4038_v30  ;;  %v4144_v45 = vpack.c.bf16 %v4107_v47, %v4107_v47  ;;  %v3822_v35 = vmul.f32 %v7826_v7, %v3747_v59 }
 0x368   : > { %8020 = vst [vmem:[#allocation2 + $0x80] sm:$0xff] %v7750_v57   ;;  %v3356_v12 = vadd.f32 %v10524_v55, %v3149_v37  ;;  %v10636_v28 = vsel %vm1411_vm1, %v10544_v33, %v10621_v42  ;;  %v7818_v36 = vunpack.c.l.bf16 %v7750_v57  ;;  %v7819_v16 = vunpack.c.h.bf16 %v7750_v57 }
 0x369   : > { %v10608_v56 = vpop.f32.mrf.mxu0  ;;  %11678 = vst [vmem:[#allocation48_spill] sm:$0xff] %v10636_v28  ;;  %v4726_v39 = vadd.f32 %v4725_v51, %v10129_v26  ;;  %v10639_v46 = vmul.f32 %v7826_v7, %v4039_v50  ;;  %v4885_v47 = vunpack.c.l.b16 %v4144_v45  ;;  %v5021_v59 = vshrl.u32 %v10595_v63, 16 }
 0x36a   : > { %v3392_v58 = vadd.f32 %v8190_v11, %v3356_v12  ;;  %5149 = vmatmul.bf16.gmra.mxu3 %v10236_v6  ;;  %v4108_v44 = vmul.f32 %v7818_v36, %v10571_v31  ;;  %v3818_v1 = vmul.f32 %v7818_v36, %v3742_v32  ;;  %v3819_v55 = vmul.f32 %v7819_v16, %v3744_v14 }
 0x36b   : > { %v4109_v20 = vmul.f32 %v7819_v16, %v4033_v13  ;;  %v3859_v14 = vpack.c.bf16 %v3822_v35, %v3822_v35 }
 0x36c   : > { %v3424_v19 = vmax.f32 %v3392_v58, 0.0  ;;  %v4145_v61 = vpack.c.bf16 %v4108_v44, %v4108_v44  ;;  %v3855_v30 = vpack.c.bf16 %v3818_v1, %v3818_v1  ;;  %v3856_v57 = vpack.c.bf16 %v3819_v55, %v3819_v55 }
 0x36d   : > { %v5110_v26 = vpop.f32.mrf.mxu3  ;;  %v4146_v51 = vpack.c.bf16 %v4109_v20, %v4109_v20 }
 0x36e   : > { %v3459_v37 = vpack.c.bf16 %v3424_v19, %v3424_v19  ;;  %v5190_v11 = vadd.f32 %v5110_v26, %v4726_v39  ;;  %v4886_v12 = vunpack.c.l.b16 %v4145_v61  ;;  %v4482_v6 = vunpack.c.l.b16 %v3855_v30 }
 0x36f   : > { %v4727_v49 = vpop.f32.mrf.mxu2  ;;  %v10645_v50 = vpop.f32.mrf.mxu1  ;;  %v10647_v31 = vld [vmem:[#allocation2 + $0x7c] sm:$0xff]  ;;  %v5241_v32 = vunpack.c.l.b16 %v3856_v57  ;;  %v10652_v7 = vunpack.c.l.b16 %v4146_v51  ;;  %v5023_v39 = vor.u32 %v5021_v59, %v5019_v15  ;;  %v5853_v30 = vunpack.c.l.b16 %v3859_v14  ;;  %v7506_v59 = vld [vmem:[#allocation11 + $0x170] sm:$0xff] }
 0x370   : > { %3491 = vst [vmem:[#allocation2 + $0x88] sm:$0xf] %v3459_v37  ;;  %v4903_v13 = vpack.c.b16 %v4886_v12, %v4885_v47  ;;  %v4499_v36 = vpack.c.b16 %v4482_v6, %v4482_v6  ;;  %v10655_v16 = vadd.f32 %v10573_v25, %v5190_v11  ;;  %v4728_v44 = vadd.f32 %v4727_v49, %v10167_v22 }
 0x371   : > { %v10643_v33 = vpop.f32.mrf.mxu0  ;;  %v5243_v45 = vpack.c.b16 %v5241_v32, %v4482_v6  ;;  %v4904_v58 = vpack.c.b16 %v10652_v7, %v10652_v7  ;;  %v3746_v22 = vsel %vm587_vm0, %v10588_v38, %v10575_v48  ;;  %v4150_v48 = vpack.c.bf16 %v10630_v24, %v10630_v24  ;;  %5713 = vmatpush.bf16.msra.mxu2 %v7506_v59 }
 0x372   : > { %4411 = vmatmul.bf16.gmra.mxu1 %v10647_v31  ;;  %v5025_v1 = vshll.u32 %v4903_v13, 16  ;;  %v4644_v55 = vshrl.u32 %v4499_v36, 16  ;;  %v4647_v20 = vshll.u32 %v4499_v36, 16  ;;  %v5029_v15 = vshrl.u32 %v4903_v13, 16 }
 0x373   : > { %v5246_v35 = vshrl.u32 %v5243_v45, 16  ;;  %v5249_v19 = vshll.u32 %v5243_v45, 16  ;;  %v5033_v61 = vshll.u32 %v4904_v58, 16  ;;  %v4037_v58 = vsel %vm879_vm2, %v10577_v9, %v10606_v23 }
 0x374   : > { %4769 = vmatmul.bf16.gmra.mxu2 %v10264_v60  ;;  %5366 = vmatmul.bf16.gmra.mxu0 %v10333_v2  ;;  %v5027_v25 = vrot.slane %v5025_v1, 1  ;;  %v4646_v26 = vrot.slane %v4644_v55, 3  ;;  %v4649_v47 = vrot.slane %v4647_v20, 4  ;;  %v5855_v1 = vpack.c.b16 %v5853_v30, %v5853_v30 }
 0x375   : > { %v5112_v6 = vpop.f32.mrf.mxu3  ;;  %v5248_v51 = vrot.slane %v5246_v35, 3  ;;  %v5251_v37 = vrot.slane %v5249_v19, 4  ;;  %v5035_v11 = vrot.slane %v5033_v61, 1  ;;  %v4149_v24 = vpack.c.bf16 %v10639_v46, %v10639_v46  ;;  %v7514_v19 = vld [vmem:[#allocation11 + $0x1b0] sm:$0xff] }
 0x376   : > { %v5191_v49 = vadd.f32 %v5112_v6, %v4728_v44  ;;  %v10669_v32 = vsel %vm1817_vm3, %v5023_v39, %v5027_v25  ;;  %v4650_v14 = vor.u32 %v4649_v47, %v4646_v26  ;;  %v10671_v36 = vor.u32 %v5029_v15, %v5027_v25  ;;  %5925 = vmatpush.bf16.msra.mxu3 %v7514_v19 }
 0x377   : > { %v4730_v63 = vpop.f32.mrf.mxu2  ;;  %v10666_v12 = vpop.f32.mrf.mxu1  ;;  %11679 = vst [vmem:[#allocation47_spill] sm:$0xff] %v10669_v32  ;;  %v10673_v45 = vor.u32 %v5251_v37, %v5248_v51  ;;  %v8037_v13 = vld [vmem:[#allocation2 + $0x88] sm:$0xff]   ;;  %v6257_v26 = vunpack.c.l.b16 %v4150_v48  ;;  %v5866_v6 = vshrl.u32 %v5855_v1, 16 }
 0x378   : > { %v10682_v38 = vsel %vm1411_vm1, %v10621_v42, %v4650_v14  ;;  %v10686_v39 = vsel %vm1817_vm3, %v10671_v36, %v5035_v11  ;;  %v7822_v44 = vunpack.c.l.bf16 %v8037_v13  ;;  %v10689_v55 = vadd.f32 %v10608_v56, %v5191_v49 }
 0x379   : > { %v10661_v57 = vpop.f32.mrf.mxu0  ;;  %v10694_v9 = vsel %vm1411_vm1, %v10621_v42, %v10673_v45  ;;  %v7823_v23 = vunpack.c.h.bf16 %v8037_v13  ;;  %v4731_v20 = vadd.f32 %v4730_v63, %v10199_v62  ;;  %v5869_v11 = vshll.u32 %v5855_v1, 16 }
 0x37a   : > { %11680 = vst [vmem:[#allocation37_spill] sm:$0xff] %v10694_v9  ;;  %5154 = vmatmul.bf16.gmra.mxu3 %v10319_v54  ;;  %v3820_v61 = vmul.f32 %v7822_v44, %v3746_v22  ;;  %v4110_v30 = vmul.f32 %v7822_v44, %v10592_v29  ;;  %v6256_v62 = vunpack.c.l.b16 %v4149_v24  ;;  %v7522_v22 = vld [vmem:[#allocation11 + $0x1f0] sm:$0xff]  ;;  %v6259_v13 = vpack.c.b16 %v6257_v26, %v6257_v26 }
 0x37b   : > { %v3821_v56 = vmul.f32 %v7823_v23, %v10602_v17  ;;  %v4111_v25 = vmul.f32 %v7823_v23, %v4037_v58  ;;  %6117 = vmatpush.bf16.msra.mxu0 %v7522_v22  ;;  %v5868_v48 = vrot.slane %v5866_v6, 3  ;;  %v8191_v44 = vld [vmem:[#allocation2 + $0xc] sm:$0xff]  ;;  %v5871_v19 = vrot.slane %v5869_v11, 4 }
 0x37c   : > { %v3857_v42 = vpack.c.bf16 %v3820_v61, %v3820_v61  ;;  %v4147_v15 = vpack.c.bf16 %v4110_v30, %v4110_v30  ;;  %v7530_v23 = vld [vmem:[#allocation11 + $0x230] sm:$0xff] }
 0x37d   : > { %v5115_v46 = vpop.f32.mrf.mxu3  ;;  %v3858_v51 = vpack.c.bf16 %v3821_v56, %v3821_v56  ;;  %v4148_v37 = vpack.c.bf16 %v4111_v25, %v4111_v25  ;;  %6324 = vmatpush.bf16.msra.mxu1 %v7530_v23 }
 0x37e   : > { %v5192_v63 = vadd.f32 %v5115_v46, %v4731_v20  ;;  %v10706_v29 = vunpack.c.l.b16 %v3857_v42  ;;  %v5645_v17 = vunpack.c.l.b16 %v4147_v15  ;;  %v6269_v15 = vshll.u32 %v6259_v13, 16 }
 0x37f   : > { %v4732_v35 = vpop.f32.mrf.mxu2  ;;  %v10704_v49 = vpop.f32.mrf.mxu1  ;;  %v5852_v59 = vunpack.c.l.b16 %v3858_v51  ;;  %v5646_v14 = vunpack.c.l.b16 %v4148_v37 }
 0x380   : > { %v10711_v58 = vadd.f32 %v10643_v33, %v5192_v63  ;;  %v5647_v1 = vpack.c.b16 %v5645_v17, %v10652_v7  ;;  %v4733_v30 = vadd.f32 %v4732_v35, %v10232_v18  ;;  %v5872_v17 = vor.u32 %v5871_v19, %v5868_v48 }
 0x381   : > { %v10702_v47 = vpop.f32.mrf.mxu0  ;;  %v5854_v24 = vpack.c.b16 %v5852_v59, %v10706_v29  ;;  %v5648_v20 = vpack.c.b16 %v5646_v14, %v5646_v14  ;;  %v6258_v61 = vpack.c.b16 %v6256_v62, %v5646_v14  ;;  %v6271_v23 = vrot.slane %v6269_v15, 1 }
 0x382   : > { %5513 = vmatmul.bf16.vlgmr.msrb.gmra.mxu1 %v8191_v44  ;;  %v5650_v25 = vshll.u32 %v5647_v1, 16  ;;  %v5654_v6 = vshrl.u32 %v5647_v1, 16 }
 0x383   : > { %v5857_v26 = vshrl.u32 %v5854_v24, 16  ;;  %v5860_v42 = vshll.u32 %v5854_v24, 16  ;;  %v5658_v33 = vshll.u32 %v5648_v20, 16  ;;  %v6261_v51 = vshll.u32 %v6258_v61, 16 }
 0x384   : > { %4774 = vmatmul.bf16.gmra.mxu2 %v10333_v2  ;;  %5371 = vmatmul.bf16.gmra.mxu0 %v10417_v5  ;;  %v5652_v7 = vrot.slane %v5650_v25, 1  ;;  %v6265_v13 = vshrl.u32 %v6258_v61, 16 }
 0x385   : > { %v5117_v37 = vpop.f32.mrf.mxu3  ;;  %v5859_v63 = vrot.slane %v5857_v26, 3  ;;  %v5862_v22 = vrot.slane %v5860_v42, 4  ;;  %v5660_v62 = vrot.slane %v5658_v33, 1  ;;  %v6263_v44 = vrot.slane %v6261_v51, 1 }
 0x386   : > { %v5193_v59 = vadd.f32 %v5117_v37, %v4733_v30  ;;  %v10720_v18 = vsel %vm1817_vm3, %v10671_v36, %v5652_v7  ;;  %v5656_v35 = vor.u32 %v5654_v6, %v5652_v7  ;;  %v10750_v7 = vld [vmem:[#allocation2 + $0x14] sm:$0xff] }
 0x387   : > { %v4735_v56 = vpop.f32.mrf.mxu2  ;;  %v10716_v11 = vpop.f32.mrf.mxu1  ;;  %11681 = vst [vmem:[#allocation65_spill] sm:$0xff] %v10720_v18  ;;  %v5863_v14 = vor.u32 %v5862_v22, %v5859_v63  ;;  %v6267_v19 = vor.u32 %v6265_v13, %v6263_v44  ;;  %v7505_v22 = vld [vmem:[#allocation11 + $0x168] sm:$0xff] }
 0x388   : > { %v10723_v1 = vadd.f32 %v10661_v57, %v5193_v59  ;;  %v10726_v24 = vsel %vm1817_vm3, %v5656_v35, %v5660_v62  ;;  %v10736_v36 = vsel %vm1817_vm3, %v5656_v35, %v6263_v44  ;;  %v4736_v61 = vadd.f32 %v4735_v56, %v10276_v8  ;;  %5714 = vmatpush.bf16.msra.mxu2 %v7505_v22  ;;  %v7513_v35 = vld [vmem:[#allocation11 + $0x1a8] sm:$0xff] }
 0x389   : > { %v5334_v46 = vpop.f32.mrf.mxu0  ;;  %11682 = vst [vmem:[#allocation66_spill] sm:$0xff] %v10726_v24  ;;  %v10730_v48 = vsel %vm1411_vm1, %v10673_v45, %v5863_v14  ;;  %v10733_v20 = vsel %vm1411_vm1, %v5863_v14, %v5872_v17  ;;  %v10741_v30 = vsel %vm1817_vm3, %v6267_v19, %v6271_v23  ;;  %5926 = vmatpush.bf16.msra.mxu3 %v7513_v35  ;;  %v7521_v13 = vld [vmem:[#allocation11 + $0x1e8] sm:$0xff] }
 0x38a   : > { %11683 = vst [vmem:[#allocation64_spill] sm:$0xff] %v10730_v48  ;;  %5159 = vmatmul.bf16.gmra.mxu3 %v10391_v4  ;;  %6118 = vmatpush.bf16.msra.mxu0 %v7521_v13  ;;  %v10766_v23 = vld [vmem:[#allocation2 + $0x1c] sm:$0xff] }
 0x38b   : > { %11684 = vst [vmem:[#allocation52_spill] sm:$0xff] %v10733_v20 }
 0x38c   : > { %11685 = vst [vmem:[#allocation50_spill] sm:$0xff] %v10736_v36 }
 0x38d   : > { %11686 = vst [vmem:[#allocation67_spill] sm:$0xff] %v10741_v30  ;;  %v5120_v26 = vpop.f32.mrf.mxu3 }
 0x38e   : > { %v5194_v42 = vadd.f32 %v5120_v26, %v4736_v61 }
 0x38f   : > { %v4737_v57 = vpop.f32.mrf.mxu2  ;;  %v10743_v33 = vpop.f32.mrf.mxu1 }
 0x390   : > { %v10748_v15 = vadd.f32 %v10702_v47, %v5194_v42  ;;  %v4738_v8 = vadd.f32 %v4737_v57, %v10313_v21 }
 0x391   : > { %v5337_v25 = vpop.f32.mrf.mxu0 }
 0x392   : > { %5518 = vmatmul.bf16.gmra.mxu1 %v10750_v7 }
 0x394   : > { %4779 = vmatmul.bf16.gmra.mxu2 %v10417_v5  ;;  %5376 = vmatmul.bf16.gmra.mxu0 %v10478_v0 }
 0x395   : > { %v5122_v51 = vpop.f32.mrf.mxu3 }
 0x396   : > { %v5195_v37 = vadd.f32 %v5122_v51, %v4738_v8 }
 0x397   : > { %v4740_v56 = vpop.f32.mrf.mxu2  ;;  %v10754_v63 = vpop.f32.mrf.mxu1 }
 0x398   : > { %v10756_v17 = vadd.f32 %v5334_v46, %v5195_v37  ;;  %v4741_v47 = vadd.f32 %v4740_v56, %v10357_v53  ;;  %v7529_v53 = vld [vmem:[#allocation11 + $0x228] sm:$0xff] }
 0x399   : > { %v5339_v6 = vpop.f32.mrf.mxu0  ;;  %6325 = vmatpush.bf16.msra.mxu1 %v7529_v53 }
 0x39a   : > { %5164 = vmatmul.bf16.gmra.mxu3 %v10464_v52 }
 0x39d   : > { %v5125_v14 = vpop.f32.mrf.mxu3 }
 0x39e   : > { %v5196_v21 = vadd.f32 %v5125_v14, %v4741_v47 }
 0x39f   : > { %v4742_v59 = vpop.f32.mrf.mxu2  ;;  %v10760_v44 = vpop.f32.mrf.mxu1 }
 0x3a0   : > { %v10764_v46 = vadd.f32 %v5337_v25, %v5196_v21  ;;  %v4743_v19 = vadd.f32 %v4742_v59, %v10387_v3  ;;  %v10782_v59 = vld [vmem:[#allocation2 + $0x24] sm:$0xff] }
 0x3a1   : > { %v5342_v62 = vpop.f32.mrf.mxu0 }
 0x3a2   : > { %5523 = vmatmul.bf16.gmra.mxu1 %v10766_v23 }
 0x3a4   : > { %4784 = vmatmul.bf16.gmra.mxu2 %v10478_v0  ;;  %5381 = vmatmul.bf16.gmra.mxu0 %v10559_v43 }
 0x3a5   : > { %v5127_v26 = vpop.f32.mrf.mxu3 }
 0x3a6   : > { %v5197_v42 = vadd.f32 %v5127_v26, %v4743_v19  ;;  %v7504_v19 = vld [vmem:[#allocation11 + $0x160] sm:$0xff] }
 0x3a7   : > { %v4745_v61 = vpop.f32.mrf.mxu2  ;;  %v10770_v8 = vpop.f32.mrf.mxu1  ;;  %v7520_v26 = vld [vmem:[#allocation11 + $0x1e0] sm:$0xff]  ;;  %5715 = vmatpush.bf16.msra.mxu2 %v7504_v19  ;;  %v7510_v19 = vld [vmem:[#allocation11 + $0x190] sm:$0xff] }
 0x3a8   : > { %v10772_v56 = vadd.f32 %v5339_v6, %v5197_v42  ;;  %v4746_v25 = vadd.f32 %v4745_v61, %v10431_v10  ;;  %v7512_v61 = vld [vmem:[#allocation11 + $0x1a0] sm:$0xff]  ;;  %6119 = vmatpush.bf16.msra.mxu0 %v7520_v26  ;;  %v7509_v26 = vld [vmem:[#allocation11 + $0x188] sm:$0xff] }
 0x3a9   : > { %v5344_v57 = vpop.f32.mrf.mxu0  ;;  %5927 = vmatpush.bf16.msra.mxu3 %v7512_v61  ;;  %v7518_v61 = vld [vmem:[#allocation11 + $0x1d0] sm:$0xff] }
 0x3aa   : > { %5169 = vmatmul.bf16.gmra.mxu3 %v10539_v34 }
 0x3ad   : > { %v5130_v22 = vpop.f32.mrf.mxu3 }
 0x3ae   : > { %v5198_v47 = vadd.f32 %v5130_v22, %v4746_v25 }
 0x3af   : > { %v4747_v51 = vpop.f32.mrf.mxu2  ;;  %v10776_v35 = vpop.f32.mrf.mxu1 }
 0x3b0   : > { %v10780_v3 = vadd.f32 %v5342_v62, %v5198_v47  ;;  %v4748_v6 = vadd.f32 %v4747_v51, %v10459_v40  ;;  %v11687_v62 = vld [vmem:[#allocation41_spill] sm:$0xff]  ;;  %v7503_v40 = vld [vmem:[#allocation11 + $0x158] sm:$0xff] }
 0x3b1   : > { %v5347_v37 = vpop.f32.mrf.mxu0  ;;  %v7511_v51 = vld [vmem:[#allocation11 + $0x198] sm:$0xff]  ;;  %5716 = vmatpush.bf16.msra.mxu2 %v7503_v40 }
 0x3b2   : > { %5528 = vmatmul.bf16.gmra.mxu1 %v10782_v59  ;;  %v7519_v47 = vld [vmem:[#allocation11 + $0x1d8] sm:$0xff]  ;;  %5928 = vmatpush.bf16.msra.mxu3 %v7511_v51  ;;  %v11688_v51 = vld [vmem:[#allocation35_spill] sm:$0xff] }
 0x3b3   : > { %6120 = vmatpush.bf16.msra.mxu0 %v7519_v47  ;;  %v10800_v40 = vld [vmem:[#allocation2 + $0x2c] sm:$0xff] }
 0x3b4   : > { %4789 = vmatmul.bf16.gmra.mxu2 %v10559_v43  ;;  %5386 = vmatmul.bf16.gmra.mxu0 %v10636_v28 }
 0x3b5   : > { %v5132_v21 = vpop.f32.mrf.mxu3 }
 0x3b6   : > { %v5199_v13 = vadd.f32 %v5132_v21, %v4748_v6  ;;  %5929 = vmatpush.bf16.msra.mxu3 %v7510_v19 }
 0x3b7   : > { %v4750_v14 = vpop.f32.mrf.mxu2  ;;  %v10786_v53 = vpop.f32.mrf.mxu1  ;;  %6121 = vmatpush.bf16.msra.mxu0 %v7518_v61  ;;  %v7508_v61 = vld [vmem:[#allocation11 + $0x180] sm:$0xff] }
 0x3b8   : > { %v10788_v42 = vadd.f32 %v5344_v57, %v5199_v13  ;;  %v4751_v25 = vadd.f32 %v4750_v14, %v11687_v62  ;;  %v5244_v57 = vpack.c.b16 %v10706_v29, %v10706_v29  ;;  %v7502_v13 = vld [vmem:[#allocation11 + $0x150] sm:$0xff]  ;;  %v7501_v14 = vld [vmem:[#allocation11 + $0x148] sm:$0xff]  ;;  %v7528_v29 = vld [vmem:[#allocation11 + $0x220] sm:$0xff] }
 0x3b9   : > { %v5349_v10 = vpop.f32.mrf.mxu0  ;;  %5717 = vmatpush.bf16.msra.mxu2 %v7502_v13  ;;  %6326 = vmatpush.bf16.msra.mxu1 %v7528_v29 }
 0x3ba   : > { %5174 = vmatmul.bf16.gmra.mxu3 %v10619_v41  ;;  %v5255_v20 = vshrl.u32 %v5244_v57, 16  ;;  %v5258_v24 = vshll.u32 %v5244_v57, 16  ;;  %v11689_v57 = vld [vmem:[#allocation32_spill] sm:$0xff] }
 0x3bb   : > { %5930 = vmatpush.bf16.msra.mxu3 %v7509_v26 }
 0x3bc   : > { %v5257_v19 = vrot.slane %v5255_v20, 3  ;;  %v5260_v18 = vrot.slane %v5258_v24, 4 }
 0x3bd   : > { %v5135_v6 = vpop.f32.mrf.mxu3  ;;  %5718 = vmatpush.bf16.msra.mxu2 %v7501_v14 }
 0x3be   : > { %v5200_v21 = vadd.f32 %v5135_v6, %v4751_v25  ;;  %v7517_v25 = vld [vmem:[#allocation11 + $0x1c8] sm:$0xff]  ;;  %v5261_v29 = vor.u32 %v5260_v18, %v5257_v19 }
 0x3bf   : > { %v4752_v22 = vpop.f32.mrf.mxu2  ;;  %v10792_v36 = vpop.f32.mrf.mxu1  ;;  %6122 = vmatpush.bf16.msra.mxu0 %v7517_v25  ;;  %5931 = vmatpush.bf16.msra.mxu3 %v7508_v61 }
 0x3c0   : > { %v10798_v62 = vadd.f32 %v5347_v37, %v5200_v21  ;;  %v4753_v47 = vadd.f32 %v4752_v22, %v11688_v51  ;;  %v5262_v24 = vsel %vm1411_vm1, %v10673_v45, %v5261_v29 }
 0x3c1   : > { %v5352_v30 = vpop.f32.mrf.mxu0 }
 0x3c2   : > { %5533 = vmatmul.bf16.gmra.mxu1 %v10800_v40 }
 0x3c4   : > { %4794 = vmatmul.bf16.gmra.mxu2 %v10636_v28  ;;  %5391 = vmatmul.bf16.gmra.mxu0 %v10694_v9  ;;  %v7500_v9 = vld [vmem:[#allocation11 + $0x140] sm:$0xff] }
 0x3c5   : > { %v5137_v13 = vpop.f32.mrf.mxu3  ;;  %v7516_v28 = vld [vmem:[#allocation11 + $0x1c0] sm:$0xff]  ;;  %5719 = vmatpush.bf16.msra.mxu2 %v7500_v9 }
 0x3c6   : > { %v5201_v37 = vadd.f32 %v5137_v13, %v4753_v47  ;;  %6123 = vmatpush.bf16.msra.mxu0 %v7516_v28  ;;  %v10817_v28 = vld [vmem:[#allocation2 + $0x34] sm:$0xff] }
 0x3c7   : > { %v4755_v6 = vpop.f32.mrf.mxu2  ;;  %v10804_v21 = vpop.f32.mrf.mxu1 }
 0x3c8   : > { %v10806_v22 = vadd.f32 %v5349_v10, %v5201_v37  ;;  %v4756_v14 = vadd.f32 %v4755_v6, %v11689_v57 }
 0x3c9   : > { %v5354_v48 = vpop.f32.mrf.mxu0 }
 0x3ca   : > { %5179 = vmatmul.bf16.gmra.mxu3 %v10669_v32 }
 0x3cd   : > { %v5140_v51 = vpop.f32.mrf.mxu3 }
 0x3ce   : > { %v5202_v47 = vadd.f32 %v5140_v51, %v4756_v14  ;;  %v11690_v51 = vld [vmem:[#allocation19_spill] sm:$0xff] }
 0x3cf   : > { %v4757_v26 = vpop.f32.mrf.mxu2  ;;  %v10810_v13 = vpop.f32.mrf.mxu1 }
 0x3d0   : > { %v10815_v9 = vadd.f32 %v5352_v30, %v5202_v47  ;;  %v4758_v20 = vadd.f32 %v4757_v26, %v10616_v27  ;;  %v10833_v26 = vld [vmem:[#allocation2 + $0x3c] sm:$0xff] }
 0x3d1   : > { %v5357_v25 = vpop.f32.mrf.mxu0 }
 0x3d2   : > { %5538 = vmatmul.bf16.gmra.mxu1 %v10817_v28 }
 0x3d4   : > { %4799 = vmatmul.bf16.gmra.mxu2 %v10682_v38  ;;  %5396 = vmatmul.bf16.gmra.mxu0 %v5262_v24 }
 0x3d5   : > { %v5142_v6 = vpop.f32.mrf.mxu3 }
 0x3d6   : > { %v5203_v37 = vadd.f32 %v5142_v6, %v4758_v20 }
 0x3d7   : > { %v4760_v18 = vpop.f32.mrf.mxu2  ;;  %v10821_v19 = vpop.f32.mrf.mxu1 }
 0x3d8   : > { %v10823_v61 = vadd.f32 %v5354_v48, %v5203_v37  ;;  %v4761_v45 = vadd.f32 %v4760_v18, %v10645_v50  ;;  %v7527_v48 = vld [vmem:[#allocation11 + $0x218] sm:$0xff] }
 0x3d9   : > { %v5359_v10 = vpop.f32.mrf.mxu0  ;;  %6327 = vmatpush.bf16.msra.mxu1 %v7527_v48  ;;  %v11691_v37 = vld [vmem:[#allocation20_spill] sm:$0xff]  ;;  %v10849_v48 = vld [vmem:[#allocation2 + $0x44] sm:$0xff] }
 0x3da   : > { %5184 = vmatmul.bf16.gmra.mxu3 %v10686_v39 }
 0x3dd   : > { %v5145_v57 = vpop.f32.mrf.mxu3 }
 0x3de   : > { %v5204_v14 = vadd.f32 %v5145_v57, %v4761_v45 }
 0x3df   : > { %v4762_v38 = vpop.f32.mrf.mxu2  ;;  %v10827_v29 = vpop.f32.mrf.mxu1 }
 0x3e0   : > { %v10831_v27 = vadd.f32 %v5357_v25, %v5204_v14  ;;  %v4763_v39 = vadd.f32 %v4762_v38, %v10666_v12  ;;  %v11692_v12 = vld [vmem:[#allocation23_spill] sm:$0xff] }
 0x3e1   : > { %v5362_v30 = vpop.f32.mrf.mxu0 }
 0x3e2   : > { %5543 = vmatmul.bf16.gmra.mxu1 %v10833_v26 }
 0x3e4   : > { %5720 = vmatmul.bf16.vlgmr.msra.gmra.mxu2 %v11690_v51  ;;  %6124 = vmatmul.bf16.vlgmr.msra.gmra.mxu0 %v10750_v7 }
 0x3e5   : > { %v5147_v24 = vpop.f32.mrf.mxu3 }
 0x3e6   : > { %v5205_v20 = vadd.f32 %v5147_v24, %v4763_v39 }
 0x3e7   : > { %v4765_v50 = vpop.f32.mrf.mxu2  ;;  %v10837_v18 = vpop.f32.mrf.mxu1 }
 0x3e8   : > { %v10839_v6 = vadd.f32 %v5359_v10, %v5205_v20  ;;  %v4766_v7 = vadd.f32 %v4765_v50, %v10704_v49 }
 0x3e9   : > { %v5364_v47 = vpop.f32.mrf.mxu0 }
 0x3ea   : > { %5932 = vmatmul.bf16.vlgmr.msra.gmra.mxu3 %v11691_v37 }
 0x3ed   : > { %v5150_v57 = vpop.f32.mrf.mxu3 }
 0x3ee   : > { %v5206_v14 = vadd.f32 %v5150_v57, %v4766_v7  ;;  %v11693_v7 = vld [vmem:[#allocation21_spill] sm:$0xff] }
 0x3ef   : > { %v4767_v25 = vpop.f32.mrf.mxu2  ;;  %v10843_v51 = vpop.f32.mrf.mxu1 }
 0x3f0   : > { %v10847_v38 = vadd.f32 %v5362_v30, %v5206_v14  ;;  %v4768_v10 = vadd.f32 %v4767_v25, %v10716_v11  ;;  %v11694_v11 = vld [vmem:[#allocation18_spill] sm:$0xff] }
 0x3f1   : > { %v5367_v45 = vpop.f32.mrf.mxu0 }
 0x3f2   : > { %5548 = vmatmul.bf16.gmra.mxu1 %v10849_v48 }
 0x3f4   : > { %5725 = vmatmul.bf16.gmra.mxu2 %v11692_v12  ;;  %6129 = vmatmul.bf16.gmra.mxu0 %v10766_v23 }
 0x3f5   : > { %v5152_v50 = vpop.f32.mrf.mxu3 }
 0x3f6   : > { %v5207_v24 = vadd.f32 %v5152_v50, %v4768_v10  ;;  %v7526_v10 = vld [vmem:[#allocation11 + $0x210] sm:$0xff] }
 0x3f7   : > { %v4770_v39 = vpop.f32.mrf.mxu2  ;;  %v10853_v20 = vpop.f32.mrf.mxu1  ;;  %6328 = vmatpush.bf16.msra.mxu1 %v7526_v10  ;;  %v11696_v10 = vld [vmem:[#allocation25_spill] sm:$0xff] }
 0x3f8   : > { %v10855_v37 = vadd.f32 %v5364_v47, %v5207_v24  ;;  %v4771_v23 = vadd.f32 %v4770_v39, %v10743_v33  ;;  %v10866_v47 = vld [vmem:[#allocation2 + $0x4c] sm:$0xff] }
 0x3f9   : > { %v5369_v49 = vpop.f32.mrf.mxu0 }
 0x3fa   : > { %5937 = vmatmul.bf16.gmra.mxu3 %v11693_v7 }
 0x3fd   : > { %v5155_v14 = vpop.f32.mrf.mxu3 }
 0x3fe   : > { %v5208_v32 = vadd.f32 %v5155_v14, %v4771_v23 }
 0x3ff   : > { %v4772_v30 = vpop.f32.mrf.mxu2  ;;  %v5514_v41 = vpop.f32.mrf.mxu1 }
 0x400   : > { %v10860_v43 = vadd.f32 %v5514_v41, %v10655_v16  ;;  %v10864_v25 = vadd.f32 %v5367_v45, %v5208_v32  ;;  %v4773_v33 = vadd.f32 %v4772_v30, %v10754_v63  ;;  %v11695_v32 = vld [vmem:[#allocation63_spill] sm:$0xff] }
 0x401   : > { %v5372_v57 = vpop.f32.mrf.mxu0 }
 0x402   : > { %5553 = vmatmul.bf16.gmra.mxu1 %v10866_v47 }
 0x404   : > { %5730 = vmatmul.bf16.gmra.mxu2 %v11694_v11  ;;  %6134 = vmatmul.bf16.gmra.mxu0 %v10782_v59 }
 0x405   : > { %v5157_v24 = vpop.f32.mrf.mxu3 }
 0x406   : > { %v5209_v7 = vadd.f32 %v5157_v24, %v4773_v33 }
 0x407   : > { %v4775_v39 = vpop.f32.mrf.mxu2  ;;  %v5516_v41 = vpop.f32.mrf.mxu1 }
 0x408   : > { %v10871_v16 = vadd.f32 %v5516_v41, %v10689_v55  ;;  %v10873_v23 = vadd.f32 %v5369_v49, %v5209_v7  ;;  %v4776_v59 = vadd.f32 %v4775_v39, %v10760_v44  ;;  %v10884_v49 = vld [vmem:[#allocation2 + $0x54] sm:$0xff] }
 0x409   : > { %v5374_v50 = vpop.f32.mrf.mxu0 }
 0x40a   : > { %5942 = vmatmul.bf16.gmra.mxu3 %v11695_v32  ;;  %v11697_v32 = vld [vmem:[#allocation22_spill] sm:$0xff] }
 0x40d   : > { %v5160_v11 = vpop.f32.mrf.mxu3 }
 0x40e   : > { %v5210_v34 = vadd.f32 %v5160_v11, %v4776_v59 }
 0x40f   : > { %v4777_v45 = vpop.f32.mrf.mxu2  ;;  %v5519_v63 = vpop.f32.mrf.mxu1 }
 0x410   : > { %v10878_v30 = vadd.f32 %v5519_v63, %v10711_v58  ;;  %v10882_v55 = vadd.f32 %v5372_v57, %v5210_v34  ;;  %v4778_v44 = vadd.f32 %v4777_v45, %v10770_v8  ;;  %v11698_v45 = vld [vmem:[#allocation27_spill] sm:$0xff] }
 0x411   : > { %v5377_v14 = vpop.f32.mrf.mxu0 }
 0x412   : > { %5558 = vmatmul.bf16.gmra.mxu1 %v10884_v49 }
 0x414   : > { %5735 = vmatmul.bf16.gmra.mxu2 %v11696_v10  ;;  %6139 = vmatmul.bf16.gmra.mxu0 %v10800_v40 }
 0x415   : > { %v5162_v24 = vpop.f32.mrf.mxu3 }
 0x416   : > { %v5211_v11 = vadd.f32 %v5162_v24, %v4778_v44  ;;  %v7525_v44 = vld [vmem:[#allocation11 + $0x208] sm:$0xff] }
 0x417   : > { %v4780_v33 = vpop.f32.mrf.mxu2  ;;  %v5521_v7 = vpop.f32.mrf.mxu1  ;;  %6329 = vmatpush.bf16.msra.mxu1 %v7525_v44  ;;  %v11700_v44 = vld [vmem:[#allocation29_spill] sm:$0xff] }
 0x418   : > { %v10889_v58 = vadd.f32 %v5521_v7, %v10723_v1  ;;  %v10891_v41 = vadd.f32 %v5374_v50, %v5211_v11  ;;  %v4781_v34 = vadd.f32 %v4780_v33, %v10776_v35  ;;  %v10902_v50 = vld [vmem:[#allocation2 + $0x5c] sm:$0xff] }
 0x419   : > { %v5379_v39 = vpop.f32.mrf.mxu0 }
 0x41a   : > { %5947 = vmatmul.bf16.gmra.mxu3 %v11697_v32 }
 0x41d   : > { %v5165_v59 = vpop.f32.mrf.mxu3 }
 0x41e   : > { %v5212_v63 = vadd.f32 %v5165_v59, %v4781_v34 }
 0x41f   : > { %v4782_v40 = vpop.f32.mrf.mxu2  ;;  %v5524_v10 = vpop.f32.mrf.mxu1 }
 0x420   : > { %v10896_v8 = vadd.f32 %v5524_v10, %v10748_v15  ;;  %v10900_v1 = vadd.f32 %v5377_v14, %v5212_v63  ;;  %v4783_v35 = vadd.f32 %v4782_v40, %v10786_v53 }
 0x421   : > { %v5382_v57 = vpop.f32.mrf.mxu0 }
 0x422   : > { %5563 = vmatmul.bf16.gmra.mxu1 %v10902_v50 }
 0x424   : > { %5740 = vmatmul.bf16.gmra.mxu2 %v11698_v45  ;;  %6144 = vmatmul.bf16.gmra.mxu0 %v10817_v28  ;;  %v11699_v28 = vld [vmem:[#allocation26_spill] sm:$0xff] }
 0x425   : > { %v5167_v11 = vpop.f32.mrf.mxu3 }
 0x426   : > { %v5213_v7 = vadd.f32 %v5167_v11, %v4783_v35 }
 0x427   : > { %v4785_v33 = vpop.f32.mrf.mxu2  ;;  %v5526_v15 = vpop.f32.mrf.mxu1 }
 0x428   : > { %v10907_v10 = vadd.f32 %v5526_v15, %v10756_v17  ;;  %v10909_v32 = vadd.f32 %v5379_v39, %v5213_v7  ;;  %v4786_v14 = vadd.f32 %v4785_v33, %v10792_v36  ;;  %v10920_v39 = vld [vmem:[#allocation2 + $0x64] sm:$0xff] }
 0x429   : > { %v5384_v24 = vpop.f32.mrf.mxu0 }
 0x42a   : > { %5952 = vmatmul.bf16.gmra.mxu3 %v11699_v28 }
 0x42d   : > { %v5170_v63 = vpop.f32.mrf.mxu3 }
 0x42e   : > { %v5214_v45 = vadd.f32 %v5170_v63, %v4786_v14  ;;  %v11701_v14 = vld [vmem:[#allocation28_spill] sm:$0xff] }
 0x42f   : > { %v4787_v34 = vpop.f32.mrf.mxu2  ;;  %v5529_v53 = vpop.f32.mrf.mxu1 }
 0x430   : > { %v10914_v40 = vadd.f32 %v5529_v53, %v10764_v46  ;;  %v10918_v17 = vadd.f32 %v5382_v57, %v5214_v45  ;;  %v4788_v36 = vadd.f32 %v4787_v34, %v10804_v21  ;;  %v11703_v34 = vld [vmem:[#allocation30_spill] sm:$0xff] }
 0x431   : > { %v5387_v59 = vpop.f32.mrf.mxu0 }
 0x432   : > { %5568 = vmatmul.bf16.gmra.mxu1 %v10920_v39 }
 0x434   : > { %5745 = vmatmul.bf16.gmra.mxu2 %v11700_v44  ;;  %6149 = vmatmul.bf16.gmra.mxu0 %v10833_v26 }
 0x435   : > { %v5172_v11 = vpop.f32.mrf.mxu3 }
 0x436   : > { %v5215_v7 = vadd.f32 %v5172_v11, %v4788_v36  ;;  %v7524_v36 = vld [vmem:[#allocation11 + $0x200] sm:$0xff] }
 0x437   : > { %v4790_v35 = vpop.f32.mrf.mxu2  ;;  %v5531_v15 = vpop.f32.mrf.mxu1  ;;  %6330 = vmatpush.bf16.msra.mxu1 %v7524_v36  ;;  %v11705_v36 = vld [vmem:[#allocation24_spill] sm:$0xff] }
 0x438   : > { %v10925_v46 = vadd.f32 %v5531_v15, %v10772_v56  ;;  %v10927_v28 = vadd.f32 %v5384_v24, %v5215_v7  ;;  %v4791_v26 = vadd.f32 %v4790_v35, %v10810_v13  ;;  %v10938_v24 = vld [vmem:[#allocation2 + $0x6c] sm:$0xff] }
 0x439   : > { %v5389_v33 = vpop.f32.mrf.mxu0 }
 0x43a   : > { %5957 = vmatmul.bf16.gmra.mxu3 %v11701_v14 }
 0x43d   : > { %v5175_v63 = vpop.f32.mrf.mxu3 }
 0x43e   : > { %v5216_v53 = vadd.f32 %v5175_v63, %v4791_v26 }
 0x43f   : > { %v4792_v57 = vpop.f32.mrf.mxu2  ;;  %v5534_v44 = vpop.f32.mrf.mxu1 }
 0x440   : > { %v10932_v21 = vadd.f32 %v5534_v44, %v10780_v3  ;;  %v10936_v56 = vadd.f32 %v5387_v59, %v5216_v53  ;;  %v4793_v13 = vadd.f32 %v4792_v57, %v10821_v19 }
 0x441   : > { %v5392_v45 = vpop.f32.mrf.mxu0 }
 0x442   : > { %11702 = vst [vmem:[#allocation38_spill] sm:$0xff] %v10932_v21  ;;  %5573 = vmatmul.bf16.gmra.mxu1 %v10938_v24 }
 0x444   : > { %5750 = vmatmul.bf16.gmra.mxu2 %v11703_v34  ;;  %6154 = vmatmul.bf16.gmra.mxu0 %v10849_v48  ;;  %v11704_v48 = vld [vmem:[#allocation33_spill] sm:$0xff] }
 0x445   : > { %v5177_v7 = vpop.f32.mrf.mxu3 }
 0x446   : > { %v5217_v15 = vadd.f32 %v5177_v7, %v4793_v13 }
 0x447   : > { %v4795_v35 = vpop.f32.mrf.mxu2  ;;  %v5536_v3 = vpop.f32.mrf.mxu1 }
 0x448   : > { %v10943_v44 = vadd.f32 %v5536_v3, %v10788_v42  ;;  %v10945_v14 = vadd.f32 %v5389_v33, %v5217_v15  ;;  %v4796_v59 = vadd.f32 %v4795_v35, %v10827_v29  ;;  %v11706_v33 = vld [vmem:[#allocation44_spill] sm:$0xff] }
 0x449   : > { %v5394_v11 = vpop.f32.mrf.mxu0 }
 0x44a   : > { %5962 = vmatmul.bf16.gmra.mxu3 %v11704_v48 }
 0x44d   : > { %v5180_v63 = vpop.f32.mrf.mxu3 }
 0x44e   : > { %v5218_v21 = vadd.f32 %v5180_v63, %v4796_v59 }
 0x44f   : > { %v4797_v26 = vpop.f32.mrf.mxu2  ;;  %v5539_v19 = vpop.f32.mrf.mxu1 }
 0x450   : > { %v10950_v57 = vadd.f32 %v5539_v19, %v10798_v62  ;;  %v10954_v42 = vadd.f32 %v5392_v45, %v5218_v21  ;;  %v4798_v13 = vadd.f32 %v4797_v26, %v10837_v18 }
 0x451   : > { %v5397_v53 = vpop.f32.mrf.mxu0 }
 0x452   : > { %5578 = vmatmul.bf16.gmra.mxu1 %v11706_v33 }
 0x454   : > { %5755 = vmatmul.bf16.gmra.mxu2 %v11705_v36  ;;  %6159 = vmatmul.bf16.gmra.mxu0 %v10866_v47 }
 0x455   : > { %v5182_v29 = vpop.f32.mrf.mxu3 }
 0x456   : > { %v5219_v35 = vadd.f32 %v5182_v29, %v4798_v13 }
 0x457   : > { %v4800_v7 = vpop.f32.mrf.mxu2  ;;  %v5541_v15 = vpop.f32.mrf.mxu1 }
 0x458   : > { %v10959_v3 = vadd.f32 %v5541_v15, %v10806_v22  ;;  %v10961_v62 = vadd.f32 %v5394_v11, %v5219_v35  ;;  %v4801_v47 = vadd.f32 %v4800_v7, %v10843_v51 }
 0x459   : > { %v5399_v48 = vpop.f32.mrf.mxu0 }
 0x45a   : > { %5967 = vmatmul.bf16.gmra.mxu3 %v10264_v60 }
 0x45d   : > { %v5185_v21 = vpop.f32.mrf.mxu3 }
 0x45e   : > { %v5220_v59 = vadd.f32 %v5185_v21, %v4801_v47 }
 0x45f   : > { %v4802_v45 = vpop.f32.mrf.mxu2  ;;  %v5544_v63 = vpop.f32.mrf.mxu1 }
 0x460   : > { %v10966_v18 = vadd.f32 %v5544_v63, %v10815_v9  ;;  %v10970_v22 = vadd.f32 %v5397_v53, %v5220_v59  ;;  %v4803_v60 = vadd.f32 %v4802_v45, %v10853_v20 }
 0x461   : > { %v6125_v11 = vpop.f32.mrf.mxu0 }
 0x462   : > { %5583 = vmatmul.bf16.gmra.mxu1 %v10647_v31 }
 0x464   : > { %5760 = vmatmul.bf16.gmra.mxu2 %v10319_v54  ;;  %6164 = vmatmul.bf16.gmra.mxu0 %v10884_v49 }
 0x465   : > { %v5187_v19 = vpop.f32.mrf.mxu3 }
 0x466   : > { %v5221_v33 = vadd.f32 %v5187_v19, %v4803_v60 }
 0x467   : > { %v5721_v26 = vpop.f32.mrf.mxu2  ;;  %v5546_v13 = vpop.f32.mrf.mxu1 }
 0x468   : > { %v5801_v51 = vadd.f32 %v5721_v26, %v10860_v43  ;;  %v10976_v9 = vadd.f32 %v5546_v13, %v10823_v61  ;;  %v10978_v7 = vadd.f32 %v5399_v48, %v5221_v33  ;;  %v10985_v43 = vld [vmem:[#allocation2 + $0x84] sm:$0xff] }
 0x469   : > { %v6127_v53 = vpop.f32.mrf.mxu0 }
 0x46a   : > { %5972 = vmatmul.bf16.gmra.mxu3 %v10333_v2 }
 0x46d   : > { %v5933_v29 = vpop.f32.mrf.mxu3 }
 0x46e   : > { %v6013_v35 = vadd.f32 %v5933_v29, %v5801_v51 }
 0x46f   : > { %v5723_v49 = vpop.f32.mrf.mxu2  ;;  %v5549_v20 = vpop.f32.mrf.mxu1 }
 0x470   : > { %v5802_v31 = vadd.f32 %v5723_v49, %v10871_v16  ;;  %v10983_v15 = vadd.f32 %v5549_v20, %v10831_v27  ;;  %v10989_v61 = vadd.f32 %v6125_v11, %v6013_v35 }
 0x471   : > { %v6130_v47 = vpop.f32.mrf.mxu0 }
 0x472   : > { %5588 = vmatmul.bf16.gmra.mxu1 %v10985_v43 }
 0x474   : > { %5765 = vmatmul.bf16.gmra.mxu2 %v10391_v4  ;;  %6169 = vmatmul.bf16.gmra.mxu0 %v10902_v50 }
 0x475   : > { %v5935_v16 = vpop.f32.mrf.mxu3 }
 0x476   : > { %v6014_v45 = vadd.f32 %v5935_v16, %v5802_v31 }
 0x477   : > { %v5726_v2 = vpop.f32.mrf.mxu2  ;;  %v5551_v21 = vpop.f32.mrf.mxu1 }
 0x478   : > { %v5803_v48 = vadd.f32 %v5726_v2, %v10878_v30  ;;  %v10994_v27 = vadd.f32 %v5551_v21, %v10839_v6  ;;  %v10996_v59 = vadd.f32 %v6127_v53, %v6014_v45  ;;  %v11708_v2 = vld [vmem:[#allocation18_spill] sm:$0xff] }
 0x479   : > { %v6132_v51 = vpop.f32.mrf.mxu0 }
 0x47a   : > { %5977 = vmatmul.bf16.gmra.mxu3 %v10417_v5 }
 0x47d   : > { %v5938_v11 = vpop.f32.mrf.mxu3 }
 0x47e   : > { %v6015_v60 = vadd.f32 %v5938_v11, %v5803_v48 }
 0x47f   : > { %v5728_v63 = vpop.f32.mrf.mxu2  ;;  %v5554_v26 = vpop.f32.mrf.mxu1 }
 0x480   : > { %v5804_v50 = vadd.f32 %v5728_v63, %v10889_v58  ;;  %v11001_v30 = vadd.f32 %v5554_v26, %v10847_v38  ;;  %v11005_v6 = vadd.f32 %v6130_v47, %v6015_v60  ;;  %v11709_v63 = vld [vmem:[#allocation39_spill] sm:$0xff] }
 0x481   : > { %v6135_v38 = vpop.f32.mrf.mxu0 }
 0x482   : > { %6331 = vmatmul.bf16.vlgmr.msra.gmra.mxu1 %v11692_v12 }
 0x484   : > { %5770 = vmatmul.bf16.gmra.mxu2 %v10464_v52  ;;  %6174 = vmatmul.bf16.gmra.mxu0 %v10920_v39 }
 0x485   : > { %v5940_v33 = vpop.f32.mrf.mxu3 }
 0x486   : > { %v6016_v58 = vadd.f32 %v5940_v33, %v5804_v50  ;;  %v11711_v33 = vld [vmem:[#allocation25_spill] sm:$0xff] }
 0x487   : > { %v5731_v19 = vpop.f32.mrf.mxu2  ;;  %v5556_v13 = vpop.f32.mrf.mxu1 }
 0x488   : > { %v5805_v5 = vadd.f32 %v5731_v19, %v10896_v8  ;;  %v11010_v49 = vadd.f32 %v5556_v13, %v10855_v37  ;;  %v11012_v53 = vadd.f32 %v6132_v51, %v6016_v58  ;;  %v11707_v8 = vld [vmem:[#allocation45_spill] sm:$0xff] }
 0x489   : > { %v6137_v16 = vpop.f32.mrf.mxu0 }
 0x48a   : > { %5982 = vmatmul.bf16.gmra.mxu3 %v10478_v0 }
 0x48d   : > { %v5943_v29 = vpop.f32.mrf.mxu3 }
 0x48e   : > { %v6017_v35 = vadd.f32 %v5943_v29, %v5805_v5  ;;  %v8204_v5 = vld [vmem:[#allocation2 + $0x74] sm:$0xff] }
 0x48f   : > { %v5733_v31 = vpop.f32.mrf.mxu2  ;;  %v5559_v12 = vpop.f32.mrf.mxu1  ;;  %v11712_v29 = vld [vmem:[#allocation48_spill] sm:$0xff] }
 0x490   : > { %v5806_v39 = vadd.f32 %v5733_v31, %v10907_v10  ;;  %v11017_v20 = vadd.f32 %v5559_v12, %v10864_v25  ;;  %v11021_v37 = vadd.f32 %v6135_v38, %v6017_v35  ;;  %v11713_v12 = vld [vmem:[#allocation47_spill] sm:$0xff] }
 0x491   : > { %v6140_v11 = vpop.f32.mrf.mxu0 }
 0x492   : > { %6336 = vmatmul.bf16.gmra.mxu1 %v11708_v2  ;;  %v8205_v2 = vld [vmem:[#allocation2 + $0x7c] sm:$0xff] }
 0x494   : > { %5775 = vmatmul.bf16.gmra.mxu2 %v11707_v8  ;;  %6179 = vmatmul.bf16.gmra.mxu0 %v10938_v24 }
 0x495   : > { %v5945_v47 = vpop.f32.mrf.mxu3 }
 0x496   : > { %v6018_v10 = vadd.f32 %v5945_v47, %v5806_v39 }
 0x497   : > { %v5736_v48 = vpop.f32.mrf.mxu2  ;;  %v5561_v45 = vpop.f32.mrf.mxu1 }
 0x498   : > { %v5807_v0 = vadd.f32 %v5736_v48, %v10914_v40  ;;  %v11026_v21 = vadd.f32 %v5561_v45, %v10873_v23  ;;  %v11028_v25 = vadd.f32 %v6137_v16, %v6018_v10  ;;  %v11710_v40 = vld [vmem:[#allocation34_spill] sm:$0xff]  ;;  %v11714_v48 = vld [vmem:[#allocation27_spill] sm:$0xff]  ;;  %v11716_v45 = vld [vmem:[#allocation65_spill] sm:$0xff] }
 0x499   : > { %v6142_v31 = vpop.f32.mrf.mxu0 }
 0x49a   : > { %5987 = vmatmul.bf16.gmra.mxu3 %v11709_v63 }
 0x49d   : > { %v5948_v60 = vpop.f32.mrf.mxu3 }
 0x49e   : > { %v6019_v26 = vadd.f32 %v5948_v60, %v5807_v0 }
 0x49f   : > { %v5738_v50 = vpop.f32.mrf.mxu2  ;;  %v5564_v51 = vpop.f32.mrf.mxu1 }
 0x4a0   : > { %v5808_v24 = vadd.f32 %v5738_v50, %v10925_v46  ;;  %v11033_v19 = vadd.f32 %v5564_v51, %v10882_v55  ;;  %v11036_v23 = vadd.f32 %v6140_v11, %v6019_v26  ;;  %v11719_v26 = vld [vmem:[#allocation66_spill] sm:$0xff]  ;;  %v11720_v51 = vld [vmem:[#allocation52_spill] sm:$0xff] }
 0x4a2   : > { %6341 = vmatmul.bf16.gmra.mxu1 %v11711_v33 }
 0x4a4   : > { %5780 = vmatmul.bf16.gmra.mxu2 %v11710_v40  ;;  %6184 = vmatmul.bf16.gmra.mxu0 %v8204_v5 }
 0x4a5   : > { %v5950_v58 = vpop.f32.mrf.mxu3 }
 0x4a6   : > { %v6020_v13 = vadd.f32 %v5950_v58, %v5808_v24  ;;  %v11718_v24 = vld [vmem:[#allocation64_spill] sm:$0xff] }
 0x4a7   : > { %v5566_v38 = vpop.f32.mrf.mxu1 }
 0x4a8   : > { %v11040_v46 = vadd.f32 %v5566_v38, %v10891_v41  ;;  %v11042_v39 = vadd.f32 %v6142_v31, %v6020_v13  ;;  %v11715_v41 = vld [vmem:[#allocation37_spill] sm:$0xff]  ;;  %v5741_v31 = vpop.f32.mrf.mxu2 }
 0x4aa   : > { %5992 = vmatmul.bf16.gmra.mxu3 %v11712_v29 }
 0x4af   : > { %v5569_v55 = vpop.f32.mrf.mxu1 }
 0x4b0   : > { %v11046_v35 = vadd.f32 %v5569_v55, %v10900_v1  ;;  %v11717_v1 = vld [vmem:[#allocation29_spill] sm:$0xff] }
 0x4b2   : > { %6346 = vmatmul.bf16.gmra.mxu1 %v11714_v48  ;;  %v8207_v48 = vld [vmem:[%s8633_s1 + $0x20] sm:$0xff] }
 0x4b4   : > { %5785 = vmatmul.bf16.gmra.mxu2 %v11713_v12  ;;  %6189 = vmatmul.bf16.gmra.mxu0 %v8205_v2  ;;  %v5953_v2 = vpop.f32.mrf.mxu3 }
 0x4b7   : > { %v5571_v16 = vpop.f32.mrf.mxu1 }
 0x4b8   : > { %v11051_v0 = vadd.f32 %v5571_v16, %v10909_v32  ;;  %v7459_v32 = vld [vmem:[#allocation2 + $0x8c] sm:$0xff] }
 0x4ba   : > { %5997 = vmatmul.bf16.gmra.mxu3 %v11715_v41 }
 0x4bf   : > { %v5574_v47 = vpop.f32.mrf.mxu1 }
 0x4c0   : > { %v11055_v10 = vadd.f32 %v5574_v47, %v10918_v17  ;;  %v5743_v47 = vpop.f32.mrf.mxu2 }
 0x4c2   : > { %6351 = vmatmul.bf16.gmra.mxu1 %v11717_v1 }
 0x4c4   : > { %5790 = vmatmul.bf16.gmra.mxu2 %v11716_v45  ;;  %6194 = vmatmul.bf16.gmra.mxu0 %v10985_v43 }
 0x4c7   : > { %v5576_v63 = vpop.f32.mrf.mxu1 }
 0x4c8   : > { %v11061_v50 = vadd.f32 %v5576_v63, %v10927_v28 }
 0x4ca   : > { %6002 = vmatmul.bf16.gmra.mxu3 %v11718_v24 }
 0x4cf   : > { %v5579_v11 = vpop.f32.mrf.mxu1 }
 0x4d0   : > { %v11065_v60 = vadd.f32 %v5579_v11, %v10936_v56  ;;  %v5955_v11 = vpop.f32.mrf.mxu3 }
 0x4d2   : > { %6356 = vmatmul.bf16.gmra.mxu1 %v11703_v34 }
 0x4d4   : > { %5795 = vmatmul.bf16.gmra.mxu2 %v11719_v26  ;;  %6199 = vmatmul.bf16.gmra.mxu0 %v7459_v32 }
 0x4d7   : > { %v5581_v17 = vpop.f32.mrf.mxu1 }
 0x4d8   : > { %v11070_v43 = vadd.f32 %v5581_v17, %v10945_v14 }
 0x4da   : > { %6007 = vmatmul.bf16.gmra.mxu3 %v11720_v51 }
 0x4df   : > { %v5584_v28 = vpop.f32.mrf.mxu1 }
 0x4e0   : > { %v11074_v5 = vadd.f32 %v5584_v28, %v10954_v42  ;;  %v11090_v42 = vld [vmem:[%s11289_s6] ss:$0 sm:$0xff] }
 0x4e2   : > { %6361 = vmatmul.bf16.gmra.mxu1 %v11705_v36 }
 0x4e7   : > { %v5586_v56 = vpop.f32.mrf.mxu1 }
 0x4e8   : > { %v11078_v33 = vadd.f32 %v5586_v56, %v10961_v62  ;;  %v5746_v56 = vpop.f32.mrf.mxu2 }
 0x4ef   : > { %v5589_v58 = vpop.f32.mrf.mxu1 }
 0x4f0   : > { %v11081_v34 = vadd.f32 %v5589_v58, %v10970_v22  ;;  %v8206_v22 = vld [vmem:[%s8633_s1 + $0x18] sm:$0xff] }
 0x4f2   : > { %6366 = vmatmul.bf16.gmra.mxu1 %v10319_v54 }
 0x4f7   : > { %v5591_v14 = vpop.f32.mrf.mxu1 }
 0x4f8   : > { %v11085_v13 = vadd.f32 %v5591_v14, %v10978_v7 }
 0x4ff   : > { %v6332_v36 = vpop.f32.mrf.mxu1 }
 0x500   : > { %v6412_v62 = vadd.f32 %v6332_v36, %v10989_v61 }
 0x502   : > { %v6448_v38 = vadd.f32 %v11090_v42, %v6412_v62  ;;  %6371 = vmatmul.bf16.gmra.mxu1 %v10391_v4  ;;  %v11103_v4 = vpop.f32.mrf.mxu0 }
 0x504   : > { %v6480_v54 = vadd.f32 %v8206_v22, %v6448_v38 }
 0x506   : > { %v6512_v29 = vmax.f32 %v6480_v54, 0.0 }
 0x507   : > { %v6334_v7 = vpop.f32.mrf.mxu1 }
 0x508   : > { %6544 = vst [vmem:[%s11097_s11] sm:$0xff] %v6512_v29  ;;  %v6413_v55 = vadd.f32 %v6334_v7, %v10996_v59  ;;  %v8208_v59 = vld [vmem:[%s8633_s1 + $0x28] sm:$0xff]  ;;  %v8210_v29 = vld [vmem:[%s8633_s1 + $0x38] sm:$0xff] }
 0x50a   : > { %v6449_v61 = vadd.f32 %v11090_v42, %v6413_v55  ;;  %v11110_v51 = vpop.f32.mrf.mxu0 }
 0x50c   : > { %v6481_v16 = vadd.f32 %v8207_v48, %v6449_v61 }
 0x50e   : > { %v6513_v41 = vmax.f32 %v6481_v16, 0.0 }
 0x50f   : > { %v6337_v1 = vpop.f32.mrf.mxu1 }
 0x510   : > { %6545 = vst [vmem:[%s11097_s11 + $0x8] sm:$0xff] %v6513_v41  ;;  %v6414_v63 = vadd.f32 %v6337_v1, %v11005_v6  ;;  %v8209_v6 = vld [vmem:[%s8633_s1 + $0x30] sm:$0xff]  ;;  %v8211_v1 = vld [vmem:[%s8633_s1 + $0x40] sm:$0xff] }
 0x512   : > { %v6450_v24 = vadd.f32 %v11090_v42, %v6414_v63  ;;  %6376 = vmatmul.bf16.gmra.mxu1 %v10464_v52  ;;  %v5958_v52 = vpop.f32.mrf.mxu3  ;;  %v11118_v22 = vpop.f32.mrf.mxu0 }
 0x514   : > { %v6482_v32 = vadd.f32 %v8208_v59, %v6450_v24 }
 0x516   : > { %v6514_v26 = vmax.f32 %v6482_v32, 0.0 }
 0x517   : > { %v6339_v17 = vpop.f32.mrf.mxu1 }
 0x518   : > { %6546 = vst [vmem:[%s11097_s11 + $0x10] sm:$0xff] %v6514_v26  ;;  %v6415_v28 = vadd.f32 %v6339_v17, %v11012_v53  ;;  %v5748_v53 = vpop.f32.mrf.mxu2  ;;  %v8212_v17 = vld [vmem:[%s8633_s1 + $0x48] sm:$0xff] }
 0x51a   : > { %v6451_v58 = vadd.f32 %v11090_v42, %v6415_v28  ;;  %v5960_v16 = vpop.f32.mrf.mxu3 }
 0x51c   : > { %v6483_v14 = vadd.f32 %v8209_v6, %v6451_v58  ;;  %v11721_v58 = vld [vmem:[#allocation38_spill] sm:$0xff] }
 0x51d   : > { %v5809_v6 = vadd.f32 %v5741_v31, %v11721_v58 }
 0x51e   : > { %v6515_v36 = vmax.f32 %v6483_v14, 0.0 }
 0x51f   : > { %v6342_v62 = vpop.f32.mrf.mxu1 }
 0x520   : > { %6547 = vst [vmem:[%s11097_s11 + $0x18] sm:$0xff] %v6515_v36  ;;  %v6416_v38 = vadd.f32 %v6342_v62, %v11021_v37  ;;  %v11126_v37 = vpop.f32.mrf.mxu0  ;;  %v5751_v24 = vpop.f32.mrf.mxu2 }
 0x522   : > { %v6452_v54 = vadd.f32 %v11090_v42, %v6416_v38  ;;  %6381 = vmatmul.bf16.gmra.mxu1 %v11707_v8 }
 0x524   : > { %v6484_v7 = vadd.f32 %v8210_v29, %v6452_v54  ;;  %v6021_v29 = vadd.f32 %v5953_v2, %v5809_v6 }
 0x526   : > { %v6516_v55 = vmax.f32 %v6484_v7, 0.0  ;;  %v8213_v7 = vld [vmem:[%s8633_s1 + $0x50] sm:$0xff]  ;;  %v6213_v31 = vadd.f32 %v11103_v4, %v6021_v29 }
 0x527   : > { %v6344_v61 = vpop.f32.mrf.mxu1 }
 0x528   : > { %6548 = vst [vmem:[%s11097_s11 + $0x20] sm:$0xff] %v6516_v55  ;;  %v6417_v48 = vadd.f32 %v6344_v61, %v11028_v25  ;;  %v5963_v25 = vpop.f32.mrf.mxu3  ;;  %v11135_v14 = vpop.f32.mrf.mxu0  ;;  %v5810_v61 = vadd.f32 %v5743_v47, %v10943_v44  ;;  %v5811_v44 = vadd.f32 %v5746_v56, %v10950_v57 }
 0x529   : > { %v5753_v62 = vpop.f32.mrf.mxu2 }
 0x52a   : > { %v6453_v41 = vadd.f32 %v11090_v42, %v6417_v48  ;;  %v6023_v58 = vadd.f32 %v5958_v52, %v5811_v44 }
 0x52c   : > { %v6485_v63 = vadd.f32 %v8211_v1, %v6453_v41  ;;  %v6215_v57 = vadd.f32 %v11118_v22, %v6023_v58  ;;  %v8218_v58 = vld [vmem:[%s8633_s1 + $0x78] sm:$0xff] }
 0x52e   : > { %v6517_v8 = vmax.f32 %v6485_v63, 0.0 }
 0x52f   : > { %v6347_v59 = vpop.f32.mrf.mxu1 }
 0x530   : > { %6549 = vst [vmem:[%s11097_s11 + $0x28] sm:$0xff] %v6517_v8  ;;  %v6418_v32 = vadd.f32 %v6347_v59, %v11036_v23  ;;  %v5965_v55 = vpop.f32.mrf.mxu3  ;;  %v11143_v1 = vpop.f32.mrf.mxu0  ;;  %v8214_v59 = vld [vmem:[%s8633_s1 + $0x58] sm:$0xff] }
 0x531   : > { %v5756_v8 = vpop.f32.mrf.mxu2 }
 0x532   : > { %v6454_v26 = vadd.f32 %v11090_v42, %v6418_v32  ;;  %6386 = vmatmul.bf16.gmra.mxu1 %v11710_v40 }
 0x534   : > { %v6486_v28 = vadd.f32 %v8212_v17, %v6454_v26 }
 0x536   : > { %v6518_v36 = vmax.f32 %v6486_v28, 0.0 }
 0x537   : > { %v6349_v38 = vpop.f32.mrf.mxu1 }
 0x538   : > { %6550 = vst [vmem:[%s11097_s11 + $0x30] sm:$0xff] %v6518_v36  ;;  %v6419_v54 = vadd.f32 %v6349_v38, %v11042_v39  ;;  %v6022_v39 = vadd.f32 %v5955_v11, %v5810_v61  ;;  %v5968_v26 = vpop.f32.mrf.mxu3  ;;  %v6160_v6 = vpop.f32.mrf.mxu0  ;;  %v8215_v38 = vld [vmem:[%s8633_s1 + $0x60] sm:$0xff]  ;;  %v8216_v61 = vld [vmem:[%s8633_s1 + $0x68] sm:$0xff] }
 0x539   : > { %v5758_v36 = vpop.f32.mrf.mxu2 }
 0x53a   : > { %v6455_v23 = vadd.f32 %v11090_v42, %v6419_v54  ;;  %v6214_v4 = vadd.f32 %v11110_v51, %v6022_v39  ;;  %v5812_v54 = vadd.f32 %v5748_v53, %v10959_v3  ;;  %v5813_v3 = vadd.f32 %v5751_v24, %v10966_v18 }
 0x53c   : > { %v6487_v40 = vadd.f32 %v8213_v7, %v6455_v23  ;;  %v6024_v7 = vadd.f32 %v5960_v16, %v5812_v54  ;;  %v6025_v39 = vadd.f32 %v5963_v25, %v5813_v3 }
 0x53e   : > { %v6519_v48 = vmax.f32 %v6487_v40, 0.0  ;;  %v6216_v22 = vadd.f32 %v11126_v37, %v6024_v7  ;;  %v6217_v18 = vadd.f32 %v11135_v14, %v6025_v39 }
 0x53f   : > { %v6352_v41 = vpop.f32.mrf.mxu1 }
 0x540   : > { %6551 = vst [vmem:[%s11097_s11 + $0x38] sm:$0xff] %v6519_v48  ;;  %v6420_v63 = vadd.f32 %v6352_v41, %v6213_v31  ;;  %v5970_v23 = vpop.f32.mrf.mxu3  ;;  %v6162_v40 = vpop.f32.mrf.mxu0 }
 0x541   : > { %v5761_v31 = vpop.f32.mrf.mxu2 }
 0x542   : > { %v6456_v2 = vadd.f32 %v11090_v42, %v6420_v63  ;;  %6391 = vmatmul.bf16.gmra.mxu1 %v11713_v12 }
 0x544   : > { %v6488_v32 = vadd.f32 %v8214_v59, %v6456_v2  ;;  %v8217_v59 = vld [vmem:[%s8633_s1 + $0x70] sm:$0xff] }
 0x546   : > { %v6520_v47 = vmax.f32 %v6488_v32, 0.0  ;;  %v5814_v32 = vadd.f32 %v5753_v62, %v10976_v9  ;;  %v5815_v9 = vadd.f32 %v5756_v8, %v10983_v15 }
 0x547   : > { %v6354_v17 = vpop.f32.mrf.mxu1 }
 0x548   : > { %6552 = vst [vmem:[%s11097_s11 + $0x40] sm:$0xff] %v6520_v47  ;;  %v6421_v28 = vadd.f32 %v6354_v17, %v6214_v4  ;;  %v5973_v2 = vpop.f32.mrf.mxu3  ;;  %v6165_v44 = vpop.f32.mrf.mxu0  ;;  %v6026_v17 = vadd.f32 %v5965_v55, %v5814_v32  ;;  %v6027_v55 = vadd.f32 %v5968_v26, %v5815_v9  ;;  %v11723_v26 = vld [vmem:[#allocation67_spill] sm:$0xff] }
 0x549   : > { %v5763_v24 = vpop.f32.mrf.mxu2 }
 0x54a   : > { %v6457_v11 = vadd.f32 %v11090_v42, %v6421_v28  ;;  %v11722_v28 = vld [vmem:[#allocation50_spill] sm:$0xff]  ;;  %v6218_v14 = vadd.f32 %v11143_v1, %v6026_v17  ;;  %v5818_v17 = vadd.f32 %v5763_v24, %v11010_v49 }
 0x54c   : > { %v6489_v12 = vadd.f32 %v8215_v38, %v6457_v11 }
 0x54e   : > { %v6521_v29 = vmax.f32 %v6489_v12, 0.0 }
 0x54f   : > { %v6357_v56 = vpop.f32.mrf.mxu1 }
 0x550   : > { %6553 = vst [vmem:[%s11097_s11 + $0x48] sm:$0xff] %v6521_v29  ;;  %v6422_v51 = vadd.f32 %v6357_v56, %v6215_v57  ;;  %v5975_v38 = vpop.f32.mrf.mxu3  ;;  %v6167_v54 = vpop.f32.mrf.mxu0 }
 0x551   : > { %v5766_v57 = vpop.f32.mrf.mxu2 }
 0x552   : > { %v6458_v52 = vadd.f32 %v11090_v42, %v6422_v51  ;;  %6396 = vmatmul.bf16.gmra.mxu1 %v11716_v45  ;;  %v8219_v51 = vld [vmem:[%s8633_s1 + $0x80] sm:$0xff] }
 0x554   : > { %v6490_v48 = vadd.f32 %v8216_v61, %v6458_v52  ;;  %v5816_v52 = vadd.f32 %v5758_v36, %v10994_v27 }
 0x556   : > { %v6522_v53 = vmax.f32 %v6490_v48, 0.0  ;;  %v6219_v48 = vadd.f32 %v6160_v6, %v6027_v55  ;;  %v6028_v3 = vadd.f32 %v5970_v23, %v5816_v52 }
 0x557   : > { %v6359_v41 = vpop.f32.mrf.mxu1 }
 0x558   : > { %6554 = vst [vmem:[%s11097_s11 + $0x50] sm:$0xff] %v6522_v53  ;;  %v6423_v63 = vadd.f32 %v6359_v41, %v6216_v22  ;;  %v5978_v15 = vpop.f32.mrf.mxu3  ;;  %v6170_v53 = vpop.f32.mrf.mxu0  ;;  %v6220_v6 = vadd.f32 %v6162_v40, %v6028_v3 }
 0x559   : > { %v5768_v41 = vpop.f32.mrf.mxu2 }
 0x55a   : > { %v6459_v16 = vadd.f32 %v11090_v42, %v6423_v63  ;;  %v8220_v63 = vld [vmem:[%s8633_s1 + $0x88] sm:$0xff]  ;;  %v5820_v52 = vadd.f32 %v5768_v41, %v11026_v21 }
 0x55c   : > { %v6491_v45 = vadd.f32 %v8217_v59, %v6459_v16  ;;  %v5817_v16 = vadd.f32 %v5761_v31, %v11001_v30 }
 0x55e   : > { %v6523_v47 = vmax.f32 %v6491_v45, 0.0  ;;  %v6029_v23 = vadd.f32 %v5973_v2, %v5817_v16  ;;  %v8222_v2 = vld [vmem:[%s8633_s1 + $0x98] sm:$0xff] }
 0x55f   : > { %v6362_v4 = vpop.f32.mrf.mxu1 }
 0x560   : > { %6555 = vst [vmem:[%s11097_s11 + $0x58] sm:$0xff] %v6523_v47  ;;  %v6424_v37 = vadd.f32 %v6362_v4, %v6217_v18  ;;  %v5980_v45 = vpop.f32.mrf.mxu3  ;;  %v6172_v47 = vpop.f32.mrf.mxu0  ;;  %v8221_v18 = vld [vmem:[%s8633_s1 + $0x90] sm:$0xff]  ;;  %v6221_v30 = vadd.f32 %v6165_v44, %v6029_v23 }
 0x562   : > { %v6460_v25 = vadd.f32 %v11090_v42, %v6424_v37  ;;  %6401 = vmatmul.bf16.gmra.mxu1 %v11722_v28  ;;  %v5771_v37 = vpop.f32.mrf.mxu2  ;;  %v6030_v28 = vadd.f32 %v5975_v38, %v5818_v17  ;;  %v8223_v38 = vld [vmem:[%s8633_s1 + $0xa0] sm:$0xff] }
 0x564   : > { %v6492_v11 = vadd.f32 %v8218_v58, %v6460_v25 }
 0x566   : > { %v6524_v62 = vmax.f32 %v6492_v11, 0.0 }
 0x567   : > { %v6364_v12 = vpop.f32.mrf.mxu1 }
 0x568   : > { %6556 = vst [vmem:[%s11097_s11 + $0x60] sm:$0xff] %v6524_v62  ;;  %v6425_v29 = vadd.f32 %v6364_v12, %v6218_v14  ;;  %v5983_v11 = vpop.f32.mrf.mxu3  ;;  %v5819_v62 = vadd.f32 %v5766_v57, %v11017_v20  ;;  %v6175_v14 = vpop.f32.mrf.mxu0 }
 0x56a   : > { %v6461_v56 = vadd.f32 %v11090_v42, %v6425_v29  ;;  %v6222_v29 = vadd.f32 %v6167_v54, %v6030_v28  ;;  %v5773_v49 = vpop.f32.mrf.mxu2  ;;  %v6031_v55 = vadd.f32 %v5978_v15, %v5819_v62  ;;  %v8224_v15 = vld [vmem:[%s8633_s1 + $0xa8] sm:$0xff] }
 0x56b   : > { %v5822_v23 = vadd.f32 %v5773_v49, %v11040_v46 }
 0x56c   : > { %v6493_v7 = vadd.f32 %v8219_v51, %v6461_v56  ;;  %v6223_v20 = vadd.f32 %v6170_v53, %v6031_v55 }
 0x56e   : > { %v6525_v61 = vmax.f32 %v6493_v7, 0.0 }
 0x56f   : > { %v6367_v8 = vpop.f32.mrf.mxu1 }
 0x570   : > { %6557 = vst [vmem:[%s11097_s11 + $0x68] sm:$0xff] %v6525_v61  ;;  %v6426_v1 = vadd.f32 %v6367_v8, %v6219_v48  ;;  %v5985_v7 = vpop.f32.mrf.mxu3  ;;  %v6177_v48 = vpop.f32.mrf.mxu0 }
 0x572   : > { %v6462_v22 = vadd.f32 %v11090_v42, %v6426_v1  ;;  %6406 = vmatmul.bf16.gmra.mxu1 %v11723_v26  ;;  %v5776_v8 = vpop.f32.mrf.mxu2  ;;  %v6032_v1 = vadd.f32 %v5980_v45, %v5820_v52  ;;  %v5821_v26 = vadd.f32 %v5771_v37, %v11033_v19  ;;  %v6034_v37 = vadd.f32 %v5985_v7, %v5822_v23  ;;  %v8228_v52 = vld [vmem:[%s8633_s1 + $0xc8] sm:$0xff] }
 0x573   : > { %v5823_v28 = vadd.f32 %v5776_v8, %v11046_v35 }
 0x574   : > { %v6494_v39 = vadd.f32 %v8220_v63, %v6462_v22  ;;  %v6033_v16 = vadd.f32 %v5983_v11, %v5821_v26  ;;  %v6226_v46 = vadd.f32 %v6177_v48, %v6034_v37  ;;  %v8229_v26 = vld [vmem:[%s8633_s1 + $0xd0] sm:$0xff] }
 0x576   : > { %v6526_v27 = vmax.f32 %v6494_v39, 0.0  ;;  %v6224_v39 = vadd.f32 %v6172_v47, %v6032_v1  ;;  %v6225_v19 = vadd.f32 %v6175_v14, %v6033_v16 }
 0x577   : > { %v6369_v36 = vpop.f32.mrf.mxu1 }
 0x578   : > { %6558 = vst [vmem:[%s11097_s11 + $0x70] sm:$0xff] %v6526_v27  ;;  %v6427_v59 = vadd.f32 %v6369_v36, %v6220_v6  ;;  %v5988_v21 = vpop.f32.mrf.mxu3  ;;  %v6180_v27 = vpop.f32.mrf.mxu0 }
 0x57a   : > { %v6463_v32 = vadd.f32 %v11090_v42, %v6427_v59  ;;  %v5778_v36 = vpop.f32.mrf.mxu2  ;;  %v8225_v59 = vld [vmem:[%s8633_s1 + $0xb0] sm:$0xff] }
 0x57b   : > { %v5824_v49 = vadd.f32 %v5778_v36, %v11051_v0 }
 0x57c   : > { %v6495_v4 = vadd.f32 %v8221_v18, %v6463_v32 }
 0x57e   : > { %v6527_v25 = vmax.f32 %v6495_v4, 0.0 }
 0x57f   : > { %v6372_v31 = vpop.f32.mrf.mxu1 }
 0x580   : > { %6559 = vst [vmem:[%s11097_s11 + $0x78] sm:$0xff] %v6527_v25  ;;  %v6428_v40 = vadd.f32 %v6372_v31, %v6221_v30  ;;  %v5990_v4 = vpop.f32.mrf.mxu3  ;;  %v6182_v25 = vpop.f32.mrf.mxu0  ;;  %v8226_v30 = vld [vmem:[%s8633_s1 + $0xb8] sm:$0xff] }
 0x582   : > { %v6464_v58 = vadd.f32 %v11090_v42, %v6428_v40  ;;  %v5781_v40 = vpop.f32.mrf.mxu2 }
 0x584   : > { %v6496_v9 = vadd.f32 %v8222_v2, %v6464_v58 }
 0x586   : > { %v6528_v12 = vmax.f32 %v6496_v9, 0.0  ;;  %v6035_v9 = vadd.f32 %v5988_v21, %v5823_v28 }
 0x587   : > { %v6374_v24 = vpop.f32.mrf.mxu1 }
 0x588   : > { %6560 = vst [vmem:[%s11097_s11 + $0x80] sm:$0xff] %v6528_v12  ;;  %v6429_v44 = vadd.f32 %v6374_v24, %v6222_v29  ;;  %v5993_v14 = vpop.f32.mrf.mxu3  ;;  %v8227_v12 = vld [vmem:[%s8633_s1 + $0xc0] sm:$0xff]  ;;  %v6185_v24 = vpop.f32.mrf.mxu0  ;;  %v6227_v55 = vadd.f32 %v6180_v27, %v6035_v9 }
 0x58a   : > { %v6465_v56 = vadd.f32 %v11090_v42, %v6429_v44  ;;  %v5783_v35 = vpop.f32.mrf.mxu2 }
 0x58c   : > { %v6497_v51 = vadd.f32 %v8223_v38, %v6465_v56 }
 0x58e   : > { %v6529_v61 = vmax.f32 %v6497_v51, 0.0  ;;  %v6036_v51 = vadd.f32 %v5990_v4, %v5824_v49 }
 0x58f   : > { %v6377_v57 = vpop.f32.mrf.mxu1 }
 0x590   : > { %6561 = vst [vmem:[%s11097_s11 + $0x88] sm:$0xff] %v6529_v61  ;;  %v6430_v54 = vadd.f32 %v6377_v57, %v6223_v20  ;;  %v5995_v20 = vpop.f32.mrf.mxu3  ;;  %v5825_v57 = vadd.f32 %v5781_v40, %v11055_v10  ;;  %v6228_v0 = vadd.f32 %v6182_v25, %v6036_v51  ;;  %v6187_v8 = vpop.f32.mrf.mxu0  ;;  %v8233_v51 = vld [vmem:[%s8633_s1 + $0xf0] sm:$0xff] }
 0x592   : > { %v6466_v3 = vadd.f32 %v11090_v42, %v6430_v54 }
 0x594   : > { %v6498_v22 = vadd.f32 %v8224_v15, %v6466_v3  ;;  %v5786_v3 = vpop.f32.mrf.mxu2  ;;  %v6037_v15 = vadd.f32 %v5993_v14, %v5825_v57  ;;  %v8232_v14 = vld [vmem:[%s8633_s1 + $0xe8] sm:$0xff] }
 0x596   : > { %v6530_v63 = vmax.f32 %v6498_v22, 0.0 }
 0x597   : > { %v6379_v41 = vpop.f32.mrf.mxu1 }
 0x598   : > { %6562 = vst [vmem:[%s11097_s11 + $0x90] sm:$0xff] %v6530_v63  ;;  %v6431_v53 = vadd.f32 %v6379_v41, %v6224_v39  ;;  %v5826_v39 = vadd.f32 %v5783_v35, %v11061_v50  ;;  %v6229_v41 = vadd.f32 %v6185_v24, %v6037_v15  ;;  %v5998_v10 = vpop.f32.mrf.mxu3 }
 0x59a   : > { %v6467_v6 = vadd.f32 %v11090_v42, %v6431_v53  ;;  %v6038_v27 = vadd.f32 %v5995_v20, %v5826_v39 }
 0x59c   : > { %v6499_v45 = vadd.f32 %v8225_v59, %v6467_v6  ;;  %v6190_v6 = vpop.f32.mrf.mxu0  ;;  %v5788_v59 = vpop.f32.mrf.mxu2  ;;  %v6230_v50 = vadd.f32 %v6187_v8, %v6038_v27  ;;  %v8235_v27 = vld [vmem:[%s8633_s1 + $0x100] sm:$0xff] }
 0x59d   : > { %v5828_v28 = vadd.f32 %v5788_v59, %v11070_v43 }
 0x59e   : > { %v6531_v32 = vmax.f32 %v6499_v45, 0.0  ;;  %v8230_v45 = vld [vmem:[%s8633_s1 + $0xd8] sm:$0xff] }
 0x59f   : > { %v6382_v18 = vpop.f32.mrf.mxu1 }
 0x5a0   : > { %6563 = vst [vmem:[%s11097_s11 + $0x98] sm:$0xff] %v6531_v32  ;;  %v6432_v47 = vadd.f32 %v6382_v18, %v6225_v19  ;;  %v5827_v32 = vadd.f32 %v5786_v3, %v11065_v60  ;;  %v6000_v4 = vpop.f32.mrf.mxu3  ;;  %v8234_v3 = vld [vmem:[%s8633_s1 + $0xf8] sm:$0xff] }
 0x5a2   : > { %v6468_v17 = vadd.f32 %v11090_v42, %v6432_v47  ;;  %v6039_v37 = vadd.f32 %v5998_v10, %v5827_v32 }
 0x5a4   : > { %v6500_v31 = vadd.f32 %v8226_v30, %v6468_v17  ;;  %v6192_v25 = vpop.f32.mrf.mxu0  ;;  %v8231_v30 = vld [vmem:[%s8633_s1 + $0xe0] sm:$0xff]  ;;  %v5791_v40 = vpop.f32.mrf.mxu2  ;;  %v6231_v60 = vadd.f32 %v6190_v6, %v6039_v37 }
 0x5a5   : > { %v5829_v49 = vadd.f32 %v5791_v40, %v11074_v5 }
 0x5a6   : > { %v6532_v58 = vmax.f32 %v6500_v31, 0.0 }
 0x5a7   : > { %v6384_v11 = vpop.f32.mrf.mxu1 }
 0x5a8   : > { %6564 = vst [vmem:[%s11097_s11 + $0xa0] sm:$0xff] %v6532_v58  ;;  %v6433_v2 = vadd.f32 %v6384_v11, %v6226_v46 }
 0x5aa   : > { %v6469_v62 = vadd.f32 %v11090_v42, %v6433_v2  ;;  %v6040_v2 = vadd.f32 %v6000_v4, %v5828_v28 }
 0x5ac   : > { %v6501_v29 = vadd.f32 %v8227_v12, %v6469_v62  ;;  %v6003_v62 = vpop.f32.mrf.mxu3  ;;  %v5793_v43 = vpop.f32.mrf.mxu2 }
 0x5ae   : > { %v6533_v44 = vmax.f32 %v6501_v29, 0.0  ;;  %v6195_v29 = vpop.f32.mrf.mxu0 }
 0x5af   : > { %v6387_v56 = vpop.f32.mrf.mxu1 }
 0x5b0   : > { %6565 = vst [vmem:[%s11097_s11 + $0xa8] sm:$0xff] %v6533_v44  ;;  %v6434_v38 = vadd.f32 %v6387_v56, %v6227_v55  ;;  %v6232_v44 = vadd.f32 %v6192_v25, %v6040_v2  ;;  %v6041_v56 = vadd.f32 %v6003_v62, %v5829_v49 }
 0x5b2   : > { %v6470_v7 = vadd.f32 %v11090_v42, %v6434_v38  ;;  %v6233_v57 = vadd.f32 %v6195_v29, %v6041_v56 }
 0x5b4   : > { %v6502_v61 = vadd.f32 %v8228_v52, %v6470_v7  ;;  %v6005_v52 = vpop.f32.mrf.mxu3 }
 0x5b6   : > { %v6534_v48 = vmax.f32 %v6502_v61, 0.0  ;;  %v5830_v61 = vadd.f32 %v5793_v43, %v11078_v33 }
 0x5b7   : > { %v6389_v54 = vpop.f32.mrf.mxu1 }
 0x5b8   : > { %6566 = vst [vmem:[%s11097_s11 + $0xb0] sm:$0xff] %v6534_v48  ;;  %v6435_v1 = vadd.f32 %v6389_v54, %v6228_v0  ;;  %v6197_v0 = vpop.f32.mrf.mxu0  ;;  %v5796_v54 = vpop.f32.mrf.mxu2  ;;  %v6042_v8 = vadd.f32 %v6005_v52, %v5830_v61 }
 0x5ba   : > { %v6471_v22 = vadd.f32 %v11090_v42, %v6435_v1 }
 0x5bc   : > { %v6503_v63 = vadd.f32 %v8229_v26, %v6471_v22  ;;  %v5831_v22 = vadd.f32 %v5796_v54, %v11081_v34  ;;  %v6008_v33 = vpop.f32.mrf.mxu3 }
 0x5be   : > { %v6535_v21 = vmax.f32 %v6503_v63, 0.0  ;;  %v6234_v63 = vadd.f32 %v6197_v0, %v6042_v8  ;;  %v6043_v10 = vadd.f32 %v6008_v33, %v5831_v22 }
 0x5bf   : > { %v6392_v53 = vpop.f32.mrf.mxu1 }
 0x5c0   : > { %6567 = vst [vmem:[%s11097_s11 + $0xb8] sm:$0xff] %v6535_v21  ;;  %v6436_v16 = vadd.f32 %v6392_v53, %v6229_v41  ;;  %v6200_v41 = vpop.f32.mrf.mxu0 }
 0x5c2   : > { %v6472_v36 = vadd.f32 %v11090_v42, %v6436_v16  ;;  %v5798_v16 = vpop.f32.mrf.mxu2 }
 0x5c3   : > { %v5832_v59 = vadd.f32 %v5798_v16, %v11085_v13 }
 0x5c4   : > { %v6504_v23 = vadd.f32 %v8230_v45, %v6472_v36  ;;  %v6235_v36 = vadd.f32 %v6200_v41, %v6043_v10  ;;  %v6010_v32 = vpop.f32.mrf.mxu3 }
 0x5c6   : > { %v6536_v19 = vmax.f32 %v6504_v23, 0.0 }
 0x5c7   : > { %v6394_v18 = vpop.f32.mrf.mxu1 }
 0x5c8   : > { %6568 = vst [vmem:[%s11097_s11 + $0xc0] sm:$0xff] %v6536_v19  ;;  %v6437_v47 = vadd.f32 %v6394_v18, %v6230_v50  ;;  %v6044_v19 = vadd.f32 %v6010_v32, %v5832_v59  ;;  %v6202_v18 = vpop.f32.mrf.mxu0 }
 0x5ca   : > { %v6473_v17 = vadd.f32 %v11090_v42, %v6437_v47  ;;  %v8236_v47 = vld [vmem:[%s8633_s1 + $0x108] sm:$0xff]  ;;  %v6236_v37 = vadd.f32 %v6202_v18, %v6044_v19 }
 0x5cc   : > { %v6505_v31 = vadd.f32 %v8231_v30, %v6473_v17 }
 0x5ce   : > { %v6537_v58 = vmax.f32 %v6505_v31, 0.0  ;;  %v8237_v31 = vld [vmem:[%s8633_s1 + $0x110] sm:$0xff] }
 0x5cf   : > { %v6397_v46 = vpop.f32.mrf.mxu1 }
 0x5d0   : > { %6569 = vst [vmem:[%s11097_s11 + $0xc8] sm:$0xff] %v6537_v58  ;;  %v6438_v11 = vadd.f32 %v6397_v46, %v6231_v60 }
 0x5d2   : > { %v6474_v9 = vadd.f32 %v11090_v42, %v6438_v11 }
 0x5d4   : > { %v6506_v12 = vadd.f32 %v8232_v14, %v6474_v9 }
 0x5d6   : > { %v6538_v24 = vmax.f32 %v6506_v12, 0.0 }
 0x5d7   : > { %v6399_v55 = vpop.f32.mrf.mxu1 }
 0x5d8   : > { %6570 = vst [vmem:[%s11097_s11 + $0xd0] sm:$0xff] %v6538_v24  ;;  %v6439_v35 = vadd.f32 %v6399_v55, %v6232_v44 }
 0x5da   : > { %v6475_v38 = vadd.f32 %v11090_v42, %v6439_v35 }
 0x5dc   : > { %v6507_v7 = vadd.f32 %v8233_v51, %v6475_v38 }
 0x5de   : > { %v6539_v20 = vmax.f32 %v6507_v7, 0.0 }
 0x5df   : > { %v6402_v5 = vpop.f32.mrf.mxu1 }
 0x5e0   : > { %6571 = vst [vmem:[%s11097_s11 + $0xd8] sm:$0xff] %v6539_v20  ;;  %v6440_v48 = vadd.f32 %v6402_v5, %v6233_v57 }
 0x5e2   : > { %v6476_v1 = vadd.f32 %v11090_v42, %v6440_v48 }
 0x5e4   : > { %v6508_v15 = vadd.f32 %v8234_v3, %v6476_v1 }
 0x5e6   : > { %v6540_v26 = vmax.f32 %v6508_v15, 0.0 }
 0x5e7   : > { %v6404_v39 = vpop.f32.mrf.mxu1 }
 0x5e8   : > { %6572 = vst [vmem:[%s11097_s11 + $0xe0] sm:$0xff] %v6540_v26  ;;  %v6441_v21 = vadd.f32 %v6404_v39, %v6234_v63 }
 0x5ea   : > { %v6477_v53 = vadd.f32 %v11090_v42, %v6441_v21 }
 0x5ec   : > { %v6509_v6 = vadd.f32 %v8235_v27, %v6477_v53 }
 0x5ee   : > { %v6541_v34 = vmax.f32 %v6509_v6, 0.0 }
 0x5ef   : > { %v6407_v45 = vpop.f32.mrf.mxu1 }
 0x5f0   : > { %6573 = vst [vmem:[%s11097_s11 + $0xe8] sm:$0xff] %v6541_v34  ;;  %v6442_v23 = vadd.f32 %v6407_v45, %v6235_v36 }
 0x5f2   : > { %v6478_v50 = vadd.f32 %v11090_v42, %v6442_v23 }
 0x5f4   : > { %v6510_v4 = vadd.f32 %v8236_v47, %v6478_v50 }
 0x5f6   : > { %v6542_v17 = vmax.f32 %v6510_v4, 0.0 }
 0x5f7   : > { %v6409_v13 = vpop.f32.mrf.mxu1 }
 0x5f8   : > { %6574 = vst [vmem:[%s11097_s11 + $0xf0] sm:$0xff] %v6542_v17  ;;  %v6443_v25 = vadd.f32 %v6409_v13, %v6236_v37 }
 0x5fa   : > { %v6479_v30 = vadd.f32 %v11090_v42, %v6443_v25 }
 0x5fc   : > { %v6511_v40 = vadd.f32 %v8237_v31, %v6479_v30 }
 0x5fe   : > { %v6543_v28 = vmax.f32 %v6511_v40, 0.0 }
 0x600   : > { %6575 = vst [vmem:[%s11097_s11 + $0xf8] sm:$0xff] %v6543_v28 }
 0x601   : > { %8415 = shalt.err (!%p8412_p10)
}
 0x602   : > { %s8473_s2 = smov 128   ;;  %s8474_s1 = smov 8  }
 0x603   : > { %8110 = dma.vmem_to_hbm [thread:$0]  (%p8599_p3), %s6590_s14, 4096, %s6592_s30, %s6577_s28, %s8473_s2, %s8473_s2, %s8474_s1  }
 0x604 PF: > { %s6606_s13 = sand.u32 1, %s8450_s24   ;;  %p11724_p12 = scmp.ge.s32.totalorder %s8462_s27, 2 }
 0x605   : > { %s6607_s11 = scalar_lea.sflag [#allocation5], %s6606_s13 }
 0x606   : > { %p8130_p13 = pnand %p11724_p12, %p8550_p6 }
 0x608   : > { %p8131_p0 = pneg %p8130_p13 }
 0x60a   : > { %8445 = dma.done.wait (%p8131_p0), %s6607_s11, 4096  }
 0x60b   : > { %8447 = vsyncadd (%p8131_p0), %s6607_s11, 4294963200  ;;  %p22_p5 = scmp.ge.s32.totalorder %s8589_s18, 4   ;;  %s11725_s24 = smov %s8454_s25 }
 0x60c   : > { %s11726_s25 = smov %s8458_s26  ;;  %s11727_s26 = smov %s8605_s9 }
 0x60d   : > { %s11728_s27 = smov %s8589_s18  ;;  %24 = sbr.rel (!%p22_p5) target bundleno = 11 (0xb), region = 125 }
 0x612   :  { %6613 = vsyncpa [#allocation4], 1 }
 0x613   :  { %6615 = vsyncpa [#allocation4 + $0x1], 1 }
 0x614   :  { %6616 = vsyncpa [#allocation7], 1 }
 0x615   :  { %6617 = vsyncpa [#allocation10], 1 }
 0x616   :  { %6618 = vsyncpa [#allocation5], 1 }
 0x617   :  { %6620 = vsyncpa [#allocation5 + $0x1], 1 }

</bundles_post_ra>
